<compile_context>
chip_gen: v6e
topology: v6e:2x2x1
jax: 0.10.0
libtpu: 0.0.40
codegen_flags: <defaults>
</compile_context>

<pallas_src>
import jax
import jax.numpy as jnp
from jax.experimental import pallas as pl
from jax.experimental.pallas import tpu as pltpu


LANE = 128   # row pitch of the padded activation layout (one vreg lane-width)


# ----------------------------------------------------------------------------
# Fused RepeatConv kernel: n_conv x (5x5 "same" conv + PReLU), NB images/program
# ----------------------------------------------------------------------------
def _make_repeat_conv_kernel(n_conv, C, H, W, NB):
    HV = H * LANE                 # flat output slab length per image
    L4 = (H + 4) * LANE           # tap-slab length (covers dy = 0..4)
    WRITE_OFF = 3 * LANE          # data rows start at row-chunk 3, column 0
    READ_BASE = LANE - 2          # absorbs the (-2, -2) pad shift of the 5x5 conv

    def kernel(x_ref, w_ref, b_ref, a_ref, o_ref, d_ref, *maybe_buf):
        # x_ref : (NB, C, PA)          bf16  padded input images (layout: see wrapper)
        # w_ref : (n_conv, 5, C, 5*C)  bf16  per-dy folded weights, K index = dx*C + ci
        # b_ref : (n_conv, C, 1)       f32   biases
        # a_ref : (n_conv, 1, 1)       f32   PReLU slopes (nn.PReLU default: shared)
        # o_ref : (NB, C, HV)          f32   output, 128-lane row pitch (cols >= W zero)
        # d_ref : (5*C, L4)            bf16  dx-shifted tap slab (scratch)
        # buf   : (C, PA)              bf16  intermediate activation (scratch, n_conv>1)
        buf_ref = maybe_buf[0] if maybe_buf else None

        # Column-validity mask: within each 128-lane row chunk, columns >= W are
        # garbage; zeroing them also maintains the next layer's pad cells.
        col = jax.lax.broadcasted_iota(jnp.int32, (1, HV), 1) % LANE
        valid = col < W

        if buf_ref is not None:
            # Zero only the pad ring (3 head + 3 tail row chunks); the interior is
            # fully rewritten every layer.  Done every grid step because under
            # megacore sharding each core owns its own scratch.
            buf_ref[:, 0:WRITE_OFF] = jnp.zeros((C, WRITE_OFF), jnp.bfloat16)
            buf_ref[:, (H + 3) * LANE:] = jnp.zeros((C, 3 * LANE), jnp.bfloat16)

        for nb in range(NB):
            for l in range(n_conv):
                # ---- tap slab: 5 shifted copies (one per dx), reused by all dy ----
                for dx in range(5):
                    lo = READ_BASE + dx
                    if l == 0:
                        shifted = x_ref[nb, :, lo:lo + L4]
                    else:
                        shifted = buf_ref[:, lo:lo + L4]
                    d_ref[dx * C:(dx + 1) * C, :] = shifted

                # ---- 5 GEMMs with K = 5*C; dy slices are 128-aligned (free) -------
                acc = jnp.broadcast_to(b_ref[l], (C, HV))          # init from bias
                for dy in range(5):
                    acc = acc + jnp.dot(
                        w_ref[l, dy],
                        d_ref[:, dy * LANE:dy * LANE + HV],
                        preferred_element_type=jnp.float32)

                y = jnp.where(acc >= 0.0, acc, acc * a_ref[l])     # PReLU (shared)
                y = jnp.where(valid, y, 0.0)                       # zero garbage cols

                if l == n_conv - 1:
                    o_ref[nb] = y.astype(o_ref.dtype)
                else:
                    # Lane-aligned interior writeback; the zeroed garbage columns
                    # land exactly on the right-pad / next-row-left-pad cells.
                    buf_ref[:, WRITE_OFF:WRITE_OFF + HV] = y.astype(jnp.bfloat16)

    return kernel


def _vmem_limit_bytes():
    """Chip-aware scoped-VMEM limit (no 64 MiB clamp on 128 MiB parts)."""
    try:
        cap = pltpu.get_tpu_info().vmem_capacity_bytes
        return int(max(cap - 16 * 1024 * 1024, 32 * 1024 * 1024))
    except Exception:
        return None   # fall back to the compiler default


def _pick_batch_block(N, max_nb=8):
    """Images per grid step: as large as possible while keeping >= 2 grid steps
    (so 'parallel' megacore sharding still has work to split) and dividing N."""
    if N < 2:
        return 1
    best = 1
    for nb in range(1, min(N, max_nb) + 1):
        if N % nb == 0 and N // nb >= 2:
            best = nb
    return best


# ----------------------------------------------------------------------------
# Wrapper: NCHW in, NCHW out (matches the PyTorch module)
# ----------------------------------------------------------------------------
def repeat_conv(x, weights, biases, alphas):
    """RepeatConv forward.

    x          : (N, C, H, W) float32 (NCHW, like the PyTorch module)
    weights[i] : (C, C, 5, 5)  conv weight of layer i (PyTorch layout)
    biases[i]  : (C,)          conv bias of layer i
    alphas[i]  : scalar        PReLU slope of layer i (nn.PReLU default: 1 param)
    """
    N, C, H, W = x.shape
    n_conv = len(weights)
    assert n_conv >= 1
    # TODO(synk): W + 4 > 128 needs a column block (or wider row pitch).
    assert W + 4 <= LANE, "repeat_conv currently supports W <= 124"

    HV = H * LANE
    L4 = (H + 4) * LANE
    PA = (H + 6) * LANE
    NB = _pick_batch_block(N)

    # Padded-activation layout (per image/channel, flat length PA):
    #   row-chunk r = lanes [r*128, (r+1)*128)
    #   chunks 0..2 and H+3..H+5 : zero (pad ring)
    #   chunks 3..H+2            : activation row (r-3) in columns 0..W-1, zeros after
    # The conv's (-2,-2) pad offset is absorbed by the tap read offsets (base 126),
    # so left-pad cells live at the (zero) tail of the previous row chunk.
    x_pad = jnp.pad(x.astype(jnp.bfloat16),
                    ((0, 0), (0, 0), (3, 3), (0, LANE - W)))
    x_flat = x_pad.reshape(N, C, PA)

    # Per-(layer, dy) folded weights: (C_out, 5*C_in) with K index = dx*C_in + ci.
    w_stack = jnp.stack([
        jnp.transpose(jnp.asarray(w, jnp.float32), (2, 0, 3, 1)).reshape(5, C, 5 * C)
        for w in weights]).astype(jnp.bfloat16)                      # (n_conv,5,C,5C)
    b_stack = jnp.stack([jnp.asarray(b, jnp.float32) for b in biases]
                        ).reshape(n_conv, C, 1)
    a_stack = jnp.stack([jnp.asarray(a, jnp.float32).reshape(()) for a in alphas]
                        ).reshape(n_conv, 1, 1)

    kernel = _make_repeat_conv_kernel(n_conv, C, H, W, NB)

    scratch_shapes = [pltpu.VMEM((5 * C, L4), jnp.bfloat16)]
    if n_conv > 1:   # no ping-pong buffer needed for a single layer
        scratch_shapes.append(pltpu.VMEM((C, PA), jnp.bfloat16))

    cost = pl.CostEstimate(
        flops=2 * N * n_conv * 25 * C * C * H * W,
        transcendentals=0,
        bytes_accessed=int(x_flat.size * 2 + N * C * HV * 4 + w_stack.size * 2
                           + b_stack.size * 4 + a_stack.size * 4))

    out_flat = pl.pallas_call(
        kernel,
        out_shape=jax.ShapeDtypeStruct((N, C, HV), jnp.float32),
        grid_spec=pltpu.PrefetchScalarGridSpec(
            num_scalar_prefetch=0,
            grid=(N // NB,),
            in_specs=[
                pl.BlockSpec((NB, C, PA), lambda i: (i, 0, 0)),               # images
                pl.BlockSpec((n_conv, 5, C, 5 * C), lambda i: (0, 0, 0, 0)),  # weights
                pl.BlockSpec((n_conv, C, 1), lambda i: (0, 0, 0)),            # biases
                pl.BlockSpec((n_conv, 1, 1), lambda i: (0, 0, 0)),            # slopes
            ],
            out_specs=pl.BlockSpec((NB, C, HV), lambda i: (i, 0, 0)),
            scratch_shapes=scratch_shapes,
        ),
        compiler_params=pltpu.CompilerParams(
            dimension_semantics=("parallel",),
            vmem_limit_bytes=_vmem_limit_bytes(),
        ),
        cost_estimate=cost,
    )(x_flat, w_stack, b_stack, a_stack)

    # Drop the (128 - W) padded columns per row and restore (N, C, H, W).
    # TODO(synk): a consumer that accepts the 128-lane row pitch (or W % 128 == 0,
    # compacted in-kernel) could skip this extra HBM pass.
    return out_flat.reshape(N, C, H, LANE)[:, :, :, :W]


# ----------------------------------------------------------------------------
# Pure-JAX reference (same bf16-operand / f32-accumulate recipe as the kernel)
# ----------------------------------------------------------------------------
def repeat_conv_reference(x, weights, biases, alphas):
    N, C, H, W = x.shape
    y = x.astype(jnp.float32)
    for w, b, a in zip(weights, biases, alphas):
        yp = jnp.pad(y, ((0, 0), (0, 0), (2, 2), (2, 2))).astype(jnp.bfloat16)
        acc = jnp.zeros((N, C, H, W), jnp.float32)
        for dy in range(5):
            for dx in range(5):
                patch = yp[:, :, dy:dy + H, dx:dx + W]
                wt = w[:, :, dy, dx].astype(jnp.bfloat16)
                acc = acc + jnp.einsum("oc,nchw->nohw", wt, patch,
                                       preferred_element_type=jnp.float32)
        y = acc + b[None, :, None, None]
        y = jnp.where(y >= 0.0, y, a * y)
    return y


if __name__ == "__main__":
    n_channels, n_conv = 16, 2
    N, H, W = 2, 16, 16

    key = jax.random.PRNGKey(0)
    keys = jax.random.split(key, 1 + 2 * n_conv)
    x = jax.random.normal(keys[0], (N, n_channels, H, W), jnp.float32)

    weights, biases, alphas = [], [], []
    fan_in = float(n_channels * 5 * 5)
    for i in range(n_conv):
        w = jax.random.normal(keys[1 + 2 * i],
                              (n_channels, n_channels, 5, 5),
                              jnp.float32) / (fan_in ** 0.5)
        b = 0.01 * jax.random.normal(keys[2 + 2 * i], (n_channels,), jnp.float32)
        weights.append(w)
        biases.append(b)
        alphas.append(jnp.float32(0.25))     # nn.PReLU() default slope

    out = jax.jit(repeat_conv)(x, weights, biases, alphas)
    out = jax.block_until_ready(out)

    assert out.shape == (N, n_channels, H, W), out.shape
    assert bool(jnp.all(jnp.isfinite(out)))

    ref = repeat_conv_reference(x, weights, biases, alphas)
    max_err = float(jnp.max(jnp.abs(out - ref)))
    assert max_err < 5e-2, f"max abs err vs reference: {max_err}"

    print("KERNEL_OK")
</pallas_src>

<mosaic_0001>
module attributes {stable_mosaic.version = 11 : i64} {
  func.func @kernel(%arg0: i32, %arg1: memref<1x16x2816xbf16, #tpu.memory_space<vmem>>, %arg2: memref<2x5x16x80xbf16, #tpu.memory_space<vmem>>, %arg3: memref<2x16x1xf32, #tpu.memory_space<vmem>>, %arg4: memref<2x1x1xf32, #tpu.memory_space<vmem>>, %arg5: memref<1x16x2048xf32, #tpu.memory_space<vmem>>, %arg6: memref<80x2560xbf16, #tpu.memory_space<vmem>>, %arg7: memref<16x2816xbf16, #tpu.memory_space<vmem>>) attributes {dimension_semantics = [#tpu.dimension_semantics<parallel>], iteration_bounds = array<i64: 2>, scalar_prefetch = 0 : i64, scratch_operands = 2 : i64, tpu.core_type = #tpu.core_type<tc>, window_params = [{transform_indices = @transform_0, window_bounds = array<i64: 1, 16, 2816>}, {pipeline_mode = #tpu.pipeline_mode<synchronous>, transform_indices = @transform_1, window_bounds = array<i64: 2, 5, 16, 80>}, {pipeline_mode = #tpu.pipeline_mode<synchronous>, transform_indices = @transform_2, window_bounds = array<i64: 2, 16, 1>}, {pipeline_mode = #tpu.pipeline_mode<synchronous>, transform_indices = @transform_3, window_bounds = array<i64: 2, 1, 1>}, {transform_indices = @transform_4, window_bounds = array<i64: 1, 16, 2048>}]} {
    %0 = tpu.iota {dimensions = array<i32: 1>} : vector<1x2048xi32>
    %c128_i32 = arith.constant 128 : i32
    %c0_i32 = arith.constant 0 : i32
    %1 = arith.cmpi eq, %c128_i32, %c0_i32 : i32
    %c1_i32 = arith.constant 1 : i32
    %2 = arith.select %1, %c1_i32, %c128_i32 : i32
    %3 = vector.broadcast %2 : i32 to vector<1x2048xi32>
    %4 = arith.remsi %0, %3 : vector<1x2048xi32>
    %c0_i32_0 = arith.constant 0 : i32
    %5 = vector.broadcast %c0_i32_0 : i32 to vector<1x2048xi32>
    %6 = arith.cmpi ne, %4, %5 : vector<1x2048xi32>
    %c0_i32_1 = arith.constant 0 : i32
    %7 = vector.broadcast %c0_i32_1 : i32 to vector<1x2048xi32>
    %8 = arith.cmpi slt, %4, %7 : vector<1x2048xi32>
    %c0_i32_2 = arith.constant 0 : i32
    %9 = arith.cmpi slt, %2, %c0_i32_2 : i32
    %10 = vector.broadcast %9 : i1 to vector<1x2048xi1>
    %11 = vector.broadcast %10 : vector<1x2048xi1> to vector<1x2048xi1>
    %12 = arith.xori %8, %11 : vector<1x2048xi1>
    %13 = arith.andi %12, %6 : vector<1x2048xi1>
    %14 = vector.broadcast %2 : i32 to vector<1x2048xi32>
    %15 = arith.addi %4, %14 : vector<1x2048xi32>
    %16 = arith.select %13, %15, %4 : vector<1x2048xi1>, vector<1x2048xi32>
    %c16_i32 = arith.constant 16 : i32
    %17 = vector.broadcast %c16_i32 : i32 to vector<1x2048xi32>
    %18 = arith.cmpi slt, %16, %17 : vector<1x2048xi32>
    %cst = arith.constant 0.000000e+00 : bf16
    %19 = vector.broadcast %cst : bf16 to vector<16x384xbf16>
    %c0 = arith.constant 0 : index
    %c0_3 = arith.constant 0 : index
    %20 = vector.load %arg7[%c0, %c0_3] : memref<16x2816xbf16, #tpu.memory_space<vmem>>, vector<16x384xbf16>
    tpu.vector_store %arg7[%c0, %c0_3], %19 {strides = array<i32>} : memref<16x2816xbf16, #tpu.memory_space<vmem>>, vector<16x384xbf16>,
    %cst_4 = arith.constant 0.000000e+00 : bf16
    %21 = vector.broadcast %cst_4 : bf16 to vector<16x384xbf16>
    %c0_5 = arith.constant 0 : index
    %c2432 = arith.constant 2432 : index
    %22 = vector.load %arg7[%c0_5, %c2432] : memref<16x2816xbf16, #tpu.memory_space<vmem>>, vector<16x384xbf16>
    tpu.vector_store %arg7[%c0_5, %c2432], %21 {strides = array<i32>} : memref<16x2816xbf16, #tpu.memory_space<vmem>>, vector<16x384xbf16>,
    %c0_6 = arith.constant 0 : index
    %c0_7 = arith.constant 0 : index
    %c126 = arith.constant 126 : index
    %23 = vector.load %arg1[%c0_6, %c0_7, %c126] : memref<1x16x2816xbf16, #tpu.memory_space<vmem>>, vector<1x16x2560xbf16>
    %24 = vector.shape_cast %23 : vector<1x16x2560xbf16> to vector<16x2560xbf16>
    %c0_8 = arith.constant 0 : index
    %c0_9 = arith.constant 0 : index
    %25 = vector.load %arg6[%c0_8, %c0_9] : memref<80x2560xbf16, #tpu.memory_space<vmem>>, vector<16x2560xbf16>
    tpu.vector_store %arg6[%c0_8, %c0_9], %24 {strides = array<i32>} : memref<80x2560xbf16, #tpu.memory_space<vmem>>, vector<16x2560xbf16>,
    %c0_10 = arith.constant 0 : index
    %c0_11 = arith.constant 0 : index
    %c127 = arith.constant 127 : index
    %26 = vector.load %arg1[%c0_10, %c0_11, %c127] : memref<1x16x2816xbf16, #tpu.memory_space<vmem>>, vector<1x16x2560xbf16>
    %27 = vector.shape_cast %26 : vector<1x16x2560xbf16> to vector<16x2560xbf16>
    %c16 = arith.constant 16 : index
    %c0_12 = arith.constant 0 : index
    %28 = vector.load %arg6[%c16, %c0_12] : memref<80x2560xbf16, #tpu.memory_space<vmem>>, vector<16x2560xbf16>
    tpu.vector_store %arg6[%c16, %c0_12], %27 {strides = array<i32>} : memref<80x2560xbf16, #tpu.memory_space<vmem>>, vector<16x2560xbf16>,
    %c0_13 = arith.constant 0 : index
    %c0_14 = arith.constant 0 : index
    %c128 = arith.constant 128 : index
    %29 = vector.load %arg1[%c0_13, %c0_14, %c128] : memref<1x16x2816xbf16, #tpu.memory_space<vmem>>, vector<1x16x2560xbf16>
    %30 = vector.shape_cast %29 : vector<1x16x2560xbf16> to vector<16x2560xbf16>
    %c32 = arith.constant 32 : index
    %c0_15 = arith.constant 0 : index
    %31 = vector.load %arg6[%c32, %c0_15] : memref<80x2560xbf16, #tpu.memory_space<vmem>>, vector<16x2560xbf16>
    tpu.vector_store %arg6[%c32, %c0_15], %30 {strides = array<i32>} : memref<80x2560xbf16, #tpu.memory_space<vmem>>, vector<16x2560xbf16>,
    %c0_16 = arith.constant 0 : index
    %c0_17 = arith.constant 0 : index
    %c129 = arith.constant 129 : index
    %32 = vector.load %arg1[%c0_16, %c0_17, %c129] : memref<1x16x2816xbf16, #tpu.memory_space<vmem>>, vector<1x16x2560xbf16>
    %33 = vector.shape_cast %32 : vector<1x16x2560xbf16> to vector<16x2560xbf16>
    %c48 = arith.constant 48 : index
    %c0_18 = arith.constant 0 : index
    %34 = vector.load %arg6[%c48, %c0_18] : memref<80x2560xbf16, #tpu.memory_space<vmem>>, vector<16x2560xbf16>
    tpu.vector_store %arg6[%c48, %c0_18], %33 {strides = array<i32>} : memref<80x2560xbf16, #tpu.memory_space<vmem>>, vector<16x2560xbf16>,
    %c0_19 = arith.constant 0 : index
    %c0_20 = arith.constant 0 : index
    %c130 = arith.constant 130 : index
    %35 = vector.load %arg1[%c0_19, %c0_20, %c130] : memref<1x16x2816xbf16, #tpu.memory_space<vmem>>, vector<1x16x2560xbf16>
    %36 = vector.shape_cast %35 : vector<1x16x2560xbf16> to vector<16x2560xbf16>
    %c64 = arith.constant 64 : index
    %c0_21 = arith.constant 0 : index
    %37 = vector.load %arg6[%c64, %c0_21] : memref<80x2560xbf16, #tpu.memory_space<vmem>>, vector<16x2560xbf16>
    tpu.vector_store %arg6[%c64, %c0_21], %36 {strides = array<i32>} : memref<80x2560xbf16, #tpu.memory_space<vmem>>, vector<16x2560xbf16>,
    %c0_22 = arith.constant 0 : index
    %c0_23 = arith.constant 0 : index
    %c0_24 = arith.constant 0 : index
    %38 = vector.load %arg3[%c0_22, %c0_23, %c0_24] : memref<2x16x1xf32, #tpu.memory_space<vmem>>, vector<1x16x1xf32>
    %39 = vector.shape_cast %38 : vector<1x16x1xf32> to vector<16x1xf32>
    %40 = vector.shape_cast %39 : vector<16x1xf32> to vector<16x1xf32>
    %41 = vector.broadcast %40 : vector<16x1xf32> to vector<16x2048xf32>
    %c0_25 = arith.constant 0 : index
    %c0_26 = arith.constant 0 : index
    %c0_27 = arith.constant 0 : index
    %c0_28 = arith.constant 0 : index
    %42 = vector.load %arg2[%c0_25, %c0_26, %c0_27, %c0_28] : memref<2x5x16x80xbf16, #tpu.memory_space<vmem>>, vector<1x1x16x80xbf16>
    %43 = vector.shape_cast %42 : vector<1x1x16x80xbf16> to vector<16x80xbf16>
    %c0_29 = arith.constant 0 : index
    %c0_30 = arith.constant 0 : index
    %44 = vector.load %arg6[%c0_29, %c0_30] : memref<80x2560xbf16, #tpu.memory_space<vmem>>, vector<80x2048xbf16>
    %cst_31 = arith.constant dense<0.000000e+00> : vector<16x2048xf32>
    %45 = tpu.matmul %43, %44, %cst_31 {dimension_numbers = #tpu.dot_dimension_numbers<[1], [0], [0], [1], [0, 0, 1, 1], [], []>} : vector<16x80xbf16>, vector<80x2048xbf16>, vector<16x2048xf32> -> vector<16x2048xf32>
    %46 = arith.addf %41, %45 : vector<16x2048xf32>
    %c0_32 = arith.constant 0 : index
    %c1 = arith.constant 1 : index
    %c0_33 = arith.constant 0 : index
    %c0_34 = arith.constant 0 : index
    %47 = vector.load %arg2[%c0_32, %c1, %c0_33, %c0_34] : memref<2x5x16x80xbf16, #tpu.memory_space<vmem>>, vector<1x1x16x80xbf16>
    %48 = vector.shape_cast %47 : vector<1x1x16x80xbf16> to vector<16x80xbf16>
    %c0_35 = arith.constant 0 : index
    %c128_36 = arith.constant 128 : index
    %49 = vector.load %arg6[%c0_35, %c128_36] : memref<80x2560xbf16, #tpu.memory_space<vmem>>, vector<80x2048xbf16>
    %cst_37 = arith.constant dense<0.000000e+00> : vector<16x2048xf32>
    %50 = tpu.matmul %48, %49, %cst_37 {dimension_numbers = #tpu.dot_dimension_numbers<[1], [0], [0], [1], [0, 0, 1, 1], [], []>} : vector<16x80xbf16>, vector<80x2048xbf16>, vector<16x2048xf32> -> vector<16x2048xf32>
    %51 = arith.addf %46, %50 : vector<16x2048xf32>
    %c0_38 = arith.constant 0 : index
    %c2 = arith.constant 2 : index
    %c0_39 = arith.constant 0 : index
    %c0_40 = arith.constant 0 : index
    %52 = vector.load %arg2[%c0_38, %c2, %c0_39, %c0_40] : memref<2x5x16x80xbf16, #tpu.memory_space<vmem>>, vector<1x1x16x80xbf16>
    %53 = vector.shape_cast %52 : vector<1x1x16x80xbf16> to vector<16x80xbf16>
    %c0_41 = arith.constant 0 : index
    %c256 = arith.constant 256 : index
    %54 = vector.load %arg6[%c0_41, %c256] : memref<80x2560xbf16, #tpu.memory_space<vmem>>, vector<80x2048xbf16>
    %cst_42 = arith.constant dense<0.000000e+00> : vector<16x2048xf32>
    %55 = tpu.matmul %53, %54, %cst_42 {dimension_numbers = #tpu.dot_dimension_numbers<[1], [0], [0], [1], [0, 0, 1, 1], [], []>} : vector<16x80xbf16>, vector<80x2048xbf16>, vector<16x2048xf32> -> vector<16x2048xf32>
    %56 = arith.addf %51, %55 : vector<16x2048xf32>
    %c0_43 = arith.constant 0 : index
    %c3 = arith.constant 3 : index
    %c0_44 = arith.constant 0 : index
    %c0_45 = arith.constant 0 : index
    %57 = vector.load %arg2[%c0_43, %c3, %c0_44, %c0_45] : memref<2x5x16x80xbf16, #tpu.memory_space<vmem>>, vector<1x1x16x80xbf16>
    %58 = vector.shape_cast %57 : vector<1x1x16x80xbf16> to vector<16x80xbf16>
    %c0_46 = arith.constant 0 : index
    %c384 = arith.constant 384 : index
    %59 = vector.load %arg6[%c0_46, %c384] : memref<80x2560xbf16, #tpu.memory_space<vmem>>, vector<80x2048xbf16>
    %cst_47 = arith.constant dense<0.000000e+00> : vector<16x2048xf32>
    %60 = tpu.matmul %58, %59, %cst_47 {dimension_numbers = #tpu.dot_dimension_numbers<[1], [0], [0], [1], [0, 0, 1, 1], [], []>} : vector<16x80xbf16>, vector<80x2048xbf16>, vector<16x2048xf32> -> vector<16x2048xf32>
    %61 = arith.addf %56, %60 : vector<16x2048xf32>
    %c0_48 = arith.constant 0 : index
    %c4 = arith.constant 4 : index
    %c0_49 = arith.constant 0 : index
    %c0_50 = arith.constant 0 : index
    %62 = vector.load %arg2[%c0_48, %c4, %c0_49, %c0_50] : memref<2x5x16x80xbf16, #tpu.memory_space<vmem>>, vector<1x1x16x80xbf16>
    %63 = vector.shape_cast %62 : vector<1x1x16x80xbf16> to vector<16x80xbf16>
    %c0_51 = arith.constant 0 : index
    %c512 = arith.constant 512 : index
    %64 = vector.load %arg6[%c0_51, %c512] : memref<80x2560xbf16, #tpu.memory_space<vmem>>, vector<80x2048xbf16>
    %cst_52 = arith.constant dense<0.000000e+00> : vector<16x2048xf32>
    %65 = tpu.matmul %63, %64, %cst_52 {dimension_numbers = #tpu.dot_dimension_numbers<[1], [0], [0], [1], [0, 0, 1, 1], [], []>} : vector<16x80xbf16>, vector<80x2048xbf16>, vector<16x2048xf32> -> vector<16x2048xf32>
    %66 = arith.addf %61, %65 : vector<16x2048xf32>
    %cst_53 = arith.constant 0.000000e+00 : f32
    %67 = vector.broadcast %cst_53 : f32 to vector<16x2048xf32>
    %68 = arith.cmpf oge, %66, %67 : vector<16x2048xf32>
    %c0_54 = arith.constant 0 : index
    %c0_55 = arith.constant 0 : index
    %c0_56 = arith.constant 0 : index
    %69 = vector.load %arg4[%c0_54, %c0_55, %c0_56] : memref<2x1x1xf32, #tpu.memory_space<vmem>>, vector<1x1x1xf32>
    %70 = vector.shape_cast %69 : vector<1x1x1xf32> to vector<1x1xf32>
    %71 = vector.broadcast %70 : vector<1x1xf32> to vector<16x2048xf32>
    %72 = arith.mulf %66, %71 : vector<16x2048xf32>
    %73 = arith.select %68, %66, %72 : vector<16x2048xi1>, vector<16x2048xf32>
    %cst_57 = arith.constant 0.000000e+00 : f32
    %74 = vector.shape_cast %18 : vector<1x2048xi1> to vector<1x2048xi1>
    %75 = vector.broadcast %74 : vector<1x2048xi1> to vector<16x2048xi1>
    %76 = vector.broadcast %cst_57 : f32 to vector<16x2048xf32>
    %77 = arith.select %75, %73, %76 : vector<16x2048xi1>, vector<16x2048xf32>
    %78 = arith.truncf %77 : vector<16x2048xf32> to vector<16x2048xbf16>
    %c0_58 = arith.constant 0 : index
    %c384_59 = arith.constant 384 : index
    %79 = vector.load %arg7[%c0_58, %c384_59] : memref<16x2816xbf16, #tpu.memory_space<vmem>>, vector<16x2048xbf16>
    tpu.vector_store %arg7[%c0_58, %c384_59], %78 {strides = array<i32>} : memref<16x2816xbf16, #tpu.memory_space<vmem>>, vector<16x2048xbf16>,
    %c0_60 = arith.constant 0 : index
    %c126_61 = arith.constant 126 : index
    %80 = vector.load %arg7[%c0_60, %c126_61] : memref<16x2816xbf16, #tpu.memory_space<vmem>>, vector<16x2560xbf16>
    %c0_62 = arith.constant 0 : index
    %c0_63 = arith.constant 0 : index
    %81 = vector.load %arg6[%c0_62, %c0_63] : memref<80x2560xbf16, #tpu.memory_space<vmem>>, vector<16x2560xbf16>
    tpu.vector_store %arg6[%c0_62, %c0_63], %80 {strides = array<i32>} : memref<80x2560xbf16, #tpu.memory_space<vmem>>, vector<16x2560xbf16>,
    %c0_64 = arith.constant 0 : index
    %c127_65 = arith.constant 127 : index
    %82 = vector.load %arg7[%c0_64, %c127_65] : memref<16x2816xbf16, #tpu.memory_space<vmem>>, vector<16x2560xbf16>
    %c16_66 = arith.constant 16 : index
    %c0_67 = arith.constant 0 : index
    %83 = vector.load %arg6[%c16_66, %c0_67] : memref<80x2560xbf16, #tpu.memory_space<vmem>>, vector<16x2560xbf16>
    tpu.vector_store %arg6[%c16_66, %c0_67], %82 {strides = array<i32>} : memref<80x2560xbf16, #tpu.memory_space<vmem>>, vector<16x2560xbf16>,
    %c0_68 = arith.constant 0 : index
    %c128_69 = arith.constant 128 : index
    %84 = vector.load %arg7[%c0_68, %c128_69] : memref<16x2816xbf16, #tpu.memory_space<vmem>>, vector<16x2560xbf16>
    %c32_70 = arith.constant 32 : index
    %c0_71 = arith.constant 0 : index
    %85 = vector.load %arg6[%c32_70, %c0_71] : memref<80x2560xbf16, #tpu.memory_space<vmem>>, vector<16x2560xbf16>
    tpu.vector_store %arg6[%c32_70, %c0_71], %84 {strides = array<i32>} : memref<80x2560xbf16, #tpu.memory_space<vmem>>, vector<16x2560xbf16>,
    %c0_72 = arith.constant 0 : index
    %c129_73 = arith.constant 129 : index
    %86 = vector.load %arg7[%c0_72, %c129_73] : memref<16x2816xbf16, #tpu.memory_space<vmem>>, vector<16x2560xbf16>
    %c48_74 = arith.constant 48 : index
    %c0_75 = arith.constant 0 : index
    %87 = vector.load %arg6[%c48_74, %c0_75] : memref<80x2560xbf16, #tpu.memory_space<vmem>>, vector<16x2560xbf16>
    tpu.vector_store %arg6[%c48_74, %c0_75], %86 {strides = array<i32>} : memref<80x2560xbf16, #tpu.memory_space<vmem>>, vector<16x2560xbf16>,
    %c0_76 = arith.constant 0 : index
    %c130_77 = arith.constant 130 : index
    %88 = vector.load %arg7[%c0_76, %c130_77] : memref<16x2816xbf16, #tpu.memory_space<vmem>>, vector<16x2560xbf16>
    %c64_78 = arith.constant 64 : index
    %c0_79 = arith.constant 0 : index
    %89 = vector.load %arg6[%c64_78, %c0_79] : memref<80x2560xbf16, #tpu.memory_space<vmem>>, vector<16x2560xbf16>
    tpu.vector_store %arg6[%c64_78, %c0_79], %88 {strides = array<i32>} : memref<80x2560xbf16, #tpu.memory_space<vmem>>, vector<16x2560xbf16>,
    %c1_80 = arith.constant 1 : index
    %c0_81 = arith.constant 0 : index
    %c0_82 = arith.constant 0 : index
    %90 = vector.load %arg3[%c1_80, %c0_81, %c0_82] : memref<2x16x1xf32, #tpu.memory_space<vmem>>, vector<1x16x1xf32>
    %91 = vector.shape_cast %90 : vector<1x16x1xf32> to vector<16x1xf32>
    %92 = vector.shape_cast %91 : vector<16x1xf32> to vector<16x1xf32>
    %93 = vector.broadcast %92 : vector<16x1xf32> to vector<16x2048xf32>
    %c1_83 = arith.constant 1 : index
    %c0_84 = arith.constant 0 : index
    %c0_85 = arith.constant 0 : index
    %c0_86 = arith.constant 0 : index
    %94 = vector.load %arg2[%c1_83, %c0_84, %c0_85, %c0_86] : memref<2x5x16x80xbf16, #tpu.memory_space<vmem>>, vector<1x1x16x80xbf16>
    %95 = vector.shape_cast %94 : vector<1x1x16x80xbf16> to vector<16x80xbf16>
    %c0_87 = arith.constant 0 : index
    %c0_88 = arith.constant 0 : index
    %96 = vector.load %arg6[%c0_87, %c0_88] : memref<80x2560xbf16, #tpu.memory_space<vmem>>, vector<80x2048xbf16>
    %cst_89 = arith.constant dense<0.000000e+00> : vector<16x2048xf32>
    %97 = tpu.matmul %95, %96, %cst_89 {dimension_numbers = #tpu.dot_dimension_numbers<[1], [0], [0], [1], [0, 0, 1, 1], [], []>} : vector<16x80xbf16>, vector<80x2048xbf16>, vector<16x2048xf32> -> vector<16x2048xf32>
    %98 = arith.addf %93, %97 : vector<16x2048xf32>
    %c1_90 = arith.constant 1 : index
    %c1_91 = arith.constant 1 : index
    %c0_92 = arith.constant 0 : index
    %c0_93 = arith.constant 0 : index
    %99 = vector.load %arg2[%c1_90, %c1_91, %c0_92, %c0_93] : memref<2x5x16x80xbf16, #tpu.memory_space<vmem>>, vector<1x1x16x80xbf16>
    %100 = vector.shape_cast %99 : vector<1x1x16x80xbf16> to vector<16x80xbf16>
    %c0_94 = arith.constant 0 : index
    %c128_95 = arith.constant 128 : index
    %101 = vector.load %arg6[%c0_94, %c128_95] : memref<80x2560xbf16, #tpu.memory_space<vmem>>, vector<80x2048xbf16>
    %cst_96 = arith.constant dense<0.000000e+00> : vector<16x2048xf32>
    %102 = tpu.matmul %100, %101, %cst_96 {dimension_numbers = #tpu.dot_dimension_numbers<[1], [0], [0], [1], [0, 0, 1, 1], [], []>} : vector<16x80xbf16>, vector<80x2048xbf16>, vector<16x2048xf32> -> vector<16x2048xf32>
    %103 = arith.addf %98, %102 : vector<16x2048xf32>
    %c1_97 = arith.constant 1 : index
    %c2_98 = arith.constant 2 : index
    %c0_99 = arith.constant 0 : index
    %c0_100 = arith.constant 0 : index
    %104 = vector.load %arg2[%c1_97, %c2_98, %c0_99, %c0_100] : memref<2x5x16x80xbf16, #tpu.memory_space<vmem>>, vector<1x1x16x80xbf16>
    %105 = vector.shape_cast %104 : vector<1x1x16x80xbf16> to vector<16x80xbf16>
    %c0_101 = arith.constant 0 : index
    %c256_102 = arith.constant 256 : index
    %106 = vector.load %arg6[%c0_101, %c256_102] : memref<80x2560xbf16, #tpu.memory_space<vmem>>, vector<80x2048xbf16>
    %cst_103 = arith.constant dense<0.000000e+00> : vector<16x2048xf32>
    %107 = tpu.matmul %105, %106, %cst_103 {dimension_numbers = #tpu.dot_dimension_numbers<[1], [0], [0], [1], [0, 0, 1, 1], [], []>} : vector<16x80xbf16>, vector<80x2048xbf16>, vector<16x2048xf32> -> vector<16x2048xf32>
    %108 = arith.addf %103, %107 : vector<16x2048xf32>
    %c1_104 = arith.constant 1 : index
    %c3_105 = arith.constant 3 : index
    %c0_106 = arith.constant 0 : index
    %c0_107 = arith.constant 0 : index
    %109 = vector.load %arg2[%c1_104, %c3_105, %c0_106, %c0_107] : memref<2x5x16x80xbf16, #tpu.memory_space<vmem>>, vector<1x1x16x80xbf16>
    %110 = vector.shape_cast %109 : vector<1x1x16x80xbf16> to vector<16x80xbf16>
    %c0_108 = arith.constant 0 : index
    %c384_109 = arith.constant 384 : index
    %111 = vector.load %arg6[%c0_108, %c384_109] : memref<80x2560xbf16, #tpu.memory_space<vmem>>, vector<80x2048xbf16>
    %cst_110 = arith.constant dense<0.000000e+00> : vector<16x2048xf32>
    %112 = tpu.matmul %110, %111, %cst_110 {dimension_numbers = #tpu.dot_dimension_numbers<[1], [0], [0], [1], [0, 0, 1, 1], [], []>} : vector<16x80xbf16>, vector<80x2048xbf16>, vector<16x2048xf32> -> vector<16x2048xf32>
    %113 = arith.addf %108, %112 : vector<16x2048xf32>
    %c1_111 = arith.constant 1 : index
    %c4_112 = arith.constant 4 : index
    %c0_113 = arith.constant 0 : index
    %c0_114 = arith.constant 0 : index
    %114 = vector.load %arg2[%c1_111, %c4_112, %c0_113, %c0_114] : memref<2x5x16x80xbf16, #tpu.memory_space<vmem>>, vector<1x1x16x80xbf16>
    %115 = vector.shape_cast %114 : vector<1x1x16x80xbf16> to vector<16x80xbf16>
    %c0_115 = arith.constant 0 : index
    %c512_116 = arith.constant 512 : index
    %116 = vector.load %arg6[%c0_115, %c512_116] : memref<80x2560xbf16, #tpu.memory_space<vmem>>, vector<80x2048xbf16>
    %cst_117 = arith.constant dense<0.000000e+00> : vector<16x2048xf32>
    %117 = tpu.matmul %115, %116, %cst_117 {dimension_numbers = #tpu.dot_dimension_numbers<[1], [0], [0], [1], [0, 0, 1, 1], [], []>} : vector<16x80xbf16>, vector<80x2048xbf16>, vector<16x2048xf32> -> vector<16x2048xf32>
    %118 = arith.addf %113, %117 : vector<16x2048xf32>
    %cst_118 = arith.constant 0.000000e+00 : f32
    %119 = vector.broadcast %cst_118 : f32 to vector<16x2048xf32>
    %120 = arith.cmpf oge, %118, %119 : vector<16x2048xf32>
    %c1_119 = arith.constant 1 : index
    %c0_120 = arith.constant 0 : index
    %c0_121 = arith.constant 0 : index
    %121 = vector.load %arg4[%c1_119, %c0_120, %c0_121] : memref<2x1x1xf32, #tpu.memory_space<vmem>>, vector<1x1x1xf32>
    %122 = vector.shape_cast %121 : vector<1x1x1xf32> to vector<1x1xf32>
    %123 = vector.broadcast %122 : vector<1x1xf32> to vector<16x2048xf32>
    %124 = arith.mulf %118, %123 : vector<16x2048xf32>
    %125 = arith.select %120, %118, %124 : vector<16x2048xi1>, vector<16x2048xf32>
    %cst_122 = arith.constant 0.000000e+00 : f32
    %126 = vector.shape_cast %18 : vector<1x2048xi1> to vector<1x2048xi1>
    %127 = vector.broadcast %126 : vector<1x2048xi1> to vector<16x2048xi1>
    %128 = vector.broadcast %cst_122 : f32 to vector<16x2048xf32>
    %129 = arith.select %127, %125, %128 : vector<16x2048xi1>, vector<16x2048xf32>
    %c0_123 = arith.constant 0 : index
    %c0_124 = arith.constant 0 : index
    %c0_125 = arith.constant 0 : index
    %130 = vector.load %arg5[%c0_123, %c0_124, %c0_125] : memref<1x16x2048xf32, #tpu.memory_space<vmem>>, vector<1x16x2048xf32>
    %131 = vector.shape_cast %130 : vector<1x16x2048xf32> to vector<16x2048xf32>
    %132 = vector.shape_cast %129 : vector<16x2048xf32> to vector<1x16x2048xf32>
    tpu.vector_store %arg5[%c0_123, %c0_124, %c0_125], %132 {strides = array<i32>} : memref<1x16x2048xf32, #tpu.memory_space<vmem>>, vector<1x16x2048xf32>,
    return
  }
  func.func @transform_0(%arg0: i32) -> (i32, i32, i32) {
    %c0_i32 = arith.constant 0 : i32
    %c0_i32_0 = arith.constant 0 : i32
    %c0_i32_1 = arith.constant 0 : i32
    return %arg0, %c0_i32, %c0_i32_0 : i32, i32, i32
  }
  func.func @transform_1(%arg0: i32) -> (i32, i32, i32, i32) {
    %c0_i32 = arith.constant 0 : i32
    %c0_i32_0 = arith.constant 0 : i32
    %c0_i32_1 = arith.constant 0 : i32
    %c0_i32_2 = arith.constant 0 : i32
    %c0_i32_3 = arith.constant 0 : i32
    return %c0_i32, %c0_i32_0, %c0_i32_1, %c0_i32_2 : i32, i32, i32, i32
  }
  func.func @transform_2(%arg0: i32) -> (i32, i32, i32) {
    %c0_i32 = arith.constant 0 : i32
    %c0_i32_0 = arith.constant 0 : i32
    %c0_i32_1 = arith.constant 0 : i32
    %c0_i32_2 = arith.constant 0 : i32
    return %c0_i32, %c0_i32_0, %c0_i32_1 : i32, i32, i32
  }
  func.func @transform_3(%arg0: i32) -> (i32, i32, i32) {
    %c0_i32 = arith.constant 0 : i32
    %c0_i32_0 = arith.constant 0 : i32
    %c0_i32_1 = arith.constant 0 : i32
    %c0_i32_2 = arith.constant 0 : i32
    return %c0_i32, %c0_i32_0, %c0_i32_1 : i32, i32, i32
  }
  func.func @transform_4(%arg0: i32) -> (i32, i32, i32) {
    %c0_i32 = arith.constant 0 : i32
    %c0_i32_0 = arith.constant 0 : i32
    %c0_i32_1 = arith.constant 0 : i32
    return %arg0, %c0_i32, %c0_i32_0 : i32, i32, i32
  }
}

</mosaic_0001>

<bundles_post_ra>
// kernel: repeat_conv.1
= control target key start
LH: loop header
LB: loop body
LE: loop exit
PB: predicated region body
PF: predicated region fallthrough
CT: control target
= control target key end

     0   :  { %s13260_s15 = smov 0   ;;  %s16434_s0 = inlined_call_operand.vmem [shape: bf16[2,16,2816], index: 0, kind: input, shape index: {}]   ;;  %s16435_s1 = inlined_call_operand.vmem [shape: bf16[2,5,16,80], index: 1, kind: input, shape index: {}]   ;;  %s16436_s2 = inlined_call_operand.vmem [shape: f32[2,16,1], index: 2, kind: input, shape index: {}]   ;;  %s16437_s3 = inlined_call_operand.vmem [shape: f32[2,1,1], index: 3, kind: input, shape index: {}]   ;;  %s16438_s4 = inlined_call_operand.vmem [shape: f32[2,16,2048], index: 4, kind: output, shape index: {}]  }
   0x1 LB: > { %s11240_s16 = sadd.s32 4294967295, %s13228_s15   ;;  %p11244_p0 = scmp.ge.s32.totalorder %s13228_s15, 1  ;;  %s13228_s15 = sphi %s13260_s15, %s14_s15  }
   0x2   : > { %p162_p1 = scmp.lt.s32.totalorder %s13228_s15, 3 }
   0x4   : > { %p163_p2 = pnand %p11244_p0, %p162_p1 }
   0x6   : > { %166 = sbr.rel (%p163_p2) target bundleno = 1526 (0x5f6), region = 36 }
   0xb   : > { %p188_p3 = scmp.lt.s32.totalorder %s11240_s16, 1  ;;  %s13230_s21 = smov 126   ;;  %v13234_v19 = vmov 0   ;;  %vm16447_vm0 = vcmask 1043456   ;;  %vm16446_vm1 = vcmask 1031168   ;;  %vm16445_vm2 = vcmask 1039360  }
   0xc   : > { %s13231_s22 = smov 127   ;;  %s13232_s23 = smov 1   ;;  %1772 = vmatprep.mubr.bf16.mxu0 %v13234_v19  ;;  %424 = vst [vmem:[#allocation3] sm:$0xff] %v13234_v19  ;;  %425 = vst [vmem:[#allocation3 + $0x8] sm:$0xf] %v13234_v19  ;;  %1815 = vmatprep.mubr.bf16.mxu1 %v13234_v19  ;;  %vm16444_vm3 = vcmask 7168  }
   0xd   : > { %s16811_s16 = smov (!%p188_p3, %s11240_s16), 1  ;;  %s13233_s24 = smov 2   ;;  %426 = vst [vmem:[#allocation3 + $0x58] sm:$0xff] %v13234_v19  ;;  %427 = vst [vmem:[#allocation3 + $0x60] sm:$0xf] %v13234_v19  ;;  %12211 = vset.pattern.permute.xlu1 %v13234_v19  ;;  %12210 = vset.pattern.permute.xlu0 %v13234_v19  ;;  %vm16443_vm4 = vcmask 15360  }
   0xe   : > { %s12196_s17 = smul.u32 176, %s16811_s16  ;;  %428 = vst [vmem:[#allocation3 + $0x4c] sm:$0xff] %v13234_v19  ;;  %429 = vst [vmem:[#allocation3 + $0x54] sm:$0xf] %v13234_v19  ;;  %vm16442_vm5 = vcmask 654336   ;;  %s12179_s11 = sshll.u32 %s16811_s16, 8 }
   0xf   : > { %430 = vst [vmem:[#allocation3 + $0xa4] sm:$0xff] %v13234_v19  ;;  %431 = vst [vmem:[#allocation3 + $0xac] sm:$0xf] %v13234_v19  ;;  %s16262_s16 = scalar_lea.vmem %s16438_s4, %s12179_s11 }
  0x10   : > { %s13274_s20 = scalar_lea.vmem %s16434_s0, %s12196_s17 }
  0x11   : > { %v13277_v0 = vld [vmem:[%s13274_s20 + $0x14] sm:$0xff]  ;;  %v13280_v1 = vld [vmem:[%s13274_s20 + $0x4] sm:$0xff]  ;;  %v13283_v2 = vld [vmem:[%s13274_s20 + $0x5c] sm:$0xff] }
  0x12   : > { %1094 = vrot.lane.b32.xlu1 %v13277_v0, %s13230_s21  ;;  %1090 = vrot.lane.b32.xlu0 %v13280_v1, %s13230_s21  ;;  %v13290_v3 = vld [vmem:[%s13274_s20 + $0xc] sm:$0xff]  ;;  %835 = vst [vmem:[#allocation2 + $0x140] sm:$0xff] %v13280_v1  ;;  %845 = vst [vmem:[#allocation2 + $0x190] sm:$0xff] %v13283_v2  ;;  %v13299_v5 = vld [vmem:[%s13274_s20 + $0x64] sm:$0xff]  ;;  %v11282_v8 = vcombine.high %v13280_v1, %v13283_v2  ;;  %v11281_v12 = vcombine.low %v13280_v1, %v13283_v2 }
  0x13   : > { %v13293_v4 = vld [vmem:[%s13274_s20 + $0x6c] sm:$0xff]  ;;  %837 = vst [vmem:[#allocation2 + $0x150] sm:$0xff] %v13277_v0  ;;  %836 = vst [vmem:[#allocation2 + $0x148] sm:$0xff] %v13290_v3  ;;  %v13305_v6 = vld [vmem:[%s13274_s20 + $0x1c] sm:$0xff]  ;;  %v11284_v9 = vcombine.high %v13290_v3, %v13299_v5  ;;  %v11283_v13 = vcombine.low %v13290_v3, %v13299_v5 }
  0x14   : > { %847 = vst [vmem:[#allocation2 + $0x1a0] sm:$0xff] %v13293_v4  ;;  %846 = vst [vmem:[#allocation2 + $0x198] sm:$0xff] %v13299_v5  ;;  %v13312_v7 = vld [vmem:[%s13274_s20 + $0x74] sm:$0xff]  ;;  %v625_v10 = vld [vmem:[%s13274_s20 + $0x8] sm:$0xff]  ;;  %v11286_v21 = vcombine.high %v13277_v0, %v13293_v4  ;;  %v11285_v23 = vcombine.low %v13277_v0, %v13293_v4 }
  0x15   : > { %838 = vst [vmem:[#allocation2 + $0x158] sm:$0xff] %v13305_v6  ;;  %848 = vst [vmem:[#allocation2 + $0x1a8] sm:$0xff] %v13312_v7  ;;  %v624_v11 = vld [vmem:[%s13274_s20] sm:$0xff]  ;;  %v635_v14 = vld [vmem:[%s13274_s20 + $0x58] sm:$0xff]  ;;  %v11288_v22 = vcombine.high %v13305_v6, %v13312_v7  ;;  %v11287_v24 = vcombine.low %v13305_v6, %v13312_v7 }
  0x16   : > { %1112 = vrot.lane.b32.xlu1 %v13283_v2, %s13230_s21  ;;  %1092 = vrot.lane.b32.xlu0 %v13290_v3, %s13230_s21  ;;  %v626_v15 = vld [vmem:[%s13274_s20 + $0x10] sm:$0xff]  ;;  %v637_v16 = vld [vmem:[%s13274_s20 + $0x68] sm:$0xff] }
  0x17   : > { %v636_v17 = vld [vmem:[%s13274_s20 + $0x60] sm:$0xff]  ;;  %v627_v26 = vld [vmem:[%s13274_s20 + $0x18] sm:$0xff]  ;;  %v638_v28 = vld [vmem:[%s13274_s20 + $0x70] sm:$0xff] }
  0x18   : > { %v1050_v18 = vld [vmem:[%s13274_s20 + $0x24] sm:$0xff]  ;;  %v1061_v20 = vld [vmem:[%s13274_s20 + $0x7c] sm:$0xff]  ;;  %v1052_v29 = vld [vmem:[%s13274_s20 + $0x34] sm:$0xff] }
  0x19   : > { %v628_v25 = vld [vmem:[%s13274_s20 + $0x20] sm:$0xff]  ;;  %v639_v27 = vld [vmem:[%s13274_s20 + $0x78] sm:$0xff]  ;;  %v1051_v30 = vld [vmem:[%s13274_s20 + $0x2c] sm:$0xff] }
  0x1a   : > { %1116 = vrot.lane.b32.xlu1 %v13293_v4, %s13230_s21  ;;  %1114 = vrot.lane.b32.xlu0 %v13299_v5, %s13230_s21  ;;  %v1063_v31 = vld [vmem:[%s13274_s20 + $0x8c] sm:$0xff]  ;;  %v1062_v32 = vld [vmem:[%s13274_s20 + $0x84] sm:$0xff] }
  0x1b   : > { %v13413_v33 = vld [vmem:[%s13274_s20 + $0x24] sm:$0xff]  ;;  %v13416_v34 = vld [vmem:[%s13274_s20 + $0x7c] sm:$0xff]  ;;  %v13419_v35 = vld [vmem:[%s13274_s20 + $0x2c] sm:$0xff] }
  0x1c   : > { %839 = vst [vmem:[#allocation2 + $0x160] sm:$0xff] %v13413_v33  ;;  %849 = vst [vmem:[#allocation2 + $0x1b0] sm:$0xff] %v13416_v34  ;;  %v11290_v36 = vcombine.high %v13413_v33, %v13416_v34  ;;  %v13428_v37 = vld [vmem:[%s13274_s20 + $0x84] sm:$0xff]  ;;  %v11289_v39 = vcombine.low %v13413_v33, %v13416_v34  ;;  %v630_v41 = vld [vmem:[%s13274_s20 + $0x30] sm:$0xff] }
  0x1d   : > { %840 = vst [vmem:[#allocation2 + $0x168] sm:$0xff] %v13419_v35  ;;  %850 = vst [vmem:[#allocation2 + $0x1b8] sm:$0xff] %v13428_v37  ;;  %v11292_v38 = vcombine.high %v13419_v35, %v13428_v37  ;;  %v11291_v40 = vcombine.low %v13419_v35, %v13428_v37  ;;  %v629_v42 = vld [vmem:[%s13274_s20 + $0x28] sm:$0xff]  ;;  %v640_v44 = vld [vmem:[%s13274_s20 + $0x80] sm:$0xff] }
  0x1e   : > { %901 = vrot.lane.b32.xlu1 %v13290_v3, %s13231_s22  ;;  %899 = vrot.lane.b32.xlu0 %v13280_v1, %s13231_s22  ;;  %v641_v43 = vld [vmem:[%s13274_s20 + $0x88] sm:$0xff]  ;;  %v1053_v46 = vld [vmem:[%s13274_s20 + $0x3c] sm:$0xff] }
  0x1f   : > { %v1054_v45 = vld [vmem:[%s13274_s20 + $0x44] sm:$0xff]  ;;  %v1065_v47 = vld [vmem:[%s13274_s20 + $0x9c] sm:$0xff]  ;;  %v1064_v48 = vld [vmem:[%s13274_s20 + $0x94] sm:$0xff] }
  0x20   : > { %v13464_v56 = vld [vmem:[%s13274_s20 + $0x34] sm:$0xff]  ;;  %v13467_v57 = vld [vmem:[%s13274_s20 + $0x8c] sm:$0xff]  ;;  %v13470_v58 = vld [vmem:[%s13274_s20 + $0x3c] sm:$0xff] }
  0x21   : > { %841 = vst [vmem:[#allocation2 + $0x170] sm:$0xff] %v13464_v56  ;;  %851 = vst [vmem:[#allocation2 + $0x1c0] sm:$0xff] %v13467_v57  ;;  %v11294_v59 = vcombine.high %v13464_v56, %v13467_v57  ;;  %v13479_v60 = vld [vmem:[%s13274_s20 + $0x94] sm:$0xff] }
  0x22   : > { %921 = vrot.lane.b32.xlu1 %v13283_v2, %s13231_s22  ;;  %903 = vrot.lane.b32.xlu0 %v13277_v0, %s13231_s22  ;;  %842 = vst [vmem:[#allocation2 + $0x178] sm:$0xff] %v13470_v58  ;;  %852 = vst [vmem:[#allocation2 + $0x1c8] sm:$0xff] %v13479_v60  ;;  %v11296_v63 = vcombine.high %v13470_v58, %v13479_v60  ;;  %v644_v2 = vld [vmem:[%s13274_s20 + $0xa0] sm:$0xff] }
  0x26   : > { %925 = vrot.lane.b32.xlu1 %v13293_v4, %s13231_s22  ;;  %923 = vrot.lane.b32.xlu0 %v13299_v5, %s13231_s22 }
  0x2a   : > { %670 = vrot.lane.b32.xlu1 %v625_v10, %s13232_s23  ;;  %668 = vrot.lane.b32.xlu0 %v624_v11, %s13232_s23 }
  0x2e   : > { %690 = vrot.lane.b32.xlu1 %v635_v14, %s13232_s23  ;;  %672 = vrot.lane.b32.xlu0 %v626_v15, %s13232_s23 }
  0x32   : > { %694 = vrot.lane.b32.xlu1 %v637_v16, %s13232_s23  ;;  %692 = vrot.lane.b32.xlu0 %v636_v17, %s13232_s23 }
  0x36   : > { %478 = vrot.lane.b32.xlu1 %v625_v10, %s13233_s24  ;;  %476 = vrot.lane.b32.xlu0 %v624_v11, %s13233_s24  ;;  %v11293_v10 = vcombine.low %v13464_v56, %v13467_v57 }
  0x3a   : > { %498 = vrot.lane.b32.xlu1 %v635_v14, %s13233_s24  ;;  %480 = vrot.lane.b32.xlu0 %v626_v15, %s13233_s24 }
  0x3e   : > { %502 = vrot.lane.b32.xlu1 %v637_v16, %s13233_s24  ;;  %500 = vrot.lane.b32.xlu0 %v636_v17, %s13233_s24  ;;  %v11295_v17 = vcombine.low %v13470_v58, %v13479_v60 }
  0x42   : > { %1098 = vrot.lane.b32.xlu1 %v1050_v18, %s13230_s21  ;;  %1096 = vrot.lane.b32.xlu0 %v13305_v6, %s13230_s21 }
  0x46   : > { %1120 = vrot.lane.b32.xlu1 %v1061_v20, %s13230_s21  ;;  %1118 = vrot.lane.b32.xlu0 %v13312_v7, %s13230_s21 }
  0x4a   : > { %907 = vrot.lane.b32.xlu1 %v1050_v18, %s13231_s22  ;;  %905 = vrot.lane.b32.xlu0 %v13305_v6, %s13231_s22 }
  0x4e   : > { %929 = vrot.lane.b32.xlu1 %v1061_v20, %s13231_s22  ;;  %927 = vrot.lane.b32.xlu0 %v13312_v7, %s13231_s22 }
  0x52   : > { %676 = vrot.lane.b32.xlu1 %v628_v25, %s13232_s23  ;;  %674 = vrot.lane.b32.xlu0 %v627_v26, %s13232_s23 }
  0x56   : > { %698 = vrot.lane.b32.xlu1 %v639_v27, %s13232_s23  ;;  %696 = vrot.lane.b32.xlu0 %v638_v28, %s13232_s23 }
  0x5a   : > { %484 = vrot.lane.b32.xlu1 %v628_v25, %s13233_s24  ;;  %482 = vrot.lane.b32.xlu0 %v627_v26, %s13233_s24 }
  0x5e   : > { %506 = vrot.lane.b32.xlu1 %v639_v27, %s13233_s24  ;;  %504 = vrot.lane.b32.xlu0 %v638_v28, %s13233_s24  ;;  %v632_v28 = vld [vmem:[%s13274_s20 + $0x40] sm:$0xff] }
  0x62   : > { %1102 = vrot.lane.b32.xlu1 %v1052_v29, %s13230_s21  ;;  %1100 = vrot.lane.b32.xlu0 %v1051_v30, %s13230_s21 }
  0x66   : > { %1124 = vrot.lane.b32.xlu1 %v1063_v31, %s13230_s21  ;;  %1122 = vrot.lane.b32.xlu0 %v1062_v32, %s13230_s21 }
  0x6a   : > { %911 = vrot.lane.b32.xlu1 %v1052_v29, %s13231_s22  ;;  %909 = vrot.lane.b32.xlu0 %v1051_v30, %s13231_s22  ;;  %v631_v29 = vld [vmem:[%s13274_s20 + $0x38] sm:$0xff] }
  0x6e   : > { %933 = vrot.lane.b32.xlu1 %v1063_v31, %s13231_s22  ;;  %931 = vrot.lane.b32.xlu0 %v1062_v32, %s13231_s22 }
  0x72   : > { %680 = vrot.lane.b32.xlu1 %v630_v41, %s13232_s23  ;;  %678 = vrot.lane.b32.xlu0 %v629_v42, %s13232_s23 }
  0x76   : > { %702 = vrot.lane.b32.xlu1 %v641_v43, %s13232_s23  ;;  %700 = vrot.lane.b32.xlu0 %v640_v44, %s13232_s23 }
  0x7a   : > { %488 = vrot.lane.b32.xlu1 %v630_v41, %s13233_s24  ;;  %486 = vrot.lane.b32.xlu0 %v629_v42, %s13233_s24 }
  0x7e   : > { %510 = vrot.lane.b32.xlu1 %v641_v43, %s13233_s24  ;;  %508 = vrot.lane.b32.xlu0 %v640_v44, %s13233_s24  ;;  %v643_v44 = vld [vmem:[%s13274_s20 + $0x98] sm:$0xff] }
  0x82   : > { %1106 = vrot.lane.b32.xlu1 %v1054_v45, %s13230_s21  ;;  %1104 = vrot.lane.b32.xlu0 %v1053_v46, %s13230_s21 }
  0x84   : > { %v13458_v49 = vpop.permute.xlu1 %1094  ;;  %v1091_v50 = vpop.permute.xlu0 %1090 }
  0x85   : > { %v1136_v53 = vrot.slane %v13458_v49, 4  ;;  %v1134_v54 = vrot.slane %v1091_v50, 4 }
  0x86   : > { %1128 = vrot.lane.b32.xlu1 %v1065_v47, %s13230_s21  ;;  %1126 = vrot.lane.b32.xlu0 %v1064_v48, %s13230_s21 }
  0x88   : > { %v1113_v51 = vpop.permute.xlu1 %1112  ;;  %v1093_v52 = vpop.permute.xlu0 %1092 }
  0x89   : > { %v1135_v55 = vrot.slane %v1093_v52, 4  ;;  %v1145_v18 = vrot.slane %v1113_v51, 4 }
  0x8a   : > { %915 = vrot.lane.b32.xlu1 %v1054_v45, %s13231_s22  ;;  %913 = vrot.lane.b32.xlu0 %v1053_v46, %s13231_s22  ;;  %v642_v45 = vld [vmem:[%s13274_s20 + $0x90] sm:$0xff] }
  0x8b   : > { %v1156_v61 = vsel %vm16447_vm0, %v1134_v54, %v1135_v55  ;;  %v1159_v62 = vsel %vm16447_vm0, %v1135_v55, %v1136_v53 }
  0x8c   : > { %v1158_v11 = vsel %vm16446_vm1, %v1091_v50, %v1156_v61  ;;  %v1160_v14 = vsel %vm16446_vm1, %v1093_v52, %v1159_v62  ;;  %v13493_v15 = vpop.permute.xlu1 %1116  ;;  %v1115_v16 = vpop.permute.xlu0 %1114 }
  0x8d   : > { %1217 = vst [vmem:[#allocation2 + $0x280] sm:$0xff] %v1158_v11  ;;  %1218 = vst [vmem:[#allocation2 + $0x288] sm:$0xff] %v1160_v14  ;;  %v1147_v20 = vrot.slane %v13493_v15, 4  ;;  %v1146_v25 = vrot.slane %v1115_v16, 4 }
  0x8e   : > { %937 = vrot.lane.b32.xlu1 %v1065_v47, %s13231_s22  ;;  %935 = vrot.lane.b32.xlu0 %v1064_v48, %s13231_s22 }
  0x8f   : > { %v1177_v26 = vsel %vm16447_vm0, %v1145_v18, %v1146_v25  ;;  %v1179_v27 = vsel %vm16447_vm0, %v1146_v25, %v1147_v20 }
  0x90   : > { %v1178_v30 = vsel %vm16446_vm1, %v1113_v51, %v1177_v26  ;;  %v1180_v31 = vsel %vm16446_vm1, %v1115_v16, %v1179_v27  ;;  %v902_v32 = vpop.permute.xlu1 %901  ;;  %v900_v41 = vpop.permute.xlu0 %899 }
  0x91   : > { %1227 = vst [vmem:[#allocation2 + $0x2d0] sm:$0xff] %v1178_v30  ;;  %1228 = vst [vmem:[#allocation2 + $0x2d8] sm:$0xff] %v1180_v31  ;;  %v944_v42 = vrot.slane %v902_v32, 4  ;;  %v943_v43 = vrot.slane %v900_v41, 4  ;;  %v11314_v46 = vcombine.high %v1158_v11, %v1178_v30  ;;  %v11316_v47 = vcombine.high %v1160_v14, %v1180_v31 }
  0x92   : > { %684 = vrot.lane.b32.xlu1 %v632_v28, %s13232_s23  ;;  %682 = vrot.lane.b32.xlu0 %v631_v29, %s13232_s23  ;;  %v11313_v48 = vcombine.low %v1158_v11, %v1178_v30  ;;  %v11315_v50 = vcombine.low %v1160_v14, %v1180_v31 }
  0x93   : > { %v965_v51 = vsel %vm16447_vm0, %v943_v43, %v944_v42  ;;  %1746 = vmatprep.subr.bf16.mxu0 %v11314_v46  ;;  %1789 = vmatprep.subr.bf16.mxu1 %v11316_v47 }
  0x94   : > { %v967_v52 = vsel %vm16445_vm2, %v900_v41, %v965_v51  ;;  %v922_v54 = vpop.permute.xlu1 %921  ;;  %v13514_v55 = vpop.permute.xlu0 %903  ;;  %1747 = vmatpush1.bf16.msra.mxu0 %v11313_v48  ;;  %1790 = vmatpush1.bf16.msra.mxu1 %v11315_v50  ;;  %v1066_v51 = vld [vmem:[%s13274_s20 + $0xa4] sm:$0xff] }
  0x95   : > { %1026 = vst [vmem:[#allocation2 + $0x1e0] sm:$0xff] %v967_v52  ;;  %v945_v61 = vrot.slane %v13514_v55, 4  ;;  %v954_v18 = vrot.slane %v922_v54, 4 }
  0x96   : > { %706 = vrot.lane.b32.xlu1 %v643_v44, %s13232_s23  ;;  %704 = vrot.lane.b32.xlu0 %v642_v45, %s13232_s23 }
  0x97   : > { %v968_v62 = vsel %vm16447_vm0, %v944_v42, %v945_v61 }
  0x98   : > { %v969_v11 = vsel %vm16445_vm2, %v902_v32, %v968_v62  ;;  %v13523_v14 = vpop.permute.xlu1 %925  ;;  %v924_v16 = vpop.permute.xlu0 %923 }
  0x99   : > { %1027 = vst [vmem:[#allocation2 + $0x1e8] sm:$0xff] %v969_v11  ;;  %v956_v25 = vrot.slane %v13523_v14, 4  ;;  %v955_v26 = vrot.slane %v924_v16, 4 }
  0x9a   : > { %492 = vrot.lane.b32.xlu1 %v632_v28, %s13233_s24  ;;  %490 = vrot.lane.b32.xlu0 %v631_v29, %s13233_s24 }
  0x9b   : > { %v986_v27 = vsel %vm16447_vm0, %v954_v18, %v955_v26  ;;  %v988_v30 = vsel %vm16447_vm0, %v955_v26, %v956_v25 }
  0x9c   : > { %v987_v31 = vsel %vm16445_vm2, %v922_v54, %v986_v27  ;;  %v989_v32 = vsel %vm16445_vm2, %v924_v16, %v988_v30  ;;  %v671_v41 = vpop.permute.xlu1 %670  ;;  %v669_v42 = vpop.permute.xlu0 %668  ;;  %v1055_v54 = vld [vmem:[%s13274_s20 + $0x4c] sm:$0xff] }
  0x9d   : > { %1036 = vst [vmem:[#allocation2 + $0x230] sm:$0xff] %v987_v31  ;;  %1037 = vst [vmem:[#allocation2 + $0x238] sm:$0xff] %v989_v32  ;;  %v713_v28 = vrot.slane %v671_v41, 4  ;;  %v712_v43 = vrot.slane %v669_v42, 4  ;;  %v11298_v29 = vcombine.high %v967_v52, %v987_v31  ;;  %v11300_v46 = vcombine.high %v969_v11, %v989_v32 }
  0x9e   : > { %514 = vrot.lane.b32.xlu1 %v643_v44, %s13233_s24  ;;  %512 = vrot.lane.b32.xlu0 %v642_v45, %s13233_s24  ;;  %v11297_v47 = vcombine.low %v967_v52, %v987_v31  ;;  %v11299_v48 = vcombine.low %v969_v11, %v989_v32 }
  0x9f   : > { %v734_v50 = vsel %vm16447_vm0, %v712_v43, %v713_v28  ;;  %1748 = vmatprep.subr.bf16.mxu0 %v11298_v29  ;;  %1791 = vmatprep.subr.bf16.mxu1 %v11300_v46 }
  0xa0   : > { %v736_v62 = vsel %vm16444_vm3, %v669_v42, %v734_v50  ;;  %v691_v16 = vpop.permute.xlu1 %690  ;;  %v13540_v18 = vpop.permute.xlu0 %672  ;;  %1749 = vmatpush1.bf16.msra.mxu0 %v11297_v47  ;;  %1792 = vmatpush1.bf16.msra.mxu1 %v11299_v48 }
  0xa1   : > { %795 = vst [vmem:[#allocation2 + $0xa0] sm:$0xff] %v736_v62  ;;  %v714_v44 = vrot.slane %v13540_v18, 4  ;;  %1750 = vmatprep.subr.bf16.mxu0 %v11282_v8  ;;  %1793 = vmatprep.subr.bf16.mxu1 %v11284_v9  ;;  %v723_v8 = vrot.slane %v691_v16, 4 }
  0xa2   : > { %1130 = vrot.lane.b32.xlu1 %v1066_v51, %s13230_s21  ;;  %1108 = vrot.lane.b32.xlu0 %v1055_v54, %s13230_s21 }
  0xa3   : > { %v737_v45 = vsel %vm16447_vm0, %v713_v28, %v714_v44 }
  0xa4   : > { %v738_v52 = vsel %vm16444_vm3, %v671_v41, %v737_v45  ;;  %v13555_v11 = vpop.permute.xlu1 %694  ;;  %v693_v26 = vpop.permute.xlu0 %692  ;;  %1751 = vmatpush1.bf16.msra.mxu0 %v11281_v12  ;;  %1794 = vmatpush1.bf16.msra.mxu1 %v11283_v13  ;;  %v633_v12 = vld [vmem:[%s13274_s20 + $0x48] sm:$0xff] }
  0xa5   : > { %796 = vst [vmem:[#allocation2 + $0xa8] sm:$0xff] %v738_v52  ;;  %v725_v9 = vrot.slane %v13555_v11, 4  ;;  %v724_v27 = vrot.slane %v693_v26, 4 }
  0xa6   : > { %939 = vrot.lane.b32.xlu1 %v1066_v51, %s13231_s22  ;;  %917 = vrot.lane.b32.xlu0 %v1055_v54, %s13231_s22  ;;  %v13581_v54 = vld [vmem:[#allocation2 + $0x148] ss:$80 sps:$4 sm:$0xff]  }
  0xa7   : > { %v755_v30 = vsel %vm16447_vm0, %v723_v8, %v724_v27  ;;  %v757_v1 = vsel %vm16447_vm0, %v724_v27, %v725_v9 }
  0xa8   : > { %v756_v3 = vsel %vm16444_vm3, %v691_v16, %v755_v30  ;;  %v758_v5 = vsel %vm16444_vm3, %v693_v26, %v757_v1  ;;  %v479_v13 = vpop.permute.xlu1 %478  ;;  %v477_v31 = vpop.permute.xlu0 %476  ;;  %v6256_v16 = vld [vmem:[#allocation3 + $0x5c] sm:$0xff]  ;;  %v1056_v26 = vld [vmem:[%s13274_s20 + $0x54] sm:$0xf] }
  0xa9   : > { %805 = vst [vmem:[#allocation2 + $0xf0] sm:$0xff] %v756_v3  ;;  %806 = vst [vmem:[#allocation2 + $0xf8] sm:$0xff] %v758_v5  ;;  %v521_v32 = vrot.slane %v479_v13, 4  ;;  %v520_v41 = vrot.slane %v477_v31, 4  ;;  %v11266_v42 = vcombine.high %v736_v62, %v756_v3  ;;  %v11268_v28 = vcombine.high %v738_v52, %v758_v5 }
  0xaa   : > { %708 = vrot.lane.b32.xlu1 %v644_v2, %s13232_s23  ;;  %686 = vrot.lane.b32.xlu0 %v633_v12, %s13232_s23  ;;  %v11265_v43 = vcombine.low %v736_v62, %v756_v3  ;;  %v11267_v29 = vcombine.low %v738_v52, %v758_v5  ;;  %v6246_v62 = vld [vmem:[#allocation3 + $0x4] sm:$0xff]  ;;  %6276 = vst [vmem:[#allocation2 + $0x190] sm:$0xff] %v6256_v16  ;;  %v1067_v52 = vld [vmem:[%s13274_s20 + $0xac] sm:$0xf] }
  0xab   : > { %v543_v46 = vsel %vm16447_vm0, %v520_v41, %v521_v32  ;;  %1752 = vmatprep.subr.bf16.mxu0 %v11266_v42  ;;  %1795 = vmatprep.subr.bf16.mxu1 %v11268_v28  ;;  %6266 = vst [vmem:[#allocation2 + $0x140] sm:$0xff] %v6246_v62 }
  0xac   : > { %v545_v47 = vsel %vm16443_vm4, %v477_v31, %v543_v46  ;;  %v499_v48 = vpop.permute.xlu1 %498  ;;  %v13578_v50 = vpop.permute.xlu0 %480  ;;  %1753 = vmatpush1.bf16.msra.mxu0 %v11265_v43  ;;  %1796 = vmatpush1.bf16.msra.mxu1 %v11267_v29  ;;  %v876_v31 = vld [vmem:[%s13274_s20 + $0xac] sm:$0xf] }
  0xad   : > { %604 = vst [vmem:[#allocation2] sm:$0xff] %v545_v47  ;;  %v522_v51 = vrot.slane %v13578_v50, 4  ;;  %v531_v1 = vrot.slane %v499_v48, 4 }
  0xae   : > { %516 = vrot.lane.b32.xlu1 %v644_v2, %s13233_s24  ;;  %494 = vrot.lane.b32.xlu0 %v633_v12, %s13233_s24 }
  0xaf   : > { %v546_v45 = vsel %vm16447_vm0, %v521_v32, %v522_v51 }
  0xb0   : > { %v547_v8 = vsel %vm16443_vm4, %v479_v13, %v546_v45  ;;  %v13591_v27 = vpop.permute.xlu1 %502  ;;  %v501_v30 = vpop.permute.xlu0 %500  ;;  %v865_v13 = vld [vmem:[%s13274_s20 + $0x54] sm:$0xf] }
  0xb1   : > { %605 = vst [vmem:[#allocation2 + $0x8] sm:$0xff] %v547_v8  ;;  %v533_v2 = vrot.slane %v13591_v27, 4  ;;  %v532_v12 = vrot.slane %v501_v30, 4 }
  0xb2   : > { %1132 = vrot.lane.b32.xlu1 %v1067_v52, %s13230_s21  ;;  %1110 = vrot.lane.b32.xlu0 %v1056_v26, %s13230_s21  ;;  %v645_v26 = vld [vmem:[%s13274_s20 + $0xa8] sm:$0xf] }
  0xb3   : > { %v564_v3 = vsel %vm16447_vm0, %v531_v1, %v532_v12  ;;  %v566_v5 = vsel %vm16447_vm0, %v532_v12, %v533_v2  ;;  %v13620_v1 = vld [vmem:[%s16435_s1] sm:$0xff]  }
  0xb4   : > { %v565_v32 = vsel %vm16443_vm4, %v499_v48, %v564_v3  ;;  %v567_v41 = vsel %vm16443_vm4, %v501_v30, %v566_v5  ;;  %v13604_v42 = vpop.permute.xlu1 %1098  ;;  %v1097_v28 = vpop.permute.xlu0 %1096  ;;  %v634_v30 = vld [vmem:[%s13274_s20 + $0x50] sm:$0xf] }
  0xb5   : > { %614 = vst [vmem:[#allocation2 + $0x50] sm:$0xff] %v565_v32  ;;  %615 = vst [vmem:[#allocation2 + $0x58] sm:$0xff] %v567_v41  ;;  %v1138_v43 = vrot.slane %v13604_v42, 4  ;;  %v1137_v29 = vrot.slane %v1097_v28, 4  ;;  %v11250_v46 = vcombine.high %v545_v47, %v565_v32  ;;  %v11252_v62 = vcombine.high %v547_v8, %v567_v41 }
  0xb6   : > { %941 = vrot.lane.b32.xlu1 %v876_v31, %s13231_s22  ;;  %919 = vrot.lane.b32.xlu0 %v865_v13, %s13231_s22  ;;  %v11249_v16 = vcombine.low %v545_v47, %v565_v32  ;;  %v11251_v48 = vcombine.low %v547_v8, %v567_v41  ;;  %v453_v13 = vld [vmem:[%s13274_s20 + $0xa8] sm:$0xf]  ;;  %v442_v32 = vld [vmem:[%s13274_s20 + $0x50] sm:$0xf] }
  0xb7   : > { %v1161_v45 = vsel %vm16447_vm0, %v1136_v53, %v1137_v29  ;;  %v1163_v52 = vsel %vm16447_vm0, %v1137_v29, %v1138_v43  ;;  %1754 = vmatprep.subr.bf16.mxu0 %v11250_v46  ;;  %1797 = vmatprep.subr.bf16.mxu1 %v11252_v62 }
  0xb8   : > { %v1162_v47 = vsel %vm16446_vm1, %v13458_v49, %v1161_v45  ;;  %v1164_v53 = vsel %vm16446_vm1, %v1097_v28, %v1163_v52  ;;  %v13625_v8 = vpop.permute.xlu1 %1120  ;;  %v1119_v12 = vpop.permute.xlu0 %1118  ;;  %1755 = vmatpush1.bf16.msra.mxu0 %v11249_v16  ;;  %1798 = vmatpush1.bf16.msra.mxu1 %v11251_v48 }
  0xb9   : > { %1219 = vst [vmem:[#allocation2 + $0x290] sm:$0xff] %v1162_v47  ;;  %1220 = vst [vmem:[#allocation2 + $0x298] sm:$0xff] %v1164_v53  ;;  %v1149_v3 = vrot.slane %v13625_v8, 4  ;;  %v1148_v5 = vrot.slane %v1119_v12, 4 }
  0xba   : > { %710 = vrot.lane.b32.xlu1 %v645_v26, %s13232_s23  ;;  %688 = vrot.lane.b32.xlu0 %v634_v30, %s13232_s23  ;;  %v1238_v26 = vld [vmem:[%s16436_s2 + $0x8] sm:$0xff]  ;;  %v1237_v30 = vld [vmem:[%s16436_s2] sm:$0xff] }
  0xbb   : > { %v1181_v49 = vsel %vm16447_vm0, %v1147_v20, %v1148_v5  ;;  %v1183_v31 = vsel %vm16447_vm0, %v1148_v5, %v1149_v3  ;;  %11329 = vmatmul.mubr.msk.bf16.vlgmr.msra.gmra.mxu0 %vm16442_vm5, %v13620_v1  ;;  %11330 = vmatmul.mubr.msk.bf16.vlgmr.msra.gmra.mxu1 %vm16442_vm5, %v13620_v1 }
  0xbc   : > { %v1182_v41 = vsel %vm16446_vm1, %v13493_v15, %v1181_v49  ;;  %v1184_v28 = vsel %vm16446_vm1, %v1119_v12, %v1183_v31  ;;  %v13645_v29 = vpop.permute.xlu1 %907  ;;  %v906_v20 = vpop.permute.xlu0 %905  ;;  %1858 = vmatprep.mubr.bf16.mxu0 %v13234_v19  ;;  %1901 = vmatprep.mubr.bf16.mxu1 %v13234_v19 }
  0xbd   : > { %1229 = vst [vmem:[#allocation2 + $0x2e0] sm:$0xff] %v1182_v41  ;;  %1230 = vst [vmem:[#allocation2 + $0x2e8] sm:$0xff] %v1184_v28  ;;  %v947_v46 = vrot.slane %v13645_v29, 4  ;;  %v946_v62 = vrot.slane %v906_v20, 4  ;;  %v11318_v16 = vcombine.high %v1162_v47, %v1182_v41  ;;  %v11320_v48 = vcombine.high %v1164_v53, %v1184_v28 }
  0xbe   : > { %518 = vrot.lane.b32.xlu1 %v453_v13, %s13233_s24  ;;  %496 = vrot.lane.b32.xlu0 %v442_v32, %s13233_s24  ;;  %v11317_v15 = vcombine.low %v1162_v47, %v1182_v41  ;;  %v11319_v45 = vcombine.low %v1164_v53, %v1184_v28 }
  0xbf   : > { %v970_v52 = vsel %vm16447_vm0, %v945_v61, %v946_v62  ;;  %v972_v19 = vsel %vm16447_vm0, %v946_v62, %v947_v46  ;;  %1832 = vmatprep.subr.bf16.mxu0 %v11318_v16  ;;  %1875 = vmatprep.subr.bf16.mxu1 %v11320_v48 }
  0xc0   : > { %v971_v47 = vsel %vm16445_vm2, %v13514_v55, %v970_v52  ;;  %v973_v53 = vsel %vm16445_vm2, %v906_v20, %v972_v19  ;;  %v13667_v61 = vpop.permute.xlu1 %929  ;;  %v928_v12 = vpop.permute.xlu0 %927  ;;  %1833 = vmatpush1.bf16.msra.mxu0 %v11317_v15  ;;  %1876 = vmatpush1.bf16.msra.mxu1 %v11319_v45 }
  0xc1   : > { %1028 = vst [vmem:[#allocation2 + $0x1f0] sm:$0xff] %v971_v47  ;;  %1029 = vst [vmem:[#allocation2 + $0x1f8] sm:$0xff] %v973_v53  ;;  %v958_v5 = vrot.slane %v13667_v61, 4  ;;  %v957_v49 = vrot.slane %v928_v12, 4 }
  0xc2   : > { %1246 = vperm.xlu1 %12211, %v1238_v26   ;;  %1241 = vperm.xlu0 %12210, %v1237_v30  }
  0xc3   : > { %v990_v31 = vsel %vm16447_vm0, %v956_v25, %v957_v49  ;;  %v992_v55 = vsel %vm16447_vm0, %v957_v49, %v958_v5 }
  0xc4   : > { %v991_v13 = vsel %vm16445_vm2, %v13523_v14, %v990_v31  ;;  %v993_v32 = vsel %vm16445_vm2, %v928_v12, %v992_v55  ;;  %v13679_v41 = vpop.permute.xlu1 %676  ;;  %v675_v28 = vpop.permute.xlu0 %674 }
  0xc5   : > { %1038 = vst [vmem:[#allocation2 + $0x240] sm:$0xff] %v991_v13  ;;  %1039 = vst [vmem:[#allocation2 + $0x248] sm:$0xff] %v993_v32  ;;  %v716_v20 = vrot.slane %v13679_v41, 4  ;;  %v715_v62 = vrot.slane %v675_v28, 4  ;;  %v11302_v16 = vcombine.high %v971_v47, %v991_v13  ;;  %v11304_v48 = vcombine.high %v973_v53, %v993_v32 }
  0xc6   : > { %v11301_v25 = vcombine.low %v971_v47, %v991_v13  ;;  %v11303_v15 = vcombine.low %v973_v53, %v993_v32 }
  0xc7   : > { %v739_v45 = vsel %vm16447_vm0, %v714_v44, %v715_v62  ;;  %v741_v14 = vsel %vm16447_vm0, %v715_v62, %v716_v20  ;;  %1834 = vmatprep.subr.bf16.mxu0 %v11302_v16  ;;  %1877 = vmatprep.subr.bf16.mxu1 %v11304_v48 }
  0xc8   : > { %v740_v52 = vsel %vm16444_vm3, %v13540_v18, %v739_v45  ;;  %v742_v19 = vsel %vm16444_vm3, %v675_v28, %v741_v14  ;;  %v13691_v26 = vpop.permute.xlu1 %698  ;;  %v697_v30 = vpop.permute.xlu0 %696  ;;  %1835 = vmatpush1.bf16.msra.mxu0 %v11301_v25  ;;  %1878 = vmatpush1.bf16.msra.mxu1 %v11303_v15 }
  0xc9   : > { %797 = vst [vmem:[#allocation2 + $0xb0] sm:$0xff] %v740_v52  ;;  %798 = vst [vmem:[#allocation2 + $0xb8] sm:$0xff] %v742_v19  ;;  %v727_v44 = vrot.slane %v13691_v26, 4  ;;  %v726_v47 = vrot.slane %v697_v30, 4  ;;  %1836 = vmatprep.subr.bf16.mxu0 %v11286_v21  ;;  %1879 = vmatprep.subr.bf16.mxu1 %v11288_v22 }
  0xcb   : > { %v759_v18 = vsel %vm16447_vm0, %v725_v9, %v726_v47  ;;  %v761_v53 = vsel %vm16447_vm0, %v726_v47, %v727_v44 }
  0xcc   : > { %v760_v12 = vsel %vm16444_vm3, %v13555_v11, %v759_v18  ;;  %v762_v49 = vsel %vm16444_vm3, %v697_v30, %v761_v53  ;;  %v13709_v31 = vpop.permute.xlu1 %484  ;;  %v483_v21 = vpop.permute.xlu0 %482  ;;  %1837 = vmatpush1.bf16.msra.mxu0 %v11285_v23  ;;  %1880 = vmatpush1.bf16.msra.mxu1 %v11287_v24  ;;  %v823_v18 = vld [vmem:[%s13274_s20 + $0x44] sm:$0xff]  ;;  %v833_v53 = vld [vmem:[%s13274_s20 + $0x9c] sm:$0xff] }
  0xcd   : > { %807 = vst [vmem:[#allocation2 + $0x100] sm:$0xff] %v760_v12  ;;  %808 = vst [vmem:[#allocation2 + $0x108] sm:$0xff] %v762_v49  ;;  %v524_v22 = vrot.slane %v13709_v31, 4  ;;  %v523_v9 = vrot.slane %v483_v21, 4  ;;  %v11270_v55 = vcombine.high %v740_v52, %v760_v12  ;;  %v11272_v11 = vcombine.high %v742_v19, %v762_v49 }
  0xce   : > { %v11269_v13 = vcombine.low %v740_v52, %v760_v12  ;;  %v11271_v32 = vcombine.low %v742_v19, %v762_v49  ;;  %843 = vst [vmem:[#allocation2 + $0x180] sm:$0xff] %v823_v18  ;;  %853 = vst [vmem:[#allocation2 + $0x1d0] sm:$0xff] %v833_v53 }
  0xcf   : > { %v548_v28 = vsel %vm16447_vm0, %v522_v51, %v523_v9  ;;  %v550_v0 = vsel %vm16447_vm0, %v523_v9, %v524_v22  ;;  %1838 = vmatprep.subr.bf16.mxu0 %v11270_v55  ;;  %1881 = vmatprep.subr.bf16.mxu1 %v11272_v11 }
  0xd0   : > { %v549_v4 = vsel %vm16443_vm4, %v13578_v50, %v548_v28  ;;  %v551_v6 = vsel %vm16443_vm4, %v483_v21, %v550_v0  ;;  %v13727_v7 = vpop.permute.xlu1 %506  ;;  %v505_v23 = vpop.permute.xlu0 %504  ;;  %1839 = vmatpush1.bf16.msra.mxu0 %v11269_v13  ;;  %1882 = vmatpush1.bf16.msra.mxu1 %v11271_v32 }
  0xd1   : > { %606 = vst [vmem:[#allocation2 + $0x10] sm:$0xff] %v549_v4  ;;  %607 = vst [vmem:[#allocation2 + $0x18] sm:$0xff] %v551_v6  ;;  %v535_v24 = vrot.slane %v13727_v7, 4  ;;  %v534_v51 = vrot.slane %v505_v23, 4 }
  0xd3   : > { %v568_v62 = vsel %vm16447_vm0, %v533_v2, %v534_v51  ;;  %v570_v50 = vsel %vm16447_vm0, %v534_v51, %v535_v24 }
  0xd4   : > { %v569_v16 = vsel %vm16443_vm4, %v13591_v27, %v568_v62  ;;  %v571_v48 = vsel %vm16443_vm4, %v505_v23, %v570_v50  ;;  %v13739_v25 = vpop.permute.xlu1 %1102  ;;  %v1101_v15 = vpop.permute.xlu0 %1100 }
  0xd5   : > { %616 = vst [vmem:[#allocation2 + $0x60] sm:$0xff] %v569_v16  ;;  %617 = vst [vmem:[#allocation2 + $0x68] sm:$0xff] %v571_v48  ;;  %v1140_v45 = vrot.slane %v13739_v25, 4  ;;  %v1139_v14 = vrot.slane %v1101_v15, 4  ;;  %v11254_v2 = vcombine.high %v549_v4, %v569_v16  ;;  %v11256_v52 = vcombine.high %v551_v6, %v571_v48 }
  0xd6   : > { %v11253_v19 = vcombine.low %v549_v4, %v569_v16  ;;  %v11255_v30 = vcombine.low %v551_v6, %v571_v48  ;;  %v13771_v4 = vld [vmem:[#allocation3] sm:$0xff] }
  0xd7   : > { %v1165_v27 = vsel %vm16447_vm0, %v1138_v43, %v1139_v14  ;;  %v1167_v47 = vsel %vm16447_vm0, %v1139_v14, %v1140_v45  ;;  %1840 = vmatprep.subr.bf16.mxu0 %v11254_v2  ;;  %1883 = vmatprep.subr.bf16.mxu1 %v11256_v52 }
  0xd8   : > { %v1166_v12 = vsel %vm16446_vm1, %v13604_v42, %v1165_v27  ;;  %v1168_v49 = vsel %vm16446_vm1, %v1101_v15, %v1167_v47  ;;  %v13753_v21 = vpop.permute.xlu1 %1124  ;;  %v1123_v9 = vpop.permute.xlu0 %1122  ;;  %1841 = vmatpush1.bf16.msra.mxu0 %v11253_v19  ;;  %1884 = vmatpush1.bf16.msra.mxu1 %v11255_v30 }
  0xd9   : > { %1221 = vst [vmem:[#allocation2 + $0x2a0] sm:$0xff] %v1166_v12  ;;  %1222 = vst [vmem:[#allocation2 + $0x2a8] sm:$0xff] %v1168_v49  ;;  %v1151_v43 = vrot.slane %v13753_v21, 4  ;;  %v1150_v55 = vrot.slane %v1123_v9, 4 }
  0xdb   : > { %v1185_v11 = vsel %vm16447_vm0, %v1149_v3, %v1150_v55  ;;  %v1187_v42 = vsel %vm16447_vm0, %v1150_v55, %v1151_v43  ;;  %11331 = vmatmul.mubr.msk.bf16.vlgmr.msra.gmra.mxu0 %vm16442_vm5, %v13620_v1  ;;  %11332 = vmatmul.mubr.msk.bf16.vlgmr.msra.gmra.mxu1 %vm16442_vm5, %v13620_v1 }
  0xdc   : > { %v1186_v13 = vsel %vm16446_vm1, %v13625_v8, %v1185_v11  ;;  %v1188_v32 = vsel %vm16446_vm1, %v1123_v9, %v1187_v42  ;;  %v13769_v28 = vpop.permute.xlu1 %911  ;;  %v910_v0 = vpop.permute.xlu0 %909  ;;  %1944 = vmatprep.mubr.bf16.mxu0 %v13771_v4  ;;  %1987 = vmatprep.mubr.bf16.mxu1 %v13771_v4 }
  0xdd   : > { %1231 = vst [vmem:[#allocation2 + $0x2f0] sm:$0xff] %v1186_v13  ;;  %1232 = vst [vmem:[#allocation2 + $0x2f8] sm:$0xff] %v1188_v32  ;;  %v949_v3 = vrot.slane %v13769_v28, 4  ;;  %v948_v6 = vrot.slane %v910_v0, 4  ;;  %v11322_v23 = vcombine.high %v1166_v12, %v1186_v13  ;;  %v11324_v51 = vcombine.high %v1168_v49, %v1188_v32 }
  0xde   : > { %v11321_v62 = vcombine.low %v1166_v12, %v1186_v13  ;;  %v11323_v8 = vcombine.low %v1168_v49, %v1188_v32 }
  0xdf   : > { %v974_v50 = vsel %vm16447_vm0, %v947_v46, %v948_v6  ;;  %v976_v16 = vsel %vm16447_vm0, %v948_v6, %v949_v3  ;;  %1918 = vmatprep.subr.bf16.mxu0 %v11322_v23  ;;  %1961 = vmatprep.subr.bf16.mxu1 %v11324_v51 }
  0xe0   : > { %v975_v48 = vsel %vm16445_vm2, %v13645_v29, %v974_v50  ;;  %v977_v15 = vsel %vm16445_vm2, %v910_v0, %v976_v16  ;;  %v13785_v14 = vpop.permute.xlu1 %933  ;;  %v932_v2 = vpop.permute.xlu0 %931  ;;  %1919 = vmatpush1.bf16.msra.mxu0 %v11321_v62  ;;  %1962 = vmatpush1.bf16.msra.mxu1 %v11323_v8 }
  0xe1   : > { %1030 = vst [vmem:[#allocation2 + $0x200] sm:$0xff] %v975_v48  ;;  %1031 = vst [vmem:[#allocation2 + $0x208] sm:$0xff] %v977_v15  ;;  %v960_v46 = vrot.slane %v13785_v14, 4  ;;  %v959_v52 = vrot.slane %v932_v2, 4 }
  0xe3   : > { %v994_v19 = vsel %vm16447_vm0, %v958_v5, %v959_v52  ;;  %v996_v29 = vsel %vm16447_vm0, %v959_v52, %v960_v46 }
  0xe4   : > { %v995_v30 = vsel %vm16445_vm2, %v13667_v61, %v994_v19  ;;  %v997_v27 = vsel %vm16445_vm2, %v932_v2, %v996_v29  ;;  %v13797_v47 = vpop.permute.xlu1 %680  ;;  %v679_v18 = vpop.permute.xlu0 %678 }
  0xe5   : > { %1040 = vst [vmem:[#allocation2 + $0x250] sm:$0xff] %v995_v30  ;;  %1041 = vst [vmem:[#allocation2 + $0x258] sm:$0xff] %v997_v27  ;;  %v718_v53 = vrot.slane %v13797_v47, 4  ;;  %v717_v12 = vrot.slane %v679_v18, 4  ;;  %v11306_v49 = vcombine.high %v975_v48, %v995_v30  ;;  %v11308_v9 = vcombine.high %v977_v15, %v997_v27 }
  0xe6   : > { %v11305_v5 = vcombine.low %v975_v48, %v995_v30  ;;  %v11307_v55 = vcombine.low %v977_v15, %v997_v27 }
  0xe7   : > { %v743_v11 = vsel %vm16447_vm0, %v716_v20, %v717_v12  ;;  %v745_v61 = vsel %vm16447_vm0, %v717_v12, %v718_v53  ;;  %1920 = vmatprep.subr.bf16.mxu0 %v11306_v49  ;;  %1963 = vmatprep.subr.bf16.mxu1 %v11308_v9 }
  0xe8   : > { %v744_v42 = vsel %vm16444_vm3, %v13679_v41, %v743_v11  ;;  %v746_v13 = vsel %vm16444_vm3, %v679_v18, %v745_v61  ;;  %v13809_v32 = vpop.permute.xlu1 %702  ;;  %v701_v0 = vpop.permute.xlu0 %700  ;;  %1921 = vmatpush1.bf16.msra.mxu0 %v11305_v5  ;;  %1964 = vmatpush1.bf16.msra.mxu1 %v11307_v55 }
  0xe9   : > { %799 = vst [vmem:[#allocation2 + $0xc0] sm:$0xff] %v744_v42  ;;  %800 = vst [vmem:[#allocation2 + $0xc8] sm:$0xff] %v746_v13  ;;  %v729_v20 = vrot.slane %v13809_v32, 4  ;;  %v728_v6 = vrot.slane %v701_v0, 4  ;;  %1922 = vmatprep.subr.bf16.mxu0 %v11290_v36  ;;  %1965 = vmatprep.subr.bf16.mxu1 %v11292_v38 }
  0xeb   : > { %v763_v41 = vsel %vm16447_vm0, %v727_v44, %v728_v6  ;;  %v765_v23 = vsel %vm16447_vm0, %v728_v6, %v729_v20 }
  0xec   : > { %v764_v51 = vsel %vm16444_vm3, %v13691_v26, %v763_v41  ;;  %v766_v62 = vsel %vm16444_vm3, %v701_v0, %v765_v23  ;;  %v13827_v8 = vpop.permute.xlu1 %488  ;;  %v487_v36 = vpop.permute.xlu0 %486  ;;  %1923 = vmatpush1.bf16.msra.mxu0 %v11289_v39  ;;  %1966 = vmatpush1.bf16.msra.mxu1 %v11291_v40 }
  0xed   : > { %809 = vst [vmem:[#allocation2 + $0x110] sm:$0xff] %v764_v51  ;;  %810 = vst [vmem:[#allocation2 + $0x118] sm:$0xff] %v766_v62  ;;  %v526_v38 = vrot.slane %v13827_v8, 4  ;;  %v525_v44 = vrot.slane %v487_v36, 4  ;;  %v11274_v50 = vcombine.high %v744_v42, %v764_v51  ;;  %v11276_v26 = vcombine.high %v746_v13, %v766_v62 }
  0xee   : > { %v11273_v16 = vcombine.low %v744_v42, %v764_v51  ;;  %v11275_v48 = vcombine.low %v746_v13, %v766_v62 }
  0xef   : > { %v552_v15 = vsel %vm16447_vm0, %v524_v22, %v525_v44  ;;  %v554_v33 = vsel %vm16447_vm0, %v525_v44, %v526_v38  ;;  %1924 = vmatprep.subr.bf16.mxu0 %v11274_v50  ;;  %1967 = vmatprep.subr.bf16.mxu1 %v11276_v26 }
  0xf0   : > { %v553_v34 = vsel %vm16443_vm4, %v13709_v31, %v552_v15  ;;  %v555_v35 = vsel %vm16443_vm4, %v487_v36, %v554_v33  ;;  %v13845_v37 = vpop.permute.xlu1 %510  ;;  %v509_v39 = vpop.permute.xlu0 %508  ;;  %1925 = vmatpush1.bf16.msra.mxu0 %v11273_v16  ;;  %1968 = vmatpush1.bf16.msra.mxu1 %v11275_v48 }
  0xf1   : > { %608 = vst [vmem:[#allocation2 + $0x20] sm:$0xff] %v553_v34  ;;  %609 = vst [vmem:[#allocation2 + $0x28] sm:$0xff] %v555_v35  ;;  %v537_v40 = vrot.slane %v13845_v37, 4  ;;  %v536_v22 = vrot.slane %v509_v39, 4 }
  0xf3   : > { %v572_v2 = vsel %vm16447_vm0, %v535_v24, %v536_v22  ;;  %v574_v31 = vsel %vm16447_vm0, %v536_v22, %v537_v40 }
  0xf4   : > { %v573_v52 = vsel %vm16443_vm4, %v13727_v7, %v572_v2  ;;  %v575_v19 = vsel %vm16443_vm4, %v509_v39, %v574_v31  ;;  %v13857_v29 = vpop.permute.xlu1 %1106  ;;  %v1105_v30 = vpop.permute.xlu0 %1104 }
  0xf5   : > { %618 = vst [vmem:[#allocation2 + $0x70] sm:$0xff] %v573_v52  ;;  %619 = vst [vmem:[#allocation2 + $0x78] sm:$0xff] %v575_v19  ;;  %v1142_v27 = vrot.slane %v13857_v29, 4  ;;  %v1141_v18 = vrot.slane %v1105_v30, 4  ;;  %v11258_v12 = vcombine.high %v553_v34, %v573_v52  ;;  %v11260_v49 = vcombine.high %v555_v35, %v575_v19 }
  0xf6   : > { %v11257_v24 = vcombine.low %v553_v34, %v573_v52  ;;  %v11259_v9 = vcombine.low %v555_v35, %v575_v19 }
  0xf7   : > { %v1169_v5 = vsel %vm16447_vm0, %v1140_v45, %v1141_v18  ;;  %v1171_v7 = vsel %vm16447_vm0, %v1141_v18, %v1142_v27  ;;  %1926 = vmatprep.subr.bf16.mxu0 %v11258_v12  ;;  %1969 = vmatprep.subr.bf16.mxu1 %v11260_v49 }
  0xf8   : > { %v1170_v55 = vsel %vm16446_vm1, %v13739_v25, %v1169_v5  ;;  %v1172_v11 = vsel %vm16446_vm1, %v1105_v30, %v1171_v7  ;;  %v13869_v61 = vpop.permute.xlu1 %1128  ;;  %v1127_v42 = vpop.permute.xlu0 %1126  ;;  %1927 = vmatpush1.bf16.msra.mxu0 %v11257_v24  ;;  %1970 = vmatpush1.bf16.msra.mxu1 %v11259_v9 }
  0xf9   : > { %1223 = vst [vmem:[#allocation2 + $0x2b0] sm:$0xff] %v1170_v55  ;;  %1224 = vst [vmem:[#allocation2 + $0x2b8] sm:$0xff] %v1172_v11  ;;  %v1153_v45 = vrot.slane %v13869_v61, 4  ;;  %v1152_v13 = vrot.slane %v1127_v42, 4 }
  0xfb   : > { %v1189_v0 = vsel %vm16447_vm0, %v1151_v43, %v1152_v13  ;;  %v1191_v25 = vsel %vm16447_vm0, %v1152_v13, %v1153_v45  ;;  %11333 = vmatmul.mubr.msk.bf16.vlgmr.msra.gmra.mxu0 %vm16442_vm5, %v13620_v1  ;;  %11334 = vmatmul.mubr.msk.bf16.vlgmr.msra.gmra.mxu1 %vm16442_vm5, %v13620_v1 }
  0xfc   : > { %v1190_v6 = vsel %vm16446_vm1, %v13753_v21, %v1189_v0  ;;  %v1192_v41 = vsel %vm16446_vm1, %v1127_v42, %v1191_v25  ;;  %v13885_v23 = vpop.permute.xlu1 %915  ;;  %v914_v51 = vpop.permute.xlu0 %913  ;;  %2030 = vmatprep.mubr.bf16.mxu0 %v13771_v4  ;;  %2073 = vmatprep.mubr.bf16.mxu1 %v13771_v4 }
  0xfd   : > { %1233 = vst [vmem:[#allocation2 + $0x300] sm:$0xff] %v1190_v6  ;;  %1234 = vst [vmem:[#allocation2 + $0x308] sm:$0xff] %v1192_v41  ;;  %v951_v43 = vrot.slane %v13885_v23, 4  ;;  %v950_v62 = vrot.slane %v914_v51, 4  ;;  %v11326_v36 = vcombine.high %v1170_v55, %v1190_v6  ;;  %v11328_v44 = vcombine.high %v1172_v11, %v1192_v41 }
  0xfe   : > { %v11325_v1 = vcombine.low %v1170_v55, %v1190_v6  ;;  %v11327_v50 = vcombine.low %v1172_v11, %v1192_v41 }
  0xff   : > { %v978_v21 = vsel %vm16447_vm0, %v949_v3, %v950_v62  ;;  %v980_v26 = vsel %vm16447_vm0, %v950_v62, %v951_v43  ;;  %2004 = vmatprep.subr.bf16.mxu0 %v11326_v36  ;;  %2047 = vmatprep.subr.bf16.mxu1 %v11328_v44 }
 0x100   : > { %v979_v16 = vsel %vm16445_vm2, %v13769_v28, %v978_v21  ;;  %v981_v48 = vsel %vm16445_vm2, %v914_v51, %v980_v26  ;;  %v13899_v15 = vpop.permute.xlu1 %937  ;;  %v936_v33 = vpop.permute.xlu0 %935  ;;  %2005 = vmatpush1.bf16.msra.mxu0 %v11325_v1  ;;  %2048 = vmatpush1.bf16.msra.mxu1 %v11327_v50 }
 0x101   : > { %1032 = vst [vmem:[#allocation2 + $0x210] sm:$0xff] %v979_v16  ;;  %1033 = vst [vmem:[#allocation2 + $0x218] sm:$0xff] %v981_v48  ;;  %v962_v3 = vrot.slane %v13899_v15, 4  ;;  %v961_v34 = vrot.slane %v936_v33, 4 }
 0x103   : > { %v998_v35 = vsel %vm16447_vm0, %v960_v46, %v961_v34  ;;  %v1000_v28 = vsel %vm16447_vm0, %v961_v34, %v962_v3 }
 0x104   : > { %v999_v39 = vsel %vm16445_vm2, %v13785_v14, %v998_v35  ;;  %v1001_v22 = vsel %vm16445_vm2, %v936_v33, %v1000_v28  ;;  %v13911_v2 = vpop.permute.xlu1 %684  ;;  %v683_v31 = vpop.permute.xlu0 %682  ;;  %v12279_v35 = vld [vmem:[#allocation2 + $0x288] ss:$80 sps:$4 sm:$0xff]   ;;  %v12281_v28 = vld [vmem:[#allocation2 + $0x290] ss:$80 sps:$4 sm:$0xff]  }
 0x105   : > { %1042 = vst [vmem:[#allocation2 + $0x260] sm:$0xff] %v999_v39  ;;  %1043 = vst [vmem:[#allocation2 + $0x268] sm:$0xff] %v1001_v22  ;;  %v720_v52 = vrot.slane %v13911_v2, 4  ;;  %v719_v19 = vrot.slane %v683_v31, 4  ;;  %v11310_v30 = vcombine.high %v979_v16, %v999_v39  ;;  %v11312_v18 = vcombine.high %v981_v48, %v1001_v22 }
 0x106   : > { %v11309_v46 = vcombine.low %v979_v16, %v999_v39  ;;  %v11311_v12 = vcombine.low %v981_v48, %v1001_v22 }
 0x107   : > { %v747_v49 = vsel %vm16447_vm0, %v718_v53, %v719_v19  ;;  %v749_v14 = vsel %vm16447_vm0, %v719_v19, %v720_v52  ;;  %2006 = vmatprep.subr.bf16.mxu0 %v11310_v30  ;;  %2049 = vmatprep.subr.bf16.mxu1 %v11312_v18  ;;  %v12283_v30 = vld [vmem:[#allocation2 + $0x284] ss:$80 sps:$4 sm:$0xff]   ;;  %v12284_v18 = vld [vmem:[#allocation2 + $0x28c] ss:$80 sps:$4 sm:$0xff]  }
 0x108   : > { %v748_v24 = vsel %vm16444_vm3, %v13797_v47, %v747_v49  ;;  %v750_v9 = vsel %vm16444_vm3, %v683_v31, %v749_v14  ;;  %v13923_v5 = vpop.permute.xlu1 %706  ;;  %v705_v7 = vpop.permute.xlu0 %704  ;;  %2007 = vmatpush1.bf16.msra.mxu0 %v11309_v46  ;;  %2050 = vmatpush1.bf16.msra.mxu1 %v11311_v12  ;;  %v13213_v46 = vld [vmem:[%s16435_s1] sm:$0xff]   ;;  %v12285_v12 = vld [vmem:[#allocation2 + $0x1e8] ss:$80 sps:$4 sm:$0xff]  }
 0x109   : > { %801 = vst [vmem:[#allocation2 + $0xd0] sm:$0xff] %v748_v24  ;;  %802 = vst [vmem:[#allocation2 + $0xd8] sm:$0xff] %v750_v9  ;;  %v731_v53 = vrot.slane %v13923_v5, 4  ;;  %v730_v55 = vrot.slane %v705_v7, 4  ;;  %2008 = vmatprep.subr.bf16.mxu0 %v11294_v59  ;;  %2051 = vmatprep.subr.bf16.mxu1 %v11296_v63  ;;  %v12287_v49 = vld [vmem:[#allocation2 + $0x1f0] ss:$80 sps:$4 sm:$0xff]  }
 0x10b   : > { %v767_v47 = vsel %vm16447_vm0, %v729_v20, %v730_v55  ;;  %v769_v11 = vsel %vm16447_vm0, %v730_v55, %v731_v53 }
 0x10c   : > { %v768_v42 = vsel %vm16444_vm3, %v13809_v32, %v767_v47  ;;  %v770_v13 = vsel %vm16444_vm3, %v705_v7, %v769_v11  ;;  %v13941_v0 = vpop.permute.xlu1 %492  ;;  %v491_v59 = vpop.permute.xlu0 %490  ;;  %2009 = vmatpush1.bf16.msra.mxu0 %v11293_v10  ;;  %2052 = vmatpush1.bf16.msra.mxu1 %v11295_v17  ;;  %v2159_v7 = vld [vmem:[#allocation2 + $0x194] sm:$0xff] }
 0x10d   : > { %811 = vst [vmem:[#allocation2 + $0x120] sm:$0xff] %v768_v42  ;;  %812 = vst [vmem:[#allocation2 + $0x128] sm:$0xff] %v770_v13  ;;  %v528_v63 = vrot.slane %v13941_v0, 4  ;;  %v527_v20 = vrot.slane %v491_v59, 4  ;;  %v11278_v25 = vcombine.high %v748_v24, %v768_v42  ;;  %v11280_v32 = vcombine.high %v750_v9, %v770_v13  ;;  %v12289_v11 = vld [vmem:[#allocation2 + $0x1e4] ss:$80 sps:$4 sm:$0xff]  }
 0x10e   : > { %v11277_v6 = vcombine.low %v748_v24, %v768_v42  ;;  %v11279_v41 = vcombine.low %v750_v9, %v770_v13  ;;  %v12290_v42 = vld [vmem:[#allocation2 + $0x1ec] ss:$80 sps:$4 sm:$0xff]  }
 0x10f   : > { %v556_v51 = vsel %vm16447_vm0, %v526_v38, %v527_v20  ;;  %v558_v56 = vsel %vm16447_vm0, %v527_v20, %v528_v63  ;;  %2010 = vmatprep.subr.bf16.mxu0 %v11278_v25  ;;  %2053 = vmatprep.subr.bf16.mxu1 %v11280_v32 }
 0x110   : > { %v557_v57 = vsel %vm16443_vm4, %v13827_v8, %v556_v51  ;;  %v559_v58 = vsel %vm16443_vm4, %v491_v59, %v558_v56  ;;  %v13959_v60 = vpop.permute.xlu1 %514  ;;  %v513_v10 = vpop.permute.xlu0 %512  ;;  %2011 = vmatpush1.bf16.msra.mxu0 %v11277_v6  ;;  %2054 = vmatpush1.bf16.msra.mxu1 %v11279_v41  ;;  %v12298_v56 = vld [vmem:[#allocation2 + $0xb0] ss:$80 sps:$4 sm:$0xff]  }
 0x111   : > { %610 = vst [vmem:[#allocation2 + $0x30] sm:$0xff] %v557_v57  ;;  %611 = vst [vmem:[#allocation2 + $0x38] sm:$0xff] %v559_v58  ;;  %v539_v17 = vrot.slane %v13959_v60, 4  ;;  %v538_v38 = vrot.slane %v513_v10, 4 }
 0x113   : > { %v576_v62 = vsel %vm16447_vm0, %v537_v40, %v538_v38  ;;  %v578_v8 = vsel %vm16447_vm0, %v538_v38, %v539_v17 }
 0x114   : > { %v577_v36 = vsel %vm16443_vm4, %v13845_v37, %v576_v62  ;;  %v579_v44 = vsel %vm16443_vm4, %v513_v10, %v578_v8  ;;  %v13971_v1 = vpop.permute.xlu1 %1130  ;;  %v13973_v50 = vpop.permute.xlu0 %1108  ;;  %v12300_v62 = vld [vmem:[#allocation2 + $0xa4] ss:$80 sps:$4 sm:$0xff]   ;;  %v12301_v8 = vld [vmem:[#allocation2 + $0xac] ss:$80 sps:$4 sm:$0xff]  }
 0x115   : > { %620 = vst [vmem:[#allocation2 + $0x80] sm:$0xff] %v577_v36  ;;  %621 = vst [vmem:[#allocation2 + $0x88] sm:$0xff] %v579_v44  ;;  %v1154_v21 = vrot.slane %v13971_v1, 4  ;;  %v1143_v26 = vrot.slane %v13973_v50, 4  ;;  %v11262_v40 = vcombine.high %v557_v57, %v577_v36  ;;  %v11264_v16 = vcombine.high %v559_v58, %v579_v44 }
 0x116   : > { %v11261_v48 = vcombine.low %v557_v57, %v577_v36  ;;  %v11263_v33 = vcombine.low %v559_v58, %v579_v44  ;;  %v12304_v36 = vld [vmem:[#allocation2 + $0x10] ss:$80 sps:$4 sm:$0xff]  }
 0x117   : > { %v1193_v37 = vsel %vm16447_vm0, %v1153_v45, %v1154_v21  ;;  %v1173_v34 = vsel %vm16447_vm0, %v1142_v27, %v1143_v26  ;;  %2012 = vmatprep.subr.bf16.mxu0 %v11262_v40  ;;  %2055 = vmatprep.subr.bf16.mxu1 %v11264_v16 }
 0x118   : > { %v1194_v39 = vsel %vm16446_vm1, %v13869_v61, %v1193_v37  ;;  %v1174_v22 = vsel %vm16446_vm1, %v13857_v29, %v1173_v34  ;;  %v13991_v31 = vpop.permute.xlu1 %939  ;;  %v13993_v19 = vpop.permute.xlu0 %917  ;;  %2013 = vmatpush1.bf16.msra.mxu0 %v11261_v48  ;;  %2056 = vmatpush1.bf16.msra.mxu1 %v11263_v33  ;;  %v12306_v37 = vld [vmem:[#allocation2 + $0x4] ss:$80 sps:$4 sm:$0xff]   ;;  %v14074_v34 = vld [vmem:[#allocation2 + $0x298] ss:$80 sps:$4 sm:$0xff]  }
 0x119   : > { %1235 = vst [vmem:[#allocation2 + $0x310] sm:$0xff] %v1194_v39  ;;  %1225 = vst [vmem:[#allocation2 + $0x2c0] sm:$0xff] %v1174_v22  ;;  %v963_v27 = vrot.slane %v13991_v31, 4  ;;  %v952_v45 = vrot.slane %v13993_v19, 4  ;;  %2613 = vmatprep.subr.bf16.mxu0 %v12279_v35  ;;  %2656 = vmatprep.subr.bf16.mxu1 %v12281_v28  ;;  %v12310_v28 = vld [vmem:[#allocation2 + $0x2a0] ss:$80 sps:$4 sm:$0xff]  }
 0x11b   : > { %v1002_v29 = vsel %vm16447_vm0, %v962_v3, %v963_v27  ;;  %v982_v61 = vsel %vm16447_vm0, %v951_v43, %v952_v45  ;;  %11335 = vmatmul.mubr.msk.bf16.vlgmr.msra.gmra.mxu0 %vm16442_vm5, %v13213_v46  ;;  %11336 = vmatmul.mubr.msk.bf16.vlgmr.msra.gmra.mxu1 %vm16442_vm5, %v13213_v46  ;;  %v2151_v43 = vld [vmem:[#allocation2 + $0x144] sm:$0xff] }
 0x11c   : > { %v1003_v14 = vsel %vm16445_vm2, %v13899_v15, %v1002_v29  ;;  %v983_v3 = vsel %vm16445_vm2, %v13885_v23, %v982_v61  ;;  %v14016_v24 = vpop.permute.xlu1 %708  ;;  %v14018_v9 = vpop.permute.xlu0 %686  ;;  %2614 = vmatpush1.bf16.msra.mxu0 %v12283_v30  ;;  %2657 = vmatpush1.bf16.msra.mxu1 %v12284_v18  ;;  %v12293_v15 = vld [vmem:[#allocation2 + $0x150] ss:$80 sps:$4 sm:$0xff]   ;;  %v11372_v6 = vcombine.low %v2151_v43, %v2159_v7  ;;  %v14099_v46 = vld [vmem:[#allocation2 + $0x1f8] ss:$80 sps:$4 sm:$0xff]  }
 0x11d   : > { %1044 = vst [vmem:[#allocation2 + $0x270] sm:$0xff] %v1003_v14  ;;  %1034 = vst [vmem:[#allocation2 + $0x220] sm:$0xff] %v983_v3  ;;  %v732_v55 = vrot.slane %v14016_v24, 4  ;;  %v721_v47 = vrot.slane %v14018_v9, 4  ;;  %2615 = vmatprep.subr.bf16.mxu0 %v12285_v12  ;;  %2658 = vmatprep.subr.bf16.mxu1 %v12287_v49  ;;  %v12317_v12 = vld [vmem:[#allocation2 + $0x200] ss:$80 sps:$4 sm:$0xff]  }
 0x11e   : > { %2639 = vmatprep.mubr.bf16.mxu0 %v13771_v4  ;;  %2682 = vmatprep.mubr.bf16.mxu1 %v13771_v4  ;;  %v14106_v7 = vld [vmem:[#allocation2 + $0x158] ss:$80 sps:$4 sm:$0xff]  }
 0x11f   : > { %v771_v23 = vsel %vm16447_vm0, %v731_v53, %v732_v55  ;;  %v751_v13 = vsel %vm16447_vm0, %v720_v52, %v721_v47  ;;  %v12295_v53 = vld [vmem:[#allocation2 + $0x14c] ss:$80 sps:$4 sm:$0xff]  }
 0x120   : > { %v772_v59 = vsel %vm16444_vm3, %v13923_v5, %v771_v23  ;;  %v752_v20 = vsel %vm16444_vm3, %v13911_v2, %v751_v13  ;;  %v14038_v25 = vpop.permute.xlu1 %516  ;;  %v14040_v32 = vpop.permute.xlu0 %494  ;;  %2616 = vmatpush1.bf16.msra.mxu0 %v12289_v11  ;;  %2659 = vmatpush1.bf16.msra.mxu1 %v12290_v42  ;;  %v12296_v5 = vld [vmem:[#allocation2 + $0xa8] ss:$80 sps:$4 sm:$0xff]   ;;  %v14109_v11 = vld [vmem:[#allocation2 + $0x1f4] ss:$80 sps:$4 sm:$0xff]  }
 0x121   : > { %813 = vst [vmem:[#allocation2 + $0x130] sm:$0xff] %v772_v59  ;;  %803 = vst [vmem:[#allocation2 + $0xe0] sm:$0xff] %v752_v20  ;;  %v540_v41 = vrot.slane %v14038_v25, 4  ;;  %v529_v52 = vrot.slane %v14040_v32, 4  ;;  %2617 = vmatprep.subr.bf16.mxu0 %v13581_v54  ;;  %2660 = vmatprep.subr.bf16.mxu1 %v12293_v15  ;;  %v14119_v23 = vld [vmem:[#allocation2 + $0x154] ss:$80 sps:$4 sm:$0xff]  }
 0x122   : > { %v14127_v20 = vld [vmem:[#allocation2 + $0xb8] ss:$80 sps:$4 sm:$0xff]  }
 0x123   : > { %v580_v2 = vsel %vm16447_vm0, %v539_v17, %v540_v41  ;;  %v560_v51 = vsel %vm16447_vm0, %v528_v63, %v529_v52 }
 0x124   : > { %v581_v57 = vsel %vm16443_vm4, %v13959_v60, %v580_v2  ;;  %v561_v54 = vsel %vm16443_vm4, %v13941_v0, %v560_v51  ;;  %v1133_v58 = vpop.permute.xlu1 %1132  ;;  %v1111_v10 = vpop.permute.xlu0 %1110  ;;  %2618 = vmatpush1.bf16.msra.mxu0 %v11372_v6  ;;  %2661 = vmatpush1.bf16.msra.mxu1 %v12295_v53  ;;  %v12302_v60 = vld [vmem:[#allocation2 + $0x8] ss:$80 sps:$4 sm:$0xff]   ;;  %v12329_v6 = vld [vmem:[#allocation2 + $0xc0] ss:$80 sps:$4 sm:$0xff]  }
 0x125   : > { %622 = vst [vmem:[#allocation2 + $0x90] sm:$0xff] %v581_v57  ;;  %612 = vst [vmem:[#allocation2 + $0x40] sm:$0xff] %v561_v54  ;;  %v1155_v17 = vrot.slane %v1133_v58, 4  ;;  %v1144_v38 = vrot.slane %v1111_v10, 4  ;;  %2619 = vmatprep.subr.bf16.mxu0 %v12296_v5  ;;  %2662 = vmatprep.subr.bf16.mxu1 %v12298_v56  ;;  %v14133_v53 = vld [vmem:[#allocation2 + $0x18] ss:$80 sps:$4 sm:$0xff]  }
 0x126   : > { %v12338_v5 = vld [vmem:[#allocation2 + $0x1c] ss:$80 sps:$4 sm:$0xff]   ;;  %v14139_v2 = vld [vmem:[#allocation2 + $0x2a8] ss:$80 sps:$4 sm:$0xff]   ;;  %v12341_v51 = vld [vmem:[#allocation2 + $0x2b0] ss:$80 sps:$4 sm:$0xff]  }
 0x127   : > { %v1195_v63 = vsel %vm16447_vm0, %v1154_v21, %v1155_v17  ;;  %v1175_v0 = vsel %vm16447_vm0, %v1143_v26, %v1144_v38  ;;  %v14072_v26 = vld [vmem:[%s16435_s1 + $0x8] sm:$0xff]   ;;  %v14143_v56 = vld [vmem:[#allocation2 + $0x2a4] ss:$80 sps:$4 sm:$0xff]   ;;  %v12347_v58 = vld [vmem:[#allocation2 + $0x210] ss:$80 sps:$4 sm:$0xff]  }
 0x128   : > { %v1196_v44 = vsel %vm16446_vm1, %v13971_v1, %v1195_v63  ;;  %v1176_v40 = vsel %vm16446_vm1, %v13973_v50, %v1175_v0  ;;  %v942_v16 = vpop.permute.xlu1 %941  ;;  %v920_v48 = vpop.permute.xlu0 %919  ;;  %2620 = vmatpush1.bf16.msra.mxu0 %v12300_v62  ;;  %2663 = vmatpush1.bf16.msra.mxu1 %v12301_v8  ;;  %v12307_v1 = vld [vmem:[#allocation2 + $0xc] ss:$80 sps:$4 sm:$0xff]   ;;  %v14145_v57 = vld [vmem:[#allocation2 + $0x208] ss:$80 sps:$4 sm:$0xff]   ;;  %v12353_v17 = vld [vmem:[#allocation2 + $0x170] ss:$80 sps:$4 sm:$0xff]  }
 0x129   : > { %1236 = vst [vmem:[#allocation2 + $0x318] sm:$0xff] %v1196_v44  ;;  %1226 = vst [vmem:[#allocation2 + $0x2c8] sm:$0xff] %v1176_v40  ;;  %v964_v33 = vrot.slane %v942_v16, 4  ;;  %v953_v21 = vrot.slane %v920_v48, 4  ;;  %2621 = vmatprep.subr.bf16.mxu0 %v12302_v60  ;;  %2664 = vmatprep.subr.bf16.mxu1 %v12304_v36  ;;  %v12344_v54 = vld [vmem:[#allocation2 + $0x2ac] ss:$80 sps:$4 sm:$0xff]  }
 0x12a   : > { %v14152_v10 = vld [vmem:[#allocation2 + $0x168] ss:$80 sps:$4 sm:$0xff]   ;;  %v14155_v38 = vld [vmem:[#allocation2 + $0x204] ss:$80 sps:$4 sm:$0xff]   ;;  %v12350_v62 = vld [vmem:[#allocation2 + $0x20c] ss:$80 sps:$4 sm:$0xff]  }
 0x12b   : > { %v1004_v50 = vsel %vm16447_vm0, %v963_v27, %v964_v33  ;;  %v984_v35 = vsel %vm16447_vm0, %v952_v45, %v953_v21  ;;  %v14087_v27 = vld [vmem:[#allocation2 + $0x294] ss:$80 sps:$4 sm:$0xff]   ;;  %v12314_v45 = vld [vmem:[#allocation2 + $0x29c] ss:$80 sps:$4 sm:$0xff]   ;;  %v14165_v60 = vld [vmem:[#allocation2 + $0xc8] ss:$80 sps:$4 sm:$0xff]  }
 0x12c   : > { %v1005_v39 = vsel %vm16445_vm2, %v13991_v31, %v1004_v50  ;;  %v985_v22 = vsel %vm16445_vm2, %v13993_v19, %v984_v35  ;;  %v711_v30 = vpop.permute.xlu1 %710  ;;  %v689_v18 = vpop.permute.xlu0 %688  ;;  %2622 = vmatpush1.bf16.msra.mxu0 %v12306_v37  ;;  %2665 = vmatpush1.bf16.msra.mxu1 %v12307_v1  ;;  %v14157_v8 = vld [vmem:[#allocation3] sm:$0xff]  ;;  %v12356_v0 = vld [vmem:[#allocation2 + $0x16c] ss:$80 sps:$4 sm:$0xff]   ;;  %v12363_v16 = vld [vmem:[#allocation2 + $0x28] ss:$80 sps:$4 sm:$0xff]  }
 0x12d   : > { %1045 = vst [vmem:[#allocation2 + $0x278] sm:$0xff] %v1005_v39  ;;  %1035 = vst [vmem:[#allocation2 + $0x228] sm:$0xff] %v985_v22  ;;  %v733_v29 = vrot.slane %v711_v30, 4  ;;  %v722_v61 = vrot.slane %v689_v18, 4  ;;  %2699 = vmatprep.subr.bf16.mxu0 %v14074_v34  ;;  %2742 = vmatprep.subr.bf16.mxu1 %v12310_v28  ;;  %v14161_v63 = vld [vmem:[#allocation2 + $0x164] ss:$80 sps:$4 sm:$0xff]  }
 0x12e   : > { %v12359_v36 = vld [vmem:[#allocation2 + $0xd0] ss:$80 sps:$4 sm:$0xff]   ;;  %v14169_v44 = vld [vmem:[#allocation2 + $0xc4] ss:$80 sps:$4 sm:$0xff]   ;;  %v12362_v40 = vld [vmem:[#allocation2 + $0xcc] ss:$80 sps:$4 sm:$0xff]  }
 0x12f   : > { %v773_v31 = vsel %vm16447_vm0, %v732_v55, %v733_v29  ;;  %v753_v19 = vsel %vm16447_vm0, %v721_v47, %v722_v61  ;;  %11420 = vmatmul.mubr.msk.bf16.vlgmr.msra.gmra.mxu0 %vm16442_vm5, %v14072_v26  ;;  %11421 = vmatmul.mubr.msk.bf16.vlgmr.msra.gmra.mxu1 %vm16442_vm5, %v14072_v26  ;;  %v12323_v55 = vld [vmem:[#allocation2 + $0x160] ss:$80 sps:$4 sm:$0xff]   ;;  %v12367_v33 = vld [vmem:[#allocation2 + $0x24] ss:$80 sps:$4 sm:$0xff]   ;;  %v12369_v21 = vld [vmem:[#allocation2 + $0x2b8] ss:$80 sps:$4 sm:$0xff]  }
 0x130   : > { %v774_v49 = vsel %vm16444_vm3, %v14016_v24, %v773_v31  ;;  %v754_v14 = vsel %vm16444_vm3, %v14018_v9, %v753_v19  ;;  %v519_v3 = vpop.permute.xlu1 %518  ;;  %v497_v43 = vpop.permute.xlu0 %496  ;;  %2700 = vmatpush1.bf16.msra.mxu0 %v14087_v27  ;;  %2743 = vmatpush1.bf16.msra.mxu1 %v12314_v45  ;;  %v12320_v24 = vld [vmem:[#allocation2 + $0x1fc] ss:$80 sps:$4 sm:$0xff]   ;;  %v12365_v48 = vld [vmem:[#allocation2 + $0x30] ss:$80 sps:$4 sm:$0xff]   ;;  %v12373_v50 = vld [vmem:[#allocation2 + $0x2b4] ss:$80 sps:$4 sm:$0xff]  }
 0x131   : > { %814 = vst [vmem:[#allocation2 + $0x138] sm:$0xff] %v774_v49  ;;  %804 = vst [vmem:[#allocation2 + $0xe8] sm:$0xff] %v754_v14  ;;  %v541_v47 = vrot.slane %v519_v3, 4  ;;  %v530_v15 = vrot.slane %v497_v43, 4  ;;  %2701 = vmatprep.subr.bf16.mxu0 %v14099_v46  ;;  %2744 = vmatprep.subr.bf16.mxu1 %v12317_v12  ;;  %v12368_v37 = vld [vmem:[#allocation2 + $0x2c] ss:$80 sps:$4 sm:$0xff]  }
 0x132   : > { %2725 = vmatprep.mubr.bf16.mxu0 %v13771_v4  ;;  %2768 = vmatprep.mubr.bf16.mxu1 %v13771_v4  ;;  %v12326_v4 = vld [vmem:[#allocation2 + $0x15c] ss:$80 sps:$4 sm:$0xff]   ;;  %v12371_v1 = vld [vmem:[#allocation2 + $0x2c0] ss:$80 sps:$4 sm:$0xff]   ;;  %v12375_v28 = vld [vmem:[#allocation2 + $0x218] ss:$80 sps:$4 sm:$0xff]  }
 0x133   : > { %v582_v9 = vsel %vm16447_vm0, %v540_v41, %v541_v47  ;;  %v562_v42 = vsel %vm16447_vm0, %v529_v52, %v530_v15  ;;  %v12335_v41 = vld [vmem:[#allocation2 + $0x20] ss:$80 sps:$4 sm:$0xff]   ;;  %v14137_v52 = vld [vmem:[#allocation2 + $0x14] ss:$80 sps:$4 sm:$0xff]   ;;  %v12374_v35 = vld [vmem:[#allocation2 + $0x2bc] ss:$80 sps:$4 sm:$0xff]  }
 0x134   : > { %v583_v13 = vsel %vm16443_vm4, %v14038_v25, %v582_v9  ;;  %v563_v59 = vsel %vm16443_vm4, %v14040_v32, %v562_v42  ;;  %2702 = vmatpush1.bf16.msra.mxu0 %v14109_v11  ;;  %2745 = vmatpush1.bf16.msra.mxu1 %v12320_v24  ;;  %v14131_v25 = vld [vmem:[#allocation2 + $0xb4] ss:$80 sps:$4 sm:$0xff]   ;;  %v12332_v32 = vld [vmem:[#allocation2 + $0xbc] ss:$80 sps:$4 sm:$0xff]   ;;  %v12377_v39 = vld [vmem:[#allocation2 + $0x220] ss:$80 sps:$4 sm:$0xff]  }
 0x135   : > { %623 = vst [vmem:[#allocation2 + $0x98] sm:$0xff] %v583_v13  ;;  %613 = vst [vmem:[#allocation2 + $0x48] sm:$0xff] %v563_v59  ;;  %2703 = vmatprep.subr.bf16.mxu0 %v14106_v7  ;;  %2746 = vmatprep.subr.bf16.mxu1 %v12323_v55  ;;  %v12381_v22 = vld [vmem:[#allocation2 + $0x178] ss:$80 sps:$4 sm:$0xff]   ;;  %v12383_v30 = vld [vmem:[#allocation2 + $0x180] ss:$80 sps:$4 sm:$0xff]  }
 0x136   : > { %v12379_v18 = vld [vmem:[#allocation2 + $0x214] ss:$80 sps:$4 sm:$0xff]   ;;  %v12380_v29 = vld [vmem:[#allocation2 + $0x21c] ss:$80 sps:$4 sm:$0xff]   ;;  %v12387_v31 = vld [vmem:[#allocation2 + $0xd8] ss:$80 sps:$4 sm:$0xff]  }
 0x137   : > { %v12385_v61 = vld [vmem:[#allocation2 + $0x174] ss:$80 sps:$4 sm:$0xff]   ;;  %v12386_v45 = vld [vmem:[#allocation2 + $0x17c] ss:$80 sps:$4 sm:$0xff]   ;;  %v12389_v19 = vld [vmem:[#allocation2 + $0xe0] ss:$80 sps:$4 sm:$0xff]  }
 0x138   : > { %2704 = vmatpush1.bf16.msra.mxu0 %v14119_v23  ;;  %2747 = vmatpush1.bf16.msra.mxu1 %v12326_v4  ;;  %v12391_v12 = vld [vmem:[#allocation2 + $0xd4] ss:$80 sps:$4 sm:$0xff]   ;;  %v12392_v49 = vld [vmem:[#allocation2 + $0xdc] ss:$80 sps:$4 sm:$0xff]   ;;  %v12393_v14 = vld [vmem:[#allocation2 + $0x38] ss:$80 sps:$4 sm:$0xff]  }
 0x139   : > { %2705 = vmatprep.subr.bf16.mxu0 %v14127_v20  ;;  %2748 = vmatprep.subr.bf16.mxu1 %v12329_v6  ;;  %v12395_v3 = vld [vmem:[#allocation2 + $0x40] ss:$80 sps:$4 sm:$0xff]   ;;  %v12397_v43 = vld [vmem:[#allocation2 + $0x34] ss:$80 sps:$4 sm:$0xff]   ;;  %v12398_v55 = vld [vmem:[#allocation2 + $0x3c] ss:$80 sps:$4 sm:$0xff]  }
 0x13a   : > { %v12399_v47 = vld [vmem:[#allocation2 + $0x28c] ss:$80 sps:$4 sm:$0xff]   ;;  %v12401_v15 = vld [vmem:[#allocation2 + $0x294] ss:$80 sps:$4 sm:$0xff]   ;;  %v12403_v24 = vld [vmem:[#allocation2 + $0x288] ss:$80 sps:$4 sm:$0xff]  }
 0x13b   : > { %v12404_v9 = vld [vmem:[#allocation2 + $0x290] ss:$80 sps:$4 sm:$0xff]   ;;  %v12405_v42 = vld [vmem:[#allocation2 + $0x1ec] ss:$80 sps:$4 sm:$0xff]   ;;  %v12407_v13 = vld [vmem:[#allocation2 + $0x1f4] ss:$80 sps:$4 sm:$0xff]  }
 0x13c   : > { %2706 = vmatpush1.bf16.msra.mxu0 %v14131_v25  ;;  %2749 = vmatpush1.bf16.msra.mxu1 %v12332_v32  ;;  %v12411_v59 = vld [vmem:[#allocation2 + $0x14c] ss:$80 sps:$4 sm:$0xff]   ;;  %v12413_v4 = vld [vmem:[#allocation2 + $0x154] ss:$80 sps:$4 sm:$0xff]   ;;  %v12409_v6 = vld [vmem:[#allocation2 + $0x1e8] ss:$80 sps:$4 sm:$0xff]  }
 0x13d   : > { %2707 = vmatprep.subr.bf16.mxu0 %v14133_v53  ;;  %2750 = vmatprep.subr.bf16.mxu1 %v12335_v41  ;;  %v12410_v32 = vld [vmem:[#allocation2 + $0x1f0] ss:$80 sps:$4 sm:$0xff]   ;;  %v12415_v41 = vld [vmem:[#allocation2 + $0x148] ss:$80 sps:$4 sm:$0xff]  }
 0x140   : > { %2708 = vmatpush1.bf16.msra.mxu0 %v14137_v52  ;;  %2751 = vmatpush1.bf16.msra.mxu1 %v12338_v5  ;;  %v12416_v5 = vld [vmem:[#allocation2 + $0x150] ss:$80 sps:$4 sm:$0xff]  }
 0x141   : > { %2785 = vmatprep.subr.bf16.mxu0 %v14139_v2  ;;  %2828 = vmatprep.subr.bf16.mxu1 %v12341_v51  ;;  %v12419_v51 = vld [vmem:[#allocation2 + $0xb4] ss:$80 sps:$4 sm:$0xff]  }
 0x143   : > { %11422 = vmatmul.mubr.msk.bf16.vlgmr.msra.gmra.mxu0 %vm16442_vm5, %v14072_v26  ;;  %11423 = vmatmul.mubr.msk.bf16.vlgmr.msra.gmra.mxu1 %vm16442_vm5, %v14072_v26 }
 0x144   : > { %2786 = vmatpush1.bf16.msra.mxu0 %v14143_v56  ;;  %2829 = vmatpush1.bf16.msra.mxu1 %v12344_v54  ;;  %v12421_v54 = vld [vmem:[#allocation2 + $0xa8] ss:$80 sps:$4 sm:$0xff]  }
 0x145   : > { %2787 = vmatprep.subr.bf16.mxu0 %v14145_v57  ;;  %2830 = vmatprep.subr.bf16.mxu1 %v12347_v58  ;;  %v12422_v58 = vld [vmem:[#allocation2 + $0xb0] ss:$80 sps:$4 sm:$0xff]  }
 0x146   : > { %2811 = vmatprep.mubr.bf16.mxu0 %v14157_v8  ;;  %2854 = vmatprep.mubr.bf16.mxu1 %v14157_v8 }
 0x148   : > { %2788 = vmatpush1.bf16.msra.mxu0 %v14155_v38  ;;  %2831 = vmatpush1.bf16.msra.mxu1 %v12350_v62  ;;  %v12425_v62 = vld [vmem:[#allocation2 + $0x14] ss:$80 sps:$4 sm:$0xff]  }
 0x149   : > { %2789 = vmatprep.subr.bf16.mxu0 %v14152_v10  ;;  %2832 = vmatprep.subr.bf16.mxu1 %v12353_v17  ;;  %v12423_v17 = vld [vmem:[#allocation2 + $0xc] ss:$80 sps:$4 sm:$0xff]  }
 0x14c   : > { %2790 = vmatpush1.bf16.msra.mxu0 %v14161_v63  ;;  %2833 = vmatpush1.bf16.msra.mxu1 %v12356_v0  ;;  %v12427_v0 = vld [vmem:[#allocation2 + $0x8] ss:$80 sps:$4 sm:$0xff]  }
 0x14d   : > { %2791 = vmatprep.subr.bf16.mxu0 %v14165_v60  ;;  %2834 = vmatprep.subr.bf16.mxu1 %v12359_v36  ;;  %v12428_v36 = vld [vmem:[#allocation2 + $0x10] ss:$80 sps:$4 sm:$0xff]  }
 0x150   : > { %2792 = vmatpush1.bf16.msra.mxu0 %v14169_v44  ;;  %2835 = vmatpush1.bf16.msra.mxu1 %v12362_v40  ;;  %v12429_v40 = vld [vmem:[#allocation2 + $0x29c] ss:$80 sps:$4 sm:$0xff]  }
 0x151   : > { %2793 = vmatprep.subr.bf16.mxu0 %v12363_v16  ;;  %2836 = vmatprep.subr.bf16.mxu1 %v12365_v48  ;;  %v12431_v16 = vld [vmem:[#allocation2 + $0x2a4] ss:$80 sps:$4 sm:$0xff]  }
 0x152   : > { %v14187_v48 = vld [vmem:[%s16435_s1 + $0x10] sm:$0xff]  }
 0x154   : > { %2794 = vmatpush1.bf16.msra.mxu0 %v12367_v33  ;;  %2837 = vmatpush1.bf16.msra.mxu1 %v12368_v37  ;;  %v14190_v33 = vld [vmem:[%s13274_s20 + $0x4c] sm:$0xff]  ;;  %v12434_v37 = vld [vmem:[#allocation2 + $0x298] ss:$80 sps:$4 sm:$0xff]  }
 0x155   : > { %2871 = vmatprep.subr.bf16.mxu0 %v12369_v21  ;;  %2914 = vmatprep.subr.bf16.mxu1 %v12371_v1  ;;  %v14193_v21 = vld [vmem:[%s13274_s20 + $0xa4] sm:$0xff]  ;;  %v12435_v1 = vld [vmem:[#allocation2 + $0x2a0] ss:$80 sps:$4 sm:$0xff]   ;;  %844 = vst [vmem:[#allocation2 + $0x188] sm:$0xff] %v14190_v33 }
 0x156   : > { %854 = vst [vmem:[#allocation2 + $0x1d8] sm:$0xff] %v14193_v21 }
 0x157   : > { %11424 = vmatmul.mubr.msk.bf16.vlgmr.msra.gmra.mxu0 %vm16442_vm5, %v14072_v26  ;;  %11425 = vmatmul.mubr.msk.bf16.vlgmr.msra.gmra.mxu1 %vm16442_vm5, %v14072_v26 }
 0x158   : > { %2872 = vmatpush1.bf16.msra.mxu0 %v12373_v50  ;;  %2915 = vmatpush1.bf16.msra.mxu1 %v12374_v35  ;;  %v12436_v50 = vld [vmem:[#allocation2 + $0x1fc] ss:$80 sps:$4 sm:$0xff]   ;;  %v12438_v35 = vld [vmem:[#allocation2 + $0x204] ss:$80 sps:$4 sm:$0xff]  }
 0x159   : > { %2873 = vmatprep.subr.bf16.mxu0 %v12375_v28  ;;  %2916 = vmatprep.subr.bf16.mxu1 %v12377_v39  ;;  %v12442_v28 = vld [vmem:[#allocation2 + $0x15c] ss:$80 sps:$4 sm:$0xff]   ;;  %v12444_v39 = vld [vmem:[#allocation2 + $0x164] ss:$80 sps:$4 sm:$0xff]  }
 0x15a   : > { %2897 = vmatprep.mubr.bf16.mxu0 %v14157_v8  ;;  %2940 = vmatprep.mubr.bf16.mxu1 %v14157_v8 }
 0x15c   : > { %2874 = vmatpush1.bf16.msra.mxu0 %v12379_v18  ;;  %2917 = vmatpush1.bf16.msra.mxu1 %v12380_v29  ;;  %v12446_v18 = vld [vmem:[#allocation2 + $0x158] ss:$80 sps:$4 sm:$0xff]   ;;  %v12447_v29 = vld [vmem:[#allocation2 + $0x160] ss:$80 sps:$4 sm:$0xff]  }
 0x15d   : > { %2875 = vmatprep.subr.bf16.mxu0 %v12381_v22  ;;  %2918 = vmatprep.subr.bf16.mxu1 %v12383_v30  ;;  %v12440_v22 = vld [vmem:[#allocation2 + $0x1f8] ss:$80 sps:$4 sm:$0xff]   ;;  %v12441_v30 = vld [vmem:[#allocation2 + $0x200] ss:$80 sps:$4 sm:$0xff]  }
 0x160   : > { %2876 = vmatpush1.bf16.msra.mxu0 %v12385_v61  ;;  %2919 = vmatpush1.bf16.msra.mxu1 %v12386_v45  ;;  %v14203_v61 = vld [vmem:[#allocation2 + $0x188] ss:$80 sps:$4 sm:$0xff]   ;;  %v12448_v45 = vld [vmem:[#allocation2 + $0xbc] ss:$80 sps:$4 sm:$0xff]  }
 0x161   : > { %2877 = vmatprep.subr.bf16.mxu0 %v12387_v31  ;;  %2920 = vmatprep.subr.bf16.mxu1 %v12389_v19  ;;  %6275 = vst [vmem:[#allocation2 + $0x188] sm:$0xff] %v14157_v8  ;;  %6285 = vst [vmem:[#allocation2 + $0x1d8] sm:$0xff] %v14157_v8  ;;  %v12450_v31 = vld [vmem:[#allocation2 + $0xc4] ss:$80 sps:$4 sm:$0xff]   ;;  %v12452_v19 = vld [vmem:[#allocation2 + $0xb8] ss:$80 sps:$4 sm:$0xff]  }
 0x164   : > { %2878 = vmatpush1.bf16.msra.mxu0 %v12391_v12  ;;  %2921 = vmatpush1.bf16.msra.mxu1 %v12392_v49  ;;  %v12453_v12 = vld [vmem:[#allocation2 + $0xc0] ss:$80 sps:$4 sm:$0xff]   ;;  %v12454_v49 = vld [vmem:[#allocation2 + $0x1c] ss:$80 sps:$4 sm:$0xff]  }
 0x165   : > { %2879 = vmatprep.subr.bf16.mxu0 %v12393_v14  ;;  %2922 = vmatprep.subr.bf16.mxu1 %v12395_v3  ;;  %v12456_v14 = vld [vmem:[#allocation2 + $0x24] ss:$80 sps:$4 sm:$0xff]   ;;  %v12458_v3 = vld [vmem:[#allocation2 + $0x18] ss:$80 sps:$4 sm:$0xff]  }
 0x168   : > { %2880 = vmatpush1.bf16.msra.mxu0 %v12397_v43  ;;  %2923 = vmatpush1.bf16.msra.mxu1 %v12398_v55  ;;  %v12459_v43 = vld [vmem:[#allocation2 + $0x20] ss:$80 sps:$4 sm:$0xff]   ;;  %v12460_v55 = vld [vmem:[#allocation2 + $0x2ac] ss:$80 sps:$4 sm:$0xff]  }
 0x169   : > { %3480 = vmatprep.subr.bf16.mxu0 %v12399_v47  ;;  %3523 = vmatprep.subr.bf16.mxu1 %v12401_v15  ;;  %v12462_v47 = vld [vmem:[#allocation2 + $0x2b4] ss:$80 sps:$4 sm:$0xff]   ;;  %v12464_v15 = vld [vmem:[#allocation2 + $0x2a8] ss:$80 sps:$4 sm:$0xff]  }
 0x16b   : > { %11426 = vmatmul.mubr.msk.bf16.vlgmr.msra.gmra.mxu0 %vm16442_vm5, %v14072_v26  ;;  %11427 = vmatmul.mubr.msk.bf16.vlgmr.msra.gmra.mxu1 %vm16442_vm5, %v14072_v26  ;;  %v12417_v26 = vld [vmem:[#allocation2 + $0xac] ss:$80 sps:$4 sm:$0xff]  }
 0x16c   : > { %3481 = vmatpush1.bf16.msra.mxu0 %v12403_v24  ;;  %3524 = vmatpush1.bf16.msra.mxu1 %v12404_v9  ;;  %v12465_v24 = vld [vmem:[#allocation2 + $0x2b0] ss:$80 sps:$4 sm:$0xff]   ;;  %v12466_v9 = vld [vmem:[#allocation2 + $0x20c] ss:$80 sps:$4 sm:$0xff]  }
 0x16d   : > { %3482 = vmatprep.subr.bf16.mxu0 %v12405_v42  ;;  %3525 = vmatprep.subr.bf16.mxu1 %v12407_v13  ;;  %v12468_v42 = vld [vmem:[#allocation2 + $0x214] ss:$80 sps:$4 sm:$0xff]   ;;  %v12472_v13 = vld [vmem:[#allocation2 + $0x16c] ss:$80 sps:$4 sm:$0xff]  }
 0x16e   : > { %3506 = vmatprep.mubr.bf16.mxu0 %v14157_v8  ;;  %3549 = vmatprep.mubr.bf16.mxu1 %v14157_v8 }
 0x170   : > { %3483 = vmatpush1.bf16.msra.mxu0 %v12409_v6  ;;  %3526 = vmatpush1.bf16.msra.mxu1 %v12410_v32  ;;  %v12471_v6 = vld [vmem:[#allocation2 + $0x210] ss:$80 sps:$4 sm:$0xff]   ;;  %v12476_v32 = vld [vmem:[#allocation2 + $0x168] ss:$80 sps:$4 sm:$0xff]  }
 0x171   : > { %3484 = vmatprep.subr.bf16.mxu0 %v12411_v59  ;;  %3527 = vmatprep.subr.bf16.mxu1 %v12413_v4  ;;  %v12474_v59 = vld [vmem:[#allocation2 + $0x174] ss:$80 sps:$4 sm:$0xff]   ;;  %v12470_v4 = vld [vmem:[#allocation2 + $0x208] ss:$80 sps:$4 sm:$0xff]  }
 0x174   : > { %3485 = vmatpush1.bf16.msra.mxu0 %v12415_v41  ;;  %3528 = vmatpush1.bf16.msra.mxu1 %v12416_v5  ;;  %v12477_v41 = vld [vmem:[#allocation2 + $0x170] ss:$80 sps:$4 sm:$0xff]   ;;  %v12478_v5 = vld [vmem:[#allocation2 + $0xcc] ss:$80 sps:$4 sm:$0xff]  }
 0x175   : > { %3486 = vmatprep.subr.bf16.mxu0 %v12417_v26  ;;  %3529 = vmatprep.subr.bf16.mxu1 %v12419_v51  ;;  %v12480_v26 = vld [vmem:[#allocation2 + $0xd4] ss:$80 sps:$4 sm:$0xff]   ;;  %v12482_v51 = vld [vmem:[#allocation2 + $0xc8] ss:$80 sps:$4 sm:$0xff]  }
 0x178   : > { %3487 = vmatpush1.bf16.msra.mxu0 %v12421_v54  ;;  %3530 = vmatpush1.bf16.msra.mxu1 %v12422_v58  ;;  %v12483_v54 = vld [vmem:[#allocation2 + $0xd0] ss:$80 sps:$4 sm:$0xff]   ;;  %v12484_v58 = vld [vmem:[#allocation2 + $0x2c] ss:$80 sps:$4 sm:$0xff]  }
 0x179   : > { %3488 = vmatprep.subr.bf16.mxu0 %v12423_v17  ;;  %3531 = vmatprep.subr.bf16.mxu1 %v12425_v62  ;;  %v12486_v17 = vld [vmem:[#allocation2 + $0x34] ss:$80 sps:$4 sm:$0xff]   ;;  %v12488_v62 = vld [vmem:[#allocation2 + $0x28] ss:$80 sps:$4 sm:$0xff]  }
 0x17c   : > { %3489 = vmatpush1.bf16.msra.mxu0 %v12427_v0  ;;  %3532 = vmatpush1.bf16.msra.mxu1 %v12428_v36  ;;  %v12489_v0 = vld [vmem:[#allocation2 + $0x30] ss:$80 sps:$4 sm:$0xff]   ;;  %v12490_v36 = vld [vmem:[#allocation2 + $0x2bc] ss:$80 sps:$4 sm:$0xff]  }
 0x17d   : > { %3566 = vmatprep.subr.bf16.mxu0 %v12429_v40  ;;  %3609 = vmatprep.subr.bf16.mxu1 %v12431_v16  ;;  %v12492_v40 = vld [vmem:[#allocation2 + $0x2c4] ss:$80 sps:$4 sm:$0xff]   ;;  %v12494_v16 = vld [vmem:[#allocation2 + $0x2b8] ss:$80 sps:$4 sm:$0xff]  }
 0x17f   : > { %11511 = vmatmul.mubr.msk.bf16.vlgmr.msra.gmra.mxu0 %vm16442_vm5, %v14187_v48  ;;  %11512 = vmatmul.mubr.msk.bf16.vlgmr.msra.gmra.mxu1 %vm16442_vm5, %v14187_v48 }
 0x180   : > { %3567 = vmatpush1.bf16.msra.mxu0 %v12434_v37  ;;  %3610 = vmatpush1.bf16.msra.mxu1 %v12435_v1  ;;  %v12495_v37 = vld [vmem:[#allocation2 + $0x2c0] ss:$80 sps:$4 sm:$0xff]   ;;  %v12496_v1 = vld [vmem:[#allocation2 + $0x21c] ss:$80 sps:$4 sm:$0xff]  }
 0x181   : > { %3568 = vmatprep.subr.bf16.mxu0 %v12436_v50  ;;  %3611 = vmatprep.subr.bf16.mxu1 %v12438_v35  ;;  %v12498_v50 = vld [vmem:[#allocation2 + $0x224] ss:$80 sps:$4 sm:$0xff]   ;;  %v12502_v35 = vld [vmem:[#allocation2 + $0x17c] ss:$80 sps:$4 sm:$0xff]  }
 0x182   : > { %3592 = vmatprep.mubr.bf16.mxu0 %v14157_v8  ;;  %3635 = vmatprep.mubr.bf16.mxu1 %v14157_v8 }
 0x184   : > { %3569 = vmatpush1.bf16.msra.mxu0 %v12440_v22  ;;  %3612 = vmatpush1.bf16.msra.mxu1 %v12441_v30  ;;  %v12500_v30 = vld [vmem:[#allocation2 + $0x218] ss:$80 sps:$4 sm:$0xff]  }
 0x185   : > { %3570 = vmatprep.subr.bf16.mxu0 %v12442_v28  ;;  %3613 = vmatprep.subr.bf16.mxu1 %v12444_v39  ;;  %v13215_v28 = vld [vmem:[#allocation2 + $0x180] sm:$0xff]  ;;  %v13216_v39 = vld [vmem:[#allocation2 + $0x1d0] sm:$0xff] }
 0x186   : > { %v11478_v22 = vcombine.high %v13215_v28, %v13216_v39 }
 0x188   : > { %3571 = vmatpush1.bf16.msra.mxu0 %v12446_v18  ;;  %3614 = vmatpush1.bf16.msra.mxu1 %v12447_v29  ;;  %v12501_v18 = vld [vmem:[#allocation2 + $0x220] ss:$80 sps:$4 sm:$0xff]   ;;  %v12505_v29 = vld [vmem:[#allocation2 + $0x178] ss:$80 sps:$4 sm:$0xff]  }
 0x189   : > { %3572 = vmatprep.subr.bf16.mxu0 %v12448_v45  ;;  %3615 = vmatprep.subr.bf16.mxu1 %v12450_v31  ;;  %v11477_v45 = vcombine.low %v13215_v28, %v13216_v39  ;;  %v12507_v31 = vld [vmem:[#allocation2 + $0xdc] ss:$80 sps:$4 sm:$0xff]   ;;  %v12549_v39 = vld [vmem:[#allocation2 + $0x28] ss:$80 sps:$4 sm:$0xff]  }
 0x18c   : > { %3573 = vmatpush1.bf16.msra.mxu0 %v12452_v19  ;;  %3616 = vmatpush1.bf16.msra.mxu1 %v12453_v12  ;;  %v12509_v19 = vld [vmem:[#allocation2 + $0xe4] ss:$80 sps:$4 sm:$0xff]   ;;  %v12511_v12 = vld [vmem:[#allocation2 + $0xd8] ss:$80 sps:$4 sm:$0xff]  }
 0x18d   : > { %3574 = vmatprep.subr.bf16.mxu0 %v12454_v49  ;;  %3617 = vmatprep.subr.bf16.mxu1 %v12456_v14  ;;  %v12512_v49 = vld [vmem:[#allocation2 + $0xe0] ss:$80 sps:$4 sm:$0xff]   ;;  %v12513_v14 = vld [vmem:[#allocation2 + $0x3c] ss:$80 sps:$4 sm:$0xff]  }
 0x190   : > { %3575 = vmatpush1.bf16.msra.mxu0 %v12458_v3  ;;  %3618 = vmatpush1.bf16.msra.mxu1 %v12459_v43  ;;  %v12515_v3 = vld [vmem:[#allocation2 + $0x44] ss:$80 sps:$4 sm:$0xff]   ;;  %v12517_v43 = vld [vmem:[#allocation2 + $0x38] ss:$80 sps:$4 sm:$0xff]  }
 0x191   : > { %3652 = vmatprep.subr.bf16.mxu0 %v12460_v55  ;;  %3695 = vmatprep.subr.bf16.mxu1 %v12462_v47  ;;  %v12518_v55 = vld [vmem:[#allocation2 + $0x40] ss:$80 sps:$4 sm:$0xff]   ;;  %v14219_v47 = vpop.f32.mrf.mxu0 }
 0x193   : > { %11513 = vmatmul.mubr.msk.bf16.vlgmr.msra.gmra.mxu0 %vm16442_vm5, %v14187_v48  ;;  %11514 = vmatmul.mubr.msk.bf16.vlgmr.msra.gmra.mxu1 %vm16442_vm5, %v14187_v48 }
 0x194   : > { %3653 = vmatpush1.bf16.msra.mxu0 %v12464_v15  ;;  %3696 = vmatpush1.bf16.msra.mxu1 %v12465_v24  ;;  %v14221_v15 = vpop.f32.mrf.mxu1  ;;  %v12519_v24 = vld [vmem:[#allocation2 + $0x290] ss:$80 sps:$4 sm:$0xff]  }
 0x195   : > { %3654 = vmatprep.subr.bf16.mxu0 %v12466_v9  ;;  %3697 = vmatprep.subr.bf16.mxu1 %v12468_v42  ;;  %v12521_v9 = vld [vmem:[#allocation2 + $0x28c] ss:$80 sps:$4 sm:$0xff]   ;;  %v14224_v42 = vpop.f32.mrf.mxu0 }
 0x196   : > { %3678 = vmatprep.mubr.bf16.mxu0 %v14157_v8  ;;  %3721 = vmatprep.mubr.bf16.mxu1 %v14157_v8 }
 0x198   : > { %3655 = vmatpush1.bf16.msra.mxu0 %v12470_v4  ;;  %3698 = vmatpush1.bf16.msra.mxu1 %v12471_v6  ;;  %v12525_v4 = vld [vmem:[#allocation2 + $0x150] ss:$80 sps:$4 sm:$0xff]   ;;  %v14236_v6 = vpop.f32.mrf.mxu0 }
 0x199   : > { %3656 = vmatprep.subr.bf16.mxu0 %v12472_v13  ;;  %3699 = vmatprep.subr.bf16.mxu1 %v12474_v59  ;;  %v14226_v13 = vpop.f32.mrf.mxu1  ;;  %v12522_v59 = vld [vmem:[#allocation2 + $0x1f0] ss:$80 sps:$4 sm:$0xff]  }
 0x19c   : > { %3657 = vmatpush1.bf16.msra.mxu0 %v12476_v32  ;;  %3700 = vmatpush1.bf16.msra.mxu1 %v12477_v41  ;;  %v14238_v32 = vpop.f32.mrf.mxu1  ;;  %v12528_v41 = vld [vmem:[#allocation2 + $0xb0] ss:$80 sps:$4 sm:$0xff]  }
 0x19d   : > { %3658 = vmatprep.subr.bf16.mxu0 %v12478_v5  ;;  %3701 = vmatprep.subr.bf16.mxu1 %v12480_v26 }
 0x1a0   : > { %3659 = vmatpush1.bf16.msra.mxu0 %v12482_v51  ;;  %3702 = vmatpush1.bf16.msra.mxu1 %v12483_v54  ;;  %v12531_v51 = vld [vmem:[#allocation2 + $0x10] ss:$80 sps:$4 sm:$0xff]  }
 0x1a1   : > { %3660 = vmatprep.subr.bf16.mxu0 %v12484_v58  ;;  %3703 = vmatprep.subr.bf16.mxu1 %v12486_v17  ;;  %v12534_v58 = vld [vmem:[#allocation2 + $0x2a0] ss:$80 sps:$4 sm:$0xff]   ;;  %v14261_v17 = vld [vmem:[%s16435_s1 + $0x18] sm:$0xff]  }
 0x1a4   : > { %3661 = vmatpush1.bf16.msra.mxu0 %v12488_v62  ;;  %3704 = vmatpush1.bf16.msra.mxu1 %v12489_v0  ;;  %v12537_v62 = vld [vmem:[#allocation2 + $0x29c] ss:$80 sps:$4 sm:$0xff]  }
 0x1a5   : > { %3738 = vmatprep.subr.bf16.mxu0 %v12490_v36  ;;  %3781 = vmatprep.subr.bf16.mxu1 %v12492_v40  ;;  %v12541_v36 = vld [vmem:[#allocation2 + $0x160] ss:$80 sps:$4 sm:$0xff]  }
 0x1a7   : > { %11515 = vmatmul.mubr.msk.bf16.vlgmr.msra.gmra.mxu0 %vm16442_vm5, %v14187_v48  ;;  %11516 = vmatmul.mubr.msk.bf16.vlgmr.msra.gmra.mxu1 %vm16442_vm5, %v14187_v48 }
 0x1a8   : > { %3739 = vmatpush1.bf16.msra.mxu0 %v12494_v16  ;;  %3782 = vmatpush1.bf16.msra.mxu1 %v12495_v37 }
 0x1a9   : > { %3740 = vmatprep.subr.bf16.mxu0 %v12496_v1  ;;  %3783 = vmatprep.subr.bf16.mxu1 %v12498_v50  ;;  %v12544_v1 = vld [vmem:[#allocation2 + $0xc0] ss:$80 sps:$4 sm:$0xff]   ;;  %v12546_v50 = vld [vmem:[#allocation2 + $0xbc] ss:$80 sps:$4 sm:$0xff]  }
 0x1aa   : > { %3764 = vmatprep.mubr.bf16.mxu0 %v14157_v8  ;;  %3807 = vmatprep.mubr.bf16.mxu1 %v14157_v8 }
 0x1ac   : > { %3741 = vmatpush1.bf16.msra.mxu0 %v12500_v30  ;;  %3784 = vmatpush1.bf16.msra.mxu1 %v12501_v18  ;;  %v12553_v18 = vld [vmem:[#allocation2 + $0x2b0] ss:$80 sps:$4 sm:$0xff]  }
 0x1ad   : > { %3742 = vmatprep.subr.bf16.mxu0 %v12502_v35  ;;  %3785 = vmatprep.subr.bf16.mxu1 %v11478_v22  ;;  %v12552_v22 = vld [vmem:[#allocation2 + $0x24] ss:$80 sps:$4 sm:$0xff]  }
 0x1b0   : > { %3743 = vmatpush1.bf16.msra.mxu0 %v12505_v29  ;;  %3786 = vmatpush1.bf16.msra.mxu1 %v11477_v45  ;;  %v12555_v29 = vld [vmem:[#allocation2 + $0x2b8] ss:$80 sps:$4 sm:$0xff]  }
 0x1b1   : > { %3744 = vmatprep.subr.bf16.mxu0 %v12507_v31  ;;  %3787 = vmatprep.subr.bf16.mxu1 %v12509_v19  ;;  %v12558_v19 = vld [vmem:[#allocation2 + $0x2b4] ss:$80 sps:$4 sm:$0xff]  }
 0x1b4   : > { %3745 = vmatpush1.bf16.msra.mxu0 %v12511_v12  ;;  %3788 = vmatpush1.bf16.msra.mxu1 %v12512_v49  ;;  %v12559_v12 = vld [vmem:[#allocation2 + $0x210] ss:$80 sps:$4 sm:$0xff]   ;;  %v12561_v49 = vld [vmem:[#allocation2 + $0x218] ss:$80 sps:$4 sm:$0xff]  }
 0x1b5   : > { %3746 = vmatprep.subr.bf16.mxu0 %v12513_v14  ;;  %3789 = vmatprep.subr.bf16.mxu1 %v12515_v3 }
 0x1b8   : > { %3747 = vmatpush1.bf16.msra.mxu0 %v12517_v43  ;;  %3790 = vmatpush1.bf16.msra.mxu1 %v12518_v55  ;;  %v12565_v43 = vld [vmem:[#allocation2 + $0x170] ss:$80 sps:$4 sm:$0xff]   ;;  %v12567_v55 = vld [vmem:[#allocation2 + $0x178] ss:$80 sps:$4 sm:$0xff]  }
 0x1b9   : > { %4347 = vmatprep.subr.bf16.mxu0 %v12519_v24  ;;  %4390 = vmatprep.subr.bf16.mxu1 %v14074_v34  ;;  %v12524_v34 = vld [vmem:[#allocation2 + $0x1ec] ss:$80 sps:$4 sm:$0xff]  }
 0x1ba   : > { %v12563_v24 = vld [vmem:[#allocation2 + $0x20c] ss:$80 sps:$4 sm:$0xff]  }
 0x1bb   : > { %11517 = vmatmul.mubr.msk.bf16.vlgmr.msra.gmra.mxu0 %vm16442_vm5, %v14187_v48  ;;  %11518 = vmatmul.mubr.msk.bf16.vlgmr.msra.gmra.mxu1 %vm16442_vm5, %v14187_v48  ;;  %v12527_v48 = vld [vmem:[#allocation2 + $0x14c] ss:$80 sps:$4 sm:$0xff]  }
 0x1bc   : > { %4348 = vmatpush1.bf16.msra.mxu0 %v12521_v9  ;;  %4391 = vmatpush1.bf16.msra.mxu1 %v14087_v27  ;;  %v14242_v27 = vpop.f32.mrf.mxu0  ;;  %v12564_v9 = vld [vmem:[#allocation2 + $0x214] ss:$80 sps:$4 sm:$0xff]  }
 0x1bd   : > { %4349 = vmatprep.subr.bf16.mxu0 %v12522_v59  ;;  %4392 = vmatprep.subr.bf16.mxu1 %v14099_v46  ;;  %v14244_v46 = vpop.f32.mrf.mxu1  ;;  %v12569_v59 = vld [vmem:[#allocation2 + $0x16c] ss:$80 sps:$4 sm:$0xff]  }
 0x1be   : > { %4373 = vmatprep.mubr.bf16.mxu0 %v14157_v8  ;;  %4416 = vmatprep.mubr.bf16.mxu1 %v14157_v8  ;;  %v14247_v5 = vpop.f32.mrf.mxu0 }
 0x1bf   : > { %v14249_v26 = vpop.f32.mrf.mxu1 }
 0x1c0   : > { %4350 = vmatpush1.bf16.msra.mxu0 %v12524_v34  ;;  %4393 = vmatpush1.bf16.msra.mxu1 %v14109_v11  ;;  %v12530_v11 = vld [vmem:[#allocation2 + $0xac] ss:$80 sps:$4 sm:$0xff]  }
 0x1c1   : > { %4351 = vmatprep.subr.bf16.mxu0 %v12525_v4  ;;  %4394 = vmatprep.subr.bf16.mxu1 %v14106_v7  ;;  %v14253_v7 = vpop.f32.mrf.mxu0  ;;  %v14255_v54 = vpop.f32.mrf.mxu1  ;;  %v12570_v4 = vld [vmem:[#allocation2 + $0x174] ss:$80 sps:$4 sm:$0xff]  }
 0x1c4   : > { %4352 = vmatpush1.bf16.msra.mxu0 %v12527_v48  ;;  %4395 = vmatpush1.bf16.msra.mxu1 %v14119_v23  ;;  %v12533_v23 = vld [vmem:[#allocation2 + $0xc] ss:$80 sps:$4 sm:$0xff]  }
 0x1c5   : > { %4353 = vmatprep.subr.bf16.mxu0 %v12528_v41  ;;  %4396 = vmatprep.subr.bf16.mxu1 %v14127_v20  ;;  %v14264_v20 = vpop.f32.mrf.mxu0  ;;  %v14323_v41 = vpop.permute.xlu0 %1241 }
 0x1c7   : > { %v14274_v0 = vpop.f32.mrf.mxu0 }
 0x1c8   : > { %4354 = vmatpush1.bf16.msra.mxu0 %v12530_v11  ;;  %4397 = vmatpush1.bf16.msra.mxu1 %v14131_v25  ;;  %v14266_v25 = vpop.f32.mrf.mxu1  ;;  %v12571_v11 = vld [vmem:[#allocation2 + $0xd0] ss:$80 sps:$4 sm:$0xff]  }
 0x1c9   : > { %4355 = vmatprep.subr.bf16.mxu0 %v12531_v51  ;;  %4398 = vmatprep.subr.bf16.mxu1 %v14133_v53  ;;  %v12538_v53 = vld [vmem:[#allocation2 + $0x200] ss:$80 sps:$4 sm:$0xff]   ;;  %v14281_v40 = vpop.f32.mrf.mxu0  ;;  %v12573_v51 = vld [vmem:[#allocation2 + $0xd8] ss:$80 sps:$4 sm:$0xff]  }
 0x1cb   : > { %v14287_v37 = vpop.f32.mrf.mxu0 }
 0x1cc   : > { %4356 = vmatpush1.bf16.msra.mxu0 %v12533_v23  ;;  %4399 = vmatpush1.bf16.msra.mxu1 %v14137_v52  ;;  %v14276_v52 = vpop.f32.mrf.mxu1 }
 0x1cd   : > { %4433 = vmatprep.subr.bf16.mxu0 %v12534_v58  ;;  %4476 = vmatprep.subr.bf16.mxu1 %v14139_v2  ;;  %v12540_v2 = vld [vmem:[#allocation2 + $0x1fc] ss:$80 sps:$4 sm:$0xff]   ;;  %v14293_v35 = vpop.f32.mrf.mxu0 }
 0x1ce   : > { %v14283_v16 = vpop.f32.mrf.mxu1 }
 0x1cf   : > { %11602 = vmatmul.mubr.msk.bf16.vlgmr.msra.gmra.mxu0 %vm16442_vm5, %v14261_v17  ;;  %11603 = vmatmul.mubr.msk.bf16.vlgmr.msra.gmra.mxu1 %vm16442_vm5, %v14261_v17 }
 0x1d0   : > { %4434 = vmatpush1.bf16.msra.mxu0 %v12537_v62  ;;  %4477 = vmatpush1.bf16.msra.mxu1 %v14143_v56  ;;  %v12543_v56 = vld [vmem:[#allocation2 + $0x15c] ss:$80 sps:$4 sm:$0xff]   ;;  %v14329_v62 = vpop.permute.xlu1 %1246 }
 0x1d1   : > { %4435 = vmatprep.subr.bf16.mxu0 %v12538_v53  ;;  %4478 = vmatprep.subr.bf16.mxu1 %v14145_v57  ;;  %v14289_v57 = vpop.f32.mrf.mxu1  ;;  %v2084_v53 = vadd.f32 %v14219_v47, %v14323_v41  ;;  %v2087_v47 = vadd.f32 %v14226_v13, %v14323_v41  ;;  %v12585_v13 = vld [vmem:[#allocation2 + $0x2c8] ss:$80 sps:$4 sm:$0xff]  }
 0x1d2   : > { %4459 = vmatprep.mubr.bf16.mxu0 %v14157_v8  ;;  %4502 = vmatprep.mubr.bf16.mxu1 %v14157_v8 }
 0x1d3   : > { %v14295_v28 = vpop.f32.mrf.mxu1 }
 0x1d4   : > { %4436 = vmatpush1.bf16.msra.mxu0 %v12540_v2  ;;  %4479 = vmatpush1.bf16.msra.mxu1 %v14155_v38  ;;  %v12547_v38 = vld [vmem:[#allocation2 + $0x20] ss:$80 sps:$4 sm:$0xff]   ;;  %v12575_v2 = vld [vmem:[#allocation2 + $0xcc] ss:$80 sps:$4 sm:$0xff]  }
 0x1d5   : > { %4437 = vmatprep.subr.bf16.mxu0 %v12541_v36  ;;  %4480 = vmatprep.subr.bf16.mxu1 %v14152_v10  ;;  %v11701_v10 = vld [vmem:[%s16437_s3] ss:$0 sm:$0xff]  ;;  %v14303_v30 = vpop.f32.mrf.mxu1  ;;  %v2086_v36 = vadd.f32 %v14221_v15, %v14323_v41 }
 0x1d6   : > { %5623 = vperm.xlu1 %12211, %v11701_v10   ;;  %16481 = vst [vmem:[#allocation5_spill] sm:$0xff] %v14303_v30  ;;  %v12579_v10 = vld [vmem:[#allocation2 + $0x38] ss:$80 sps:$4 sm:$0xff]  }
 0x1d8   : > { %4438 = vmatpush1.bf16.msra.mxu0 %v12543_v56  ;;  %4481 = vmatpush1.bf16.msra.mxu1 %v14161_v63  ;;  %v12551_v63 = vld [vmem:[#allocation2 + $0x1c] ss:$80 sps:$4 sm:$0xff]   ;;  %v12576_v56 = vld [vmem:[#allocation2 + $0xd4] ss:$80 sps:$4 sm:$0xff]  }
 0x1d9   : > { %4439 = vmatprep.subr.bf16.mxu0 %v12544_v1  ;;  %4482 = vmatprep.subr.bf16.mxu1 %v14165_v60  ;;  %v14301_v60 = vpop.f32.mrf.mxu0 }
 0x1da   : > { %16480 = vst [vmem:[#allocation4_spill] sm:$0xff] %v14301_v60 }
 0x1db   : > { %v14305_v45 = vpop.f32.mrf.mxu0  ;;  %v14307_v31 = vpop.f32.mrf.mxu1 }
 0x1dc   : > { %4440 = vmatpush1.bf16.msra.mxu0 %v12546_v50  ;;  %4483 = vmatpush1.bf16.msra.mxu1 %v14169_v44  ;;  %v12557_v44 = vld [vmem:[#allocation2 + $0x2ac] ss:$80 sps:$4 sm:$0xff]  }
 0x1dd   : > { %4441 = vmatprep.subr.bf16.mxu0 %v12547_v38  ;;  %4484 = vmatprep.subr.bf16.mxu1 %v12549_v39  ;;  %v14313_v14 = vpop.f32.mrf.mxu0  ;;  %v14315_v3 = vpop.f32.mrf.mxu1  ;;  %v2085_v38 = vadd.f32 %v14224_v42, %v14323_v41  ;;  %v12577_v39 = vld [vmem:[#allocation2 + $0x30] ss:$80 sps:$4 sm:$0xff]   ;;  %v2100_v42 = vadd.f32 %v14236_v6, %v14329_v62 }
 0x1de   : > { %v12589_v6 = vld [vmem:[#allocation2 + $0x220] ss:$80 sps:$4 sm:$0xff]  }
 0x1df   : > { %v14319_v34 = vpop.f32.mrf.mxu0  ;;  %v14321_v48 = vpop.f32.mrf.mxu1 }
 0x1e0   : > { %4442 = vmatpush1.bf16.msra.mxu0 %v12551_v63  ;;  %4485 = vmatpush1.bf16.msra.mxu1 %v12552_v22 }
 0x1e1   : > { %4519 = vmatprep.subr.bf16.mxu0 %v12553_v18  ;;  %4562 = vmatprep.subr.bf16.mxu1 %v12555_v29  ;;  %v14325_v23 = vpop.f32.mrf.mxu0  ;;  %v14327_v58 = vpop.f32.mrf.mxu1 }
 0x1e2   : > { %16482 = vst [vmem:[#allocation6_spill] sm:$0xff] %v14325_v23  ;;  %16483 = vst [vmem:[#allocation7_spill] sm:$0xff] %v14327_v58 }
 0x1e3   : > { %11604 = vmatmul.mubr.msk.bf16.vlgmr.msra.gmra.mxu0 %vm16442_vm5, %v14261_v17  ;;  %11605 = vmatmul.mubr.msk.bf16.vlgmr.msra.gmra.mxu1 %vm16442_vm5, %v14261_v17 }
 0x1e4   : > { %4520 = vmatpush1.bf16.msra.mxu0 %v12557_v44  ;;  %4563 = vmatpush1.bf16.msra.mxu1 %v12558_v19  ;;  %v2102_v19 = vadd.f32 %v14238_v32, %v14329_v62  ;;  %v12591_v32 = vld [vmem:[#allocation2 + $0x228] ss:$80 sps:$4 sm:$0xff]  }
 0x1e5   : > { %4521 = vmatprep.subr.bf16.mxu0 %v12559_v12  ;;  %4564 = vmatprep.subr.bf16.mxu1 %v12561_v49  ;;  %v12581_v12 = vld [vmem:[#allocation2 + $0x2c] ss:$80 sps:$4 sm:$0xff]   ;;  %v12582_v49 = vld [vmem:[#allocation2 + $0x34] ss:$80 sps:$4 sm:$0xff]  }
 0x1e6   : > { %4545 = vmatprep.mubr.bf16.mxu0 %v14157_v8  ;;  %4588 = vmatprep.mubr.bf16.mxu1 %v14157_v8 }
 0x1e8   : > { %4522 = vmatpush1.bf16.msra.mxu0 %v12563_v24  ;;  %4565 = vmatpush1.bf16.msra.mxu1 %v12564_v9  ;;  %v12583_v24 = vld [vmem:[#allocation2 + $0x2c0] ss:$80 sps:$4 sm:$0xff]  }
 0x1e9   : > { %4523 = vmatprep.subr.bf16.mxu0 %v12565_v43  ;;  %4566 = vmatprep.subr.bf16.mxu1 %v12567_v55 }
 0x1ec   : > { %4524 = vmatpush1.bf16.msra.mxu0 %v12569_v59  ;;  %4567 = vmatpush1.bf16.msra.mxu1 %v12570_v4  ;;  %v12587_v4 = vld [vmem:[#allocation2 + $0x2bc] ss:$80 sps:$4 sm:$0xff]  }
 0x1ed   : > { %4525 = vmatprep.subr.bf16.mxu0 %v12571_v11  ;;  %4568 = vmatprep.subr.bf16.mxu1 %v12573_v51  ;;  %v12588_v11 = vld [vmem:[#allocation2 + $0x2c4] ss:$80 sps:$4 sm:$0xff]   ;;  %v12595_v51 = vld [vmem:[#allocation2 + $0x180] ss:$80 sps:$4 sm:$0xff]  }
 0x1ef   : > { %v2641_v1 = vpop.f32.mrf.mxu0  ;;  %v2684_v50 = vpop.f32.mrf.mxu1 }
 0x1f0   : > { %v14337_v63 = vadd.f32 %v2641_v1, %v2084_v53  ;;  %v14339_v22 = vadd.f32 %v2684_v50, %v2086_v36  ;;  %4526 = vmatpush1.bf16.msra.mxu0 %v12575_v2  ;;  %4569 = vmatpush1.bf16.msra.mxu1 %v12576_v56  ;;  %v12593_v53 = vld [vmem:[#allocation2 + $0x21c] ss:$80 sps:$4 sm:$0xff]   ;;  %v12594_v36 = vld [vmem:[#allocation2 + $0x224] ss:$80 sps:$4 sm:$0xff]   ;;  %v12601_v1 = vld [vmem:[#allocation2 + $0xe0] ss:$80 sps:$4 sm:$0xff]  }
 0x1f1   : > { %v2643_v18 = vpop.f32.mrf.mxu0  ;;  %v2686_v15 = vpop.f32.mrf.mxu1  ;;  %4527 = vmatprep.subr.bf16.mxu0 %v12577_v39  ;;  %4570 = vmatprep.subr.bf16.mxu1 %v12579_v10  ;;  %v12599_v2 = vld [vmem:[#allocation2 + $0x17c] ss:$80 sps:$4 sm:$0xff]   ;;  %v12600_v56 = vld [vmem:[#allocation2 + $0x184] ss:$80 sps:$4 sm:$0xff]   ;;  %v12603_v50 = vld [vmem:[#allocation2 + $0xe8] ss:$80 sps:$4 sm:$0xff]   ;;  %v2090_v10 = vadd.f32 %v14249_v26, %v14323_v41 }
 0x1f2   : > { %v14343_v29 = vadd.f32 %v2643_v18, %v2085_v38  ;;  %v14345_v44 = vadd.f32 %v2686_v15, %v2087_v47  ;;  %v12605_v47 = vld [vmem:[#allocation2 + $0xdc] ss:$80 sps:$4 sm:$0xff]   ;;  %v12606_v18 = vld [vmem:[#allocation2 + $0xe4] ss:$80 sps:$4 sm:$0xff]  }
 0x1f3   : > { %v2645_v43 = vpop.f32.mrf.mxu0  ;;  %v2688_v55 = vpop.f32.mrf.mxu1 }
 0x1f4   : > { %v14351_v9 = vadd.f32 %v2645_v43, %v2100_v42  ;;  %v14353_v59 = vadd.f32 %v2688_v55, %v2102_v19  ;;  %4528 = vmatpush1.bf16.msra.mxu0 %v12581_v12  ;;  %4571 = vmatpush1.bf16.msra.mxu1 %v12582_v49  ;;  %v12607_v19 = vld [vmem:[#allocation2 + $0x40] ss:$80 sps:$4 sm:$0xff]   ;;  %v12609_v12 = vld [vmem:[#allocation2 + $0x48] ss:$80 sps:$4 sm:$0xff]   ;;  %v2091_v49 = vadd.f32 %v14255_v54, %v14323_v41  ;;  %v12611_v54 = vld [vmem:[#allocation2 + $0x3c] ss:$80 sps:$4 sm:$0xff]  }
 0x1f5   : > { %4605 = vmatprep.subr.bf16.mxu0 %v12583_v24  ;;  %4648 = vmatprep.subr.bf16.mxu1 %v12585_v13  ;;  %v14362_v38 = vpop.f32.mrf.mxu0  ;;  %v14364_v39 = vpop.f32.mrf.mxu1  ;;  %v2106_v24 = vadd.f32 %v14266_v25, %v14329_v62  ;;  %v12618_v25 = vld [vmem:[#allocation2 + $0x298] ss:$80 sps:$4 sm:$0xff]  }
 0x1f7   : > { %11606 = vmatmul.mubr.msk.bf16.vlgmr.msra.gmra.mxu0 %vm16442_vm5, %v14261_v17  ;;  %11607 = vmatmul.mubr.msk.bf16.vlgmr.msra.gmra.mxu1 %vm16442_vm5, %v14261_v17 }
 0x1f8   : > { %4606 = vmatpush1.bf16.msra.mxu0 %v12587_v4  ;;  %4649 = vmatpush1.bf16.msra.mxu1 %v12588_v11  ;;  %v12612_v11 = vld [vmem:[#allocation2 + $0x44] ss:$80 sps:$4 sm:$0xff]  }
 0x1f9   : > { %4607 = vmatprep.subr.bf16.mxu0 %v12589_v6  ;;  %4650 = vmatprep.subr.bf16.mxu1 %v12591_v32 }
 0x1fa   : > { %4631 = vmatprep.mubr.bf16.mxu0 %v14157_v8  ;;  %4674 = vmatprep.mubr.bf16.mxu1 %v14157_v8  ;;  %v2088_v8 = vadd.f32 %v14247_v5, %v14323_v41 }
 0x1fc   : > { %4608 = vmatpush1.bf16.msra.mxu0 %v12593_v53  ;;  %4651 = vmatpush1.bf16.msra.mxu1 %v12594_v36  ;;  %v12615_v53 = vld [vmem:[#allocation2 + $0x29c] ss:$80 sps:$4 sm:$0xff]  }
 0x1fd   : > { %4609 = vmatprep.subr.bf16.mxu0 %v12595_v51  ;;  %4652 = vmatprep.subr.bf16.mxu1 %v14203_v61  ;;  %v2089_v61 = vadd.f32 %v14253_v7, %v14323_v41  ;;  %v2104_v7 = vadd.f32 %v14264_v20, %v14329_v62  ;;  %v12613_v51 = vld [vmem:[#allocation2 + $0x294] ss:$80 sps:$4 sm:$0xff]   ;;  %v12617_v20 = vld [vmem:[#allocation2 + $0x290] ss:$80 sps:$4 sm:$0xff]  }
 0x200   : > { %4610 = vmatpush1.bf16.msra.mxu0 %v12599_v2  ;;  %4653 = vmatpush1.bf16.msra.mxu1 %v12600_v56  ;;  %v12619_v56 = vld [vmem:[#allocation2 + $0x1f4] ss:$80 sps:$4 sm:$0xff]  }
 0x201   : > { %4611 = vmatprep.subr.bf16.mxu0 %v12601_v1  ;;  %4654 = vmatprep.subr.bf16.mxu1 %v12603_v50  ;;  %v12621_v1 = vld [vmem:[#allocation2 + $0x1fc] ss:$80 sps:$4 sm:$0xff]   ;;  %v12625_v50 = vld [vmem:[#allocation2 + $0x154] ss:$80 sps:$4 sm:$0xff]  }
 0x203   : > { %v2727_v15 = vpop.f32.mrf.mxu0  ;;  %v2770_v42 = vpop.f32.mrf.mxu1 }
 0x204   : > { %v14374_v43 = vadd.f32 %v2727_v15, %v2088_v8  ;;  %v14376_v55 = vadd.f32 %v2770_v42, %v2090_v10  ;;  %4612 = vmatpush1.bf16.msra.mxu0 %v12605_v47  ;;  %4655 = vmatpush1.bf16.msra.mxu1 %v12606_v18  ;;  %v12627_v8 = vld [vmem:[#allocation2 + $0x15c] ss:$80 sps:$4 sm:$0xff]   ;;  %v12623_v10 = vld [vmem:[#allocation2 + $0x1f0] ss:$80 sps:$4 sm:$0xff]   ;;  %v12624_v47 = vld [vmem:[#allocation2 + $0x1f8] ss:$80 sps:$4 sm:$0xff]  }
 0x205   : > { %v2729_v5 = vpop.f32.mrf.mxu0  ;;  %v2772_v26 = vpop.f32.mrf.mxu1  ;;  %4613 = vmatprep.subr.bf16.mxu0 %v12607_v19  ;;  %4656 = vmatprep.subr.bf16.mxu1 %v12609_v12  ;;  %v14394_v18 = vld [vmem:[#allocation3] sm:$0xff]  ;;  %v12633_v42 = vld [vmem:[#allocation2 + $0xbc] ss:$80 sps:$4 sm:$0xff]  }
 0x206   : > { %v14382_v13 = vadd.f32 %v2729_v5, %v2089_v61  ;;  %v14384_v4 = vadd.f32 %v2772_v26, %v2091_v49  ;;  %v12629_v61 = vld [vmem:[#allocation2 + $0x150] ss:$80 sps:$4 sm:$0xff]   ;;  %v12631_v15 = vld [vmem:[#allocation2 + $0xb4] ss:$80 sps:$4 sm:$0xff]   ;;  %v2092_v49 = vadd.f32 %v14281_v40, %v14323_v41  ;;  %v2094_v5 = vadd.f32 %v14283_v16, %v14323_v41 }
 0x207   : > { %v2731_v6 = vpop.f32.mrf.mxu0  ;;  %v2774_v32 = vpop.f32.mrf.mxu1  ;;  %v12635_v26 = vld [vmem:[#allocation2 + $0xb0] ss:$80 sps:$4 sm:$0xff]  }
 0x208   : > { %v14386_v36 = vadd.f32 %v2731_v6, %v2104_v7  ;;  %v14388_v2 = vadd.f32 %v2774_v32, %v2106_v24  ;;  %4614 = vmatpush1.bf16.msra.mxu0 %v12611_v54  ;;  %4657 = vmatpush1.bf16.msra.mxu1 %v12612_v11  ;;  %v12636_v7 = vld [vmem:[#allocation2 + $0xb8] ss:$80 sps:$4 sm:$0xff]   ;;  %v2093_v24 = vadd.f32 %v14287_v37, %v14323_v41  ;;  %v12637_v6 = vld [vmem:[#allocation2 + $0x14] ss:$80 sps:$4 sm:$0xff]   ;;  %v12639_v32 = vld [vmem:[#allocation2 + $0x1c] ss:$80 sps:$4 sm:$0xff]  }
 0x209   : > { %5214 = vmatprep.subr.bf16.mxu0 %v12613_v51  ;;  %5257 = vmatprep.subr.bf16.mxu1 %v12615_v53  ;;  %v14398_v19 = vpop.f32.mrf.mxu0  ;;  %v14400_v12 = vpop.f32.mrf.mxu1  ;;  %v2095_v51 = vadd.f32 %v14289_v57, %v14323_v41  ;;  %v2108_v37 = vadd.f32 %v14293_v35, %v14329_v62  ;;  %v12641_v57 = vld [vmem:[#allocation2 + $0x10] ss:$80 sps:$4 sm:$0xff]  }
 0x20b   : > { %11608 = vmatmul.mubr.msk.bf16.vlgmr.msra.gmra.mxu0 %vm16442_vm5, %v14261_v17  ;;  %11609 = vmatmul.mubr.msk.bf16.vlgmr.msra.gmra.mxu1 %vm16442_vm5, %v14261_v17  ;;  %v12630_v17 = vld [vmem:[#allocation2 + $0x158] ss:$80 sps:$4 sm:$0xff]  }
 0x20c   : > { %5215 = vmatpush1.bf16.msra.mxu0 %v12617_v20  ;;  %5258 = vmatpush1.bf16.msra.mxu1 %v12618_v25  ;;  %v2110_v25 = vadd.f32 %v14295_v28, %v14329_v62  ;;  %v12648_v28 = vld [vmem:[#allocation2 + $0x2a0] ss:$80 sps:$4 sm:$0xff]  }
 0x20d   : > { %5216 = vmatprep.subr.bf16.mxu0 %v12619_v56  ;;  %5259 = vmatprep.subr.bf16.mxu1 %v12621_v1 }
 0x20e   : > { %5240 = vmatprep.mubr.bf16.mxu0 %v14394_v18  ;;  %5283 = vmatprep.mubr.bf16.mxu1 %v14394_v18 }
 0x210   : > { %5217 = vmatpush1.bf16.msra.mxu0 %v12623_v10  ;;  %5260 = vmatpush1.bf16.msra.mxu1 %v12624_v47  ;;  %v12643_v47 = vld [vmem:[#allocation2 + $0x2a4] ss:$80 sps:$4 sm:$0xff]  }
 0x211   : > { %5218 = vmatprep.subr.bf16.mxu0 %v12625_v50  ;;  %5261 = vmatprep.subr.bf16.mxu1 %v12627_v8  ;;  %v12642_v50 = vld [vmem:[#allocation2 + $0x18] ss:$80 sps:$4 sm:$0xff]  }
 0x214   : > { %5219 = vmatpush1.bf16.msra.mxu0 %v12629_v61  ;;  %5262 = vmatpush1.bf16.msra.mxu1 %v12630_v17  ;;  %v12645_v61 = vld [vmem:[#allocation2 + $0x2ac] ss:$80 sps:$4 sm:$0xff]   ;;  %v14425_v17 = vld [vmem:[%s16435_s1 + $0x20] sm:$0xff]  }
 0x215   : > { %5220 = vmatprep.subr.bf16.mxu0 %v12631_v15  ;;  %5263 = vmatprep.subr.bf16.mxu1 %v12633_v42  ;;  %v12649_v42 = vld [vmem:[#allocation2 + $0x2a8] ss:$80 sps:$4 sm:$0xff]  }
 0x217   : > { %v2813_v54 = vpop.f32.mrf.mxu0  ;;  %v2856_v11 = vpop.f32.mrf.mxu1 }
 0x218   : > { %v14410_v53 = vadd.f32 %v2813_v54, %v2092_v49  ;;  %v14412_v20 = vadd.f32 %v2856_v11, %v2094_v5  ;;  %5221 = vmatpush1.bf16.msra.mxu0 %v12635_v26  ;;  %5264 = vmatpush1.bf16.msra.mxu1 %v12636_v7  ;;  %v12650_v49 = vld [vmem:[#allocation2 + $0x204] ss:$80 sps:$4 sm:$0xff]   ;;  %v12652_v5 = vld [vmem:[#allocation2 + $0x20c] ss:$80 sps:$4 sm:$0xff]   ;;  %v12655_v54 = vld [vmem:[#allocation2 + $0x208] ss:$80 sps:$4 sm:$0xff]  }
 0x219   : > { %v2815_v40 = vpop.f32.mrf.mxu0  ;;  %v2858_v16 = vpop.f32.mrf.mxu1  ;;  %5222 = vmatprep.subr.bf16.mxu0 %v12637_v6  ;;  %5265 = vmatprep.subr.bf16.mxu1 %v12639_v32  ;;  %v12656_v26 = vld [vmem:[#allocation2 + $0x164] ss:$80 sps:$4 sm:$0xff]   ;;  %v12658_v7 = vld [vmem:[#allocation2 + $0x16c] ss:$80 sps:$4 sm:$0xff]   ;;  %v12660_v11 = vld [vmem:[#allocation2 + $0x160] ss:$80 sps:$4 sm:$0xff]  }
 0x21a   : > { %v14418_v56 = vadd.f32 %v2815_v40, %v2093_v24  ;;  %v14420_v1 = vadd.f32 %v2858_v16, %v2095_v51  ;;  %v12654_v24 = vld [vmem:[#allocation2 + $0x200] ss:$80 sps:$4 sm:$0xff]   ;;  %v12661_v6 = vld [vmem:[#allocation2 + $0x168] ss:$80 sps:$4 sm:$0xff]   ;;  %v12662_v32 = vld [vmem:[#allocation2 + $0xc4] ss:$80 sps:$4 sm:$0xff]  }
 0x21b   : > { %v2817_v8 = vpop.f32.mrf.mxu0  ;;  %v2860_v10 = vpop.f32.mrf.mxu1  ;;  %v12664_v51 = vld [vmem:[#allocation2 + $0xcc] ss:$80 sps:$4 sm:$0xff]  }
 0x21c   : > { %v14427_v15 = vadd.f32 %v2817_v8, %v2108_v37  ;;  %v14429_v35 = vadd.f32 %v2860_v10, %v2110_v25  ;;  %5223 = vmatpush1.bf16.msra.mxu0 %v12641_v57  ;;  %5266 = vmatpush1.bf16.msra.mxu1 %v12642_v50  ;;  %v2096_v37 = vadd.f32 %v14305_v45, %v14323_v41  ;;  %v12666_v57 = vld [vmem:[#allocation2 + $0xc0] ss:$80 sps:$4 sm:$0xff]   ;;  %v12667_v50 = vld [vmem:[#allocation2 + $0xc8] ss:$80 sps:$4 sm:$0xff]  }
 0x21d   : > { %5300 = vmatprep.subr.bf16.mxu0 %v12643_v47  ;;  %5343 = vmatprep.subr.bf16.mxu1 %v12645_v61  ;;  %v14437_v40 = vpop.f32.mrf.mxu0  ;;  %v14439_v16 = vpop.f32.mrf.mxu1  ;;  %v2098_v25 = vadd.f32 %v14307_v31, %v14323_v41  ;;  %v2097_v8 = vadd.f32 %v14313_v14, %v14323_v41  ;;  %v12668_v61 = vld [vmem:[#allocation2 + $0x24] ss:$80 sps:$4 sm:$0xff]   ;;  %v2112_v14 = vadd.f32 %v14319_v34, %v14329_v62  ;;  %v12678_v34 = vld [vmem:[#allocation2 + $0x2b0] ss:$80 sps:$4 sm:$0xff]  }
 0x21e   : > { %16484 = vst [vmem:[#allocation8_spill] sm:$0xff] %v14437_v40  ;;  %16485 = vst [vmem:[#allocation9_spill] sm:$0xff] %v14439_v16 }
 0x21f   : > { %11693 = vmatmul.mubr.msk.bf16.vlgmr.msra.gmra.mxu0 %vm16442_vm5, %v14425_v17  ;;  %11694 = vmatmul.mubr.msk.bf16.vlgmr.msra.gmra.mxu1 %vm16442_vm5, %v14425_v17 }
 0x220   : > { %5301 = vmatpush1.bf16.msra.mxu0 %v12648_v28  ;;  %5344 = vmatpush1.bf16.msra.mxu1 %v12649_v42  ;;  %v12670_v28 = vld [vmem:[#allocation2 + $0x2c] ss:$80 sps:$4 sm:$0xff]   ;;  %v2099_v42 = vadd.f32 %v14315_v3, %v14323_v41  ;;  %v12672_v3 = vld [vmem:[#allocation2 + $0x20] ss:$80 sps:$4 sm:$0xff]   ;;  %v12673_v41 = vld [vmem:[#allocation2 + $0x28] ss:$80 sps:$4 sm:$0xff]  }
 0x221   : > { %5302 = vmatprep.subr.bf16.mxu0 %v12650_v49  ;;  %5345 = vmatprep.subr.bf16.mxu1 %v12652_v5 }
 0x222   : > { %5326 = vmatprep.mubr.bf16.mxu0 %v14394_v18  ;;  %5369 = vmatprep.mubr.bf16.mxu1 %v14394_v18 }
 0x224   : > { %5303 = vmatpush1.bf16.msra.mxu0 %v12654_v24  ;;  %5346 = vmatpush1.bf16.msra.mxu1 %v12655_v54 }
 0x225   : > { %5304 = vmatprep.subr.bf16.mxu0 %v12656_v26  ;;  %5347 = vmatprep.subr.bf16.mxu1 %v12658_v7  ;;  %v2114_v26 = vadd.f32 %v14321_v48, %v14329_v62  ;;  %v12679_v48 = vld [vmem:[#allocation2 + $0x2b8] ss:$80 sps:$4 sm:$0xff]  }
 0x228   : > { %5305 = vmatpush1.bf16.msra.mxu0 %v12660_v11  ;;  %5348 = vmatpush1.bf16.msra.mxu1 %v12661_v6  ;;  %v12674_v6 = vld [vmem:[#allocation2 + $0x2b4] ss:$80 sps:$4 sm:$0xff]  }
 0x229   : > { %5306 = vmatprep.subr.bf16.mxu0 %v12662_v32  ;;  %5349 = vmatprep.subr.bf16.mxu1 %v12664_v51  ;;  %v12676_v32 = vld [vmem:[#allocation2 + $0x2bc] ss:$80 sps:$4 sm:$0xff]  }
 0x22b   : > { %v2899_v10 = vpop.f32.mrf.mxu0  ;;  %v2942_v47 = vpop.f32.mrf.mxu1 }
 0x22c   : > { %v14449_v49 = vadd.f32 %v2899_v10, %v2096_v37  ;;  %v14451_v5 = vadd.f32 %v2942_v47, %v2098_v25  ;;  %5307 = vmatpush1.bf16.msra.mxu0 %v12666_v57  ;;  %5350 = vmatpush1.bf16.msra.mxu1 %v12667_v50  ;;  %v12680_v25 = vld [vmem:[#allocation2 + $0x214] ss:$80 sps:$4 sm:$0xff]   ;;  %v12682_v57 = vld [vmem:[#allocation2 + $0x21c] ss:$80 sps:$4 sm:$0xff]   ;;  %v12684_v10 = vld [vmem:[#allocation2 + $0x210] ss:$80 sps:$4 sm:$0xff]  }
 0x22d   : > { %v2901_v45 = vpop.f32.mrf.mxu0  ;;  %v2944_v31 = vpop.f32.mrf.mxu1  ;;  %5308 = vmatprep.subr.bf16.mxu0 %v12668_v61  ;;  %5351 = vmatprep.subr.bf16.mxu1 %v12670_v28  ;;  %v12686_v50 = vld [vmem:[#allocation2 + $0x174] ss:$80 sps:$4 sm:$0xff]   ;;  %v12685_v47 = vld [vmem:[#allocation2 + $0x218] ss:$80 sps:$4 sm:$0xff]   ;;  %v12690_v61 = vld [vmem:[#allocation2 + $0x170] ss:$80 sps:$4 sm:$0xff]  }
 0x22e   : > { %v14457_v7 = vadd.f32 %v2901_v45, %v2097_v8  ;;  %v14459_v24 = vadd.f32 %v2944_v31, %v2099_v42  ;;  %v12688_v8 = vld [vmem:[#allocation2 + $0x17c] ss:$80 sps:$4 sm:$0xff]   ;;  %v12691_v28 = vld [vmem:[#allocation2 + $0x178] ss:$80 sps:$4 sm:$0xff]   ;;  %v12692_v42 = vld [vmem:[#allocation2 + $0xd4] ss:$80 sps:$4 sm:$0xff]  }
 0x22f   : > { %v2903_v54 = vpop.f32.mrf.mxu0  ;;  %v2946_v11 = vpop.f32.mrf.mxu1  ;;  %v12694_v45 = vld [vmem:[#allocation2 + $0xdc] ss:$80 sps:$4 sm:$0xff]   ;;  %v12696_v31 = vld [vmem:[#allocation2 + $0xd0] ss:$80 sps:$4 sm:$0xff]  }
 0x230   : > { %v14461_v51 = vadd.f32 %v2903_v54, %v2112_v14  ;;  %v14463_v37 = vadd.f32 %v2946_v11, %v2114_v26  ;;  %5309 = vmatpush1.bf16.msra.mxu0 %v12672_v3  ;;  %5352 = vmatpush1.bf16.msra.mxu1 %v12673_v41  ;;  %v12697_v14 = vld [vmem:[#allocation2 + $0xd8] ss:$80 sps:$4 sm:$0xff]   ;;  %v12698_v26 = vld [vmem:[#allocation2 + $0x34] ss:$80 sps:$4 sm:$0xff]   ;;  %v12700_v3 = vld [vmem:[#allocation2 + $0x3c] ss:$80 sps:$4 sm:$0xff]  }
 0x231   : > { %5386 = vmatprep.subr.bf16.mxu0 %v12674_v6  ;;  %5429 = vmatprep.subr.bf16.mxu1 %v12676_v32  ;;  %v12702_v41 = vld [vmem:[#allocation2 + $0x30] ss:$80 sps:$4 sm:$0xff]   ;;  %v12703_v54 = vld [vmem:[#allocation2 + $0x38] ss:$80 sps:$4 sm:$0xff]   ;;  %v14471_v11 = vpop.f32.mrf.mxu0  ;;  %v14473_v6 = vpop.f32.mrf.mxu1  ;;  %v12704_v32 = vld [vmem:[#allocation2 + $0x2c4] ss:$80 sps:$4 sm:$0xff]  }
 0x232   : > { %16486 = vst [vmem:[#allocation10_spill] sm:$0xff] %v14471_v11  ;;  %16487 = vst [vmem:[#allocation11_spill] sm:$0xff] %v14473_v6  ;;  %v12732_v6 = vld [vmem:[#allocation2 + $0x48] ss:$80 sps:$4 sm:$0xff]  }
 0x233   : > { %11695 = vmatmul.mubr.msk.bf16.vlgmr.msra.gmra.mxu0 %vm16442_vm5, %v14425_v17  ;;  %11696 = vmatmul.mubr.msk.bf16.vlgmr.msra.gmra.mxu1 %vm16442_vm5, %v14425_v17 }
 0x234   : > { %5387 = vmatpush1.bf16.msra.mxu0 %v12678_v34  ;;  %5430 = vmatpush1.bf16.msra.mxu1 %v12679_v48  ;;  %v12706_v34 = vld [vmem:[#allocation2 + $0x2cc] ss:$80 sps:$4 sm:$0xff]  }
 0x235   : > { %5388 = vmatprep.subr.bf16.mxu0 %v12680_v25  ;;  %5431 = vmatprep.subr.bf16.mxu1 %v12682_v57  ;;  %v12708_v57 = vld [vmem:[#allocation2 + $0x2c0] ss:$80 sps:$4 sm:$0xff]  }
 0x236   : > { %5412 = vmatprep.mubr.bf16.mxu0 %v14394_v18  ;;  %5455 = vmatprep.mubr.bf16.mxu1 %v14394_v18 }
 0x238   : > { %5389 = vmatpush1.bf16.msra.mxu0 %v12684_v10  ;;  %5432 = vmatpush1.bf16.msra.mxu1 %v12685_v47  ;;  %v12712_v10 = vld [vmem:[#allocation2 + $0x22c] ss:$80 sps:$4 sm:$0xff]  }
 0x239   : > { %5390 = vmatprep.subr.bf16.mxu0 %v12686_v50  ;;  %5433 = vmatprep.subr.bf16.mxu1 %v12688_v8  ;;  %v12709_v50 = vld [vmem:[#allocation2 + $0x2c8] ss:$80 sps:$4 sm:$0xff]   ;;  %v12710_v8 = vld [vmem:[#allocation2 + $0x224] ss:$80 sps:$4 sm:$0xff]  }
 0x23c   : > { %5391 = vmatpush1.bf16.msra.mxu0 %v12690_v61  ;;  %5434 = vmatpush1.bf16.msra.mxu1 %v12691_v28  ;;  %v12716_v28 = vld [vmem:[#allocation2 + $0x184] ss:$80 sps:$4 sm:$0xff]  }
 0x23d   : > { %5392 = vmatprep.subr.bf16.mxu0 %v12692_v42  ;;  %5435 = vmatprep.subr.bf16.mxu1 %v12694_v45  ;;  %v11660_v42 = vcombine.high %v14190_v33, %v14193_v21  ;;  %v12714_v45 = vld [vmem:[#allocation2 + $0x220] ss:$80 sps:$4 sm:$0xff]  }
 0x23f   : > { %v14475_v48 = vpop.f32.mrf.mxu0  ;;  %v14477_v25 = vpop.f32.mrf.mxu1 }
 0x240   : > { %5393 = vmatpush1.bf16.msra.mxu0 %v12696_v31  ;;  %5436 = vmatpush1.bf16.msra.mxu1 %v12697_v14  ;;  %v12715_v31 = vld [vmem:[#allocation2 + $0x228] ss:$80 sps:$4 sm:$0xff]   ;;  %v12719_v14 = vld [vmem:[#allocation2 + $0x180] ss:$80 sps:$4 sm:$0xff]  }
 0x241   : > { %5394 = vmatprep.subr.bf16.mxu0 %v12698_v26  ;;  %5437 = vmatprep.subr.bf16.mxu1 %v12700_v3  ;;  %v14483_v47 = vpop.f32.mrf.mxu0  ;;  %v14485_v61 = vpop.f32.mrf.mxu1  ;;  %v11659_v26 = vcombine.low %v14190_v33, %v14193_v21  ;;  %v12727_v21 = vld [vmem:[#allocation2 + $0x44] ss:$80 sps:$4 sm:$0xff]  }
 0x243   : > { %v14493_v3 = vpop.f32.mrf.mxu0 }
 0x244   : > { %5395 = vmatpush1.bf16.msra.mxu0 %v12702_v41  ;;  %5438 = vmatpush1.bf16.msra.mxu1 %v12703_v54  ;;  %v14495_v41 = vpop.f32.mrf.mxu1  ;;  %v12721_v54 = vld [vmem:[#allocation2 + $0xe4] ss:$80 sps:$4 sm:$0xff]  }
 0x245   : > { %5472 = vmatprep.subr.bf16.mxu0 %v12704_v32  ;;  %5515 = vmatprep.subr.bf16.mxu1 %v12706_v34  ;;  %v12723_v32 = vld [vmem:[#allocation2 + $0xec] ss:$80 sps:$4 sm:$0xff]   ;;  %v14497_v34 = vpop.f32.mrf.mxu0 }
 0x247   : > { %11697 = vmatmul.mubr.msk.bf16.vlgmr.msra.gmra.mxu0 %vm16442_vm5, %v14425_v17  ;;  %11698 = vmatmul.mubr.msk.bf16.vlgmr.msra.gmra.mxu1 %vm16442_vm5, %v14425_v17 }
 0x248   : > { %5473 = vmatpush1.bf16.msra.mxu0 %v12708_v57  ;;  %5516 = vmatpush1.bf16.msra.mxu1 %v12709_v50  ;;  %v14499_v57 = vpop.f32.mrf.mxu1  ;;  %v12725_v50 = vld [vmem:[#allocation2 + $0xe0] ss:$80 sps:$4 sm:$0xff]  }
 0x249   : > { %5474 = vmatprep.subr.bf16.mxu0 %v12710_v8  ;;  %5517 = vmatprep.subr.bf16.mxu1 %v12712_v10  ;;  %v12726_v8 = vld [vmem:[#allocation2 + $0xe8] ss:$80 sps:$4 sm:$0xff]  }
 0x24a   : > { %5498 = vmatprep.mubr.bf16.mxu0 %v14394_v18  ;;  %5541 = vmatprep.mubr.bf16.mxu1 %v14394_v18 }
 0x24c   : > { %5475 = vmatpush1.bf16.msra.mxu0 %v12714_v45  ;;  %5518 = vmatpush1.bf16.msra.mxu1 %v12715_v31  ;;  %v12729_v45 = vld [vmem:[#allocation2 + $0x4c] ss:$80 sps:$4 sm:$0xff]  }
 0x24d   : > { %5476 = vmatprep.subr.bf16.mxu0 %v12716_v28  ;;  %5519 = vmatprep.subr.bf16.mxu1 %v11660_v42 }
 0x250   : > { %5477 = vmatpush1.bf16.msra.mxu0 %v12719_v14  ;;  %5520 = vmatpush1.bf16.msra.mxu1 %v11659_v26 }
 0x251   : > { %5478 = vmatprep.subr.bf16.mxu0 %v12721_v54  ;;  %5521 = vmatprep.subr.bf16.mxu1 %v12723_v32  ;;  %v12731_v32 = vld [vmem:[#allocation2 + $0x40] ss:$80 sps:$4 sm:$0xff]  }
 0x253   : > { %v3594_v10 = vpop.f32.mrf.mxu0  ;;  %v3637_v33 = vpop.f32.mrf.mxu1 }
 0x254   : > { %v14502_v31 = vadd.f32 %v3594_v10, %v14374_v43  ;;  %v14505_v28 = vadd.f32 %v3637_v33, %v14376_v55  ;;  %5479 = vmatpush1.bf16.msra.mxu0 %v12725_v50  ;;  %5522 = vmatpush1.bf16.msra.mxu1 %v12726_v8 }
 0x255   : > { %v3596_v42 = vpop.f32.mrf.mxu0  ;;  %v3639_v14 = vpop.f32.mrf.mxu1  ;;  %5480 = vmatprep.subr.bf16.mxu0 %v12727_v21  ;;  %5523 = vmatprep.subr.bf16.mxu1 %v12729_v45 }
 0x256   : > { %v14508_v26 = vadd.f32 %v3596_v42, %v14382_v13  ;;  %v14511_v54 = vadd.f32 %v3639_v14, %v14384_v4 }
 0x257   : > { %v3598_v11 = vpop.f32.mrf.mxu0  ;;  %v3641_v43 = vpop.f32.mrf.mxu1 }
 0x258   : > { %v14514_v10 = vadd.f32 %v3598_v11, %v14386_v36  ;;  %v14517_v55 = vadd.f32 %v3641_v43, %v14388_v2  ;;  %5481 = vmatpush1.bf16.msra.mxu0 %v12731_v32  ;;  %5524 = vmatpush1.bf16.msra.mxu1 %v12732_v6  ;;  %v6297_v32 = vld [vmem:[#allocation3 + $0x5c] sm:$0xff] }
 0x259   : > { %v14525_v13 = vpop.f32.mrf.mxu0  ;;  %v14527_v4 = vpop.f32.mrf.mxu1 }
 0x25b   : > { %11699 = vmatmul.mubr.msk.bf16.vlgmr.msra.gmra.mxu0 %vm16442_vm5, %v14425_v17  ;;  %11700 = vmatmul.mubr.msk.bf16.vlgmr.msra.gmra.mxu1 %vm16442_vm5, %v14425_v17 }
 0x25c   : > { %7202 = vmatprep.mubr.bf16.mxu0 %v14394_v18  ;;  %7245 = vmatprep.mubr.bf16.mxu1 %v14394_v18 }
 0x267   : > { %v3680_v36 = vpop.f32.mrf.mxu0  ;;  %v3723_v11 = vpop.f32.mrf.mxu1 }
 0x268   : > { %v14530_v2 = vadd.f32 %v3680_v36, %v14410_v53  ;;  %v14533_v6 = vadd.f32 %v3723_v11, %v14412_v20  ;;  %v6286_v53 = vld [vmem:[#allocation3 + $0x4] sm:$0xff] }
 0x269   : > { %v3682_v50 = vpop.f32.mrf.mxu0  ;;  %v3725_v8 = vpop.f32.mrf.mxu1  ;;  %v12217_v20 = vpack.i.bf16 %v6297_v32, %v6286_v53 }
 0x26a   : > { %16488 = vst [vmem:[#allocation12_spill] sm:$0xff] %v14530_v2  ;;  %16489 = vst [vmem:[#allocation13_spill] sm:$0xff] %v14533_v6  ;;  %v14536_v17 = vadd.f32 %v3682_v50, %v14418_v56  ;;  %v14539_v33 = vadd.f32 %v3725_v8, %v14420_v1  ;;  %v14551_v56 = vpack.i.bf16 %v14394_v18, %v14394_v18 }
 0x26b   : > { %v3684_v21 = vpop.f32.mrf.mxu0  ;;  %v3727_v45 = vpop.f32.mrf.mxu1  ;;  %12218 = vrot.lane.b32.xlu1 %v12217_v20, %s13231_s22  ;;  %12213 = vrot.lane.b32.xlu0 %v12217_v20, %s13230_s21 }
 0x26c   : > { %16490 = vst [vmem:[#allocation14_spill] sm:$0xff] %v14536_v17  ;;  %16491 = vst [vmem:[#allocation15_spill] sm:$0xff] %v14539_v33  ;;  %v14542_v42 = vadd.f32 %v3684_v21, %v14427_v15  ;;  %v14545_v14 = vadd.f32 %v3727_v45, %v14429_v35 }
 0x26d   : > { %16494 = vst [vmem:[#allocation18_spill] sm:$0xff] %v14551_v56  ;;  %v14557_v1 = vpop.f32.mrf.mxu0  ;;  %v14559_v15 = vpop.f32.mrf.mxu1 }
 0x26e   : > { %16492 = vst [vmem:[#allocation16_spill] sm:$0xff] %v14542_v42  ;;  %16493 = vst [vmem:[#allocation17_spill] sm:$0xff] %v14545_v14 }
 0x26f   : > { %12228 = vrot.lane.b32.xlu1 %v14551_v56, %s13233_s24  ;;  %12223 = vrot.lane.b32.xlu0 %v14551_v56, %s13232_s23  ;;  %16495 = vst [vmem:[#allocation19_spill] sm:$0xff] %v14557_v1  ;;  %16496 = vst [vmem:[#allocation20_spill] sm:$0xff] %v14559_v15 }
 0x27b   : > { %v3766_v35 = vpop.f32.mrf.mxu0  ;;  %v3809_v43 = vpop.f32.mrf.mxu1 }
 0x27c   : > { %v3830_v36 = vadd.f32 %v3766_v35, %v14449_v49  ;;  %v3832_v11 = vadd.f32 %v3809_v43, %v14451_v5 }
 0x27d   : > { %v3768_v50 = vpop.f32.mrf.mxu0  ;;  %v3811_v8 = vpop.f32.mrf.mxu1 }
 0x27e   : > { %v3831_v18 = vadd.f32 %v3768_v50, %v14457_v7  ;;  %v3833_v21 = vadd.f32 %v3811_v8, %v14459_v24 }
 0x27f   : > { %v3770_v45 = vpop.f32.mrf.mxu0  ;;  %v3813_v53 = vpop.f32.mrf.mxu1 }
 0x280   : > { %v3846_v32 = vadd.f32 %v3770_v45, %v14461_v51  ;;  %v3848_v20 = vadd.f32 %v3813_v53, %v14463_v37 }
 0x281   : > { %v14567_v56 = vpop.f32.mrf.mxu0  ;;  %v14569_v58 = vpop.f32.mrf.mxu1 }
 0x282   : > { %16497 = vst [vmem:[#allocation21_spill] sm:$0xff] %v14567_v56  ;;  %16498 = vst [vmem:[#allocation22_spill] sm:$0xff] %v14569_v58 }
 0x28f   : > { %v4375_v23 = vpop.f32.mrf.mxu0  ;;  %v4418_v49 = vpop.f32.mrf.mxu1 }
 0x291   : > { %v14571_v35 = vpop.f32.mrf.mxu0  ;;  %v14573_v5 = vpop.f32.mrf.mxu1 }
 0x293   : > { %v14575_v43 = vpop.f32.mrf.mxu0  ;;  %v14577_v7 = vpop.f32.mrf.mxu1 }
 0x295   : > { %v14579_v24 = vpop.f32.mrf.mxu0  ;;  %v14581_v50 = vpop.f32.mrf.mxu1 }
 0x2a3   : > { %v14583_v51 = vpop.f32.mrf.mxu0  ;;  %v14585_v37 = vpop.f32.mrf.mxu1 }
 0x2a5   : > { %v14587_v8 = vpop.f32.mrf.mxu0  ;;  %v14589_v45 = vpop.f32.mrf.mxu1 }
 0x2a7   : > { %v14591_v53 = vpop.f32.mrf.mxu0  ;;  %v14593_v58 = vpop.f32.mrf.mxu1 }
 0x2a8   : > { %16499 = vst [vmem:[#allocation23_spill] sm:$0xff] %v14593_v58 }
 0x2a9   : > { %v14595_v56 = vpop.f32.mrf.mxu0  ;;  %v14597_v14 = vpop.f32.mrf.mxu1 }
 0x2aa   : > { %16500 = vst [vmem:[#allocation24_spill] sm:$0xff] %v14595_v56  ;;  %16501 = vst [vmem:[#allocation25_spill] sm:$0xff] %v14597_v14 }
 0x2b7   : > { %v14599_v42 = vpop.f32.mrf.mxu0  ;;  %v14601_v33 = vpop.f32.mrf.mxu1 }
 0x2b8   : > { %16502 = vst [vmem:[#allocation26_spill] sm:$0xff] %v14599_v42  ;;  %16503 = vst [vmem:[#allocation27_spill] sm:$0xff] %v14601_v33 }
 0x2b9   : > { %v14603_v17 = vpop.f32.mrf.mxu0  ;;  %v14605_v15 = vpop.f32.mrf.mxu1 }
 0x2ba   : > { %16504 = vst [vmem:[#allocation28_spill] sm:$0xff] %v14603_v17  ;;  %16505 = vst [vmem:[#allocation29_spill] sm:$0xff] %v14605_v15 }
 0x2bb   : > { %v14607_v1 = vpop.f32.mrf.mxu0  ;;  %v14609_v6 = vpop.f32.mrf.mxu1 }
 0x2bc   : > { %16506 = vst [vmem:[#allocation30_spill] sm:$0xff] %v14607_v1  ;;  %16507 = vst [vmem:[#allocation31_spill] sm:$0xff] %v14609_v6 }
 0x2bd   : > { %v14611_v2 = vpop.f32.mrf.mxu0  ;;  %v14613_v16 = vpop.f32.mrf.mxu1 }
 0x2be   : > { %16508 = vst [vmem:[#allocation32_spill] sm:$0xff] %v14611_v2  ;;  %16509 = vst [vmem:[#allocation33_spill] sm:$0xff] %v14613_v16  ;;  %v199_v2 = vlaneseq }
 0x2c0   : > { %v14627_v16 = vand.u32 127, %v199_v2 }
 0x2c2   : > { %vm16441_vm6 = vcmp.lt.s32.totalorder %v14627_v16, 16 }
 0x2cb   : > { %v4633_v40 = vpop.f32.mrf.mxu0  ;;  %v4676_v30 = vpop.f32.mrf.mxu1 }
 0x2cc   : > { %v14615_v60 = vadd.f32 %v4633_v40, %v3830_v36  ;;  %v14617_v14 = vadd.f32 %v4676_v30, %v3832_v11  ;;  %v202_v40 = vadd.s32 256, %v14627_v16  ;;  %v2101_v30 = vadd.f32 %v14242_v27, %v14329_v62 }
 0x2cd   : > { %v4635_v42 = vpop.f32.mrf.mxu0  ;;  %v4678_v33 = vpop.f32.mrf.mxu1  ;;  %v203_v36 = vadd.s32 384, %v14627_v16  ;;  %v3819_v27 = vadd.f32 %v14483_v47, %v14343_v29 }
 0x2ce   : > { %v14619_v56 = vadd.f32 %v4635_v42, %v3831_v18  ;;  %v14621_v17 = vadd.f32 %v4678_v33, %v3833_v21  ;;  %v2103_v42 = vadd.f32 %v14244_v46, %v14329_v62  ;;  %v201_v33 = vadd.s32 128, %v14627_v16 }
 0x2cf   : > { %v4637_v15 = vpop.f32.mrf.mxu0  ;;  %v4680_v1 = vpop.f32.mrf.mxu1  ;;  %v234_v2 = vand.u32 127, %v202_v40  ;;  %v2968_v11 = vadd.f32 %v14362_v38, %v2101_v30  ;;  %v3821_v46 = vadd.f32 %v14485_v61, %v14345_v44  ;;  %v241_v44 = vand.u32 127, %v203_v36 }
 0x2d0   : > { %v14623_v58 = vadd.f32 %v4637_v15, %v3846_v32  ;;  %v14625_v6 = vadd.f32 %v4680_v1, %v3848_v20  ;;  %v3818_v15 = vadd.f32 %v14475_v48, %v14337_v63  ;;  %v3820_v1 = vadd.f32 %v14477_v25, %v14339_v22  ;;  %v14656_v61 = vpop.permute.xlu1 %5623 }
 0x2d1   : > { %v2970_v18 = vadd.f32 %v14364_v39, %v2103_v42  ;;  %v14646_v21 = vpop.f32.mrf.mxu0  ;;  %v14648_v32 = vpop.f32.mrf.mxu1  ;;  %v3834_v63 = vadd.f32 %v14493_v3, %v14351_v9  ;;  %v3836_v22 = vadd.f32 %v14495_v41, %v14353_v59  ;;  %v3835_v39 = vadd.f32 %v14497_v34, %v2968_v11 }
 0x2d2   : > { %v4685_v48 = vadd.f32 %v4375_v23, %v3818_v15  ;;  %v4687_v38 = vadd.f32 %v4418_v49, %v3820_v1  ;;  %v227_v20 = vand.u32 127, %v201_v33  ;;  %vm14659_vm7 = vcmp.lt.s32.totalorder %v234_v2, 16 }
 0x2d3   : > { %v3837_v25 = vadd.f32 %v14499_v57, %v2970_v18  ;;  %v4686_v23 = vadd.f32 %v14571_v35, %v3819_v27  ;;  %v4688_v3 = vadd.f32 %v14573_v5, %v3821_v46  ;;  %v4701_v41 = vadd.f32 %v14575_v43, %v3834_v63 }
 0x2d4   : > { %v4703_v34 = vadd.f32 %v14577_v7, %v3836_v22  ;;  %vm14669_vm10 = vcmp.lt.s32.totalorder %v227_v20, 16  ;;  %vm14673_vm11 = vcmp.lt.s32.totalorder %v241_v44, 16  ;;  %v4702_v15 = vadd.f32 %v14579_v24, %v3835_v39 }
 0x2d5   : > { %v4704_v18 = vadd.f32 %v14581_v50, %v3837_v25 }
 0x2df   : > { %v5242_v29 = vpop.f32.mrf.mxu0  ;;  %v5285_v47 = vpop.f32.mrf.mxu1 }
 0x2e0   : > { %v5552_v40 = vadd.f32 %v5242_v29, %v4685_v48  ;;  %v5554_v59 = vadd.f32 %v5285_v47, %v4687_v38 }
 0x2e1   : > { %v5244_v57 = vpop.f32.mrf.mxu0  ;;  %v5287_v49 = vpop.f32.mrf.mxu1 }
 0x2e2   : > { %vm5584_vm8 = vcmp.ge.f32.partialorder %v5552_v40, 0.0  ;;  %v5626_v30 = vmul.f32 %v14656_v61, %v5552_v40  ;;  %vm5586_vm9 = vcmp.ge.f32.partialorder %v5554_v59, 0.0  ;;  %v5628_v42 = vmul.f32 %v14656_v61, %v5554_v59 }
 0x2e3   : > { %v5553_v36 = vadd.f32 %v5244_v57, %v4686_v23  ;;  %v5555_v5 = vadd.f32 %v5287_v49, %v4688_v3  ;;  %v5246_v43 = vpop.f32.mrf.mxu0  ;;  %v5289_v7 = vpop.f32.mrf.mxu1 }
 0x2e4   : > { %v5658_v1 = vsel %vm5584_vm8, %v5552_v40, %v5626_v30  ;;  %v5568_v2 = vadd.f32 %v5246_v43, %v4701_v41  ;;  %v5570_v11 = vadd.f32 %v5289_v7, %v4703_v34  ;;  %v5660_v27 = vsel %vm5586_vm9, %v5554_v59, %v5628_v42 }
 0x2e5   : > { %vm5585_vm12 = vcmp.ge.f32.partialorder %v5553_v36, 0.0  ;;  %v5627_v46 = vmul.f32 %v14656_v61, %v5553_v36  ;;  %v5248_v63 = vpop.f32.mrf.mxu0  ;;  %v5291_v22 = vpop.f32.mrf.mxu1  ;;  %v5722_v48 = vsel %vm16441_vm6, %v5658_v1, 0.0  ;;  %vm5587_vm13 = vcmp.ge.f32.partialorder %v5555_v5, 0.0 }
 0x2e6   : > { %v5629_v38 = vmul.f32 %v14656_v61, %v5555_v5  ;;  %v5642_v29 = vmul.f32 %v14656_v61, %v5568_v2  ;;  %vm5600_vm14 = vcmp.ge.f32.partialorder %v5568_v2, 0.0  ;;  %v5644_v39 = vmul.f32 %v14656_v61, %v5570_v11 }
 0x2e7   : > { %v5659_v24 = vsel %vm5585_vm12, %v5553_v36, %v5627_v46  ;;  %v5569_v47 = vadd.f32 %v5248_v63, %v4702_v15  ;;  %vm5602_vm15 = vcmp.ge.f32.partialorder %v5570_v11, 0.0  ;;  %v5571_v20 = vadd.f32 %v5291_v22, %v4704_v18 }
 0x2e8   : > { %v5723_v50 = vsel %vm14669_vm10, %v5659_v24, 0.0  ;;  %v5661_v25 = vsel %vm5587_vm13, %v5555_v5, %v5629_v38  ;;  %v5724_v44 = vsel %vm14659_vm7, %v5660_v27, 0.0  ;;  %v5674_v3 = vsel %vm5600_vm14, %v5568_v2, %v5642_v29 }
 0x2e9   : > { %v12180_v40 = vpack.c.bf16 %v5723_v50, %v5722_v48  ;;  %v5725_v59 = vsel %vm14673_vm11, %v5661_v25, 0.0  ;;  %vm5601_vm8 = vcmp.ge.f32.partialorder %v5569_v47, 0.0  ;;  %v5643_v41 = vmul.f32 %v14656_v61, %v5569_v47 }
 0x2ea   : > { %v12181_v23 = vpack.c.bf16 %v5725_v59, %v5724_v44  ;;  %v5676_v34 = vsel %vm5602_vm15, %v5570_v11, %v5644_v39  ;;  %vm5603_vm9 = vcmp.ge.f32.partialorder %v5571_v20, 0.0  ;;  %v5645_v57 = vmul.f32 %v14656_v61, %v5571_v20  ;;  %v16522_v44 = vld [vmem:[#allocation23_spill] sm:$0xff] }
 0x2eb   : > { %5850 = vst [vmem:[#allocation3 + $0xc] sm:$0xff] %v12180_v40  ;;  %6267 = vst [vmem:[#allocation2 + $0x148] sm:$0xff] %v12180_v40  ;;  %6522 = vrot.lane.b32.xlu1 %v12180_v40, %s13230_s21  ;;  %v5675_v49 = vsel %vm5601_vm8, %v5569_v47, %v5643_v41  ;;  %v204_v30 = vadd.s32 512, %v14627_v16  ;;  %v206_v42 = vadd.s32 768, %v14627_v16  ;;  %v5738_v36 = vsel %vm16441_vm6, %v5674_v3, 0.0 }
 0x2ec   : > { %5851 = vst [vmem:[#allocation3 + $0x14] sm:$0xff] %v12181_v23  ;;  %6268 = vst [vmem:[#allocation2 + $0x150] sm:$0xff] %v12181_v23  ;;  %6524 = vrot.lane.b32.xlu0 %v12181_v23, %s13230_s21  ;;  %v5739_v5 = vsel %vm14669_vm10, %v5675_v49, 0.0  ;;  %v5677_v43 = vsel %vm5603_vm9, %v5571_v20, %v5645_v57  ;;  %v2105_v7 = vadd.f32 %v14274_v0, %v14329_v62  ;;  %v5740_v15 = vsel %vm14659_vm7, %v5676_v34, 0.0 }
 0x2ed   : > { %v14705_v1 = vpack.c.bf16 %v5739_v5, %v5738_v36  ;;  %v5741_v2 = vsel %vm14673_vm11, %v5677_v43, 0.0  ;;  %v2107_v11 = vadd.f32 %v14276_v52, %v14329_v62  ;;  %v205_v27 = vadd.s32 640, %v14627_v16 }
 0x2ee   : > { %v14711_v18 = vpack.c.bf16 %v5741_v2, %v5740_v15  ;;  %v207_v46 = vadd.s32 896, %v14627_v16  ;;  %v248_v0 = vand.u32 127, %v204_v30  ;;  %v262_v63 = vand.u32 127, %v206_v42  ;;  %v16530_v42 = vld [vmem:[#allocation25_spill] sm:$0xff] }
 0x2ef   : > { %6334 = vrot.lane.b32.xlu1 %v12181_v23, %s13231_s22  ;;  %5858 = vst [vmem:[#allocation3 + $0x64] sm:$0xff] %v14705_v1  ;;  %6277 = vst [vmem:[#allocation2 + $0x198] sm:$0xff] %v14705_v1  ;;  %v2972_v22 = vadd.f32 %v14398_v19, %v2105_v7  ;;  %v2974_v52 = vadd.f32 %v14400_v12, %v2107_v11  ;;  %v4689_v48 = vadd.f32 %v14583_v51, %v14502_v31  ;;  %v16516_v20 = vmov 0 }
 0x2f0   : > { %6332 = vrot.lane.b32.xlu0 %v12180_v40, %s13231_s22  ;;  %5859 = vst [vmem:[#allocation3 + $0x6c] sm:$0xff] %v14711_v18  ;;  %6278 = vst [vmem:[#allocation2 + $0x1a0] sm:$0xff] %v14711_v18  ;;  %v4691_v38 = vadd.f32 %v14585_v37, %v14505_v28  ;;  %v255_v19 = vand.u32 127, %v205_v27  ;;  %v269_v25 = vand.u32 127, %v207_v46  ;;  %vm14730_vm12 = vcmp.lt.s32.totalorder %v248_v0, 16 }
 0x2f1   : > { %v3839_v24 = vadd.f32 %v14525_v13, %v2972_v22  ;;  %v3841_v39 = vadd.f32 %v14527_v4, %v2974_v52  ;;  %v16517_v20 = vsel %vm14730_vm12, 4294967295, %v16516_v20  ;;  %vm14734_vm13 = vcmp.lt.s32.totalorder %v262_v63, 16 }
 0x2f2   : > { %v6057_v29 = vld [vmem:[#allocation3 + $0x8] sm:$0xff]  ;;  %16518 = vst [vmem:[#allocation34_spill] sm:$0xff] %v16517_v20  ;;  %v16519_v51 = vmov 0  ;;  %v4690_v13 = vadd.f32 %v14587_v8, %v14508_v26  ;;  %v4692_v4 = vadd.f32 %v14589_v45, %v14511_v54  ;;  %v4705_v37 = vadd.f32 %v14591_v53, %v14514_v10  ;;  %v16529_v45 = vld [vmem:[#allocation24_spill] sm:$0xff] }
 0x2f3   : > { %v5328_v47 = vpop.f32.mrf.mxu0  ;;  %v5371_v50 = vpop.f32.mrf.mxu1  ;;  %v6058_v12 = vld [vmem:[#allocation3 + $0x10] sm:$0xff]  ;;  %6102 = vrot.lane.b32.xlu1 %v6057_v29, %s13232_s23  ;;  %v16520_v51 = vsel %vm14734_vm13, 4294967295, %v16519_v51  ;;  %v4707_v40 = vadd.f32 %v16522_v44, %v14517_v55  ;;  %vm14749_vm8 = vcmp.lt.s32.totalorder %v255_v19, 16  ;;  %v16523_v34 = vmov 0 }
 0x2f4   : > { %v5556_v31 = vadd.f32 %v5328_v47, %v4689_v48  ;;  %16521 = vst [vmem:[#allocation35_spill] sm:$0xff] %v16520_v51  ;;  %v5558_v28 = vadd.f32 %v5371_v50, %v4691_v38  ;;  %6104 = vrot.lane.b32.xlu0 %v6058_v12, %s13232_s23  ;;  %v16524_v34 = vsel %vm14749_vm8, 4294967295, %v16523_v34  ;;  %vm14753_vm9 = vcmp.lt.s32.totalorder %v269_v25, 16 }
 0x2f5   : > { %v5330_v59 = vpop.f32.mrf.mxu0  ;;  %v5373_v23 = vpop.f32.mrf.mxu1  ;;  %16525 = vst [vmem:[#allocation23_spill] sm:$0xff] %v16524_v34  ;;  %v16526_v54 = vmov 0  ;;  %v4706_v53 = vadd.f32 %v16529_v45, %v3839_v24  ;;  %v4708_v36 = vadd.f32 %v16530_v42, %v3841_v39 }
 0x2f6   : > { %vm5588_vm14 = vcmp.ge.f32.partialorder %v5556_v31, 0.0  ;;  %v5630_v3 = vmul.f32 %v14656_v61, %v5556_v31  ;;  %vm5590_vm15 = vcmp.ge.f32.partialorder %v5558_v28, 0.0  ;;  %v5632_v41 = vmul.f32 %v14656_v61, %v5558_v28 }
 0x2f7   : > { %v5557_v26 = vadd.f32 %v5330_v59, %v4690_v13  ;;  %v16527_v54 = vsel %vm14753_vm9, 4294967295, %v16526_v54  ;;  %v5559_v10 = vadd.f32 %v5373_v23, %v4692_v4  ;;  %v5332_v8 = vpop.f32.mrf.mxu0  ;;  %v5375_v55 = vpop.f32.mrf.mxu1  ;;  %5914 = vrot.lane.b32.xlu1 %v6058_v12, %s13233_s24  ;;  %v6068_v23 = vld [vmem:[#allocation3 + $0x60] sm:$0xff] }
 0x2f8   : > { %16528 = vst [vmem:[#allocation36_spill] sm:$0xff] %v16527_v54  ;;  %v5662_v57 = vsel %vm5588_vm14, %v5556_v31, %v5630_v3  ;;  %v5572_v49 = vadd.f32 %v5332_v8, %v4705_v37  ;;  %v5574_v30 = vadd.f32 %v5375_v55, %v4707_v40  ;;  %5912 = vrot.lane.b32.xlu0 %v6057_v29, %s13233_s24  ;;  %v208_v31 = vadd.s32 1024, %v14627_v16  ;;  %v16532_v3 = vld [vmem:[#allocation5_spill] sm:$0xff]  ;;  %v6069_v55 = vld [vmem:[#allocation3 + $0x68] sm:$0xff] }
 0x2f9   : > { %v5664_v5 = vsel %vm5590_vm15, %v5558_v28, %v5632_v41  ;;  %vm5589_vm6 = vcmp.ge.f32.partialorder %v5557_v26, 0.0  ;;  %v5631_v43 = vmul.f32 %v14656_v61, %v5557_v26  ;;  %v5334_v7 = vpop.f32.mrf.mxu0  ;;  %v5377_v15 = vpop.f32.mrf.mxu1  ;;  %v5726_v2 = vsel %vm14730_vm12, %v5662_v57, 0.0  ;;  %v16533_v57 = vld [vmem:[#allocation8_spill] sm:$0xff] }
 0x2fa   : > { %vm5591_vm5 = vcmp.ge.f32.partialorder %v5559_v10, 0.0  ;;  %v5633_v11 = vmul.f32 %v14656_v61, %v5559_v10  ;;  %v5646_v27 = vmul.f32 %v14656_v61, %v5572_v49  ;;  %vm5604_vm14 = vcmp.ge.f32.partialorder %v5572_v49, 0.0 }
 0x2fb   : > { %v5663_v46 = vsel %vm5589_vm6, %v5557_v26, %v5631_v43  ;;  %v5648_v0 = vmul.f32 %v14656_v61, %v5574_v30  ;;  %v5573_v63 = vadd.f32 %v5334_v7, %v4706_v53  ;;  %6544 = vrot.lane.b32.xlu1 %v14705_v1, %s13230_s21  ;;  %vm5606_vm15 = vcmp.ge.f32.partialorder %v5574_v30, 0.0  ;;  %v16537_v7 = vld [vmem:[#allocation13_spill] sm:$0xff] }
 0x2fc   : > { %v5727_v22 = vsel %vm14749_vm8, %v5663_v46, 0.0  ;;  %v5665_v52 = vsel %vm5591_vm5, %v5559_v10, %v5633_v11  ;;  %v5575_v48 = vadd.f32 %v5377_v15, %v4708_v36  ;;  %6546 = vrot.lane.b32.xlu0 %v14711_v18, %s13230_s21  ;;  %v5728_v38 = vsel %vm14734_vm13, %v5664_v5, 0.0  ;;  %v16535_v36 = vld [vmem:[#allocation12_spill] sm:$0xff]  ;;  %v16536_v5 = vld [vmem:[#allocation26_spill] sm:$0xff]  ;;  %v16538_v15 = vld [vmem:[#allocation27_spill] sm:$0xff] }
 0x2fd   : > { %v14775_v29 = vpack.c.bf16 %v5727_v22, %v5726_v2  ;;  %v5729_v24 = vsel %vm14753_vm9, %v5665_v52, 0.0  ;;  %v5678_v47 = vsel %vm5604_vm14, %v5572_v49, %v5646_v27  ;;  %vm5605_vm6 = vcmp.ge.f32.partialorder %v5573_v63, 0.0  ;;  %v16539_v11 = vld [vmem:[#allocation19_spill] sm:$0xff]  ;;  %v16540_v46 = vld [vmem:[#allocation20_spill] sm:$0xff] }
 0x2fe   : > { %v14779_v39 = vpack.c.bf16 %v5729_v24, %v5728_v38  ;;  %v5647_v50 = vmul.f32 %v14656_v61, %v5573_v63  ;;  %v5680_v19 = vsel %vm5606_vm15, %v5574_v30, %v5648_v0  ;;  %vm5607_vm5 = vcmp.ge.f32.partialorder %v5575_v48, 0.0  ;;  %v16534_v30 = vld [vmem:[#allocation9_spill] sm:$0xff] }
 0x2ff   : > { %5852 = vst [vmem:[#allocation3 + $0x1c] sm:$0xff] %v14775_v29  ;;  %6269 = vst [vmem:[#allocation2 + $0x158] sm:$0xff] %v14775_v29  ;;  %v5649_v25 = vmul.f32 %v14656_v61, %v5575_v48  ;;  %6356 = vrot.lane.b32.xlu1 %v14711_v18, %s13231_s22  ;;  %v210_v28 = vadd.s32 1280, %v14627_v16  ;;  %v5742_v13 = vsel %vm14730_vm12, %v5678_v47, 0.0  ;;  %v16531_v18 = vld [vmem:[#allocation4_spill] sm:$0xff]  ;;  %v5744_v40 = vsel %vm14734_vm13, %v5680_v19, 0.0 }
 0x300   : > { %5853 = vst [vmem:[#allocation3 + $0x24] sm:$0xff] %v14779_v39  ;;  %6270 = vst [vmem:[#allocation2 + $0x160] sm:$0xff] %v14779_v39  ;;  %v5679_v12 = vsel %vm5605_vm6, %v5573_v63, %v5647_v50  ;;  %6354 = vrot.lane.b32.xlu0 %v14705_v1, %s13231_s22  ;;  %v2109_v44 = vadd.f32 %v16531_v18, %v14329_v62  ;;  %v2111_v41 = vadd.f32 %v16532_v3, %v14329_v62  ;;  %v16541_v38 = vmov 0  ;;  %v16547_v19 = vld [vmem:[#allocation14_spill] sm:$0xff] }
 0x301   : > { %v5743_v4 = vsel %vm14749_vm8, %v5679_v12, 0.0  ;;  %v5681_v37 = vsel %vm5607_vm5, %v5575_v48, %v5649_v25  ;;  %v209_v10 = vadd.s32 1152, %v14627_v16  ;;  %v211_v8 = vadd.s32 1408, %v14627_v16  ;;  %v16548_v25 = vld [vmem:[#allocation28_spill] sm:$0xff] }
 0x302   : > { %v14801_v59 = vpack.c.bf16 %v5743_v4, %v5742_v13  ;;  %v5745_v1 = vsel %vm14753_vm9, %v5681_v37, 0.0  ;;  %v276_v45 = vand.u32 127, %v208_v31  ;;  %v290_v53 = vand.u32 127, %v210_v28  ;;  %v16549_v31 = vld [vmem:[#allocation15_spill] sm:$0xff]  ;;  %v16550_v28 = vld [vmem:[#allocation29_spill] sm:$0xff]  ;;  %v16551_v4 = vld [vmem:[#allocation16_spill] sm:$0xff] }
 0x303   : > { %v14807_v26 = vpack.c.bf16 %v5745_v1, %v5744_v40  ;;  %6124 = vrot.lane.b32.xlu1 %v6068_v23, %s13232_s23  ;;  %v2976_v49 = vadd.f32 %v16533_v57, %v2109_v44  ;;  %v2978_v42 = vadd.f32 %v16534_v30, %v2111_v41  ;;  %v4693_v43 = vadd.f32 %v16536_v5, %v16535_v36  ;;  %v16552_v37 = vld [vmem:[#allocation30_spill] sm:$0xff]  ;;  %v16553_v44 = vld [vmem:[#allocation17_spill] sm:$0xff]  ;;  %v16554_v40 = vld [vmem:[#allocation31_spill] sm:$0xff] }
 0x304   : > { %5860 = vst [vmem:[#allocation3 + $0x74] sm:$0xff] %v14801_v59  ;;  %6279 = vst [vmem:[#allocation2 + $0x1a8] sm:$0xff] %v14801_v59  ;;  %6126 = vrot.lane.b32.xlu0 %v6069_v55, %s13232_s23  ;;  %v4695_v2 = vadd.f32 %v16538_v15, %v16537_v7  ;;  %v283_v52 = vand.u32 127, %v209_v10  ;;  %v297_v48 = vand.u32 127, %v211_v8  ;;  %vm14826_vm14 = vcmp.lt.s32.totalorder %v276_v45, 16  ;;  %v16561_v30 = vld [vmem:[#allocation32_spill] sm:$0xff] }
 0x305   : > { %5861 = vst [vmem:[#allocation3 + $0x7c] sm:$0xff] %v14807_v26  ;;  %6280 = vst [vmem:[#allocation2 + $0x1b0] sm:$0xff] %v14807_v26  ;;  %v3843_v27 = vadd.f32 %v16539_v11, %v2976_v49  ;;  %v3845_v0 = vadd.f32 %v16540_v46, %v2978_v42  ;;  %v16542_v38 = vsel %vm14826_vm14, 4294967295, %v16541_v38  ;;  %vm14830_vm15 = vcmp.lt.s32.totalorder %v290_v53, 16  ;;  %v16562_v7 = vld [vmem:[#allocation33_spill] sm:$0xff] }
 0x306   : > { %16543 = vst [vmem:[#allocation24_spill] sm:$0xff] %v16542_v38  ;;  %v16544_v47 = vmov 0  ;;  %v4694_v12 = vadd.f32 %v16548_v25, %v16547_v19  ;;  %v4696_v13 = vadd.f32 %v16550_v28, %v16549_v31  ;;  %v4709_v18 = vadd.f32 %v16552_v37, %v16551_v4 }
 0x307   : > { %v5414_v63 = vpop.f32.mrf.mxu0  ;;  %v5457_v22 = vpop.f32.mrf.mxu1  ;;  %5936 = vrot.lane.b32.xlu1 %v6069_v55, %s13233_s24  ;;  %v16545_v47 = vsel %vm14830_vm15, 4294967295, %v16544_v47  ;;  %v4711_v1 = vadd.f32 %v16554_v40, %v16553_v44  ;;  %vm14845_vm4 = vcmp.lt.s32.totalorder %v283_v52, 16  ;;  %v16555_v8 = vmov 0  ;;  %v6060_v37 = vld [vmem:[#allocation3 + $0x20] sm:$0xff]  ;;  %v6059_v44 = vld [vmem:[#allocation3 + $0x18] sm:$0xff] }
 0x308   : > { %v5560_v24 = vadd.f32 %v5414_v63, %v4693_v43  ;;  %16546 = vst [vmem:[#allocation25_spill] sm:$0xff] %v16545_v47  ;;  %v5562_v50 = vadd.f32 %v5457_v22, %v4695_v2  ;;  %5934 = vrot.lane.b32.xlu0 %v6068_v23, %s13233_s24  ;;  %v16556_v8 = vsel %vm14845_vm4, 4294967295, %v16555_v8  ;;  %vm14849_vm3 = vcmp.lt.s32.totalorder %v297_v48, 16 }
 0x309   : > { %v5416_v3 = vpop.f32.mrf.mxu0  ;;  %v5459_v41 = vpop.f32.mrf.mxu1  ;;  %16557 = vst [vmem:[#allocation4_spill] sm:$0xff] %v16556_v8  ;;  %v16558_v45 = vmov 0  ;;  %v4710_v42 = vadd.f32 %v16561_v30, %v3843_v27  ;;  %v4712_v15 = vadd.f32 %v16562_v7, %v3845_v0  ;;  %v213_v30 = vadd.s32 1664, %v14627_v16 }
 0x30a   : > { %vm5592_vm6 = vcmp.ge.f32.partialorder %v5560_v24, 0.0  ;;  %v5634_v10 = vmul.f32 %v14656_v61, %v5560_v24  ;;  %vm5594_vm5 = vcmp.ge.f32.partialorder %v5562_v50, 0.0  ;;  %v5636_v23 = vmul.f32 %v14656_v61, %v5562_v50 }
 0x30b   : > { %v5561_v55 = vadd.f32 %v5416_v3, %v4694_v12  ;;  %v16559_v45 = vsel %vm14849_vm3, 4294967295, %v16558_v45  ;;  %v5563_v53 = vadd.f32 %v5459_v41, %v4696_v13  ;;  %v5418_v57 = vpop.f32.mrf.mxu0  ;;  %v5461_v49 = vpop.f32.mrf.mxu1  ;;  %6528 = vrot.lane.b32.xlu1 %v14779_v39, %s13230_s21 }
 0x30c   : > { %16560 = vst [vmem:[#allocation5_spill] sm:$0xff] %v16559_v45  ;;  %v5666_v36 = vsel %vm5592_vm6, %v5560_v24, %v5634_v10  ;;  %v5576_v5 = vadd.f32 %v5418_v57, %v4709_v18  ;;  %v5578_v43 = vadd.f32 %v5461_v49, %v4711_v1  ;;  %6526 = vrot.lane.b32.xlu0 %v14775_v29, %s13230_s21  ;;  %v212_v1 = vadd.s32 1536, %v14627_v16 }
 0x30d   : > { %v5668_v2 = vsel %vm5594_vm5, %v5562_v50, %v5636_v23  ;;  %vm5593_vm2 = vcmp.ge.f32.partialorder %v5561_v55, 0.0  ;;  %v5635_v11 = vmul.f32 %v14656_v61, %v5561_v55  ;;  %v5420_v46 = vpop.f32.mrf.mxu0  ;;  %v5463_v63 = vpop.f32.mrf.mxu1  ;;  %v5730_v22 = vsel %vm14826_vm14, %v5666_v36, 0.0  ;;  %v16563_v36 = vld [vmem:[#allocation6_spill] sm:$0xff] }
 0x30e   : > { %vm5595_vm1 = vcmp.ge.f32.partialorder %v5563_v53, 0.0  ;;  %v5637_v27 = vmul.f32 %v14656_v61, %v5563_v53  ;;  %v5650_v52 = vmul.f32 %v14656_v61, %v5576_v5  ;;  %vm5608_vm6 = vcmp.ge.f32.partialorder %v5576_v5, 0.0 }
 0x30f   : > { %v5667_v48 = vsel %vm5593_vm2, %v5561_v55, %v5635_v11  ;;  %v5652_v24 = vmul.f32 %v14656_v61, %v5578_v43  ;;  %v5577_v19 = vadd.f32 %v5420_v46, %v4710_v42  ;;  %6338 = vrot.lane.b32.xlu1 %v14779_v39, %s13231_s22  ;;  %vm5610_vm5 = vcmp.ge.f32.partialorder %v5578_v43, 0.0  ;;  %v16565_v11 = vld [vmem:[#allocation10_spill] sm:$0xff] }
 0x310   : > { %v5731_v0 = vsel %vm14845_vm4, %v5667_v48, 0.0  ;;  %v5669_v50 = vsel %vm5595_vm1, %v5563_v53, %v5637_v27  ;;  %v5579_v25 = vadd.f32 %v5463_v63, %v4712_v15  ;;  %6336 = vrot.lane.b32.xlu0 %v14775_v29, %s13231_s22  ;;  %v5732_v12 = vsel %vm14830_vm15, %v5668_v2, 0.0  ;;  %v16566_v63 = vld [vmem:[#allocation11_spill] sm:$0xff] }
 0x311   : > { %v14873_v31 = vpack.c.bf16 %v5731_v0, %v5730_v22  ;;  %v5733_v28 = vsel %vm14849_vm3, %v5669_v50, 0.0  ;;  %v5682_v39 = vsel %vm5608_vm6, %v5576_v5, %v5650_v52  ;;  %vm5609_vm2 = vcmp.ge.f32.partialorder %v5577_v19, 0.0  ;;  %v16567_v0 = vld [vmem:[#allocation21_spill] sm:$0xff] }
 0x312   : > { %v14877_v13 = vpack.c.bf16 %v5733_v28, %v5732_v12  ;;  %v5651_v4 = vmul.f32 %v14656_v61, %v5577_v19  ;;  %v5684_v29 = vsel %vm5610_vm5, %v5578_v43, %v5652_v24  ;;  %vm5611_vm1 = vcmp.ge.f32.partialorder %v5579_v25, 0.0  ;;  %v16564_v43 = vld [vmem:[#allocation7_spill] sm:$0xff] }
 0x313   : > { %5854 = vst [vmem:[#allocation3 + $0x2c] sm:$0xff] %v14873_v31  ;;  %6271 = vst [vmem:[#allocation2 + $0x168] sm:$0xff] %v14873_v31  ;;  %v5653_v18 = vmul.f32 %v14656_v61, %v5579_v25  ;;  %6108 = vrot.lane.b32.xlu1 %v6060_v37, %s13232_s23  ;;  %v5746_v3 = vsel %vm14826_vm14, %v5682_v39, 0.0  ;;  %v214_v23 = vadd.s32 1792, %v14627_v16  ;;  %v5748_v55 = vsel %vm14830_vm15, %v5684_v29, 0.0 }
 0x314   : > { %5855 = vst [vmem:[#allocation3 + $0x34] sm:$0xff] %v14877_v13  ;;  %6272 = vst [vmem:[#allocation2 + $0x170] sm:$0xff] %v14877_v13  ;;  %v5683_v40 = vsel %vm5609_vm2, %v5577_v19, %v5651_v4  ;;  %6106 = vrot.lane.b32.xlu0 %v6059_v44, %s13232_s23  ;;  %v215_v42 = vadd.s32 1920, %v14627_v16  ;;  %v2113_v5 = vadd.f32 %v16563_v36, %v14329_v62  ;;  %v304_v15 = vand.u32 127, %v212_v1 }
 0x315   : > { %v5747_v41 = vsel %vm14845_vm4, %v5683_v40, 0.0  ;;  %v5685_v10 = vsel %vm5611_vm1, %v5579_v25, %v5653_v18  ;;  %v2115_v7 = vadd.f32 %v16564_v43, %v14329_v62  ;;  %v318_v2 = vand.u32 127, %v214_v23  ;;  %v16568_v25 = vld [vmem:[#allocation22_spill] sm:$0xff] }
 0x316   : > { %v14895_v53 = vpack.c.bf16 %v5747_v41, %v5746_v3  ;;  %v5749_v57 = vsel %vm14849_vm3, %v5685_v10, 0.0  ;;  %v2980_v46 = vadd.f32 %v16565_v11, %v2113_v5  ;;  %v311_v48 = vand.u32 127, %v213_v30  ;;  %v6070_v5 = vld [vmem:[#allocation3 + $0x70] sm:$0xff] }
 0x317   : > { %v14899_v49 = vpack.c.bf16 %v5749_v57, %v5748_v55  ;;  %5918 = vrot.lane.b32.xlu1 %v6060_v37, %s13233_s24  ;;  %v2982_v22 = vadd.f32 %v16566_v63, %v2115_v7  ;;  %v325_v24 = vand.u32 127, %v215_v42  ;;  %vm14923_vm6 = vcmp.lt.s32.totalorder %v304_v15, 16 }
 0x318   : > { %5862 = vst [vmem:[#allocation3 + $0x84] sm:$0xff] %v14895_v53  ;;  %6281 = vst [vmem:[#allocation2 + $0x1b8] sm:$0xff] %v14895_v53  ;;  %5916 = vrot.lane.b32.xlu0 %v6059_v44, %s13233_s24  ;;  %v3847_v50 = vadd.f32 %v16567_v0, %v2980_v46  ;;  %v16569_v28 = vmov 0  ;;  %vm14927_vm5 = vcmp.lt.s32.totalorder %v318_v2, 16  ;;  %v16572_v39 = vmov 0 }
 0x319   : > { %5863 = vst [vmem:[#allocation3 + $0x8c] sm:$0xff] %v14899_v49  ;;  %6282 = vst [vmem:[#allocation2 + $0x1c0] sm:$0xff] %v14899_v49  ;;  %v3849_v12 = vadd.f32 %v16568_v25, %v2982_v22  ;;  %v16570_v28 = vsel %vm14923_vm6, 4294967295, %v16569_v28  ;;  %v16573_v39 = vsel %vm14927_vm5, 4294967295, %v16572_v39  ;;  %vm14933_vm0 = vcmp.lt.s32.totalorder %v311_v48, 16 }
 0x31a   : > { %16571 = vst [vmem:[#allocation8_spill] sm:$0xff] %v16570_v28  ;;  %16574 = vst [vmem:[#allocation9_spill] sm:$0xff] %v16573_v39  ;;  %v16575_v29 = vmov 0  ;;  %vm14938_vm3 = vcmp.lt.s32.totalorder %v325_v24, 16  ;;  %v16578_v44 = vmov 0  ;;  %v4714_v41 = vadd.f32 %v14646_v21, %v3847_v50 }
 0x31b   : > { %v5500_v27 = vpop.f32.mrf.mxu0  ;;  %v5543_v52 = vpop.f32.mrf.mxu1  ;;  %6550 = vrot.lane.b32.xlu1 %v14807_v26, %s13230_s21  ;;  %v16576_v29 = vsel %vm14933_vm0, 4294967295, %v16575_v29  ;;  %v16579_v44 = vsel %vm14938_vm3, 4294967295, %v16578_v44 }
 0x31c   : > { %v5564_v19 = vadd.f32 %v5500_v27, %v14615_v60  ;;  %v5566_v62 = vadd.f32 %v5543_v52, %v14617_v14  ;;  %6548 = vrot.lane.b32.xlu0 %v14801_v59, %s13230_s21  ;;  %16577 = vst [vmem:[#allocation12_spill] sm:$0xff] %v16576_v29  ;;  %16580 = vst [vmem:[#allocation26_spill] sm:$0xff] %v16579_v44 }
 0x31d   : > { %v5502_v4 = vpop.f32.mrf.mxu0  ;;  %v5545_v37 = vpop.f32.mrf.mxu1 }
 0x31e   : > { %vm5596_vm2 = vcmp.ge.f32.partialorder %v5564_v19, 0.0  ;;  %v5638_v60 = vmul.f32 %v14656_v61, %v5564_v19  ;;  %vm5598_vm1 = vcmp.ge.f32.partialorder %v5566_v62, 0.0  ;;  %v5640_v14 = vmul.f32 %v14656_v61, %v5566_v62 }
 0x31f   : > { %v5565_v18 = vadd.f32 %v5502_v4, %v14619_v56  ;;  %v5567_v40 = vadd.f32 %v5545_v37, %v14621_v17  ;;  %v5504_v1 = vpop.f32.mrf.mxu0  ;;  %v5547_v3 = vpop.f32.mrf.mxu1  ;;  %6360 = vrot.lane.b32.xlu1 %v14807_v26, %s13231_s22  ;;  %v4716_v56 = vadd.f32 %v14648_v32, %v3849_v12  ;;  %v6062_v4 = vld [vmem:[#allocation3 + $0x30] sm:$0xff]  ;;  %v6061_v37 = vld [vmem:[#allocation3 + $0x28] sm:$0xff] }
 0x320   : > { %v5670_v10 = vsel %vm5596_vm2, %v5564_v19, %v5638_v60  ;;  %v5580_v23 = vadd.f32 %v5504_v1, %v14623_v58  ;;  %v5582_v55 = vadd.f32 %v5547_v3, %v14625_v6  ;;  %6358 = vrot.lane.b32.xlu0 %v14801_v59, %s13231_s22  ;;  %v5672_v57 = vsel %vm5598_vm1, %v5566_v62, %v5640_v14  ;;  %v6071_v6 = vld [vmem:[#allocation3 + $0x78] sm:$0xff]  ;;  %v15007_v60 = vpop.permute.xlu0 %12213 }
 0x321   : > { %vm5597_vm4 = vcmp.ge.f32.partialorder %v5565_v18, 0.0  ;;  %v5639_v17 = vmul.f32 %v14656_v61, %v5565_v18  ;;  %v5506_v30 = vpop.f32.mrf.mxu0  ;;  %v5549_v42 = vpop.f32.mrf.mxu1  ;;  %v5734_v26 = vsel %vm14923_vm6, %v5670_v10, 0.0  ;;  %vm5599_vm15 = vcmp.ge.f32.partialorder %v5567_v40, 0.0 }
 0x322   : > { %v5641_v21 = vmul.f32 %v14656_v61, %v5567_v40  ;;  %v5654_v58 = vmul.f32 %v14656_v61, %v5580_v23  ;;  %vm5612_vm2 = vcmp.ge.f32.partialorder %v5580_v23, 0.0  ;;  %v5656_v59 = vmul.f32 %v14656_v61, %v5582_v55 }
 0x323   : > { %v5671_v36 = vsel %vm5597_vm4, %v5565_v18, %v5639_v17  ;;  %v5581_v32 = vadd.f32 %v5506_v30, %v4714_v41  ;;  %6130 = vrot.lane.b32.xlu1 %v6071_v6, %s13232_s23  ;;  %vm5614_vm1 = vcmp.ge.f32.partialorder %v5582_v55, 0.0  ;;  %v5583_v15 = vadd.f32 %v5549_v42, %v4716_v56 }
 0x324   : > { %v5735_v43 = vsel %vm14933_vm0, %v5671_v36, 0.0  ;;  %v5673_v7 = vsel %vm5599_vm15, %v5567_v40, %v5641_v21  ;;  %6128 = vrot.lane.b32.xlu0 %v6070_v5, %s13232_s23  ;;  %v5736_v2 = vsel %vm14927_vm5, %v5672_v57, 0.0  ;;  %v5686_v22 = vsel %vm5612_vm2, %v5580_v23, %v5654_v58  ;;  %v15015_v40 = vpop.permute.xlu0 %12223 }
 0x325   : > { %v12186_v11 = vpack.c.bf16 %v5735_v43, %v5734_v26  ;;  %v5737_v46 = vsel %vm14938_vm3, %v5673_v7, 0.0  ;;  %vm5613_vm4 = vcmp.ge.f32.partialorder %v5581_v32, 0.0  ;;  %v5655_v27 = vmul.f32 %v14656_v61, %v5581_v32 }
 0x326   : > { %v12187_v63 = vpack.c.bf16 %v5737_v46, %v5736_v2  ;;  %v5688_v52 = vsel %vm5614_vm1, %v5582_v55, %v5656_v59  ;;  %vm5615_vm15 = vcmp.ge.f32.partialorder %v5583_v15, 0.0  ;;  %v5657_v48 = vmul.f32 %v14656_v61, %v5583_v15 }
 0x327   : > { %5856 = vst [vmem:[#allocation3 + $0x3c] sm:$0xff] %v12186_v11  ;;  %6273 = vst [vmem:[#allocation2 + $0x178] sm:$0xff] %v12186_v11  ;;  %5940 = vrot.lane.b32.xlu1 %v6071_v6, %s13233_s24  ;;  %v5687_v24 = vsel %vm5613_vm4, %v5581_v32, %v5655_v27  ;;  %v5750_v19 = vsel %vm14923_vm6, %v5686_v22, 0.0  ;;  %v5752_v50 = vsel %vm14927_vm5, %v5688_v52, 0.0  ;;  %v12215_v1 = vunpack.i.l.bf16 %v15007_v60 }
 0x328   : > { %5857 = vst [vmem:[#allocation3 + $0x44] sm:$0xff] %v12187_v63  ;;  %6274 = vst [vmem:[#allocation2 + $0x180] sm:$0xff] %v12187_v63  ;;  %5938 = vrot.lane.b32.xlu0 %v6070_v5, %s13233_s24  ;;  %v5751_v62 = vsel %vm14933_vm0, %v5687_v24, 0.0  ;;  %v5689_v0 = vsel %vm5615_vm15, %v5583_v15, %v5657_v48  ;;  %vm16581_vm2 = vcmask 1043456   ;;  %vm16582_vm1 = vcmask 1031168  }
 0x329   : > { %v12194_v25 = vpack.c.bf16 %v5751_v62, %v5750_v19  ;;  %v5753_v61 = vsel %vm14938_vm3, %v5689_v0, 0.0  ;;  %v6564_v41 = vrot.slane %v12215_v1, 4  ;;  %vm16583_vm4 = vmmov %vm16581_vm2  ;;  %v12225_v26 = vunpack.i.l.bf16 %v15015_v40 }
 0x32a   : > { %v12195_v12 = vpack.c.bf16 %v5753_v61, %v5752_v50  ;;  %vm16584_vm15 = vmmov %vm16582_vm1  ;;  %v12216_v0 = vunpack.i.h.bf16 %v15007_v60 }
 0x32b   : > { %6532 = vrot.lane.b32.xlu1 %v14877_v13, %s13230_s21  ;;  %5864 = vst [vmem:[#allocation3 + $0x94] sm:$0xff] %v12194_v25  ;;  %6283 = vst [vmem:[#allocation2 + $0x1c8] sm:$0xff] %v12194_v25  ;;  %v6144_v2 = vrot.slane %v12225_v26, 4 }
 0x32c   : > { %6530 = vrot.lane.b32.xlu0 %v14873_v31, %s13230_s21  ;;  %5865 = vst [vmem:[#allocation3 + $0x9c] sm:$0xff] %v12195_v12  ;;  %6284 = vst [vmem:[#allocation2 + $0x1d0] sm:$0xff] %v12195_v12 }
 0x32e   : > { %v6063_v14 = vld [vmem:[#allocation3 + $0x38] sm:$0xff] }
 0x32f   : > { %6342 = vrot.lane.b32.xlu1 %v14877_v13, %s13231_s22  ;;  %v6072_v13 = vld [vmem:[#allocation3 + $0x80] sm:$0xff] }
 0x330   : > { %6340 = vrot.lane.b32.xlu0 %v14873_v31, %s13231_s22  ;;  %v6073_v31 = vld [vmem:[#allocation3 + $0x88] sm:$0xff] }
 0x332   : > { %v6074_v5 = vld [vmem:[#allocation3 + $0x90] sm:$0xff] }
 0x333   : > { %6112 = vrot.lane.b32.xlu1 %v6062_v4, %s13232_s23  ;;  %v6075_v36 = vld [vmem:[#allocation3 + $0x98] sm:$0xff] }
 0x334   : > { %6110 = vrot.lane.b32.xlu0 %v6061_v37, %s13232_s23 }
 0x337   : > { %5922 = vrot.lane.b32.xlu1 %v6062_v4, %s13233_s24 }
 0x338   : > { %5920 = vrot.lane.b32.xlu0 %v6061_v37, %s13233_s24  ;;  %v16592_v37 = vld [vmem:[#allocation18_spill] sm:$0xff] }
 0x33b   : > { %6554 = vrot.lane.b32.xlu1 %v14899_v49, %s13230_s21 }
 0x33c   : > { %6552 = vrot.lane.b32.xlu0 %v14895_v53, %s13230_s21 }
 0x33f   : > { %6364 = vrot.lane.b32.xlu1 %v14899_v49, %s13231_s22  ;;  %v15005_v49 = vpop.permute.xlu1 %12218 }
 0x340   : > { %6362 = vrot.lane.b32.xlu0 %v14895_v53, %s13231_s22  ;;  %v6064_v53 = vld [vmem:[#allocation3 + $0x40] sm:$0xff]  ;;  %v12220_v55 = vunpack.i.l.bf16 %v15005_v49 }
 0x342   : > { %v6374_v59 = vrot.slane %v12220_v55, 4 }
 0x343   : > { %6134 = vrot.lane.b32.xlu1 %v6073_v31, %s13232_s23  ;;  %v15012_v18 = vpop.permute.xlu1 %12228 }
 0x344   : > { %6132 = vrot.lane.b32.xlu0 %v6072_v13, %s13232_s23  ;;  %v12230_v27 = vunpack.i.l.bf16 %v15012_v18 }
 0x347   : > { %5944 = vrot.lane.b32.xlu1 %v6073_v31, %s13233_s24  ;;  %v12221_v31 = vunpack.i.h.bf16 %v15005_v49 }
 0x348   : > { %5942 = vrot.lane.b32.xlu0 %v6072_v13, %s13233_s24 }
 0x34b   : > { %6536 = vrot.lane.b32.xlu1 %v12187_v63, %s13230_s21 }
 0x34c   : > { %6534 = vrot.lane.b32.xlu0 %v12186_v11, %s13230_s21 }
 0x34f   : > { %6346 = vrot.lane.b32.xlu1 %v12187_v63, %s13231_s22 }
 0x350   : > { %6344 = vrot.lane.b32.xlu0 %v12186_v11, %s13231_s22 }
 0x353   : > { %6116 = vrot.lane.b32.xlu1 %v6064_v53, %s13232_s23 }
 0x354   : > { %6114 = vrot.lane.b32.xlu0 %v6063_v14, %s13232_s23 }
 0x357   : > { %6558 = vrot.lane.b32.xlu1 %v12195_v12, %s13230_s21 }
 0x358   : > { %6556 = vrot.lane.b32.xlu0 %v12194_v25, %s13230_s21 }
 0x35b   : > { %6368 = vrot.lane.b32.xlu1 %v12195_v12, %s13231_s22  ;;  %v5954_v12 = vrot.slane %v12230_v27, 4 }
 0x35c   : > { %6366 = vrot.lane.b32.xlu0 %v12194_v25, %s13231_s22 }
 0x35d   : > { %v6523_v3 = vpop.permute.xlu1 %6522 }
 0x35e   : > { %v6565_v10 = vrot.slane %v6523_v3, 4  ;;  %v15020_v23 = vpop.permute.xlu0 %6524 }
 0x35f   : > { %v6566_v56 = vrot.slane %v15020_v23, 4  ;;  %5926 = vrot.lane.b32.xlu1 %v6064_v53, %s13233_s24 }
 0x360   : > { %v6586_v57 = vsel %vm16581_vm2, %v6564_v41, %v6565_v10  ;;  %5924 = vrot.lane.b32.xlu0 %v6063_v14, %s13233_s24  ;;  %v6575_v14 = vrot.slane %v12216_v0, 4 }
 0x361   : > { %v15028_v17 = vsel %vm16582_vm1, %v12215_v1, %v6586_v57  ;;  %v6588_v30 = vsel %vm16583_vm4, %v6565_v10, %v6566_v56  ;;  %v15033_v42 = vpop.permute.xlu1 %6334  ;;  %vm16585_vm1 = vmmov %vm16581_vm2  ;;  %vm16586_vm4 = vcmask 1039360   ;;  %v6065_v57 = vld [vmem:[#allocation3 + $0x48] sm:$0xff] }
 0x362   : > { %6646 = vst [vmem:[#allocation2 + $0x280] sm:$0xff] %v15028_v17  ;;  %v15038_v21 = vsel %vm16584_vm15, %v6523_v3, %v6588_v30  ;;  %v6376_v58 = vrot.slane %v15033_v42, 4  ;;  %v6333_v6 = vpop.permute.xlu0 %6332  ;;  %vm16587_vm15 = vmmov %vm16586_vm4 }
 0x363   : > { %6647 = vst [vmem:[#allocation2 + $0x288] sm:$0xff] %v15038_v21  ;;  %v6375_v32 = vrot.slane %v6333_v6, 4  ;;  %6138 = vrot.lane.b32.xlu1 %v6075_v36, %s13232_s23 }
 0x364   : > { %6136 = vrot.lane.b32.xlu0 %v6074_v5, %s13232_s23 }
 0x365   : > { %v6396_v43 = vsel %vm16581_vm2, %v6374_v59, %v6375_v32  ;;  %v6398_v7 = vsel %vm16585_vm1, %v6375_v32, %v6376_v58  ;;  %v6103_v15 = vpop.permute.xlu1 %6102  ;;  %vm16588_vm2 = vmmov %vm16585_vm1  ;;  %vm16589_vm1 = vcmask 7168   ;;  %v12226_v59 = vunpack.i.h.bf16 %v15015_v40 }
 0x366   : > { %v15049_v11 = vsel %vm16586_vm4, %v12220_v55, %v6396_v43  ;;  %v15052_v46 = vsel %vm16587_vm15, %v6333_v6, %v6398_v7  ;;  %v6145_v63 = vrot.slane %v6103_v15, 4  ;;  %v15054_v22 = vpop.permute.xlu0 %6104  ;;  %vm16590_vm4 = vmmov %vm16588_vm2  ;;  %v6076_v55 = vld [vmem:[#allocation3 + $0xa0] sm:$0xff]  ;;  %v6307_v6 = vld [vmem:[#allocation3 + $0xac] sm:$0xf] }
 0x367   : > { %6456 = vst [vmem:[#allocation2 + $0x1e0] sm:$0xff] %v15049_v11  ;;  %6457 = vst [vmem:[#allocation2 + $0x1e8] sm:$0xff] %v15052_v46  ;;  %v6146_v52 = vrot.slane %v15054_v22, 4  ;;  %5948 = vrot.lane.b32.xlu1 %v6075_v36, %s13233_s24  ;;  %v6385_v36 = vrot.slane %v12221_v31, 4  ;;  %v6486_v7 = vld [vmem:[#allocation3 + $0x54] sm:$0xf] }
 0x368   : > { %v6166_v48 = vsel %vm16588_vm2, %v6144_v2, %v6145_v63  ;;  %5946 = vrot.lane.b32.xlu0 %v6074_v5, %s13233_s24  ;;  %vm16591_vm15 = vmmov %vm16589_vm1 }
 0x369   : > { %v15064_v24 = vsel %vm16589_vm1, %v12225_v26, %v6166_v48  ;;  %v6168_v19 = vsel %vm16590_vm4, %v6145_v63, %v6146_v52  ;;  %v15069_v62 = vpop.permute.xlu1 %5914  ;;  %vm16593_vm1 = vmmov %vm16588_vm2  ;;  %vm16594_vm4 = vcmask 15360   ;;  %v6296_v26 = vld [vmem:[#allocation3 + $0x54] sm:$0xf] }
 0x36a   : > { %6226 = vst [vmem:[#allocation2 + $0xa0] sm:$0xff] %v15064_v24  ;;  %v15074_v50 = vsel %vm16591_vm15, %v6103_v15, %v6168_v19  ;;  %v5956_v25 = vrot.slane %v15069_v62, 4  ;;  %v5913_v61 = vpop.permute.xlu0 %5912  ;;  %vm16595_vm15 = vmmov %vm16594_vm4  ;;  %v6497_v15 = vld [vmem:[#allocation3 + $0xac] sm:$0xf] }
 0x36b   : > { %6227 = vst [vmem:[#allocation2 + $0xa8] sm:$0xff] %v15074_v50  ;;  %v5955_v4 = vrot.slane %v5913_v61, 4  ;;  %12238 = vrot.lane.b32.xlu1 %v16592_v37, %s13231_s22 }
 0x36c   : > { %12233 = vrot.lane.b32.xlu0 %v16592_v37, %s13230_s21 }
 0x36d   : > { %v5976_v13 = vsel %vm16588_vm2, %v5954_v12, %v5955_v4  ;;  %v5978_v53 = vsel %vm16593_vm1, %v5955_v4, %v5956_v25  ;;  %v6545_v60 = vpop.permute.xlu1 %6544  ;;  %vm16596_vm2 = vmmov %vm16593_vm1  ;;  %vm16597_vm1 = vcmask 1031168   ;;  %v5887_v12 = vld [vmem:[#allocation3 + $0xa8] sm:$0xf] }
 0x36e   : > { %v15088_v1 = vsel %vm16594_vm4, %v12230_v27, %v5976_v13  ;;  %v15091_v3 = vsel %vm16595_vm15, %v5913_v61, %v5978_v53  ;;  %v6576_v41 = vrot.slane %v6545_v60, 4  ;;  %v15093_v10 = vpop.permute.xlu0 %6546  ;;  %vm16598_vm4 = vmmov %vm16596_vm2  ;;  %v5876_v61 = vld [vmem:[#allocation3 + $0x50] sm:$0xf]  ;;  %v12242_v13 = vpack.i.bf16 %v6497_v15, %v6486_v7 }
 0x36f   : > { %6036 = vst [vmem:[#allocation2] sm:$0xff] %v15088_v1  ;;  %6037 = vst [vmem:[#allocation2 + $0x8] sm:$0xff] %v15091_v3  ;;  %v6577_v49 = vrot.slane %v15093_v10, 4  ;;  %6140 = vrot.lane.b32.xlu1 %v6076_v55, %s13232_s23  ;;  %v12231_v53 = vunpack.i.h.bf16 %v15012_v18  ;;  %v12257_v18 = vpack.i.bf16 %v5887_v12, %v5876_v61  ;;  %v12735_v12 = vld [vmem:[#allocation2 + $0x14c] ss:$80 sps:$4 sm:$0xff]  }
 0x370   : > { %v6606_v30 = vsel %vm16596_vm2, %v6575_v14, %v6576_v41  ;;  %6118 = vrot.lane.b32.xlu0 %v6065_v57, %s13232_s23  ;;  %vm16599_vm15 = vmmov %vm16597_vm1 }
 0x371   : > { %v6607_v32 = vsel %vm16597_vm1, %v12216_v0, %v6606_v30  ;;  %v6608_v5 = vsel %vm16598_vm4, %v6576_v41, %v6577_v49  ;;  %v15106_v43 = vpop.permute.xlu1 %6356  ;;  %v12247_v0 = vpack.i.bf16 %v6307_v6, %v6296_v26  ;;  %vm16600_vm1 = vmmov %vm16596_vm2  ;;  %v6077_v30 = vld [vmem:[#allocation3 + $0xa8] sm:$0xf]  ;;  %vm16601_vm4 = vcmask 1039360  }
 0x372   : > { %6656 = vst [vmem:[#allocation2 + $0x2d0] sm:$0xff] %v6607_v32  ;;  %v6609_v2 = vsel %vm16599_vm15, %v6545_v60, %v6608_v5  ;;  %v6387_v63 = vrot.slane %v15106_v43, 4  ;;  %v6355_v27 = vpop.permute.xlu0 %6354  ;;  %v11787_v48 = vcombine.low %v15028_v17, %v6607_v32  ;;  %v11788_v40 = vcombine.high %v15028_v17, %v6607_v32  ;;  %vm16602_vm15 = vmmov %vm16601_vm4 }
 0x373   : > { %6657 = vst [vmem:[#allocation2 + $0x2d8] sm:$0xff] %v6609_v2  ;;  %v6386_v19 = vrot.slane %v6355_v27, 4  ;;  %5950 = vrot.lane.b32.xlu1 %v6076_v55, %s13233_s24  ;;  %v11789_v4 = vcombine.low %v15038_v21, %v6609_v2  ;;  %v11790_v37 = vcombine.high %v15038_v21, %v6609_v2  ;;  %v6155_v60 = vrot.slane %v12226_v59, 4  ;;  %v6066_v55 = vld [vmem:[#allocation3 + $0x50] sm:$0xf] }
 0x374   : > { %5928 = vrot.lane.b32.xlu0 %v6065_v57, %s13233_s24  ;;  %7176 = vmatprep.subr.bf16.mxu0 %v11788_v40  ;;  %v12252_v15 = vpack.i.bf16 %v6077_v30, %v6066_v55 }
 0x375   : > { %v6416_v17 = vsel %vm16596_vm2, %v6385_v36, %v6386_v19  ;;  %v6418_v14 = vsel %vm16600_vm1, %v6386_v19, %v6387_v63  ;;  %v6125_v41 = vpop.permute.xlu1 %6124  ;;  %7219 = vmatprep.subr.bf16.mxu1 %v11790_v37  ;;  %7177 = vmatpush1.bf16.msra.mxu0 %v11787_v48  ;;  %vm16603_vm2 = vmmov %vm16600_vm1  ;;  %vm16604_vm1 = vcmask 7168   ;;  %v12738_v19 = vld [vmem:[#allocation2 + $0x144] ss:$80 sps:$4 sm:$0xff]   ;;  %v11719_v37 = vld [vmem:[%s16436_s2 + $0x18] sm:$0xff] }
 0x376   : > { %v6417_v21 = vsel %vm16601_vm4, %v12221_v31, %v6416_v17  ;;  %v6419_v57 = vsel %vm16602_vm15, %v6355_v27, %v6418_v14  ;;  %v6156_v26 = vrot.slane %v6125_v41, 4  ;;  %v15123_v6 = vpop.permute.xlu0 %6126  ;;  %7220 = vmatpush1.bf16.msra.mxu1 %v11789_v4  ;;  %vm16605_vm4 = vmmov %vm16603_vm2  ;;  %v5965_v4 = vrot.slane %v12231_v53, 4  ;;  %v11718_v14 = vld [vmem:[%s16436_s2 + $0x10] sm:$0xff] }
 0x377   : > { %6466 = vst [vmem:[#allocation2 + $0x230] sm:$0xff] %v6417_v21  ;;  %6467 = vst [vmem:[#allocation2 + $0x238] sm:$0xff] %v6419_v57  ;;  %v6157_v36 = vrot.slane %v15123_v6, 4  ;;  %12248 = vrot.lane.b32.xlu1 %v12247_v0, %s13231_s22  ;;  %v11771_v32 = vcombine.low %v15049_v11, %v6417_v21  ;;  %v11772_v5 = vcombine.high %v15049_v11, %v6417_v21 }
 0x378   : > { %v11773_v7 = vcombine.low %v15052_v46, %v6419_v57  ;;  %v6186_v31 = vsel %vm16603_vm2, %v6155_v60, %v6156_v26  ;;  %12243 = vrot.lane.b32.xlu0 %v12242_v13, %s13230_s21  ;;  %v11774_v2 = vcombine.high %v15052_v46, %v6419_v57  ;;  %vm16606_vm15 = vmmov %vm16604_vm1  ;;  %v12736_v46 = vld [vmem:[#allocation2 + $0x140] ss:$80 sps:$4 sm:$0xff]  }
 0x379   : > { %v6187_v27 = vsel %vm16604_vm1, %v12226_v59, %v6186_v31  ;;  %v6188_v48 = vsel %vm16605_vm4, %v6156_v26, %v6157_v36  ;;  %v15137_v40 = vpop.permute.xlu1 %5936  ;;  %7178 = vmatprep.subr.bf16.mxu0 %v11772_v5  ;;  %vm16607_vm1 = vmmov %vm16603_vm2  ;;  %vm16608_vm4 = vcmask 15360  }
 0x37a   : > { %6236 = vst [vmem:[#allocation2 + $0xf0] sm:$0xff] %v6187_v27  ;;  %v6189_v11 = vsel %vm16606_vm15, %v6125_v41, %v6188_v48  ;;  %v5967_v0 = vrot.slane %v15137_v40, 4  ;;  %v5935_v61 = vpop.permute.xlu0 %5934  ;;  %7221 = vmatprep.subr.bf16.mxu1 %v11774_v2  ;;  %7179 = vmatpush1.bf16.msra.mxu0 %v11771_v32  ;;  %v12733_v41 = vld [vmem:[#allocation2 + $0x148] ss:$80 sps:$4 sm:$0xff]   ;;  %vm16609_vm15 = vmmov %vm16608_vm4  ;;  %v11740_v26 = vcombine.high %v15064_v24, %v6187_v27 }
 0x37b   : > { %6237 = vst [vmem:[#allocation2 + $0xf8] sm:$0xff] %v6189_v11  ;;  %v5966_v59 = vrot.slane %v5935_v61, 4  ;;  %12258 = vrot.lane.b32.xlu1 %v12257_v18, %s13233_s24  ;;  %7222 = vmatpush1.bf16.msra.mxu1 %v11773_v7  ;;  %v11742_v32 = vcombine.high %v15074_v50, %v6189_v11  ;;  %v11739_v5 = vcombine.low %v15064_v24, %v6187_v27 }
 0x37c   : > { %12253 = vrot.lane.b32.xlu0 %v12252_v15, %s13232_s23  ;;  %7223 = vmatprep.subr.bf16.mxu1 %v12735_v12  ;;  %v12176_v15 = vld [vmem:[%s16437_s3 + $0x1] ss:$0 sm:$0xff]  ;;  %v11741_v2 = vcombine.low %v15074_v50, %v6189_v11 }
 0x37d   : > { %v5996_v13 = vsel %vm16603_vm2, %v5965_v4, %v5966_v59  ;;  %v5998_v60 = vsel %vm16607_vm1, %v5966_v59, %v5967_v0  ;;  %v15150_v17 = vpop.permute.xlu1 %6528  ;;  %7180 = vmatprep.subr.bf16.mxu0 %v12738_v19  ;;  %vm16610_vm2 = vmmov %vm16607_vm1  ;;  %v15198_v59 = vld [vmem:[%s16435_s1 + $0x28] sm:$0xff]  }
 0x37e   : > { %v5997_v55 = vsel %vm16608_vm4, %v12231_v53, %v5996_v13  ;;  %v5999_v30 = vsel %vm16609_vm15, %v5935_v61, %v5998_v60  ;;  %v6568_v21 = vrot.slane %v15150_v17, 4  ;;  %v6527_v57 = vpop.permute.xlu0 %6526  ;;  %7181 = vmatpush1.bf16.msra.mxu0 %v12736_v46  ;;  %vm16611_vm4 = vcmask 1031168  }
 0x37f   : > { %6046 = vst [vmem:[#allocation2 + $0x50] sm:$0xff] %v5997_v55  ;;  %6047 = vst [vmem:[#allocation2 + $0x58] sm:$0xff] %v5999_v30  ;;  %v6567_v18 = vrot.slane %v6527_v57, 4  ;;  %6676 = vperm.xlu1 %12211, %v11719_v37   ;;  %7224 = vmatpush1.bf16.msra.mxu1 %v12733_v41  ;;  %v11724_v24 = vcombine.high %v15088_v1, %v5997_v55  ;;  %v11726_v61 = vcombine.high %v15091_v3, %v5999_v30 }
 0x380   : > { %6671 = vperm.xlu0 %12210, %v11718_v14   ;;  %7182 = vmatprep.subr.bf16.mxu0 %v11740_v26  ;;  %vm16612_vm15 = vmmov %vm16611_vm4  ;;  %v11725_v4 = vcombine.low %v15091_v3, %v5999_v30 }
 0x381   : > { %v6590_v53 = vsel %vm16610_vm2, %v6566_v56, %v6567_v18  ;;  %v6592_v7 = vsel %vm16607_vm1, %v6567_v18, %v6568_v21  ;;  %v15167_v31 = vpop.permute.xlu1 %6338  ;;  %7225 = vmatprep.subr.bf16.mxu1 %v11742_v32  ;;  %vm16613_vm2 = vmmov %vm16607_vm1 }
 0x382   : > { %v15176_v27 = vsel %vm16611_vm4, %v15020_v23, %v6590_v53  ;;  %v15179_v56 = vsel %vm16612_vm15, %v6527_v57, %v6592_v7  ;;  %v6378_v48 = vrot.slane %v15167_v31, 4  ;;  %v6337_v19 = vpop.permute.xlu0 %6336  ;;  %7183 = vmatpush1.bf16.msra.mxu0 %v11739_v5  ;;  %v11723_v23 = vcombine.low %v15088_v1, %v5997_v55 }
 0x383   : > { %6648 = vst [vmem:[#allocation2 + $0x290] sm:$0xff] %v15176_v27  ;;  %6649 = vst [vmem:[#allocation2 + $0x298] sm:$0xff] %v15179_v56  ;;  %v6377_v50 = vrot.slane %v6337_v19, 4  ;;  %7226 = vmatpush1.bf16.msra.mxu1 %v11741_v2  ;;  %7184 = vmatprep.subr.bf16.mxu0 %v11724_v24  ;;  %vm16614_vm4 = vcmask 1039360  }
 0x384   : > { %11054 = vperm.xlu0 %12210, %v12176_v15   ;;  %7227 = vmatprep.subr.bf16.mxu1 %v11726_v61  ;;  %vm16615_vm15 = vmmov %vm16614_vm4 }
 0x385   : > { %v6400_v11 = vsel %vm16613_vm2, %v6376_v58, %v6377_v50  ;;  %v6402_v12 = vsel %vm16607_vm1, %v6377_v50, %v6378_v48  ;;  %v15192_v46 = vpop.permute.xlu1 %6108  ;;  %vm16616_vm2 = vmmov %vm16607_vm1 }
 0x386   : > { %v15202_v1 = vsel %vm16614_vm4, %v15033_v42, %v6400_v11  ;;  %v15205_v37 = vsel %vm16615_vm15, %v6337_v19, %v6402_v12  ;;  %v6148_v58 = vrot.slane %v15192_v46, 4  ;;  %v6107_v13 = vpop.permute.xlu0 %6106  ;;  %7185 = vmatpush1.bf16.msra.mxu0 %v11723_v23  ;;  %vm16617_vm4 = vcmask 654336  }
 0x387   : > { %6458 = vst [vmem:[#allocation2 + $0x1f0] sm:$0xff] %v15202_v1  ;;  %6459 = vst [vmem:[#allocation2 + $0x1f8] sm:$0xff] %v15205_v37  ;;  %v6147_v3 = vrot.slane %v6107_v13, 4  ;;  %7228 = vmatpush1.bf16.msra.mxu1 %v11725_v4  ;;  %vm16618_vm15 = vcmask 7168  }
 0x388   : > { %vm16619_vm3 = vmmov %vm16618_vm15 }
 0x389   : > { %v6170_v60 = vsel %vm16616_vm2, %v6146_v52, %v6147_v3  ;;  %v6172_v42 = vsel %vm16607_vm1, %v6147_v3, %v6148_v58  ;;  %v15216_v14 = vpop.permute.xlu1 %5918  ;;  %11803 = vmatmul.mubr.msk.bf16.vlgmr.msra.gmra.mxu0 %vm16617_vm4, %v15198_v59  ;;  %vm16620_vm2 = vmmov %vm16617_vm4  ;;  %v15230_v52 = vld [vmem:[#allocation3] sm:$0xff]  ;;  %vm16622_vm4 = vcmask 15360  }
 0x38a   : > { %v15222_v41 = vsel %vm16618_vm15, %v15054_v22, %v6170_v60  ;;  %v15225_v55 = vsel %vm16619_vm3, %v6107_v13, %v6172_v42  ;;  %v5958_v30 = vrot.slane %v15216_v14, 4  ;;  %v5917_v57 = vpop.permute.xlu0 %5916  ;;  %11804 = vmatmul.mubr.msk.bf16.vlgmr.msra.gmra.mxu1 %vm16620_vm2, %v15198_v59  ;;  %7288 = vmatprep.mubr.bf16.mxu0 %v15230_v52  ;;  %vm16621_vm3 = vmmov %vm16607_vm1 }
 0x38b   : > { %6228 = vst [vmem:[#allocation2 + $0xb0] sm:$0xff] %v15222_v41  ;;  %6229 = vst [vmem:[#allocation2 + $0xb8] sm:$0xff] %v15225_v55  ;;  %v5957_v26 = vrot.slane %v5917_v57, 4  ;;  %7331 = vmatprep.mubr.bf16.mxu1 %v15230_v52 }
 0x38c   : > { %vm16623_vm15 = vmmov %vm16622_vm4 }
 0x38d   : > { %v5980_v22 = vsel %vm16621_vm3, %v5956_v25, %v5957_v26  ;;  %v5982_v18 = vsel %vm16607_vm1, %v5957_v26, %v5958_v30  ;;  %v15242_v32 = vpop.permute.xlu1 %6550  ;;  %vm16624_vm2 = vmmov %vm16607_vm1 }
 0x38e   : > { %v15246_v5 = vsel %vm16622_vm4, %v15069_v62, %v5980_v22  ;;  %v15249_v53 = vsel %vm16623_vm15, %v5917_v57, %v5982_v18  ;;  %v6579_v7 = vrot.slane %v15242_v32, 4  ;;  %v6549_v15 = vpop.permute.xlu0 %6548  ;;  %vm16625_vm3 = vmmov %vm16607_vm1  ;;  %vm16626_vm1 = vcmask 1031168  }
 0x38f   : > { %6038 = vst [vmem:[#allocation2 + $0x10] sm:$0xff] %v15246_v5  ;;  %6039 = vst [vmem:[#allocation2 + $0x18] sm:$0xff] %v15249_v53  ;;  %v6578_v25 = vrot.slane %v6549_v15, 4 }
 0x390   : > { %vm16627_vm4 = vmmov %vm16626_vm1 }
 0x391   : > { %v6610_v2 = vsel %vm16624_vm2, %v6577_v49, %v6578_v25  ;;  %v6612_v62 = vsel %vm16625_vm3, %v6578_v25, %v6579_v7  ;;  %v15260_v24 = vpop.permute.xlu1 %6360  ;;  %vm16628_vm15 = vmmov %vm16624_vm2  ;;  %vm16629_vm3 = vcmask 1039360  }
 0x392   : > { %v6611_v19 = vsel %vm16626_vm1, %v15093_v10, %v6610_v2  ;;  %v6613_v61 = vsel %vm16627_vm4, %v6549_v15, %v6612_v62  ;;  %v6389_v50 = vrot.slane %v15260_v24, 4  ;;  %v6359_v23 = vpop.permute.xlu0 %6358  ;;  %vm16630_vm1 = vmmov %vm16629_vm3  ;;  %v12742_v62 = vld [vmem:[#allocation2 + $0x154] ss:$80 sps:$4 sm:$0xff]  }
 0x393   : > { %6658 = vst [vmem:[#allocation2 + $0x2e0] sm:$0xff] %v6611_v19  ;;  %6659 = vst [vmem:[#allocation2 + $0x2e8] sm:$0xff] %v6613_v61  ;;  %v6388_v11 = vrot.slane %v6359_v23, 4  ;;  %v11791_v12 = vcombine.low %v15176_v27, %v6611_v19  ;;  %v11792_v49 = vcombine.high %v15176_v27, %v6611_v19  ;;  %v11793_v4 = vcombine.low %v15179_v56, %v6613_v61 }
 0x394   : > { %v11794_v13 = vcombine.high %v15179_v56, %v6613_v61  ;;  %vm16631_vm4 = vmmov %vm16624_vm2 }
 0x395   : > { %v6420_v10 = vsel %vm16628_vm15, %v6387_v63, %v6388_v11  ;;  %v6422_v3 = vsel %vm16624_vm2, %v6388_v11, %v6389_v50  ;;  %v15276_v60 = vpop.permute.xlu1 %6130  ;;  %7262 = vmatprep.subr.bf16.mxu0 %v11792_v49  ;;  %vm16632_vm15 = vmmov %vm16624_vm2  ;;  %vm16633_vm2 = vcmask 7168   ;;  %v12740_v11 = vld [vmem:[#allocation2 + $0x150] ss:$80 sps:$4 sm:$0xff]  }
 0x396   : > { %v6421_v42 = vsel %vm16629_vm3, %v15106_v43, %v6420_v10  ;;  %v6423_v27 = vsel %vm16630_vm1, %v6359_v23, %v6422_v3  ;;  %v6159_v57 = vrot.slane %v15276_v60, 4  ;;  %v6129_v26 = vpop.permute.xlu0 %6128  ;;  %7305 = vmatprep.subr.bf16.mxu1 %v11794_v13  ;;  %7263 = vmatpush1.bf16.msra.mxu0 %v11791_v12  ;;  %vm16634_vm3 = vmmov %vm16633_vm2  ;;  %v12745_v23 = vld [vmem:[#allocation2 + $0x15c] ss:$80 sps:$4 sm:$0xff]  }
 0x397   : > { %6468 = vst [vmem:[#allocation2 + $0x240] sm:$0xff] %v6421_v42  ;;  %6469 = vst [vmem:[#allocation2 + $0x248] sm:$0xff] %v6423_v27  ;;  %v6158_v63 = vrot.slane %v6129_v26, 4  ;;  %7306 = vmatpush1.bf16.msra.mxu1 %v11793_v4  ;;  %v11775_v56 = vcombine.low %v15202_v1, %v6421_v42  ;;  %v11776_v22 = vcombine.high %v15202_v1, %v6421_v42  ;;  %v12743_v4 = vld [vmem:[#allocation2 + $0x158] ss:$80 sps:$4 sm:$0xff]  }
 0x398   : > { %v11777_v18 = vcombine.low %v15205_v37, %v6423_v27  ;;  %v11778_v15 = vcombine.high %v15205_v37, %v6423_v27  ;;  %vm16635_vm1 = vmmov %vm16631_vm4 }
 0x399   : > { %v6190_v43 = vsel %vm16631_vm4, %v6157_v36, %v6158_v63  ;;  %v6192_v25 = vsel %vm16632_vm15, %v6158_v63, %v6159_v57  ;;  %v15292_v2 = vpop.permute.xlu1 %5940  ;;  %7264 = vmatprep.subr.bf16.mxu0 %v11776_v22  ;;  %vm16636_vm4 = vmmov %vm16635_vm1  ;;  %vm16637_vm15 = vcmask 15360  }
 0x39a   : > { %v6191_v19 = vsel %vm16633_vm2, %v15123_v6, %v6190_v43  ;;  %v6193_v1 = vsel %vm16634_vm3, %v6129_v26, %v6192_v25  ;;  %v5969_v61 = vrot.slane %v15292_v2, 4  ;;  %v5939_v37 = vpop.permute.xlu0 %5938  ;;  %7307 = vmatprep.subr.bf16.mxu1 %v11778_v15  ;;  %7265 = vmatpush1.bf16.msra.mxu0 %v11775_v56  ;;  %vm16638_vm2 = vmmov %vm16637_vm15 }
 0x39b   : > { %6238 = vst [vmem:[#allocation2 + $0x100] sm:$0xff] %v6191_v19  ;;  %6239 = vst [vmem:[#allocation2 + $0x108] sm:$0xff] %v6193_v1  ;;  %v5968_v36 = vrot.slane %v5939_v37, 4  ;;  %7308 = vmatpush1.bf16.msra.mxu1 %v11777_v18  ;;  %7266 = vmatprep.subr.bf16.mxu0 %v12742_v62  ;;  %v11744_v13 = vcombine.high %v15222_v41, %v6191_v19  ;;  %v11743_v63 = vcombine.low %v15222_v41, %v6191_v19 }
 0x39c   : > { %7309 = vmatprep.subr.bf16.mxu1 %v12745_v23  ;;  %vm16639_vm3 = vmmov %vm16635_vm1  ;;  %v11745_v18 = vcombine.low %v15225_v55, %v6193_v1 }
 0x39d   : > { %v6000_v12 = vsel %vm16635_vm1, %v5967_v0, %v5968_v36  ;;  %v6002_v6 = vsel %vm16636_vm4, %v5968_v36, %v5969_v61  ;;  %v15304_v49 = vpop.permute.xlu1 %6532  ;;  %v11746_v0 = vcombine.high %v15225_v55, %v6193_v1  ;;  %vm16640_vm4 = vcmask 1031168  }
 0x39e   : > { %v6001_v10 = vsel %vm16637_vm15, %v15137_v40, %v6000_v12  ;;  %v6003_v3 = vsel %vm16638_vm2, %v5939_v37, %v6002_v6  ;;  %v6570_v42 = vrot.slane %v15304_v49, 4  ;;  %v6531_v27 = vpop.permute.xlu0 %6530  ;;  %7267 = vmatpush1.bf16.msra.mxu0 %v12740_v11  ;;  %vm16641_vm15 = vmmov %vm16640_vm4 }
 0x39f   : > { %6048 = vst [vmem:[#allocation2 + $0x60] sm:$0xff] %v6001_v10  ;;  %6049 = vst [vmem:[#allocation2 + $0x68] sm:$0xff] %v6003_v3  ;;  %v6569_v26 = vrot.slane %v6531_v27, 4  ;;  %7310 = vmatpush1.bf16.msra.mxu1 %v12743_v4  ;;  %7268 = vmatprep.subr.bf16.mxu0 %v11744_v13  ;;  %v11728_v15 = vcombine.high %v15246_v5, %v6001_v10  ;;  %v11730_v62 = vcombine.high %v15249_v53, %v6003_v3 }
 0x3a0   : > { %7311 = vmatprep.subr.bf16.mxu1 %v11746_v0  ;;  %v11727_v19 = vcombine.low %v15246_v5, %v6001_v10  ;;  %vm16642_vm2 = vmmov %vm16635_vm1  ;;  %v11729_v23 = vcombine.low %v15249_v53, %v6003_v3 }
 0x3a1   : > { %v6594_v40 = vsel %vm16639_vm3, %v6568_v21, %v6569_v26  ;;  %v6596_v56 = vsel %vm16635_vm1, %v6569_v26, %v6570_v42  ;;  %v15319_v22 = vpop.permute.xlu1 %6342  ;;  %vm16643_vm3 = vmmov %vm16635_vm1  ;;  %vm16644_vm1 = vcmask 1039360  }
 0x3a2   : > { %v15325_v43 = vsel %vm16640_vm4, %v15150_v17, %v6594_v40  ;;  %v15328_v41 = vsel %vm16641_vm15, %v6531_v27, %v6596_v56  ;;  %v6380_v25 = vrot.slane %v15319_v22, 4  ;;  %v6341_v21 = vpop.permute.xlu0 %6340  ;;  %7269 = vmatpush1.bf16.msra.mxu0 %v11743_v63  ;;  %vm16645_vm4 = vmmov %vm16644_vm1 }
 0x3a3   : > { %6650 = vst [vmem:[#allocation2 + $0x2a0] sm:$0xff] %v15325_v43  ;;  %6651 = vst [vmem:[#allocation2 + $0x2a8] sm:$0xff] %v15328_v41  ;;  %v6379_v55 = vrot.slane %v6341_v21, 4  ;;  %7312 = vmatpush1.bf16.msra.mxu1 %v11745_v18  ;;  %7270 = vmatprep.subr.bf16.mxu0 %v11728_v15 }
 0x3a4   : > { %7313 = vmatprep.subr.bf16.mxu1 %v11730_v62  ;;  %vm16646_vm15 = vmmov %vm16642_vm2 }
 0x3a5   : > { %v6404_v17 = vsel %vm16642_vm2, %v6378_v48, %v6379_v55  ;;  %v6406_v1 = vsel %vm16643_vm3, %v6379_v55, %v6380_v25  ;;  %v15341_v37 = vpop.permute.xlu1 %6112  ;;  %vm16647_vm3 = vcmask 654336  }
 0x3a6   : > { %v15346_v36 = vsel %vm16644_vm1, %v15167_v31, %v6404_v17  ;;  %v15349_v11 = vsel %vm16645_vm4, %v6341_v21, %v6406_v1  ;;  %v6150_v5 = vrot.slane %v15341_v37, 4  ;;  %v6111_v12 = vpop.permute.xlu0 %6110  ;;  %7271 = vmatpush1.bf16.msra.mxu0 %v11727_v19  ;;  %vm16648_vm1 = vcmask 7168  }
 0x3a7   : > { %6460 = vst [vmem:[#allocation2 + $0x200] sm:$0xff] %v15346_v36  ;;  %6461 = vst [vmem:[#allocation2 + $0x208] sm:$0xff] %v15349_v11  ;;  %v6149_v48 = vrot.slane %v6111_v12, 4  ;;  %7314 = vmatpush1.bf16.msra.mxu1 %v11729_v23 }
 0x3a8   : > { %vm16649_vm4 = vmmov %vm16648_vm1 }
 0x3a9   : > { %v6174_v53 = vsel %vm16646_vm15, %v6148_v58, %v6149_v48  ;;  %v6176_v31 = vsel %vm16642_vm2, %v6149_v48, %v6150_v5  ;;  %v15360_v6 = vpop.permute.xlu1 %5922  ;;  %11805 = vmatmul.mubr.msk.bf16.vlgmr.msra.gmra.mxu0 %vm16647_vm3, %v15198_v59  ;;  %vm16650_vm15 = vmmov %vm16647_vm3 }
 0x3aa   : > { %v15366_v4 = vsel %vm16648_vm1, %v15192_v46, %v6174_v53  ;;  %v15369_v13 = vsel %vm16649_vm4, %v6111_v12, %v6176_v31  ;;  %v5960_v10 = vrot.slane %v15360_v6, 4  ;;  %v5921_v3 = vpop.permute.xlu0 %5920  ;;  %11806 = vmatmul.mubr.msk.bf16.vlgmr.msra.gmra.mxu1 %vm16650_vm15, %v15198_v59  ;;  %7374 = vmatprep.mubr.bf16.mxu0 %v15230_v52  ;;  %vm16651_vm3 = vmmov %vm16642_vm2  ;;  %vm16652_vm1 = vcmask 15360  }
 0x3ab   : > { %6230 = vst [vmem:[#allocation2 + $0xc0] sm:$0xff] %v15366_v4  ;;  %6231 = vst [vmem:[#allocation2 + $0xc8] sm:$0xff] %v15369_v13  ;;  %v5959_v58 = vrot.slane %v5921_v3, 4  ;;  %7417 = vmatprep.mubr.bf16.mxu1 %v15230_v52 }
 0x3ac   : > { %vm16653_vm4 = vmmov %vm16652_vm1 }
 0x3ad   : > { %v5984_v46 = vsel %vm16642_vm2, %v5958_v30, %v5959_v58  ;;  %v5986_v27 = vsel %vm16651_vm3, %v5959_v58, %v5960_v10  ;;  %v15384_v0 = vpop.permute.xlu1 %6554  ;;  %vm16654_vm15 = vmmov %vm16642_vm2  ;;  %vm16655_vm3 = vcmask 1031168  }
 0x3ae   : > { %v15388_v26 = vsel %vm16652_vm1, %v15216_v14, %v5984_v46  ;;  %v15391_v63 = vsel %vm16653_vm4, %v5921_v3, %v5986_v27  ;;  %v6581_v40 = vrot.slane %v15384_v0, 4  ;;  %v6553_v56 = vpop.permute.xlu0 %6552  ;;  %vm16656_vm1 = vmmov %vm16655_vm3 }
 0x3af   : > { %6040 = vst [vmem:[#allocation2 + $0x20] sm:$0xff] %v15388_v26  ;;  %6041 = vst [vmem:[#allocation2 + $0x28] sm:$0xff] %v15391_v63  ;;  %v6580_v30 = vrot.slane %v6553_v56, 4 }
 0x3b0   : > { %vm16657_vm4 = vmmov %vm16642_vm2 }
 0x3b1   : > { %v6614_v18 = vsel %vm16654_vm15, %v6579_v7, %v6580_v30  ;;  %v6616_v14 = vsel %vm16642_vm2, %v6580_v30, %v6581_v40  ;;  %v15402_v15 = vpop.permute.xlu1 %6364  ;;  %vm16658_vm15 = vmmov %vm16642_vm2  ;;  %vm16659_vm2 = vcmask 1039360  }
 0x3b2   : > { %v6615_v21 = vsel %vm16655_vm3, %v15242_v32, %v6614_v18  ;;  %v6617_v62 = vsel %vm16656_vm1, %v6553_v56, %v6616_v14  ;;  %v6391_v55 = vrot.slane %v15402_v15, 4  ;;  %v6363_v19 = vpop.permute.xlu0 %6362  ;;  %vm16660_vm3 = vmmov %vm16659_vm2  ;;  %v12748_v14 = vld [vmem:[#allocation2 + $0x164] ss:$80 sps:$4 sm:$0xff]  }
 0x3b3   : > { %6660 = vst [vmem:[#allocation2 + $0x2f0] sm:$0xff] %v6615_v21  ;;  %6661 = vst [vmem:[#allocation2 + $0x2f8] sm:$0xff] %v6617_v62  ;;  %v6390_v17 = vrot.slane %v6363_v19, 4  ;;  %v11795_v1 = vcombine.low %v15325_v43, %v6615_v21  ;;  %v11796_v7 = vcombine.high %v15325_v43, %v6615_v21  ;;  %v11797_v23 = vcombine.low %v15328_v41, %v6617_v62 }
 0x3b4   : > { %v11798_v12 = vcombine.high %v15328_v41, %v6617_v62  ;;  %vm16661_vm1 = vmmov %vm16657_vm4 }
 0x3b5   : > { %v6424_v32 = vsel %vm16657_vm4, %v6389_v50, %v6390_v17  ;;  %v6426_v48 = vsel %vm16658_vm15, %v6390_v17, %v6391_v55  ;;  %v15418_v53 = vpop.permute.xlu1 %6134  ;;  %7348 = vmatprep.subr.bf16.mxu0 %v11796_v7  ;;  %vm16662_vm4 = vmmov %vm16661_vm1  ;;  %vm16663_vm15 = vcmask 7168   ;;  %v12746_v17 = vld [vmem:[#allocation2 + $0x160] ss:$80 sps:$4 sm:$0xff]  }
 0x3b6   : > { %v6425_v31 = vsel %vm16659_vm2, %v15260_v24, %v6424_v32  ;;  %v6427_v43 = vsel %vm16660_vm3, %v6363_v19, %v6426_v48  ;;  %v6161_v3 = vrot.slane %v15418_v53, 4  ;;  %v6133_v58 = vpop.permute.xlu0 %6132  ;;  %7391 = vmatprep.subr.bf16.mxu1 %v11798_v12  ;;  %7349 = vmatpush1.bf16.msra.mxu0 %v11795_v1  ;;  %vm16664_vm2 = vmmov %vm16663_vm15  ;;  %v12751_v19 = vld [vmem:[#allocation2 + $0x16c] ss:$80 sps:$4 sm:$0xff]  }
 0x3b7   : > { %6470 = vst [vmem:[#allocation2 + $0x250] sm:$0xff] %v6425_v31  ;;  %6471 = vst [vmem:[#allocation2 + $0x258] sm:$0xff] %v6427_v43  ;;  %v6160_v50 = vrot.slane %v6133_v58, 4  ;;  %7392 = vmatpush1.bf16.msra.mxu1 %v11797_v23  ;;  %v11779_v41 = vcombine.low %v15346_v36, %v6425_v31  ;;  %v11780_v46 = vcombine.high %v15346_v36, %v6425_v31  ;;  %v12749_v23 = vld [vmem:[#allocation2 + $0x168] ss:$80 sps:$4 sm:$0xff]  }
 0x3b8   : > { %v11781_v27 = vcombine.low %v15349_v11, %v6427_v43  ;;  %v11782_v56 = vcombine.high %v15349_v11, %v6427_v43  ;;  %vm16665_vm3 = vmmov %vm16661_vm1 }
 0x3b9   : > { %v6194_v24 = vsel %vm16661_vm1, %v6159_v57, %v6160_v50  ;;  %v6196_v30 = vsel %vm16662_vm4, %v6160_v50, %v6161_v3  ;;  %v15434_v18 = vpop.permute.xlu1 %5944  ;;  %7350 = vmatprep.subr.bf16.mxu0 %v11780_v46  ;;  %vm16666_vm4 = vcmask 15360  }
 0x3ba   : > { %v6195_v21 = vsel %vm16663_vm15, %v15276_v60, %v6194_v24  ;;  %v6197_v36 = vsel %vm16664_vm2, %v6133_v58, %v6196_v30  ;;  %v5971_v62 = vrot.slane %v15434_v18, 4  ;;  %v5943_v11 = vpop.permute.xlu0 %5942  ;;  %7393 = vmatprep.subr.bf16.mxu1 %v11782_v56  ;;  %7351 = vmatpush1.bf16.msra.mxu0 %v11779_v41  ;;  %vm16667_vm15 = vmmov %vm16666_vm4 }
 0x3bb   : > { %6240 = vst [vmem:[#allocation2 + $0x110] sm:$0xff] %v6195_v21  ;;  %6241 = vst [vmem:[#allocation2 + $0x118] sm:$0xff] %v6197_v36  ;;  %v5970_v57 = vrot.slane %v5943_v11, 4  ;;  %7394 = vmatpush1.bf16.msra.mxu1 %v11781_v27  ;;  %7352 = vmatprep.subr.bf16.mxu0 %v12748_v14  ;;  %v11748_v12 = vcombine.high %v15366_v4, %v6195_v21  ;;  %v11747_v50 = vcombine.low %v15366_v4, %v6195_v21 }
 0x3bc   : > { %7395 = vmatprep.subr.bf16.mxu1 %v12751_v19  ;;  %vm16668_vm2 = vmmov %vm16661_vm1  ;;  %v11749_v27 = vcombine.low %v15369_v13, %v6197_v36 }
 0x3bd   : > { %v6004_v1 = vsel %vm16665_vm3, %v5969_v61, %v5970_v57  ;;  %v6006_v60 = vsel %vm16661_vm1, %v5970_v57, %v5971_v62  ;;  %v15446_v7 = vpop.permute.xlu1 %6536  ;;  %v11750_v61 = vcombine.high %v15369_v13, %v6197_v36  ;;  %vm16669_vm3 = vmmov %vm16661_vm1  ;;  %vm16670_vm1 = vcmask 1031168  }
 0x3be   : > { %v6005_v32 = vsel %vm16666_vm4, %v15292_v2, %v6004_v1  ;;  %v6007_v48 = vsel %vm16667_vm15, %v5943_v11, %v6006_v60  ;;  %v6572_v31 = vrot.slane %v15446_v7, 4  ;;  %v6535_v43 = vpop.permute.xlu0 %6534  ;;  %7353 = vmatpush1.bf16.msra.mxu0 %v12746_v17  ;;  %vm16671_vm4 = vmmov %vm16670_vm1 }
 0x3bf   : > { %6050 = vst [vmem:[#allocation2 + $0x70] sm:$0xff] %v6005_v32  ;;  %6051 = vst [vmem:[#allocation2 + $0x78] sm:$0xff] %v6007_v48  ;;  %v6571_v58 = vrot.slane %v6535_v43, 4  ;;  %7396 = vmatpush1.bf16.msra.mxu1 %v12749_v23  ;;  %7354 = vmatprep.subr.bf16.mxu0 %v11748_v12  ;;  %v11732_v56 = vcombine.high %v15388_v26, %v6005_v32  ;;  %v11734_v14 = vcombine.high %v15391_v63, %v6007_v48 }
 0x3c0   : > { %7397 = vmatprep.subr.bf16.mxu1 %v11750_v61  ;;  %v11731_v21 = vcombine.low %v15388_v26, %v6005_v32  ;;  %vm16672_vm15 = vmmov %vm16668_vm2  ;;  %v11733_v19 = vcombine.low %v15391_v63, %v6007_v48 }
 0x3c1   : > { %v6598_v2 = vsel %vm16668_vm2, %v6570_v42, %v6571_v58  ;;  %v6600_v41 = vsel %vm16669_vm3, %v6571_v58, %v6572_v31  ;;  %v15461_v46 = vpop.permute.xlu1 %6346  ;;  %vm16673_vm3 = vcmask 1039360  }
 0x3c2   : > { %v15467_v24 = vsel %vm16670_vm1, %v15304_v49, %v6598_v2  ;;  %v15470_v4 = vsel %vm16671_vm4, %v6535_v43, %v6600_v41  ;;  %v6382_v30 = vrot.slane %v15461_v46, 4  ;;  %v6345_v42 = vpop.permute.xlu0 %6344  ;;  %7355 = vmatpush1.bf16.msra.mxu0 %v11747_v50  ;;  %vm16674_vm1 = vmmov %vm16673_vm3 }
 0x3c3   : > { %6652 = vst [vmem:[#allocation2 + $0x2b0] sm:$0xff] %v15467_v24  ;;  %6653 = vst [vmem:[#allocation2 + $0x2b8] sm:$0xff] %v15470_v4  ;;  %v6381_v13 = vrot.slane %v6345_v42, 4  ;;  %7398 = vmatpush1.bf16.msra.mxu1 %v11749_v27  ;;  %7356 = vmatprep.subr.bf16.mxu0 %v11732_v56 }
 0x3c4   : > { %7399 = vmatprep.subr.bf16.mxu1 %v11734_v14  ;;  %vm16675_vm4 = vmmov %vm16668_vm2 }
 0x3c5   : > { %v6408_v49 = vsel %vm16672_vm15, %v6380_v25, %v6381_v13  ;;  %v6410_v36 = vsel %vm16668_vm2, %v6381_v13, %v6382_v30  ;;  %v15483_v11 = vpop.permute.xlu1 %6116  ;;  %vm16676_vm15 = vmmov %vm16668_vm2  ;;  %vm16677_vm2 = vcmask 654336  }
 0x3c6   : > { %v15488_v57 = vsel %vm16673_vm3, %v15319_v22, %v6408_v49  ;;  %v15491_v17 = vsel %vm16674_vm1, %v6345_v42, %v6410_v36  ;;  %v6152_v26 = vrot.slane %v15483_v11, 4  ;;  %v6115_v1 = vpop.permute.xlu0 %6114  ;;  %7357 = vmatpush1.bf16.msra.mxu0 %v11731_v21  ;;  %vm16678_vm3 = vcmask 7168  }
 0x3c7   : > { %6462 = vst [vmem:[#allocation2 + $0x210] sm:$0xff] %v15488_v57  ;;  %6463 = vst [vmem:[#allocation2 + $0x218] sm:$0xff] %v15491_v17  ;;  %v6151_v25 = vrot.slane %v6115_v1, 4  ;;  %7400 = vmatpush1.bf16.msra.mxu1 %v11733_v19 }
 0x3c8   : > { %vm16679_vm1 = vmmov %vm16678_vm3 }
 0x3c9   : > { %v6178_v63 = vsel %vm16675_vm4, %v6150_v5, %v6151_v25  ;;  %v6180_v22 = vsel %vm16676_vm15, %v6151_v25, %v6152_v26  ;;  %v15502_v60 = vpop.permute.xlu1 %6558  ;;  %11807 = vmatmul.mubr.msk.bf16.vlgmr.msra.gmra.mxu0 %vm16677_vm2, %v15198_v59  ;;  %vm16680_vm4 = vmmov %vm16677_vm2 }
 0x3ca   : > { %v15508_v23 = vsel %vm16678_vm3, %v15341_v37, %v6178_v63  ;;  %v15511_v12 = vsel %vm16679_vm1, %v6115_v1, %v6180_v22  ;;  %v6583_v32 = vrot.slane %v15502_v60, 4  ;;  %v6557_v48 = vpop.permute.xlu0 %6556  ;;  %11808 = vmatmul.mubr.msk.bf16.vlgmr.msra.gmra.mxu1 %vm16680_vm4, %v15198_v59  ;;  %7460 = vmatprep.mubr.bf16.mxu0 %v15230_v52  ;;  %vm16681_vm2 = vmmov %vm16676_vm15  ;;  %vm16682_vm3 = vcmask 1031168   ;;  %v12754_v22 = vld [vmem:[#allocation2 + $0x174] ss:$80 sps:$4 sm:$0xff]  }
 0x3cb   : > { %6232 = vst [vmem:[#allocation2 + $0xd0] sm:$0xff] %v15508_v23  ;;  %6233 = vst [vmem:[#allocation2 + $0xd8] sm:$0xff] %v15511_v12  ;;  %v6582_v5 = vrot.slane %v6557_v48, 4  ;;  %7503 = vmatprep.mubr.bf16.mxu1 %v15230_v52 }
 0x3cc   : > { %vm16683_vm1 = vmmov %vm16682_vm3 }
 0x3cd   : > { %v6618_v37 = vsel %vm16676_vm15, %v6581_v40, %v6582_v5  ;;  %v6620_v43 = vsel %vm16681_vm2, %v6582_v5, %v6583_v32  ;;  %v15526_v61 = vpop.permute.xlu1 %6368  ;;  %vm16684_vm4 = vmmov %vm16681_vm2 }
 0x3ce   : > { %v6619_v59 = vsel %vm16682_vm3, %v15384_v0, %v6618_v37  ;;  %v6621_v58 = vsel %vm16683_vm1, %v6557_v48, %v6620_v43  ;;  %v6393_v50 = vrot.slane %v15526_v61, 4  ;;  %v6367_v2 = vpop.permute.xlu0 %6366  ;;  %vm16685_vm15 = vmmov %vm16681_vm2  ;;  %vm16686_vm2 = vcmask 1039360   ;;  %v12752_v43 = vld [vmem:[#allocation2 + $0x170] ss:$80 sps:$4 sm:$0xff]  }
 0x3cf   : > { %6662 = vst [vmem:[#allocation2 + $0x300] sm:$0xff] %v6619_v59  ;;  %6663 = vst [vmem:[#allocation2 + $0x308] sm:$0xff] %v6621_v58  ;;  %v6392_v52 = vrot.slane %v6367_v2, 4  ;;  %v11799_v41 = vcombine.low %v15467_v24, %v6619_v59  ;;  %v11800_v40 = vcombine.high %v15467_v24, %v6619_v59  ;;  %v11801_v27 = vcombine.low %v15470_v4, %v6621_v58 }
 0x3d0   : > { %v11802_v56 = vcombine.high %v15470_v4, %v6621_v58  ;;  %vm16687_vm3 = vmmov %vm16686_vm2 }
 0x3d1   : > { %v6428_v0 = vsel %vm16684_vm4, %v6391_v55, %v6392_v52  ;;  %v6430_v42 = vsel %vm16685_vm15, %v6392_v52, %v6393_v50  ;;  %v15542_v14 = vpop.permute.xlu1 %5926  ;;  %7434 = vmatprep.subr.bf16.mxu0 %v11800_v40  ;;  %vm16688_vm1 = vmmov %vm16684_vm4  ;;  %vm16690_vm15 = vcmask 15360  }
 0x3d2   : > { %v6429_v13 = vsel %vm16686_vm2, %v15402_v15, %v6428_v0  ;;  %v6431_v24 = vsel %vm16687_vm3, %v6367_v2, %v6430_v42  ;;  %v5962_v21 = vrot.slane %v15542_v14, 4  ;;  %v5925_v49 = vpop.permute.xlu0 %5924  ;;  %7477 = vmatprep.subr.bf16.mxu1 %v11802_v56  ;;  %7435 = vmatpush1.bf16.msra.mxu0 %v11799_v41  ;;  %vm16689_vm4 = vmmov %vm16688_vm1  ;;  %v12755_v2 = vld [vmem:[#allocation2 + $0x178] ss:$80 sps:$4 sm:$0xff]  }
 0x3d3   : > { %6472 = vst [vmem:[#allocation2 + $0x260] sm:$0xff] %v6429_v13  ;;  %6473 = vst [vmem:[#allocation2 + $0x268] sm:$0xff] %v6431_v24  ;;  %v5961_v55 = vrot.slane %v5925_v49, 4  ;;  %7478 = vmatpush1.bf16.msra.mxu1 %v11801_v27  ;;  %v11783_v4 = vcombine.low %v15488_v57, %v6429_v13  ;;  %v11784_v36 = vcombine.high %v15488_v57, %v6429_v13 }
 0x3d4   : > { %v11785_v19 = vcombine.low %v15491_v17, %v6431_v24  ;;  %v11786_v1 = vcombine.high %v15491_v17, %v6431_v24  ;;  %vm16691_vm2 = vmmov %vm16690_vm15 }
 0x3d5   : > { %v5988_v15 = vsel %vm16688_vm1, %v5960_v10, %v5961_v55  ;;  %v5990_v25 = vsel %vm16689_vm4, %v5961_v55, %v5962_v21  ;;  %v15558_v63 = vpop.permute.xlu1 %6138  ;;  %7436 = vmatprep.subr.bf16.mxu0 %v11784_v36  ;;  %v12757_v10 = vld [vmem:[#allocation2 + $0x17c] ss:$80 sps:$4 sm:$0xff]   ;;  %vm16692_vm3 = vmmov %vm16688_vm1  ;;  %vm16693_vm4 = vcmask 7168  }
 0x3d6   : > { %v5989_v48 = vsel %vm16690_vm15, %v15360_v6, %v5988_v15  ;;  %v15563_v57 = vsel %vm16691_vm2, %v5925_v49, %v5990_v25  ;;  %v6163_v17 = vrot.slane %v15558_v63, 4  ;;  %v6137_v5 = vpop.permute.xlu0 %6136  ;;  %7479 = vmatprep.subr.bf16.mxu1 %v11786_v1  ;;  %7437 = vmatpush1.bf16.msra.mxu0 %v11783_v4  ;;  %vm16694_vm15 = vmmov %vm16693_vm4 }
 0x3d7   : > { %6042 = vst [vmem:[#allocation2 + $0x30] sm:$0xff] %v5989_v48  ;;  %6043 = vst [vmem:[#allocation2 + $0x38] sm:$0xff] %v15563_v57  ;;  %v6162_v37 = vrot.slane %v6137_v5, 4  ;;  %7480 = vmatpush1.bf16.msra.mxu1 %v11785_v19  ;;  %7438 = vmatprep.subr.bf16.mxu0 %v12754_v22 }
 0x3d8   : > { %7481 = vmatprep.subr.bf16.mxu1 %v12757_v10  ;;  %vm16695_vm2 = vmmov %vm16688_vm1 }
 0x3d9   : > { %v6198_v6 = vsel %vm16692_vm3, %v6161_v3, %v6162_v37  ;;  %v6200_v59 = vsel %vm16688_vm1, %v6162_v37, %v6163_v17  ;;  %v15573_v58 = vpop.permute.xlu1 %5948  ;;  %vm16696_vm3 = vmmov %vm16688_vm1  ;;  %vm16697_vm1 = vcmask 15360  }
 0x3da   : > { %v6199_v52 = vsel %vm16693_vm4, %v15418_v53, %v6198_v6  ;;  %v6201_v41 = vsel %vm16694_vm15, %v6137_v5, %v6200_v59  ;;  %v5973_v40 = vrot.slane %v15573_v58, 4  ;;  %v5947_v27 = vpop.permute.xlu0 %5946  ;;  %7439 = vmatpush1.bf16.msra.mxu0 %v12752_v43  ;;  %vm16698_vm4 = vmmov %vm16697_vm1 }
 0x3db   : > { %6242 = vst [vmem:[#allocation2 + $0x120] sm:$0xff] %v6199_v52  ;;  %6243 = vst [vmem:[#allocation2 + $0x128] sm:$0xff] %v6201_v41  ;;  %v5972_v56 = vrot.slane %v5947_v27, 4  ;;  %7482 = vmatpush1.bf16.msra.mxu1 %v12755_v2  ;;  %v11751_v3 = vcombine.low %v15508_v23, %v6199_v52  ;;  %v11752_v0 = vcombine.high %v15508_v23, %v6199_v52  ;;  %v12760_v2 = vld [vmem:[#allocation2 + $0x288] ss:$80 sps:$4 sm:$0xff]  }
 0x3dc   : > { %v11753_v42 = vcombine.low %v15511_v12, %v6201_v41  ;;  %v11754_v13 = vcombine.high %v15511_v12, %v6201_v41  ;;  %vm16699_vm15 = vmmov %vm16695_vm2  ;;  %v12763_v52 = vld [vmem:[#allocation2 + $0x290] ss:$80 sps:$4 sm:$0xff]  }
 0x3dd   : > { %v6008_v53 = vsel %vm16695_vm2, %v5971_v62, %v5972_v56  ;;  %v6010_v24 = vsel %vm16696_vm3, %v5972_v56, %v5973_v40  ;;  %v15589_v49 = vpop.permute.xlu1 %12238  ;;  %7440 = vmatprep.subr.bf16.mxu0 %v11752_v0  ;;  %vm16700_vm3 = vcmask 1039360   ;;  %v12761_v0 = vld [vmem:[#allocation2 + $0x28c] ss:$80 sps:$4 sm:$0xff]  }
 0x3de   : > { %v6009_v55 = vsel %vm16697_vm1, %v15434_v18, %v6008_v53  ;;  %v6011_v23 = vsel %vm16698_vm4, %v5947_v27, %v6010_v24  ;;  %v12241_v4 = vunpack.i.h.bf16 %v15589_v49  ;;  %v12240_v12 = vunpack.i.l.bf16 %v15589_v49  ;;  %v15596_v36 = vpop.permute.xlu0 %12233  ;;  %7483 = vmatprep.subr.bf16.mxu1 %v11754_v13  ;;  %7441 = vmatpush1.bf16.msra.mxu0 %v11751_v3  ;;  %vm16701_vm1 = vmmov %vm16700_vm3  ;;  %v12758_v3 = vld [vmem:[#allocation2 + $0x284] ss:$80 sps:$4 sm:$0xff]   ;;  %v12769_v53 = vld [vmem:[#allocation2 + $0x1f0] ss:$80 sps:$4 sm:$0xff]  }
 0x3df   : > { %6052 = vst [vmem:[#allocation2 + $0x80] sm:$0xff] %v6009_v55  ;;  %6053 = vst [vmem:[#allocation2 + $0x88] sm:$0xff] %v6011_v23  ;;  %v12236_v62 = vunpack.i.h.bf16 %v15596_v36  ;;  %v12235_v19 = vunpack.i.l.bf16 %v15596_v36  ;;  %7484 = vmatpush1.bf16.msra.mxu1 %v11753_v42  ;;  %v11735_v1 = vcombine.low %v5989_v48, %v6009_v55  ;;  %v11736_v15 = vcombine.high %v5989_v48, %v6009_v55 }
 0x3e0   : > { %v15602_v18 = vrot.slane %v12241_v4, 4  ;;  %v15606_v25 = vrot.slane %v12240_v12, 4  ;;  %v11737_v22 = vcombine.low %v15563_v57, %v6011_v23  ;;  %v11738_v5 = vcombine.high %v15563_v57, %v6011_v23  ;;  %vm16702_vm4 = vmmov %vm16695_vm2  ;;  %v12764_v23 = vld [vmem:[#allocation2 + $0x1e4] ss:$80 sps:$4 sm:$0xff]  }
 0x3e1   : > { %v15612_v10 = vrot.slane %v12236_v62, 4  ;;  %v15616_v37 = vrot.slane %v12235_v19, 4  ;;  %v15618_v48 = vpop.permute.xlu1 %6140  ;;  %7442 = vmatprep.subr.bf16.mxu0 %v11736_v15 }
 0x3e2   : > { %v6432_v43 = vsel %vm16699_vm15, %v6393_v50, %v15602_v18  ;;  %v6412_v57 = vsel %vm16695_vm2, %v6382_v30, %v15606_v25  ;;  %v6164_v6 = vrot.slane %v15618_v48, 4  ;;  %v15629_v59 = vpop.permute.xlu0 %6118  ;;  %7485 = vmatprep.subr.bf16.mxu1 %v11738_v5  ;;  %7443 = vmatpush1.bf16.msra.mxu0 %v11735_v1  ;;  %vm16703_vm15 = vmmov %vm16695_vm2  ;;  %vm16704_vm2 = vcmask 1031168   ;;  %v15678_v1 = vld [vmem:[#allocation3] sm:$0xff]  ;;  %v12767_v5 = vld [vmem:[#allocation2 + $0x1ec] ss:$80 sps:$4 sm:$0xff]  }
 0x3e3   : > { %v6433_v41 = vsel %vm16700_vm3, %v15526_v61, %v6432_v43  ;;  %v6413_v27 = vsel %vm16701_vm1, %v15461_v46, %v6412_v57  ;;  %v6622_v50 = vsel %vm16702_vm4, %v6583_v32, %v15612_v10  ;;  %v6602_v30 = vsel %vm16703_vm15, %v6572_v31, %v15616_v37  ;;  %7486 = vmatpush1.bf16.msra.mxu1 %v11737_v22  ;;  %vm16705_vm3 = vmmov %vm16704_vm2  ;;  %v12772_v43 = vld [vmem:[#allocation2 + $0x148] ss:$80 sps:$4 sm:$0xff]  }
 0x3e4   : > { %6474 = vst [vmem:[#allocation2 + $0x270] sm:$0xff] %v6433_v41  ;;  %6464 = vst [vmem:[#allocation2 + $0x220] sm:$0xff] %v6413_v27  ;;  %v6623_v56 = vsel %vm16704_vm2, %v15502_v60, %v6622_v50  ;;  %v6603_v61 = vsel %vm16705_vm3, %v15446_v7, %v6602_v30  ;;  %v6153_v32 = vrot.slane %v15629_v59, 4  ;;  %8043 = vmatprep.subr.bf16.mxu0 %v12760_v2  ;;  %8086 = vmatprep.subr.bf16.mxu1 %v12763_v52  ;;  %v13219_v7 = vld [vmem:[%s16435_s1 + $0x28] sm:$0xff]   ;;  %vm16708_vm15 = vcmask 654336  }
 0x3e5   : > { %vm16706_vm1 = vmmov %vm16702_vm4  ;;  %6664 = vst [vmem:[#allocation2 + $0x310] sm:$0xff] %v6623_v56  ;;  %vm16707_vm4 = vcmask 7168   ;;  %v15655_v60 = vpop.permute.xlu1 %5950  ;;  %11809 = vmatmul.mubr.msk.bf16.vlgmr.msra.gmra.mxu0 %vm16708_vm15, %v13219_v7  ;;  %v12770_v50 = vld [vmem:[#allocation2 + $0x144] ss:$80 sps:$4 sm:$0xff]   ;;  %v12773_v56 = vld [vmem:[#allocation2 + $0x14c] ss:$80 sps:$4 sm:$0xff]  }
 0x3e6   : > { %v6202_v46 = vsel %vm16706_vm1, %v6163_v17, %v6164_v6  ;;  %6654 = vst [vmem:[#allocation2 + $0x2c0] sm:$0xff] %v6603_v61  ;;  %v12766_v17 = vld [vmem:[#allocation2 + $0x1e8] ss:$80 sps:$4 sm:$0xff]   ;;  %vm16709_vm2 = vmmov %vm16706_vm1  ;;  %v5974_v13 = vrot.slane %v15655_v60, 4  ;;  %8044 = vmatpush1.bf16.msra.mxu0 %v12758_v3  ;;  %8069 = vmatprep.mubr.bf16.mxu0 %v15678_v1 }
 0x3e7   : > { %v6203_v31 = vsel %vm16707_vm4, %v15558_v63, %v6202_v46  ;;  %v6182_v42 = vsel %vm16709_vm2, %v6152_v26, %v6153_v32  ;;  %v15667_v63 = vpop.permute.xlu0 %5928  ;;  %vm16710_vm3 = vmmov %vm16708_vm15  ;;  %8045 = vmatprep.subr.bf16.mxu0 %v12766_v17  ;;  %vm16713_vm15 = vcmask 15360  }
 0x3e8   : > { %6244 = vst [vmem:[#allocation2 + $0x130] sm:$0xff] %v6203_v31  ;;  %11810 = vmatmul.mubr.msk.bf16.vlgmr.msra.gmra.mxu1 %vm16710_vm3, %v13219_v7  ;;  %vm16711_vm1 = vmmov %vm16707_vm4  ;;  %v5963_v55 = vrot.slane %v15667_v63, 4  ;;  %v12778_v31 = vld [vmem:[#allocation2 + $0xa8] ss:$80 sps:$4 sm:$0xff]  }
 0x3e9   : > { %v6183_v24 = vsel %vm16711_vm1, %v15483_v11, %v6182_v42  ;;  %8087 = vmatpush1.bf16.msra.mxu1 %v12761_v0  ;;  %vm16712_vm4 = vmmov %vm16709_vm2  ;;  %v12249_v22 = vpop.permute.xlu1 %12248  ;;  %8112 = vmatprep.mubr.bf16.mxu1 %v15678_v1 }
 0x3ea   : > { %6234 = vst [vmem:[#allocation2 + $0xe0] sm:$0xff] %v6183_v24  ;;  %v6012_v26 = vsel %vm16712_vm4, %v5973_v40, %v5974_v13  ;;  %8088 = vmatprep.subr.bf16.mxu1 %v12769_v53  ;;  %v5992_v15 = vsel %vm16709_vm2, %v5962_v21, %v5963_v55  ;;  %vm16714_vm3 = vmmov %vm16713_vm15  ;;  %v12251_v57 = vunpack.i.h.bf16 %v12249_v22  ;;  %v12250_v2 = vunpack.i.l.bf16 %v12249_v22  ;;  %8046 = vmatpush1.bf16.msra.mxu0 %v12764_v23 }
 0x3eb   : > { %v6013_v11 = vsel %vm16713_vm15, %v15573_v58, %v6012_v26  ;;  %v5993_v40 = vsel %vm16714_vm3, %v15542_v14, %v5992_v15  ;;  %v12244_v52 = vpop.permute.xlu0 %12243  ;;  %v12775_v58 = vld [vmem:[#allocation2 + $0x150] ss:$80 sps:$4 sm:$0xff]   ;;  %8047 = vmatprep.subr.bf16.mxu0 %v12772_v43  ;;  %vm16715_vm1 = vmmov %vm16709_vm2  ;;  %vm16717_vm15 = vcmask 1039360   ;;  %v12779_v15 = vld [vmem:[#allocation2 + $0xac] ss:$80 sps:$4 sm:$0xff]  }
 0x3ec   : > { %6054 = vst [vmem:[#allocation2 + $0x90] sm:$0xff] %v6013_v11  ;;  %6044 = vst [vmem:[#allocation2 + $0x40] sm:$0xff] %v5993_v40  ;;  %v12246_v41 = vunpack.i.h.bf16 %v12244_v52  ;;  %v12245_v27 = vunpack.i.l.bf16 %v12244_v52  ;;  %v6395_v21 = vrot.slane %v12251_v57, 4  ;;  %v6384_v30 = vrot.slane %v12250_v2, 4  ;;  %v12781_v14 = vld [vmem:[#allocation2 + $0xb0] ss:$80 sps:$4 sm:$0xff]  }
 0x3ed   : > { %8089 = vmatpush1.bf16.msra.mxu1 %v12767_v5  ;;  %v12259_v3 = vpop.permute.xlu1 %12258  ;;  %vm16716_vm4 = vmmov %vm16715_vm1  ;;  %v12785_v2 = vld [vmem:[#allocation2 + $0x4] ss:$80 sps:$4 sm:$0xff]   ;;  %v12782_v52 = vld [vmem:[#allocation2 + $0xc] ss:$80 sps:$4 sm:$0xff]  }
 0x3ee   : > { %8090 = vmatprep.subr.bf16.mxu1 %v12775_v58  ;;  %v6585_v61 = vrot.slane %v12246_v41, 4  ;;  %v6574_v46 = vrot.slane %v12245_v27, 4  ;;  %v6414_v0 = vsel %vm16715_vm1, %v15606_v25, %v6384_v30  ;;  %v6434_v7 = vsel %vm16716_vm4, %v15602_v18, %v6395_v21  ;;  %8048 = vmatpush1.bf16.msra.mxu0 %v12770_v50  ;;  %vm16718_vm2 = vmmov %vm16717_vm15  ;;  %v12776_v18 = vld [vmem:[#allocation2 + $0xa4] ss:$80 sps:$4 sm:$0xff]   ;;  %v12790_v27 = vld [vmem:[#allocation2 + $0x2a0] ss:$80 sps:$4 sm:$0xff]  }
 0x3ef   : > { %v12261_v17 = vunpack.i.h.bf16 %v12259_v3  ;;  %v12260_v42 = vunpack.i.l.bf16 %v12259_v3  ;;  %v12254_v53 = vpop.permute.xlu0 %12253  ;;  %v6415_v24 = vsel %vm16717_vm15, %v12240_v12, %v6414_v0  ;;  %v6435_v26 = vsel %vm16718_vm2, %v12241_v4, %v6434_v7  ;;  %vm16719_vm3 = vmmov %vm16715_vm1  ;;  %8049 = vmatprep.subr.bf16.mxu0 %v12778_v31  ;;  %v15741_v50 = vld [vmem:[#allocation2 + $0x1f8] ss:$80 sps:$4 sm:$0xff]   ;;  %v15751_v21 = vld [vmem:[#allocation2 + $0x1f4] ss:$80 sps:$4 sm:$0xff]  }
 0x3f0   : > { %v6604_v23 = vsel %vm16719_vm3, %v15616_v37, %v6574_v46  ;;  %v6624_v25 = vsel %vm16715_vm1, %v15612_v10, %v6585_v61  ;;  %6465 = vst [vmem:[#allocation2 + $0x228] sm:$0xff] %v6415_v24  ;;  %6475 = vst [vmem:[#allocation2 + $0x278] sm:$0xff] %v6435_v26  ;;  %vm16720_vm4 = vcmask 1031168   ;;  %v12787_v37 = vld [vmem:[#allocation2 + $0x8] ss:$80 sps:$4 sm:$0xff]   ;;  %v12256_v10 = vunpack.i.h.bf16 %v12254_v53 }
 0x3f1   : > { %8091 = vmatpush1.bf16.msra.mxu1 %v12773_v56  ;;  %v6605_v11 = vsel %vm16720_vm4, %v12235_v19, %v6604_v23  ;;  %vm16721_vm15 = vmmov %vm16720_vm4  ;;  %v5975_v12 = vrot.slane %v12261_v17, 4  ;;  %v5964_v4 = vrot.slane %v12260_v42, 4  ;;  %v12255_v22 = vunpack.i.l.bf16 %v12254_v53  ;;  %v12798_v30 = vld [vmem:[#allocation2 + $0x1fc] ss:$80 sps:$4 sm:$0xff]   ;;  %v12806_v56 = vld [vmem:[#allocation2 + $0x160] ss:$80 sps:$4 sm:$0xff]  }
 0x3f2   : > { %v6625_v49 = vsel %vm16721_vm15, %v12236_v62, %v6624_v25  ;;  %8092 = vmatprep.subr.bf16.mxu1 %v12781_v14  ;;  %6655 = vst [vmem:[#allocation2 + $0x2c8] sm:$0xff] %v6605_v11  ;;  %vm16722_vm2 = vmmov %vm16715_vm1  ;;  %8050 = vmatpush1.bf16.msra.mxu0 %v12776_v18  ;;  %v12784_v62 = vld [vmem:[#allocation2 + $0x10] ss:$80 sps:$4 sm:$0xff]   ;;  %v6165_v40 = vrot.slane %v12256_v10, 4  ;;  %v15756_v61 = vld [vmem:[#allocation2 + $0x154] ss:$80 sps:$4 sm:$0xff]  }
 0x3f3   : > { %6665 = vst [vmem:[#allocation2 + $0x318] sm:$0xff] %v6625_v49  ;;  %v6014_v5 = vsel %vm16722_vm2, %v5974_v13, %v5975_v12  ;;  %vm16723_vm3 = vmmov %vm16715_vm1  ;;  %vm16724_vm1 = vcmask 15360   ;;  %v6154_v57 = vrot.slane %v12255_v22, 4  ;;  %8051 = vmatprep.subr.bf16.mxu0 %v12787_v37  ;;  %v15724_v13 = vld [vmem:[%s16435_s1 + $0x30] sm:$0xff]   ;;  %v12804_v46 = vld [vmem:[#allocation2 + $0x15c] ss:$80 sps:$4 sm:$0xff]  }
 0x3f4   : > { %v5994_v36 = vsel %vm16723_vm3, %v5963_v55, %v5964_v4  ;;  %v6015_v19 = vsel %vm16724_vm1, %v15655_v60, %v6014_v5  ;;  %vm16725_vm4 = vmmov %vm16724_vm1  ;;  %v15726_v55 = vld [vmem:[#allocation2 + $0x298] ss:$80 sps:$4 sm:$0xff]   ;;  %vm16727_vm3 = vcmask 7168   ;;  %v12812_v31 = vld [vmem:[#allocation2 + $0xc0] ss:$80 sps:$4 sm:$0xff]  }
 0x3f5   : > { %v5995_v43 = vsel %vm16725_vm4, %v15667_v63, %v5994_v36  ;;  %8093 = vmatpush1.bf16.msra.mxu1 %v12779_v15  ;;  %6055 = vst [vmem:[#allocation2 + $0x98] sm:$0xff] %v6015_v19  ;;  %vm16726_vm15 = vmmov %vm16722_vm2  ;;  %v6184_v63 = vsel %vm16722_vm2, %v6153_v32, %v6154_v57  ;;  %v12788_v32 = vld [vmem:[#allocation2 + $0x29c] ss:$80 sps:$4 sm:$0xff]   ;;  %vm16729_vm4 = vcmask 654336   ;;  %v15759_v3 = vld [vmem:[#allocation2 + $0xb8] ss:$80 sps:$4 sm:$0xff]  }
 0x3f6   : > { %6045 = vst [vmem:[#allocation2 + $0x48] sm:$0xff] %v5995_v43  ;;  %8094 = vmatprep.subr.bf16.mxu1 %v12784_v62  ;;  %v6204_v60 = vsel %vm16726_vm15, %v6164_v6, %v6165_v40  ;;  %vm16728_vm1 = vmmov %vm16727_vm3  ;;  %8052 = vmatpush1.bf16.msra.mxu0 %v12785_v2  ;;  %v15739_v6 = vld [vmem:[#allocation2 + $0x294] ss:$80 sps:$4 sm:$0xff]   ;;  %v15765_v0 = vld [vmem:[#allocation2 + $0x18] ss:$80 sps:$4 sm:$0xff]  }
 0x3f7   : > { %v6205_v58 = vsel %vm16727_vm3, %v15618_v48, %v6204_v60  ;;  %v6185_v41 = vsel %vm16728_vm1, %v15629_v59, %v6184_v63  ;;  %8129 = vmatprep.subr.bf16.mxu0 %v15726_v55  ;;  %vm16730_vm15 = vmmov %vm16729_vm4  ;;  %v12800_v48 = vld [vmem:[#allocation2 + $0x200] ss:$80 sps:$4 sm:$0xff]   ;;  %v15749_v59 = vld [vmem:[#allocation2 + $0x158] ss:$80 sps:$4 sm:$0xff]  }
 0x3f8   : > { %6245 = vst [vmem:[#allocation2 + $0x138] sm:$0xff] %v6205_v58  ;;  %6235 = vst [vmem:[#allocation2 + $0xe8] sm:$0xff] %v6185_v41  ;;  %v15762_v14 = vld [vmem:[#allocation2 + $0xb4] ss:$80 sps:$4 sm:$0xff]   ;;  %v12810_v7 = vld [vmem:[#allocation2 + $0xbc] ss:$80 sps:$4 sm:$0xff]  }
 0x3f9   : > { %8095 = vmatpush1.bf16.msra.mxu1 %v12782_v52  ;;  %11894 = vmatmul.mubr.msk.bf16.vlgmr.msra.gmra.mxu0 %vm16729_vm4, %v15724_v13  ;;  %v12818_v17 = vld [vmem:[#allocation2 + $0x20] ss:$80 sps:$4 sm:$0xff]   ;;  %v15769_v42 = vld [vmem:[#allocation2 + $0x14] ss:$80 sps:$4 sm:$0xff]   ;;  %v15771_v53 = vld [vmem:[#allocation2 + $0x2a8] ss:$80 sps:$4 sm:$0xff]  }
 0x3fa   : > { %8172 = vmatprep.subr.bf16.mxu1 %v12790_v27  ;;  %8130 = vmatpush1.bf16.msra.mxu0 %v15739_v6  ;;  %v12816_v24 = vld [vmem:[#allocation2 + $0x1c] ss:$80 sps:$4 sm:$0xff]   ;;  %v12824_v26 = vld [vmem:[#allocation2 + $0x2b0] ss:$80 sps:$4 sm:$0xff]   ;;  %v15775_v23 = vld [vmem:[#allocation2 + $0x2a4] ss:$80 sps:$4 sm:$0xff]  }
 0x3fb   : > { %8131 = vmatprep.subr.bf16.mxu0 %v15741_v50  ;;  %8155 = vmatprep.mubr.bf16.mxu0 %v15678_v1  ;;  %v15777_v25 = vld [vmem:[#allocation2 + $0x208] ss:$80 sps:$4 sm:$0xff]   ;;  %v12822_v18 = vld [vmem:[#allocation2 + $0x2ac] ss:$80 sps:$4 sm:$0xff]   ;;  %vm16731_vm2 = vmmov %vm16729_vm4 }
 0x3fc   : > { %11895 = vmatmul.mubr.msk.bf16.vlgmr.msra.gmra.mxu1 %vm16730_vm15, %v15724_v13  ;;  %vm16732_vm3 = vmmov %vm16731_vm2  ;;  %v12830_v11 = vld [vmem:[#allocation2 + $0x210] ss:$80 sps:$4 sm:$0xff]   ;;  %v15785_v49 = vld [vmem:[#allocation2 + $0x204] ss:$80 sps:$4 sm:$0xff]  }
 0x3fd   : > { %8173 = vmatpush1.bf16.msra.mxu1 %v12788_v32  ;;  %8198 = vmatprep.mubr.bf16.mxu1 %v15678_v1  ;;  %v15787_v12 = vld [vmem:[#allocation2 + $0x168] ss:$80 sps:$4 sm:$0xff]   ;;  %v12828_v4 = vld [vmem:[#allocation2 + $0x20c] ss:$80 sps:$4 sm:$0xff]   ;;  %v12836_v15 = vld [vmem:[#allocation2 + $0x170] ss:$80 sps:$4 sm:$0xff]  }
 0x3fe   : > { %8174 = vmatprep.subr.bf16.mxu1 %v12800_v48  ;;  %8132 = vmatpush1.bf16.msra.mxu0 %v15751_v21  ;;  %v15793_v37 = vld [vmem:[#allocation2 + $0x164] ss:$80 sps:$4 sm:$0xff]   ;;  %v12834_v10 = vld [vmem:[#allocation2 + $0x16c] ss:$80 sps:$4 sm:$0xff]   ;;  %v15795_v22 = vld [vmem:[#allocation2 + $0xc8] ss:$80 sps:$4 sm:$0xff]  }
 0x3ff   : > { %8133 = vmatprep.subr.bf16.mxu0 %v15749_v59  ;;  %v12842_v5 = vld [vmem:[#allocation2 + $0xd0] ss:$80 sps:$4 sm:$0xff]   ;;  %v15799_v36 = vld [vmem:[#allocation2 + $0xc4] ss:$80 sps:$4 sm:$0xff]   ;;  %v12845_v62 = vld [vmem:[#allocation2 + $0x28] ss:$80 sps:$4 sm:$0xff]  }
 0x400   : > { %v12840_v19 = vld [vmem:[#allocation2 + $0xcc] ss:$80 sps:$4 sm:$0xff]   ;;  %v12848_v43 = vld [vmem:[#allocation2 + $0x30] ss:$80 sps:$4 sm:$0xff]   ;;  %v12843_v40 = vld [vmem:[#allocation2 + $0x24] ss:$80 sps:$4 sm:$0xff]  }
 0x401   : > { %8175 = vmatpush1.bf16.msra.mxu1 %v12798_v30  ;;  %v12851_v57 = vld [vmem:[#allocation2 + $0x2b8] ss:$80 sps:$4 sm:$0xff]   ;;  %v12846_v2 = vld [vmem:[#allocation2 + $0x2c] ss:$80 sps:$4 sm:$0xff]   ;;  %v12854_v60 = vld [vmem:[#allocation2 + $0x2c0] ss:$80 sps:$4 sm:$0xff]  }
 0x402   : > { %8176 = vmatprep.subr.bf16.mxu1 %v12806_v56  ;;  %8134 = vmatpush1.bf16.msra.mxu0 %v15756_v61  ;;  %v12849_v63 = vld [vmem:[#allocation2 + $0x2b4] ss:$80 sps:$4 sm:$0xff]   ;;  %v12857_v52 = vld [vmem:[#allocation2 + $0x218] ss:$80 sps:$4 sm:$0xff]   ;;  %v12852_v58 = vld [vmem:[#allocation2 + $0x2bc] ss:$80 sps:$4 sm:$0xff]  }
 0x403   : > { %8135 = vmatprep.subr.bf16.mxu0 %v15759_v3  ;;  %vm16733_vm1 = vmmov %vm16731_vm2  ;;  %v12860_v41 = vld [vmem:[#allocation2 + $0x220] ss:$80 sps:$4 sm:$0xff]   ;;  %v12863_v27 = vld [vmem:[#allocation2 + $0x178] ss:$80 sps:$4 sm:$0xff]  }
 0x404   : > { %vm16734_vm4 = vmmov %vm16733_vm1  ;;  %v12855_v32 = vld [vmem:[#allocation2 + $0x214] ss:$80 sps:$4 sm:$0xff]   ;;  %v12858_v48 = vld [vmem:[#allocation2 + $0x21c] ss:$80 sps:$4 sm:$0xff]  }
 0x405   : > { %8177 = vmatpush1.bf16.msra.mxu1 %v12804_v46  ;;  %v12866_v30 = vld [vmem:[#allocation2 + $0x180] ss:$80 sps:$4 sm:$0xff]   ;;  %v12861_v56 = vld [vmem:[#allocation2 + $0x174] ss:$80 sps:$4 sm:$0xff]   ;;  %v12864_v46 = vld [vmem:[#allocation2 + $0x17c] ss:$80 sps:$4 sm:$0xff]  }
 0x406   : > { %8178 = vmatprep.subr.bf16.mxu1 %v12812_v31  ;;  %8136 = vmatpush1.bf16.msra.mxu0 %v15762_v14  ;;  %v12869_v31 = vld [vmem:[#allocation2 + $0xd8] ss:$80 sps:$4 sm:$0xff]   ;;  %vm16735_vm15 = vmmov %vm16733_vm1 }
 0x407   : > { %8137 = vmatprep.subr.bf16.mxu0 %v15765_v0 }
 0x409   : > { %8179 = vmatpush1.bf16.msra.mxu1 %v12810_v7  ;;  %v12872_v7 = vld [vmem:[#allocation2 + $0xe0] ss:$80 sps:$4 sm:$0xff]  }
 0x40a   : > { %8180 = vmatprep.subr.bf16.mxu1 %v12818_v17  ;;  %8138 = vmatpush1.bf16.msra.mxu0 %v15769_v42  ;;  %v12867_v17 = vld [vmem:[#allocation2 + $0xd4] ss:$80 sps:$4 sm:$0xff]  }
 0x40b   : > { %8215 = vmatprep.subr.bf16.mxu0 %v15771_v53 }
 0x40d   : > { %8181 = vmatpush1.bf16.msra.mxu1 %v12816_v24  ;;  %11896 = vmatmul.mubr.msk.bf16.vlgmr.msra.gmra.mxu0 %vm16731_vm2, %v15724_v13  ;;  %v12870_v24 = vld [vmem:[#allocation2 + $0xdc] ss:$80 sps:$4 sm:$0xff]   ;;  %vm16736_vm2 = vmmov %vm16733_vm1 }
 0x40e   : > { %8258 = vmatprep.subr.bf16.mxu1 %v12824_v26  ;;  %8216 = vmatpush1.bf16.msra.mxu0 %v15775_v23  ;;  %v12875_v26 = vld [vmem:[#allocation2 + $0x38] ss:$80 sps:$4 sm:$0xff]  }
 0x40f   : > { %8217 = vmatprep.subr.bf16.mxu0 %v15777_v25  ;;  %8241 = vmatprep.mubr.bf16.mxu0 %v15678_v1 }
 0x410   : > { %11897 = vmatmul.mubr.msk.bf16.vlgmr.msra.gmra.mxu1 %vm16732_vm3, %v15724_v13  ;;  %vm16737_vm3 = vmmov %vm16733_vm1 }
 0x411   : > { %8259 = vmatpush1.bf16.msra.mxu1 %v12822_v18  ;;  %8284 = vmatprep.mubr.bf16.mxu1 %v15678_v1  ;;  %v12878_v18 = vld [vmem:[#allocation2 + $0x40] ss:$80 sps:$4 sm:$0xff]  }
 0x412   : > { %8260 = vmatprep.subr.bf16.mxu1 %v12830_v11  ;;  %8218 = vmatpush1.bf16.msra.mxu0 %v15785_v49  ;;  %v12873_v11 = vld [vmem:[#allocation2 + $0x34] ss:$80 sps:$4 sm:$0xff]  }
 0x413   : > { %8219 = vmatprep.subr.bf16.mxu0 %v15787_v12 }
 0x415   : > { %8261 = vmatpush1.bf16.msra.mxu1 %v12828_v4  ;;  %v12876_v4 = vld [vmem:[#allocation2 + $0x3c] ss:$80 sps:$4 sm:$0xff]  }
 0x416   : > { %8262 = vmatprep.subr.bf16.mxu1 %v12836_v15  ;;  %8220 = vmatpush1.bf16.msra.mxu0 %v15793_v37  ;;  %v12881_v15 = vld [vmem:[#allocation2 + $0x28c] ss:$80 sps:$4 sm:$0xff]  }
 0x417   : > { %8221 = vmatprep.subr.bf16.mxu0 %v15795_v22 }
 0x419   : > { %8263 = vmatpush1.bf16.msra.mxu1 %v12834_v10  ;;  %v12884_v10 = vld [vmem:[#allocation2 + $0x294] ss:$80 sps:$4 sm:$0xff]  }
 0x41a   : > { %8264 = vmatprep.subr.bf16.mxu1 %v12842_v5  ;;  %8222 = vmatpush1.bf16.msra.mxu0 %v15799_v36  ;;  %v12879_v5 = vld [vmem:[#allocation2 + $0x288] ss:$80 sps:$4 sm:$0xff]  }
 0x41b   : > { %8223 = vmatprep.subr.bf16.mxu0 %v12845_v62  ;;  %v12882_v62 = vld [vmem:[#allocation2 + $0x290] ss:$80 sps:$4 sm:$0xff]  }
 0x41d   : > { %8265 = vmatpush1.bf16.msra.mxu1 %v12840_v19  ;;  %v12887_v19 = vld [vmem:[#allocation2 + $0x1ec] ss:$80 sps:$4 sm:$0xff]  }
 0x41e   : > { %8266 = vmatprep.subr.bf16.mxu1 %v12848_v43  ;;  %8224 = vmatpush1.bf16.msra.mxu0 %v12843_v40  ;;  %v12890_v43 = vld [vmem:[#allocation2 + $0x1f4] ss:$80 sps:$4 sm:$0xff]   ;;  %v12885_v40 = vld [vmem:[#allocation2 + $0x1e8] ss:$80 sps:$4 sm:$0xff]  }
 0x41f   : > { %8301 = vmatprep.subr.bf16.mxu0 %v12851_v57  ;;  %v12888_v57 = vld [vmem:[#allocation2 + $0x1f0] ss:$80 sps:$4 sm:$0xff]  }
 0x421   : > { %8267 = vmatpush1.bf16.msra.mxu1 %v12846_v2  ;;  %11898 = vmatmul.mubr.msk.bf16.vlgmr.msra.gmra.mxu0 %vm16733_vm1, %v15724_v13  ;;  %v12893_v2 = vld [vmem:[#allocation2 + $0x14c] ss:$80 sps:$4 sm:$0xff]  }
 0x422   : > { %8344 = vmatprep.subr.bf16.mxu1 %v12854_v60  ;;  %8302 = vmatpush1.bf16.msra.mxu0 %v12849_v63  ;;  %v12896_v60 = vld [vmem:[#allocation2 + $0x154] ss:$80 sps:$4 sm:$0xff]   ;;  %v12891_v63 = vld [vmem:[#allocation2 + $0x148] ss:$80 sps:$4 sm:$0xff]  }
 0x423   : > { %8303 = vmatprep.subr.bf16.mxu0 %v12857_v52  ;;  %8327 = vmatprep.mubr.bf16.mxu0 %v15678_v1  ;;  %v12894_v52 = vld [vmem:[#allocation2 + $0x150] ss:$80 sps:$4 sm:$0xff]  }
 0x424   : > { %11899 = vmatmul.mubr.msk.bf16.vlgmr.msra.gmra.mxu1 %vm16734_vm4, %v15724_v13  ;;  %vm16738_vm4 = vmmov %vm16733_vm1 }
 0x425   : > { %8345 = vmatpush1.bf16.msra.mxu1 %v12852_v58  ;;  %8370 = vmatprep.mubr.bf16.mxu1 %v15678_v1  ;;  %v12902_v58 = vld [vmem:[#allocation2 + $0xb4] ss:$80 sps:$4 sm:$0xff]  }
 0x426   : > { %8346 = vmatprep.subr.bf16.mxu1 %v12860_v41  ;;  %8304 = vmatpush1.bf16.msra.mxu0 %v12855_v32  ;;  %v12897_v41 = vld [vmem:[#allocation2 + $0xa8] ss:$80 sps:$4 sm:$0xff]   ;;  %v12905_v32 = vld [vmem:[#allocation2 + $0xc] ss:$80 sps:$4 sm:$0xff]  }
 0x427   : > { %8305 = vmatprep.subr.bf16.mxu0 %v12863_v27  ;;  %v12900_v27 = vld [vmem:[#allocation2 + $0xb0] ss:$80 sps:$4 sm:$0xff]  }
 0x429   : > { %8347 = vmatpush1.bf16.msra.mxu1 %v12858_v48  ;;  %v12908_v48 = vld [vmem:[#allocation2 + $0x14] ss:$80 sps:$4 sm:$0xff]  }
 0x42a   : > { %8348 = vmatprep.subr.bf16.mxu1 %v12866_v30  ;;  %8306 = vmatpush1.bf16.msra.mxu0 %v12861_v56  ;;  %v12903_v30 = vld [vmem:[#allocation2 + $0x8] ss:$80 sps:$4 sm:$0xff]   ;;  %v12906_v56 = vld [vmem:[#allocation2 + $0x10] ss:$80 sps:$4 sm:$0xff]  }
 0x42b   : > { %8307 = vmatprep.subr.bf16.mxu0 %v12869_v31  ;;  %v15817_v31 = vld [vmem:[%s16435_s1 + $0x38] sm:$0xff]  }
 0x42d   : > { %8349 = vmatpush1.bf16.msra.mxu1 %v12864_v46  ;;  %v12911_v46 = vld [vmem:[#allocation2 + $0x29c] ss:$80 sps:$4 sm:$0xff]  }
 0x42e   : > { %8350 = vmatprep.subr.bf16.mxu1 %v12872_v7  ;;  %8308 = vmatpush1.bf16.msra.mxu0 %v12867_v17  ;;  %v12914_v7 = vld [vmem:[#allocation2 + $0x2a4] ss:$80 sps:$4 sm:$0xff]   ;;  %v12909_v17 = vld [vmem:[#allocation2 + $0x298] ss:$80 sps:$4 sm:$0xff]  }
 0x42f   : > { %8309 = vmatprep.subr.bf16.mxu0 %v12875_v26  ;;  %v12918_v26 = vld [vmem:[#allocation2 + $0x1fc] ss:$80 sps:$4 sm:$0xff]  }
 0x431   : > { %8351 = vmatpush1.bf16.msra.mxu1 %v12870_v24  ;;  %v12912_v24 = vld [vmem:[#allocation2 + $0x2a0] ss:$80 sps:$4 sm:$0xff]  }
 0x432   : > { %8352 = vmatprep.subr.bf16.mxu1 %v12878_v18  ;;  %8310 = vmatpush1.bf16.msra.mxu0 %v12873_v11  ;;  %v12921_v18 = vld [vmem:[#allocation2 + $0x204] ss:$80 sps:$4 sm:$0xff]   ;;  %v12916_v11 = vld [vmem:[#allocation2 + $0x1f8] ss:$80 sps:$4 sm:$0xff]  }
 0x433   : > { %8910 = vmatprep.subr.bf16.mxu0 %v12881_v15  ;;  %v12924_v15 = vld [vmem:[#allocation2 + $0x15c] ss:$80 sps:$4 sm:$0xff]  }
 0x435   : > { %8353 = vmatpush1.bf16.msra.mxu1 %v12876_v4  ;;  %11900 = vmatmul.mubr.msk.bf16.vlgmr.msra.gmra.mxu0 %vm16735_vm15, %v15724_v13  ;;  %v12919_v4 = vld [vmem:[#allocation2 + $0x200] ss:$80 sps:$4 sm:$0xff]   ;;  %vm16739_vm15 = vmmov %vm16733_vm1 }
 0x436   : > { %8953 = vmatprep.subr.bf16.mxu1 %v12884_v10  ;;  %8911 = vmatpush1.bf16.msra.mxu0 %v12879_v5  ;;  %v12927_v10 = vld [vmem:[#allocation2 + $0x164] ss:$80 sps:$4 sm:$0xff]   ;;  %v12922_v5 = vld [vmem:[#allocation2 + $0x158] ss:$80 sps:$4 sm:$0xff]  }
 0x437   : > { %8912 = vmatprep.subr.bf16.mxu0 %v12887_v19  ;;  %8936 = vmatprep.mubr.bf16.mxu0 %v15678_v1  ;;  %v12930_v19 = vld [vmem:[#allocation2 + $0xbc] ss:$80 sps:$4 sm:$0xff]  }
 0x438   : > { %11901 = vmatmul.mubr.msk.bf16.vlgmr.msra.gmra.mxu1 %vm16736_vm2, %v15724_v13  ;;  %v12899_v13 = vld [vmem:[#allocation2 + $0xac] ss:$80 sps:$4 sm:$0xff]   ;;  %vm16740_vm2 = vmmov %vm16733_vm1 }
 0x439   : > { %8954 = vmatpush1.bf16.msra.mxu1 %v12882_v62  ;;  %8979 = vmatprep.mubr.bf16.mxu1 %v15678_v1  ;;  %v12925_v62 = vld [vmem:[#allocation2 + $0x160] ss:$80 sps:$4 sm:$0xff]  }
 0x43a   : > { %8955 = vmatprep.subr.bf16.mxu1 %v12890_v43  ;;  %8913 = vmatpush1.bf16.msra.mxu0 %v12885_v40  ;;  %v12933_v43 = vld [vmem:[#allocation2 + $0xc4] ss:$80 sps:$4 sm:$0xff]   ;;  %v12928_v40 = vld [vmem:[#allocation2 + $0xb8] ss:$80 sps:$4 sm:$0xff]  }
 0x43b   : > { %8914 = vmatprep.subr.bf16.mxu0 %v12893_v2  ;;  %v12936_v2 = vld [vmem:[#allocation2 + $0x1c] ss:$80 sps:$4 sm:$0xff]  }
 0x43d   : > { %8956 = vmatpush1.bf16.msra.mxu1 %v12888_v57  ;;  %v12931_v57 = vld [vmem:[#allocation2 + $0xc0] ss:$80 sps:$4 sm:$0xff]  }
 0x43e   : > { %8957 = vmatprep.subr.bf16.mxu1 %v12896_v60  ;;  %8915 = vmatpush1.bf16.msra.mxu0 %v12891_v63  ;;  %v12939_v60 = vld [vmem:[#allocation2 + $0x24] ss:$80 sps:$4 sm:$0xff]   ;;  %v12934_v63 = vld [vmem:[#allocation2 + $0x18] ss:$80 sps:$4 sm:$0xff]  }
 0x43f   : > { %8916 = vmatprep.subr.bf16.mxu0 %v12899_v13  ;;  %v12942_v13 = vld [vmem:[#allocation2 + $0x2ac] ss:$80 sps:$4 sm:$0xff]  }
 0x441   : > { %8958 = vmatpush1.bf16.msra.mxu1 %v12894_v52  ;;  %v12937_v52 = vld [vmem:[#allocation2 + $0x20] ss:$80 sps:$4 sm:$0xff]  }
 0x442   : > { %8959 = vmatprep.subr.bf16.mxu1 %v12902_v58  ;;  %8917 = vmatpush1.bf16.msra.mxu0 %v12897_v41  ;;  %v12945_v58 = vld [vmem:[#allocation2 + $0x2b4] ss:$80 sps:$4 sm:$0xff]   ;;  %v12940_v41 = vld [vmem:[#allocation2 + $0x2a8] ss:$80 sps:$4 sm:$0xff]  }
 0x443   : > { %8918 = vmatprep.subr.bf16.mxu0 %v12905_v32  ;;  %v12948_v32 = vld [vmem:[#allocation2 + $0x20c] ss:$80 sps:$4 sm:$0xff]  }
 0x445   : > { %8960 = vmatpush1.bf16.msra.mxu1 %v12900_v27  ;;  %v12943_v27 = vld [vmem:[#allocation2 + $0x2b0] ss:$80 sps:$4 sm:$0xff]  }
 0x446   : > { %8961 = vmatprep.subr.bf16.mxu1 %v12908_v48  ;;  %8919 = vmatpush1.bf16.msra.mxu0 %v12903_v30  ;;  %v12951_v48 = vld [vmem:[#allocation2 + $0x214] ss:$80 sps:$4 sm:$0xff]   ;;  %v12946_v30 = vld [vmem:[#allocation2 + $0x208] ss:$80 sps:$4 sm:$0xff]  }
 0x447   : > { %8996 = vmatprep.subr.bf16.mxu0 %v12911_v46  ;;  %v12954_v46 = vld [vmem:[#allocation2 + $0x16c] ss:$80 sps:$4 sm:$0xff]  }
 0x449   : > { %8962 = vmatpush1.bf16.msra.mxu1 %v12906_v56  ;;  %11985 = vmatmul.mubr.msk.bf16.vlgmr.msra.gmra.mxu0 %vm16737_vm3, %v15817_v31  ;;  %v12949_v56 = vld [vmem:[#allocation2 + $0x210] ss:$80 sps:$4 sm:$0xff]   ;;  %vm16741_vm3 = vmmov %vm16733_vm1 }
 0x44a   : > { %9039 = vmatprep.subr.bf16.mxu1 %v12914_v7  ;;  %8997 = vmatpush1.bf16.msra.mxu0 %v12909_v17  ;;  %v12957_v7 = vld [vmem:[#allocation2 + $0x174] ss:$80 sps:$4 sm:$0xff]   ;;  %v12952_v17 = vld [vmem:[#allocation2 + $0x168] ss:$80 sps:$4 sm:$0xff]  }
 0x44b   : > { %8998 = vmatprep.subr.bf16.mxu0 %v12918_v26  ;;  %9022 = vmatprep.mubr.bf16.mxu0 %v15678_v1  ;;  %v12960_v26 = vld [vmem:[#allocation2 + $0xcc] ss:$80 sps:$4 sm:$0xff]  }
 0x44c   : > { %11986 = vmatmul.mubr.msk.bf16.vlgmr.msra.gmra.mxu1 %vm16733_vm1, %v15817_v31 }
 0x44d   : > { %9040 = vmatpush1.bf16.msra.mxu1 %v12912_v24  ;;  %9065 = vmatprep.mubr.bf16.mxu1 %v15678_v1  ;;  %v12955_v24 = vld [vmem:[#allocation2 + $0x170] ss:$80 sps:$4 sm:$0xff]  }
 0x44e   : > { %9041 = vmatprep.subr.bf16.mxu1 %v12921_v18  ;;  %8999 = vmatpush1.bf16.msra.mxu0 %v12916_v11  ;;  %v12963_v18 = vld [vmem:[#allocation2 + $0xd4] ss:$80 sps:$4 sm:$0xff]   ;;  %v12958_v11 = vld [vmem:[#allocation2 + $0xc8] ss:$80 sps:$4 sm:$0xff]  }
 0x44f   : > { %9000 = vmatprep.subr.bf16.mxu0 %v12924_v15  ;;  %v12966_v15 = vld [vmem:[#allocation2 + $0x2c] ss:$80 sps:$4 sm:$0xff]  }
 0x451   : > { %9042 = vmatpush1.bf16.msra.mxu1 %v12919_v4  ;;  %v12961_v4 = vld [vmem:[#allocation2 + $0xd0] ss:$80 sps:$4 sm:$0xff]  }
 0x452   : > { %9043 = vmatprep.subr.bf16.mxu1 %v12927_v10  ;;  %9001 = vmatpush1.bf16.msra.mxu0 %v12922_v5  ;;  %v12969_v10 = vld [vmem:[#allocation2 + $0x34] ss:$80 sps:$4 sm:$0xff]   ;;  %v12964_v5 = vld [vmem:[#allocation2 + $0x28] ss:$80 sps:$4 sm:$0xff]  }
 0x453   : > { %9002 = vmatprep.subr.bf16.mxu0 %v12930_v19  ;;  %v12972_v19 = vld [vmem:[#allocation2 + $0x2bc] ss:$80 sps:$4 sm:$0xff]  }
 0x455   : > { %9044 = vmatpush1.bf16.msra.mxu1 %v12925_v62  ;;  %v12967_v62 = vld [vmem:[#allocation2 + $0x30] ss:$80 sps:$4 sm:$0xff]  }
 0x456   : > { %9045 = vmatprep.subr.bf16.mxu1 %v12933_v43  ;;  %9003 = vmatpush1.bf16.msra.mxu0 %v12928_v40  ;;  %v12975_v43 = vld [vmem:[#allocation2 + $0x2c4] ss:$80 sps:$4 sm:$0xff]   ;;  %v12970_v40 = vld [vmem:[#allocation2 + $0x2b8] ss:$80 sps:$4 sm:$0xff]  }
 0x457   : > { %9004 = vmatprep.subr.bf16.mxu0 %v12936_v2  ;;  %v12978_v2 = vld [vmem:[#allocation2 + $0x21c] ss:$80 sps:$4 sm:$0xff]  }
 0x459   : > { %9046 = vmatpush1.bf16.msra.mxu1 %v12931_v57  ;;  %v12973_v57 = vld [vmem:[#allocation2 + $0x2c0] ss:$80 sps:$4 sm:$0xff]  }
 0x45a   : > { %9047 = vmatprep.subr.bf16.mxu1 %v12939_v60  ;;  %9005 = vmatpush1.bf16.msra.mxu0 %v12934_v63  ;;  %v12981_v60 = vld [vmem:[#allocation2 + $0x224] ss:$80 sps:$4 sm:$0xff]   ;;  %v12976_v63 = vld [vmem:[#allocation2 + $0x218] ss:$80 sps:$4 sm:$0xff]  }
 0x45b   : > { %9082 = vmatprep.subr.bf16.mxu0 %v12942_v13  ;;  %v12984_v13 = vld [vmem:[#allocation2 + $0x17c] ss:$80 sps:$4 sm:$0xff]  }
 0x45d   : > { %9048 = vmatpush1.bf16.msra.mxu1 %v12937_v52  ;;  %11987 = vmatmul.mubr.msk.bf16.vlgmr.msra.gmra.mxu0 %vm16738_vm4, %v15817_v31  ;;  %v12979_v52 = vld [vmem:[#allocation2 + $0x220] ss:$80 sps:$4 sm:$0xff]   ;;  %vm16742_vm4 = vmmov %vm16733_vm1 }
 0x45e   : > { %9125 = vmatprep.subr.bf16.mxu1 %v12945_v58  ;;  %9083 = vmatpush1.bf16.msra.mxu0 %v12940_v41  ;;  %v12987_v58 = vld [vmem:[#allocation2 + $0x184] ss:$80 sps:$4 sm:$0xff]   ;;  %v12982_v41 = vld [vmem:[#allocation2 + $0x178] ss:$80 sps:$4 sm:$0xff]  }
 0x45f   : > { %9084 = vmatprep.subr.bf16.mxu0 %v12948_v32  ;;  %9108 = vmatprep.mubr.bf16.mxu0 %v15678_v1  ;;  %v12990_v32 = vld [vmem:[#allocation2 + $0xdc] ss:$80 sps:$4 sm:$0xff]  }
 0x460   : > { %11988 = vmatmul.mubr.msk.bf16.vlgmr.msra.gmra.mxu1 %vm16739_vm15, %v15817_v31  ;;  %vm16743_vm15 = vmmov %vm16733_vm1 }
 0x461   : > { %9126 = vmatpush1.bf16.msra.mxu1 %v12943_v27  ;;  %9151 = vmatprep.mubr.bf16.mxu1 %v15678_v1  ;;  %v12985_v27 = vld [vmem:[#allocation2 + $0x180] ss:$80 sps:$4 sm:$0xff]  }
 0x462   : > { %9127 = vmatprep.subr.bf16.mxu1 %v12951_v48  ;;  %9085 = vmatpush1.bf16.msra.mxu0 %v12946_v30  ;;  %v12993_v48 = vld [vmem:[#allocation2 + $0xe4] ss:$80 sps:$4 sm:$0xff]   ;;  %v15837_v30 = vpop.f32.mrf.mxu0 }
 0x463   : > { %9086 = vmatprep.subr.bf16.mxu0 %v12954_v46  ;;  %v12988_v46 = vld [vmem:[#allocation2 + $0xd8] ss:$80 sps:$4 sm:$0xff]  }
 0x465   : > { %9128 = vmatpush1.bf16.msra.mxu1 %v12949_v56  ;;  %v15839_v56 = vpop.f32.mrf.mxu1 }
 0x466   : > { %9129 = vmatprep.subr.bf16.mxu1 %v12957_v7  ;;  %9087 = vmatpush1.bf16.msra.mxu0 %v12952_v17  ;;  %v12991_v7 = vld [vmem:[#allocation2 + $0xe0] ss:$80 sps:$4 sm:$0xff]   ;;  %v12996_v17 = vld [vmem:[#allocation2 + $0x3c] ss:$80 sps:$4 sm:$0xff]  }
 0x467   : > { %9088 = vmatprep.subr.bf16.mxu0 %v12960_v26  ;;  %v15841_v26 = vpop.f32.mrf.mxu0 }
 0x469   : > { %9130 = vmatpush1.bf16.msra.mxu1 %v12955_v24  ;;  %v12999_v24 = vld [vmem:[#allocation2 + $0x44] ss:$80 sps:$4 sm:$0xff]  }
 0x46a   : > { %9131 = vmatprep.subr.bf16.mxu1 %v12963_v18  ;;  %9089 = vmatpush1.bf16.msra.mxu0 %v12958_v11  ;;  %v15843_v18 = vpop.f32.mrf.mxu1  ;;  %v12994_v11 = vld [vmem:[#allocation2 + $0x38] ss:$80 sps:$4 sm:$0xff]  }
 0x46b   : > { %9090 = vmatprep.subr.bf16.mxu0 %v12966_v15  ;;  %v13002_v15 = vld [vmem:[#allocation2 + $0x290] ss:$80 sps:$4 sm:$0xff]  }
 0x46d   : > { %9132 = vmatpush1.bf16.msra.mxu1 %v12961_v4  ;;  %v12997_v4 = vld [vmem:[#allocation2 + $0x40] ss:$80 sps:$4 sm:$0xff]  }
 0x46e   : > { %9133 = vmatprep.subr.bf16.mxu1 %v12969_v10  ;;  %9091 = vmatpush1.bf16.msra.mxu0 %v12964_v5  ;;  %v15845_v10 = vpop.f32.mrf.mxu0  ;;  %v15847_v5 = vpop.f32.mrf.mxu1 }
 0x46f   : > { %9168 = vmatprep.subr.bf16.mxu0 %v12972_v19  ;;  %v13005_v19 = vld [vmem:[#allocation2 + $0x1f0] ss:$80 sps:$4 sm:$0xff]  }
 0x471   : > { %9134 = vmatpush1.bf16.msra.mxu1 %v12967_v62  ;;  %11989 = vmatmul.mubr.msk.bf16.vlgmr.msra.gmra.mxu0 %vm16740_vm2, %v15817_v31  ;;  %v13000_v62 = vld [vmem:[#allocation2 + $0x28c] ss:$80 sps:$4 sm:$0xff]   ;;  %vm16744_vm2 = vmmov %vm16733_vm1 }
 0x472   : > { %9211 = vmatprep.subr.bf16.mxu1 %v12975_v43  ;;  %9169 = vmatpush1.bf16.msra.mxu0 %v12970_v40  ;;  %v15854_v43 = vpop.f32.mrf.mxu0  ;;  %v15857_v40 = vpop.f32.mrf.mxu1 }
 0x473   : > { %9170 = vmatprep.subr.bf16.mxu0 %v12978_v2  ;;  %9194 = vmatprep.mubr.bf16.mxu0 %v15678_v1  ;;  %v13008_v2 = vld [vmem:[#allocation2 + $0x150] ss:$80 sps:$4 sm:$0xff]  }
 0x474   : > { %11990 = vmatmul.mubr.msk.bf16.vlgmr.msra.gmra.mxu1 %vm16741_vm3, %v15817_v31  ;;  %vm16745_vm3 = vmmov %vm16733_vm1 }
 0x475   : > { %9212 = vmatpush1.bf16.msra.mxu1 %v12973_v57  ;;  %9237 = vmatprep.mubr.bf16.mxu1 %v15678_v1  ;;  %v13003_v57 = vld [vmem:[#allocation2 + $0x1ec] ss:$80 sps:$4 sm:$0xff]  }
 0x476   : > { %9213 = vmatprep.subr.bf16.mxu1 %v12981_v60  ;;  %9171 = vmatpush1.bf16.msra.mxu0 %v12976_v63  ;;  %v15864_v60 = vpop.f32.mrf.mxu1  ;;  %v13011_v63 = vld [vmem:[#allocation2 + $0xb0] ss:$80 sps:$4 sm:$0xff]  }
 0x477   : > { %9172 = vmatprep.subr.bf16.mxu0 %v12984_v13  ;;  %v13014_v13 = vld [vmem:[#allocation2 + $0x10] ss:$80 sps:$4 sm:$0xff]  }
 0x479   : > { %9214 = vmatpush1.bf16.msra.mxu1 %v12979_v52  ;;  %v13009_v52 = vld [vmem:[#allocation2 + $0xac] ss:$80 sps:$4 sm:$0xff]  }
 0x47a   : > { %9215 = vmatprep.subr.bf16.mxu1 %v12987_v58  ;;  %9173 = vmatpush1.bf16.msra.mxu0 %v12982_v41  ;;  %v13017_v41 = vld [vmem:[#allocation2 + $0x2a0] ss:$80 sps:$4 sm:$0xff]  }
 0x47b   : > { %9174 = vmatprep.subr.bf16.mxu0 %v12990_v32  ;;  %v13015_v32 = vld [vmem:[#allocation2 + $0x29c] ss:$80 sps:$4 sm:$0xff]  }
 0x47d   : > { %9216 = vmatpush1.bf16.msra.mxu1 %v12985_v27 }
 0x47e   : > { %9217 = vmatprep.subr.bf16.mxu1 %v12993_v48  ;;  %9175 = vmatpush1.bf16.msra.mxu0 %v12988_v46  ;;  %v13019_v46 = vld [vmem:[#allocation2 + $0x1fc] ss:$80 sps:$4 sm:$0xff]  }
 0x47f   : > { %9176 = vmatprep.subr.bf16.mxu0 %v12996_v17 }
 0x481   : > { %9218 = vmatpush1.bf16.msra.mxu1 %v12991_v7  ;;  %v15905_v7 = vld [vmem:[#allocation3] sm:$0xff] }
 0x482   : > { %9219 = vmatprep.subr.bf16.mxu1 %v12999_v24  ;;  %9177 = vmatpush1.bf16.msra.mxu0 %v12994_v11  ;;  %v13022_v24 = vld [vmem:[#allocation2 + $0x15c] ss:$80 sps:$4 sm:$0xff]   ;;  %v13027_v11 = vld [vmem:[#allocation2 + $0xc0] ss:$80 sps:$4 sm:$0xff]  }
 0x483   : > { %9777 = vmatprep.subr.bf16.mxu0 %v13002_v15  ;;  %v13025_v15 = vld [vmem:[#allocation2 + $0xbc] ss:$80 sps:$4 sm:$0xff]  }
 0x485   : > { %9220 = vmatpush1.bf16.msra.mxu1 %v12997_v4  ;;  %11991 = vmatmul.mubr.msk.bf16.vlgmr.msra.gmra.mxu0 %vm16733_vm1, %v15817_v31 }
 0x486   : > { %9820 = vmatprep.subr.bf16.mxu1 %v15726_v55  ;;  %9778 = vmatpush1.bf16.msra.mxu0 %v13000_v62  ;;  %v15861_v55 = vpop.f32.mrf.mxu0 }
 0x487   : > { %9779 = vmatprep.subr.bf16.mxu0 %v13005_v19  ;;  %9803 = vmatprep.mubr.bf16.mxu0 %v15678_v1 }
 0x488   : > { %11992 = vmatmul.mubr.msk.bf16.vlgmr.msra.gmra.mxu1 %vm16742_vm4, %v15817_v31  ;;  %v15868_v31 = vpop.f32.mrf.mxu0  ;;  %vm16746_vm4 = vmmov %vm16733_vm1 }
 0x489   : > { %9821 = vmatpush1.bf16.msra.mxu1 %v15739_v6  ;;  %9846 = vmatprep.mubr.bf16.mxu1 %v15678_v1  ;;  %v13006_v6 = vld [vmem:[#allocation2 + $0x14c] ss:$80 sps:$4 sm:$0xff]  }
 0x48a   : > { %9822 = vmatprep.subr.bf16.mxu1 %v15741_v50  ;;  %9780 = vmatpush1.bf16.msra.mxu0 %v13003_v57  ;;  %v15870_v50 = vpop.f32.mrf.mxu1  ;;  %v15874_v1 = vpop.f32.mrf.mxu0  ;;  %v13033_v57 = vld [vmem:[#allocation2 + $0x28] ss:$80 sps:$4 sm:$0xff]  }
 0x48b   : > { %9781 = vmatprep.subr.bf16.mxu0 %v13008_v2 }
 0x48c   : > { %v15880_v58 = vpop.f32.mrf.mxu0 }
 0x48d   : > { %9823 = vmatpush1.bf16.msra.mxu1 %v15751_v21  ;;  %v15876_v21 = vpop.f32.mrf.mxu1 }
 0x48e   : > { %9824 = vmatprep.subr.bf16.mxu1 %v15749_v59  ;;  %9782 = vmatpush1.bf16.msra.mxu0 %v13006_v6  ;;  %v13012_v59 = vld [vmem:[#allocation2 + $0xc] ss:$80 sps:$4 sm:$0xff]   ;;  %v15889_v27 = vpop.f32.mrf.mxu0  ;;  %v13031_v6 = vld [vmem:[#allocation2 + $0x24] ss:$80 sps:$4 sm:$0xff]  }
 0x48f   : > { %9783 = vmatprep.subr.bf16.mxu0 %v13011_v63 }
 0x490   : > { %v15899_v48 = vpop.f32.mrf.mxu0 }
 0x491   : > { %9825 = vmatpush1.bf16.msra.mxu1 %v15756_v61  ;;  %v15885_v61 = vld [vmem:[%s16435_s1 + $0x40] sm:$0xff]  }
 0x492   : > { %9826 = vmatprep.subr.bf16.mxu1 %v15759_v3  ;;  %9784 = vmatpush1.bf16.msra.mxu0 %v13009_v52  ;;  %v15887_v3 = vpop.f32.mrf.mxu1  ;;  %v15909_v17 = vpop.f32.mrf.mxu0 }
 0x493   : > { %9785 = vmatprep.subr.bf16.mxu0 %v13014_v13  ;;  %v13039_v13 = vld [vmem:[#allocation2 + $0x2b8] ss:$80 sps:$4 sm:$0xff]  }
 0x495   : > { %9827 = vmatpush1.bf16.msra.mxu1 %v15762_v14  ;;  %v15892_v14 = vpop.f32.mrf.mxu1 }
 0x496   : > { %9828 = vmatprep.subr.bf16.mxu1 %v15765_v0  ;;  %9786 = vmatpush1.bf16.msra.mxu0 %v13012_v59  ;;  %v13021_v0 = vld [vmem:[#allocation2 + $0x200] ss:$80 sps:$4 sm:$0xff]   ;;  %v15934_v59 = vpop.permute.xlu1 %6676 }
 0x497   : > { %9863 = vmatprep.subr.bf16.mxu0 %v13017_v41 }
 0x499   : > { %9829 = vmatpush1.bf16.msra.mxu1 %v15769_v42  ;;  %12076 = vmatmul.mubr.msk.bf16.vlgmr.msra.gmra.mxu0 %vm16743_vm15, %v15885_v61  ;;  %v15902_v42 = vpop.f32.mrf.mxu1  ;;  %vm16747_vm15 = vmmov %vm16733_vm1 }
 0x49a   : > { %9906 = vmatprep.subr.bf16.mxu1 %v15771_v53  ;;  %9864 = vmatpush1.bf16.msra.mxu0 %v13015_v32  ;;  %v13024_v53 = vld [vmem:[#allocation2 + $0x160] ss:$80 sps:$4 sm:$0xff]  }
 0x49b   : > { %9865 = vmatprep.subr.bf16.mxu0 %v13021_v0  ;;  %9889 = vmatprep.mubr.bf16.mxu0 %v15905_v7  ;;  %v13034_v0 = vld [vmem:[#allocation2 + $0x2ac] ss:$80 sps:$4 sm:$0xff]  }
 0x49c   : > { %12077 = vmatmul.mubr.msk.bf16.vlgmr.msra.gmra.mxu1 %vm16744_vm2, %v15885_v61  ;;  %vm16748_vm2 = vmmov %vm16733_vm1 }
 0x49d   : > { %9907 = vmatpush1.bf16.msra.mxu1 %v15775_v23  ;;  %9932 = vmatprep.mubr.bf16.mxu1 %v15905_v7  ;;  %v15912_v23 = vpop.f32.mrf.mxu1 }
 0x49e   : > { %9908 = vmatprep.subr.bf16.mxu1 %v15777_v25  ;;  %9866 = vmatpush1.bf16.msra.mxu0 %v13019_v46  ;;  %v15915_v25 = vpop.f32.mrf.mxu0 }
 0x49f   : > { %9867 = vmatprep.subr.bf16.mxu0 %v13024_v53  ;;  %v15918_v4 = vpop.f32.mrf.mxu1  ;;  %v13037_v53 = vld [vmem:[#allocation2 + $0x2b4] ss:$80 sps:$4 sm:$0xff]  }
 0x4a1   : > { %9909 = vmatpush1.bf16.msra.mxu1 %v15785_v49  ;;  %v13030_v49 = vld [vmem:[#allocation2 + $0x20] ss:$80 sps:$4 sm:$0xff]  }
 0x4a2   : > { %9910 = vmatprep.subr.bf16.mxu1 %v15787_v12  ;;  %9868 = vmatpush1.bf16.msra.mxu0 %v13022_v24  ;;  %v13042_v24 = vld [vmem:[#allocation2 + $0x210] ss:$80 sps:$4 sm:$0xff]  }
 0x4a3   : > { %9869 = vmatprep.subr.bf16.mxu0 %v13027_v11  ;;  %v13045_v11 = vld [vmem:[#allocation2 + $0x218] ss:$80 sps:$4 sm:$0xff]  }
 0x4a5   : > { %9911 = vmatpush1.bf16.msra.mxu1 %v15793_v37  ;;  %v15921_v62 = vpop.f32.mrf.mxu0  ;;  %v13028_v37 = vld [vmem:[#allocation2 + $0x1c] ss:$80 sps:$4 sm:$0xff]  }
 0x4a6   : > { %9912 = vmatprep.subr.bf16.mxu1 %v15795_v22  ;;  %9870 = vmatpush1.bf16.msra.mxu0 %v13025_v15  ;;  %v13036_v22 = vld [vmem:[#allocation2 + $0x2b0] ss:$80 sps:$4 sm:$0xff]   ;;  %v13040_v15 = vld [vmem:[#allocation2 + $0x20c] ss:$80 sps:$4 sm:$0xff]  }
 0x4a7   : > { %v15926_v12 = vpop.f32.mrf.mxu0  ;;  %9871 = vmatprep.subr.bf16.mxu0 %v13030_v49  ;;  %v13043_v49 = vld [vmem:[#allocation2 + $0x214] ss:$80 sps:$4 sm:$0xff]  }
 0x4a8   : > { %v15923_v19 = vpop.f32.mrf.mxu1 }
 0x4a9   : > { %9913 = vmatpush1.bf16.msra.mxu1 %v15799_v36  ;;  %v15930_v63 = vpop.f32.mrf.mxu0 }
 0x4aa   : > { %v15928_v2 = vpop.f32.mrf.mxu1  ;;  %9914 = vmatprep.subr.bf16.mxu1 %v13033_v57  ;;  %9872 = vmatpush1.bf16.msra.mxu0 %v13028_v37  ;;  %v13048_v57 = vld [vmem:[#allocation2 + $0x170] ss:$80 sps:$4 sm:$0xff]   ;;  %v13051_v37 = vld [vmem:[#allocation2 + $0x178] ss:$80 sps:$4 sm:$0xff]  }
 0x4ab   : > { %v7468_v41 = vpop.f32.mrf.mxu0  ;;  %9949 = vmatprep.subr.bf16.mxu0 %v13036_v22  ;;  %v13049_v22 = vld [vmem:[#allocation2 + $0x174] ss:$80 sps:$4 sm:$0xff]  }
 0x4ac   : > { %v15932_v52 = vpop.f32.mrf.mxu1  ;;  %v15937_v36 = vadd.f32 %v7468_v41, %v15934_v59  ;;  %v13057_v41 = vld [vmem:[#allocation2 + $0xd8] ss:$80 sps:$4 sm:$0xff]  }
 0x4ad   : > { %9915 = vmatpush1.bf16.msra.mxu1 %v13031_v6  ;;  %12078 = vmatmul.mubr.msk.bf16.vlgmr.msra.gmra.mxu0 %vm16745_vm3, %v15885_v61  ;;  %v13046_v6 = vld [vmem:[#allocation2 + $0x16c] ss:$80 sps:$4 sm:$0xff]   ;;  %vm16749_vm3 = vmmov %vm16733_vm1 }
 0x4ae   : > { %v7511_v32 = vpop.f32.mrf.mxu1  ;;  %9992 = vmatprep.subr.bf16.mxu1 %v13039_v13  ;;  %9950 = vmatpush1.bf16.msra.mxu0 %v13034_v0  ;;  %v13054_v13 = vld [vmem:[#allocation2 + $0xd0] ss:$80 sps:$4 sm:$0xff]  }
 0x4af   : > { %v15940_v46 = vadd.f32 %v7511_v32, %v15934_v59  ;;  %9951 = vmatprep.subr.bf16.mxu0 %v13042_v24  ;;  %9975 = vmatprep.mubr.bf16.mxu0 %v15905_v7  ;;  %v15948_v32 = vpop.permute.xlu0 %6671 }
 0x4b0   : > { %12079 = vmatmul.mubr.msk.bf16.vlgmr.msra.gmra.mxu1 %vm16733_vm1, %v15885_v61  ;;  %v7514_v0 = vadd.f32 %v15837_v30, %v15948_v32  ;;  %v7516_v24 = vadd.f32 %v15839_v56, %v15948_v32  ;;  %v7530_v56 = vadd.f32 %v15845_v10, %v15934_v59  ;;  %v13069_v10 = vld [vmem:[#allocation2 + $0x2c8] ss:$80 sps:$4 sm:$0xff]  }
 0x4b1   : > { %9993 = vmatpush1.bf16.msra.mxu1 %v13037_v53  ;;  %10018 = vmatprep.mubr.bf16.mxu1 %v15905_v7  ;;  %v13052_v53 = vld [vmem:[#allocation2 + $0xcc] ss:$80 sps:$4 sm:$0xff]  }
 0x4b2   : > { %9994 = vmatprep.subr.bf16.mxu1 %v13045_v11  ;;  %9952 = vmatpush1.bf16.msra.mxu0 %v13040_v15  ;;  %v13055_v11 = vld [vmem:[#allocation2 + $0xd4] ss:$80 sps:$4 sm:$0xff]  }
 0x4b3   : > { %9953 = vmatprep.subr.bf16.mxu0 %v13048_v57  ;;  %v7515_v57 = vadd.f32 %v15841_v26, %v15948_v32  ;;  %v13058_v26 = vld [vmem:[#allocation2 + $0x2c] ss:$80 sps:$4 sm:$0xff]  }
 0x4b5   : > { %9995 = vmatpush1.bf16.msra.mxu1 %v13043_v49  ;;  %v13060_v49 = vld [vmem:[#allocation2 + $0x30] ss:$80 sps:$4 sm:$0xff]  }
 0x4b6   : > { %9996 = vmatprep.subr.bf16.mxu1 %v13051_v37  ;;  %9954 = vmatpush1.bf16.msra.mxu0 %v13046_v6 }
 0x4b7   : > { %9955 = vmatprep.subr.bf16.mxu0 %v13054_v13  ;;  %v7517_v13 = vadd.f32 %v15843_v18, %v15948_v32 }
 0x4b9   : > { %9997 = vmatpush1.bf16.msra.mxu1 %v13049_v22  ;;  %v8071_v15 = vpop.f32.mrf.mxu0  ;;  %v13063_v22 = vld [vmem:[#allocation2 + $0x38] ss:$80 sps:$4 sm:$0xff]  }
 0x4ba   : > { %9998 = vmatprep.subr.bf16.mxu1 %v13057_v41  ;;  %v15956_v37 = vadd.f32 %v8071_v15, %v7514_v0  ;;  %9956 = vmatpush1.bf16.msra.mxu0 %v13052_v53  ;;  %v7532_v0 = vadd.f32 %v15847_v5, %v15934_v59  ;;  %v13061_v15 = vld [vmem:[#allocation2 + $0x34] ss:$80 sps:$4 sm:$0xff]  }
 0x4bb   : > { %v8073_v41 = vpop.f32.mrf.mxu0  ;;  %9957 = vmatprep.subr.bf16.mxu0 %v13060_v49 }
 0x4bc   : > { %v8114_v6 = vpop.f32.mrf.mxu1  ;;  %v15964_v44 = vadd.f32 %v8073_v41, %v7515_v57  ;;  %v7533_v57 = vadd.f32 %v15857_v40, %v15934_v59  ;;  %v13064_v41 = vld [vmem:[#allocation2 + $0x2bc] ss:$80 sps:$4 sm:$0xff]   ;;  %v13075_v40 = vld [vmem:[#allocation2 + $0x228] ss:$80 sps:$4 sm:$0xff]  }
 0x4bd   : > { %v15960_v30 = vadd.f32 %v8114_v6, %v7516_v24  ;;  %9999 = vmatpush1.bf16.msra.mxu1 %v13055_v11  ;;  %v8075_v18 = vpop.f32.mrf.mxu0  ;;  %v13066_v24 = vld [vmem:[#allocation2 + $0x2c0] ss:$80 sps:$4 sm:$0xff]   ;;  %v7531_v11 = vadd.f32 %v15854_v43, %v15934_v59  ;;  %v13067_v43 = vld [vmem:[#allocation2 + $0x2c4] ss:$80 sps:$4 sm:$0xff]  }
 0x4be   : > { %v8116_v29 = vpop.f32.mrf.mxu1  ;;  %10000 = vmatprep.subr.bf16.mxu1 %v13063_v22  ;;  %v15972_v49 = vadd.f32 %v8075_v18, %v7530_v56  ;;  %9958 = vmatpush1.bf16.msra.mxu0 %v13058_v26  ;;  %v13072_v56 = vld [vmem:[#allocation2 + $0x220] ss:$80 sps:$4 sm:$0xff]   ;;  %v13070_v26 = vld [vmem:[#allocation2 + $0x21c] ss:$80 sps:$4 sm:$0xff]   ;;  %v13081_v18 = vld [vmem:[#allocation2 + $0x188] ss:$80 sps:$4 sm:$0xff]  }
 0x4bf   : > { %v15968_v53 = vadd.f32 %v8116_v29, %v7517_v13  ;;  %v8077_v5 = vpop.f32.mrf.mxu0  ;;  %10035 = vmatprep.subr.bf16.mxu0 %v13066_v24  ;;  %v13076_v24 = vld [vmem:[#allocation2 + $0x17c] ss:$80 sps:$4 sm:$0xff]  }
 0x4c0   : > { %v8118_v6 = vpop.f32.mrf.mxu1  ;;  %v15978_v29 = vadd.f32 %v8077_v5, %v7531_v11  ;;  %v13079_v11 = vld [vmem:[#allocation2 + $0x184] ss:$80 sps:$4 sm:$0xff]   ;;  %v13082_v5 = vld [vmem:[#allocation2 + $0xdc] ss:$80 sps:$4 sm:$0xff]  }
 0x4c1   : > { %v15976_v22 = vadd.f32 %v8118_v6, %v7532_v0  ;;  %10001 = vmatpush1.bf16.msra.mxu1 %v13061_v15  ;;  %12080 = vmatmul.mubr.msk.bf16.vlgmr.msra.gmra.mxu0 %vm16746_vm4, %v15885_v61  ;;  %v13073_v0 = vld [vmem:[#allocation2 + $0x224] ss:$80 sps:$4 sm:$0xff]   ;;  %v13078_v15 = vld [vmem:[#allocation2 + $0x180] ss:$80 sps:$4 sm:$0xff]   ;;  %vm16750_vm4 = vmmov %vm16733_vm1 }
 0x4c2   : > { %v8120_v13 = vpop.f32.mrf.mxu1  ;;  %10078 = vmatprep.subr.bf16.mxu1 %v13069_v10  ;;  %10036 = vmatpush1.bf16.msra.mxu0 %v13064_v41  ;;  %v13084_v6 = vld [vmem:[#allocation2 + $0xe0] ss:$80 sps:$4 sm:$0xff]   ;;  %v13087_v10 = vld [vmem:[#allocation2 + $0xe8] ss:$80 sps:$4 sm:$0xff]   ;;  %v13085_v41 = vld [vmem:[#allocation2 + $0xe4] ss:$80 sps:$4 sm:$0xff]  }
 0x4c3   : > { %v15980_v39 = vadd.f32 %v8120_v13, %v7533_v57  ;;  %10037 = vmatprep.subr.bf16.mxu0 %v13072_v56  ;;  %10061 = vmatprep.mubr.bf16.mxu0 %v15905_v7  ;;  %v7518_v57 = vadd.f32 %v15861_v55, %v15948_v32  ;;  %v7520_v13 = vadd.f32 %v15864_v60, %v15948_v32  ;;  %v13090_v56 = vld [vmem:[#allocation2 + $0x40] ss:$80 sps:$4 sm:$0xff]  }
 0x4c4   : > { %12081 = vmatmul.mubr.msk.bf16.vlgmr.msra.gmra.mxu1 %vm16747_vm15, %v15885_v61  ;;  %v7534_v60 = vadd.f32 %v15874_v1, %v15934_v59  ;;  %v13099_v1 = vld [vmem:[#allocation2 + $0x29c] ss:$80 sps:$4 sm:$0xff]   ;;  %vm16751_vm15 = vmmov %vm16733_vm1 }
 0x4c5   : > { %10079 = vmatpush1.bf16.msra.mxu1 %v13067_v43  ;;  %10104 = vmatprep.mubr.bf16.mxu1 %v15905_v7 }
 0x4c6   : > { %10080 = vmatprep.subr.bf16.mxu1 %v13075_v40  ;;  %10038 = vmatpush1.bf16.msra.mxu0 %v13070_v26  ;;  %v7519_v40 = vadd.f32 %v15868_v31, %v15948_v32  ;;  %v13088_v31 = vld [vmem:[#allocation2 + $0x3c] ss:$80 sps:$4 sm:$0xff]  }
 0x4c7   : > { %10039 = vmatprep.subr.bf16.mxu0 %v13078_v15  ;;  %v13093_v15 = vld [vmem:[#allocation2 + $0x48] ss:$80 sps:$4 sm:$0xff]  }
 0x4c9   : > { %10081 = vmatpush1.bf16.msra.mxu1 %v13073_v0 }
 0x4ca   : > { %10082 = vmatprep.subr.bf16.mxu1 %v13081_v18  ;;  %10040 = vmatpush1.bf16.msra.mxu0 %v13076_v24  ;;  %v7521_v18 = vadd.f32 %v15870_v50, %v15948_v32 }
 0x4cb   : > { %10041 = vmatprep.subr.bf16.mxu0 %v13084_v6 }
 0x4cd   : > { %10083 = vmatpush1.bf16.msra.mxu1 %v13079_v11  ;;  %v8157_v43 = vpop.f32.mrf.mxu0 }
 0x4ce   : > { %10084 = vmatprep.subr.bf16.mxu1 %v13087_v10  ;;  %v15994_v26 = vadd.f32 %v8157_v43, %v7518_v57  ;;  %10042 = vmatpush1.bf16.msra.mxu0 %v13082_v5  ;;  %v7536_v10 = vadd.f32 %v15876_v21, %v15934_v59  ;;  %v13091_v5 = vld [vmem:[#allocation2 + $0x44] ss:$80 sps:$4 sm:$0xff]  }
 0x4cf   : > { %v8159_v24 = vpop.f32.mrf.mxu0  ;;  %10043 = vmatprep.subr.bf16.mxu0 %v13090_v56 }
 0x4d0   : > { %v8200_v0 = vpop.f32.mrf.mxu1  ;;  %v16002_v11 = vadd.f32 %v8159_v24, %v7519_v40  ;;  %v7537_v40 = vadd.f32 %v15887_v3, %v15934_v59  ;;  %v13094_v24 = vld [vmem:[#allocation2 + $0x290] ss:$80 sps:$4 sm:$0xff]   ;;  %v13105_v3 = vld [vmem:[#allocation2 + $0x1fc] ss:$80 sps:$4 sm:$0xff]  }
 0x4d1   : > { %v15998_v55 = vadd.f32 %v8200_v0, %v7520_v13  ;;  %10085 = vmatpush1.bf16.msra.mxu1 %v13085_v41  ;;  %v8161_v50 = vpop.f32.mrf.mxu0  ;;  %v13096_v13 = vld [vmem:[#allocation2 + $0x294] ss:$80 sps:$4 sm:$0xff]   ;;  %v7535_v41 = vadd.f32 %v15880_v58, %v15934_v59  ;;  %v13097_v58 = vld [vmem:[#allocation2 + $0x298] ss:$80 sps:$4 sm:$0xff]  }
 0x4d2   : > { %v8202_v6 = vpop.f32.mrf.mxu1  ;;  %10086 = vmatprep.subr.bf16.mxu1 %v13093_v15  ;;  %v16010_v43 = vadd.f32 %v8161_v50, %v7534_v60  ;;  %10044 = vmatpush1.bf16.msra.mxu0 %v13088_v31  ;;  %v13102_v60 = vld [vmem:[#allocation2 + $0x1f4] ss:$80 sps:$4 sm:$0xff]   ;;  %v13100_v31 = vld [vmem:[#allocation2 + $0x1f0] ss:$80 sps:$4 sm:$0xff]   ;;  %v13111_v50 = vld [vmem:[#allocation2 + $0x15c] ss:$80 sps:$4 sm:$0xff]  }
 0x4d3   : > { %v16006_v57 = vadd.f32 %v8202_v6, %v7521_v18  ;;  %v8163_v21 = vpop.f32.mrf.mxu0  ;;  %10644 = vmatprep.subr.bf16.mxu0 %v13096_v13  ;;  %v13106_v13 = vld [vmem:[#allocation2 + $0x150] ss:$80 sps:$4 sm:$0xff]  }
 0x4d4   : > { %v8204_v56 = vpop.f32.mrf.mxu1  ;;  %v16016_v15 = vadd.f32 %v8163_v21, %v7535_v41  ;;  %v13109_v41 = vld [vmem:[#allocation2 + $0x158] ss:$80 sps:$4 sm:$0xff]   ;;  %v7524_v21 = vadd.f32 %v15892_v14, %v15948_v32  ;;  %v7538_v14 = vadd.f32 %v15909_v17, %v15934_v59  ;;  %v7539_v17 = vadd.f32 %v15915_v25, %v15934_v59 }
 0x4d5   : > { %v16014_v0 = vadd.f32 %v8204_v56, %v7536_v10  ;;  %10087 = vmatpush1.bf16.msra.mxu1 %v13091_v5  ;;  %12082 = vmatmul.mubr.msk.bf16.vlgmr.msra.gmra.mxu0 %vm16748_vm2, %v15885_v61  ;;  %v13103_v10 = vld [vmem:[#allocation2 + $0x1f8] ss:$80 sps:$4 sm:$0xff]   ;;  %v13108_v5 = vld [vmem:[#allocation2 + $0x154] ss:$80 sps:$4 sm:$0xff]   ;;  %v13117_v56 = vld [vmem:[#allocation2 + $0xbc] ss:$80 sps:$4 sm:$0xff]  }
 0x4d6   : > { %v8206_v18 = vpop.f32.mrf.mxu1  ;;  %10687 = vmatprep.subr.bf16.mxu1 %v13099_v1  ;;  %10645 = vmatpush1.bf16.msra.mxu0 %v13094_v24  ;;  %v7522_v1 = vadd.f32 %v15889_v27, %v15948_v32  ;;  %v13127_v25 = vld [vmem:[#allocation2 + $0x2a8] ss:$80 sps:$4 sm:$0xff]   ;;  %vm16752_vm2 = vmmov %vm16733_vm1 }
 0x4d7   : > { %v16018_v6 = vadd.f32 %v8206_v18, %v7537_v40  ;;  %10646 = vmatprep.subr.bf16.mxu0 %v13102_v60  ;;  %10670 = vmatprep.mubr.bf16.mxu0 %v15905_v7  ;;  %v13112_v40 = vld [vmem:[#allocation2 + $0xb0] ss:$80 sps:$4 sm:$0xff]   ;;  %v13115_v18 = vld [vmem:[#allocation2 + $0xb8] ss:$80 sps:$4 sm:$0xff]   ;;  %v7523_v60 = vadd.f32 %v15899_v48, %v15948_v32 }
 0x4d8   : > { %12083 = vmatmul.mubr.msk.bf16.vlgmr.msra.gmra.mxu1 %vm16749_vm3, %v15885_v61  ;;  %v13114_v61 = vld [vmem:[#allocation2 + $0xb4] ss:$80 sps:$4 sm:$0xff]   ;;  %v13118_v48 = vld [vmem:[#allocation2 + $0x10] ss:$80 sps:$4 sm:$0xff]   ;;  %vm16753_vm3 = vmmov %vm16733_vm1 }
 0x4d9   : > { %10688 = vmatpush1.bf16.msra.mxu1 %v13097_v58  ;;  %10713 = vmatprep.mubr.bf16.mxu1 %v15905_v7  ;;  %v13120_v58 = vld [vmem:[#allocation2 + $0x14] ss:$80 sps:$4 sm:$0xff]  }
 0x4da   : > { %10689 = vmatprep.subr.bf16.mxu1 %v13105_v3  ;;  %10647 = vmatpush1.bf16.msra.mxu0 %v13100_v31 }
 0x4db   : > { %10648 = vmatprep.subr.bf16.mxu0 %v13108_v5  ;;  %v7525_v5 = vadd.f32 %v15902_v42, %v15948_v32 }
 0x4dd   : > { %10690 = vmatpush1.bf16.msra.mxu1 %v13103_v10  ;;  %v13123_v10 = vld [vmem:[#allocation2 + $0x1c] ss:$80 sps:$4 sm:$0xff]  }
 0x4de   : > { %10691 = vmatprep.subr.bf16.mxu1 %v13111_v50  ;;  %10649 = vmatpush1.bf16.msra.mxu0 %v13106_v13 }
 0x4df   : > { %10650 = vmatprep.subr.bf16.mxu0 %v13114_v61  ;;  %v7540_v61 = vadd.f32 %v15912_v23, %v15934_v59  ;;  %v7541_v23 = vadd.f32 %v15918_v4, %v15934_v59  ;;  %v13136_v4 = vld [vmem:[#allocation2 + $0x20c] ss:$80 sps:$4 sm:$0xff]  }
 0x4e1   : > { %10692 = vmatpush1.bf16.msra.mxu1 %v13109_v41  ;;  %v8243_v24 = vpop.f32.mrf.mxu0 }
 0x4e2   : > { %10693 = vmatprep.subr.bf16.mxu1 %v13117_v56  ;;  %v16032_v3 = vadd.f32 %v8243_v24, %v7522_v1  ;;  %10651 = vmatpush1.bf16.msra.mxu0 %v13112_v40  ;;  %v13121_v1 = vld [vmem:[#allocation2 + $0x18] ss:$80 sps:$4 sm:$0xff]   ;;  %v13126_v40 = vld [vmem:[#allocation2 + $0x2a4] ss:$80 sps:$4 sm:$0xff]  }
 0x4e3   : > { %v8245_v50 = vpop.f32.mrf.mxu0  ;;  %10652 = vmatprep.subr.bf16.mxu0 %v13120_v58  ;;  %v13129_v58 = vld [vmem:[#allocation2 + $0x2ac] ss:$80 sps:$4 sm:$0xff]  }
 0x4e4   : > { %v8286_v31 = vpop.f32.mrf.mxu1  ;;  %v16040_v13 = vadd.f32 %v8245_v50, %v7523_v60  ;;  %v13124_v50 = vld [vmem:[#allocation2 + $0x2a0] ss:$80 sps:$4 sm:$0xff]  }
 0x4e5   : > { %v16036_v27 = vadd.f32 %v8286_v31, %v7524_v21  ;;  %10694 = vmatpush1.bf16.msra.mxu1 %v13115_v18  ;;  %v8247_v42 = vpop.f32.mrf.mxu0  ;;  %v16049_v21 = vld [vmem:[%s16435_s1 + $0x48] sm:$0xff]  }
 0x4e6   : > { %v8288_v41 = vpop.f32.mrf.mxu1  ;;  %10695 = vmatprep.subr.bf16.mxu1 %v13123_v10  ;;  %v16053_v18 = vadd.f32 %v8247_v42, %v7538_v14  ;;  %10653 = vmatpush1.bf16.msra.mxu0 %v13118_v48  ;;  %v13133_v14 = vld [vmem:[#allocation2 + $0x204] ss:$80 sps:$4 sm:$0xff]   ;;  %v13131_v48 = vld [vmem:[#allocation2 + $0x200] ss:$80 sps:$4 sm:$0xff]   ;;  %v13142_v42 = vld [vmem:[#allocation2 + $0x16c] ss:$80 sps:$4 sm:$0xff]  }
 0x4e7   : > { %v16044_v56 = vadd.f32 %v8288_v41, %v7525_v5  ;;  %v8249_v31 = vpop.f32.mrf.mxu0  ;;  %10730 = vmatprep.subr.bf16.mxu0 %v13126_v40  ;;  %v13137_v40 = vld [vmem:[#allocation2 + $0x160] ss:$80 sps:$4 sm:$0xff]  }
 0x4e8   : > { %v8290_v24 = vpop.f32.mrf.mxu1  ;;  %v16059_v10 = vadd.f32 %v8249_v31, %v7539_v17  ;;  %v13140_v17 = vld [vmem:[#allocation2 + $0x168] ss:$80 sps:$4 sm:$0xff]   ;;  %v13143_v31 = vld [vmem:[#allocation2 + $0xc0] ss:$80 sps:$4 sm:$0xff]  }
 0x4e9   : > { %v16057_v60 = vadd.f32 %v8290_v24, %v7540_v61  ;;  %10696 = vmatpush1.bf16.msra.mxu1 %v13121_v1  ;;  %12167 = vmatmul.mubr.msk.bf16.vlgmr.msra.gmra.mxu0 %vm16733_vm1, %v16049_v21  ;;  %v13134_v61 = vld [vmem:[#allocation2 + $0x208] ss:$80 sps:$4 sm:$0xff]   ;;  %v13139_v1 = vld [vmem:[#allocation2 + $0x164] ss:$80 sps:$4 sm:$0xff]  }
 0x4ea   : > { %v8292_v5 = vpop.f32.mrf.mxu1  ;;  %10773 = vmatprep.subr.bf16.mxu1 %v13129_v58  ;;  %10731 = vmatpush1.bf16.msra.mxu0 %v13124_v50  ;;  %v13145_v24 = vld [vmem:[#allocation2 + $0xc4] ss:$80 sps:$4 sm:$0xff]   ;;  %v13148_v58 = vld [vmem:[#allocation2 + $0xcc] ss:$80 sps:$4 sm:$0xff]   ;;  %v13146_v50 = vld [vmem:[#allocation2 + $0xc8] ss:$80 sps:$4 sm:$0xff]  }
 0x4eb   : > { %v16061_v41 = vadd.f32 %v8292_v5, %v7541_v23  ;;  %10732 = vmatprep.subr.bf16.mxu0 %v13133_v14  ;;  %10756 = vmatprep.mubr.bf16.mxu0 %v15905_v7  ;;  %v7526_v23 = vadd.f32 %v15921_v62, %v15948_v32  ;;  %v7528_v5 = vadd.f32 %v15923_v19, %v15948_v32  ;;  %v13151_v14 = vld [vmem:[#allocation2 + $0x24] ss:$80 sps:$4 sm:$0xff]  }
 0x4ec   : > { %12168 = vmatmul.mubr.msk.bf16.vlgmr.msra.gmra.mxu1 %vm16750_vm4, %v16049_v21  ;;  %v7542_v19 = vadd.f32 %v15930_v63, %v15934_v59  ;;  %vm16755_vm4 = vmmov %vm16733_vm1 }
 0x4ed   : > { %10774 = vmatpush1.bf16.msra.mxu1 %v13127_v25  ;;  %10799 = vmatprep.mubr.bf16.mxu1 %v15905_v7 }
 0x4ee   : > { %10775 = vmatprep.subr.bf16.mxu1 %v13136_v4  ;;  %10733 = vmatpush1.bf16.msra.mxu0 %v13131_v48  ;;  %v7527_v4 = vadd.f32 %v15926_v12, %v15948_v32  ;;  %v13149_v12 = vld [vmem:[#allocation2 + $0x20] ss:$80 sps:$4 sm:$0xff]  }
 0x4ef   : > { %10734 = vmatprep.subr.bf16.mxu0 %v13139_v1  ;;  %v13154_v1 = vld [vmem:[#allocation2 + $0x2c] ss:$80 sps:$4 sm:$0xff]  }
 0x4f1   : > { %10776 = vmatpush1.bf16.msra.mxu1 %v13134_v61 }
 0x4f2   : > { %10777 = vmatprep.subr.bf16.mxu1 %v13142_v42  ;;  %10735 = vmatpush1.bf16.msra.mxu0 %v13137_v40  ;;  %v7529_v42 = vadd.f32 %v15928_v2, %v15948_v32  ;;  %v13157_v32 = vld [vmem:[#allocation2 + $0x2b4] ss:$80 sps:$4 sm:$0xff]  }
 0x4f3   : > { %10736 = vmatprep.subr.bf16.mxu0 %v13145_v24 }
 0x4f5   : > { %10778 = vmatpush1.bf16.msra.mxu1 %v13140_v17  ;;  %v8329_v25 = vpop.f32.mrf.mxu0 }
 0x4f6   : > { %10779 = vmatprep.subr.bf16.mxu1 %v13148_v58  ;;  %v16075_v48 = vadd.f32 %v8329_v25, %v7526_v23  ;;  %10737 = vmatpush1.bf16.msra.mxu0 %v13143_v31  ;;  %v7544_v58 = vadd.f32 %v15932_v52, %v15934_v59  ;;  %v13152_v31 = vld [vmem:[#allocation2 + $0x28] ss:$80 sps:$4 sm:$0xff]   ;;  %v13160_v25 = vld [vmem:[#allocation2 + $0x2bc] ss:$80 sps:$4 sm:$0xff]   ;;  %v13155_v52 = vld [vmem:[#allocation2 + $0x2b0] ss:$80 sps:$4 sm:$0xff]  }
 0x4f7   : > { %v8331_v40 = vpop.f32.mrf.mxu0  ;;  %10738 = vmatprep.subr.bf16.mxu0 %v13151_v14 }
 0x4f8   : > { %v8372_v61 = vpop.f32.mrf.mxu1  ;;  %v16083_v17 = vadd.f32 %v8331_v40, %v7527_v4  ;;  %v13166_v40 = vld [vmem:[#allocation2 + $0x21c] ss:$80 sps:$4 sm:$0xff]  }
 0x4f9   : > { %v16079_v62 = vadd.f32 %v8372_v61, %v7528_v5  ;;  %10780 = vmatpush1.bf16.msra.mxu1 %v13146_v50  ;;  %v8333_v2 = vpop.f32.mrf.mxu0 }
 0x4fa   : > { %v8374_v24 = vpop.f32.mrf.mxu1  ;;  %10781 = vmatprep.subr.bf16.mxu1 %v13154_v1  ;;  %v16089_v5 = vadd.f32 %v8333_v2, %v7542_v19  ;;  %10739 = vmatpush1.bf16.msra.mxu0 %v13149_v12  ;;  %v13158_v1 = vld [vmem:[#allocation2 + $0x2b8] ss:$80 sps:$4 sm:$0xff]   ;;  %v13167_v12 = vld [vmem:[#allocation2 + $0x170] ss:$80 sps:$4 sm:$0xff]   ;;  %v13178_v2 = vld [vmem:[#allocation2 + $0xdc] ss:$80 sps:$4 sm:$0xff]  }
 0x4fb   : > { %v16087_v23 = vadd.f32 %v8374_v24, %v7529_v42  ;;  %v8335_v63 = vpop.f32.mrf.mxu0  ;;  %10816 = vmatprep.subr.bf16.mxu0 %v13157_v32  ;;  %v13163_v42 = vld [vmem:[#allocation2 + $0x214] ss:$80 sps:$4 sm:$0xff]   ;;  %v13164_v19 = vld [vmem:[#allocation2 + $0x218] ss:$80 sps:$4 sm:$0xff]   ;;  %v13173_v32 = vld [vmem:[#allocation2 + $0xd0] ss:$80 sps:$4 sm:$0xff]  }
 0x4fc   : > { %v8376_v50 = vpop.f32.mrf.mxu1  ;;  %v16094_v4 = vadd.f32 %v8335_v63, %v15937_v36  ;;  %v13161_v36 = vld [vmem:[#allocation2 + $0x210] ss:$80 sps:$4 sm:$0xff]   ;;  %v13169_v24 = vld [vmem:[#allocation2 + $0x174] ss:$80 sps:$4 sm:$0xff]   ;;  %v13184_v63 = vld [vmem:[#allocation2 + $0x3c] ss:$80 sps:$4 sm:$0xff]  }
 0x4fd   : > { %v16091_v14 = vadd.f32 %v8376_v50, %v7544_v58  ;;  %10782 = vmatpush1.bf16.msra.mxu1 %v13152_v31  ;;  %12169 = vmatmul.mubr.msk.bf16.vlgmr.msra.gmra.mxu0 %vm16751_vm15, %v16049_v21  ;;  %v13170_v58 = vld [vmem:[#allocation2 + $0x178] ss:$80 sps:$4 sm:$0xff]   ;;  %v13175_v31 = vld [vmem:[#allocation2 + $0xd4] ss:$80 sps:$4 sm:$0xff]   ;;  %vm16756_vm15 = vmmov %vm16733_vm1 }
 0x4fe   : > { %v8378_v61 = vpop.f32.mrf.mxu1  ;;  %10859 = vmatprep.subr.bf16.mxu1 %v13160_v25  ;;  %10817 = vmatpush1.bf16.msra.mxu0 %v13155_v52  ;;  %v13176_v50 = vld [vmem:[#allocation2 + $0xd8] ss:$80 sps:$4 sm:$0xff]   ;;  %v13181_v25 = vld [vmem:[#allocation2 + $0x34] ss:$80 sps:$4 sm:$0xff]  }
 0x4ff   : > { %v16097_v59 = vadd.f32 %v8378_v61, %v15940_v46  ;;  %10818 = vmatprep.subr.bf16.mxu0 %v13163_v42  ;;  %10842 = vmatprep.mubr.bf16.mxu0 %v15905_v7  ;;  %v13172_v46 = vld [vmem:[#allocation2 + $0x17c] ss:$80 sps:$4 sm:$0xff]   ;;  %v13179_v61 = vld [vmem:[#allocation2 + $0x30] ss:$80 sps:$4 sm:$0xff]   ;;  %v13182_v52 = vld [vmem:[#allocation2 + $0x38] ss:$80 sps:$4 sm:$0xff]  }
 0x500   : > { %12170 = vmatmul.mubr.msk.bf16.vlgmr.msra.gmra.mxu1 %vm16752_vm2, %v16049_v21  ;;  %v13190_v42 = vld [vmem:[#allocation2 + $0x2cc] ss:$80 sps:$4 sm:$0xff]  }
 0x501   : > { %10860 = vmatpush1.bf16.msra.mxu1 %v13158_v1  ;;  %10885 = vmatprep.mubr.bf16.mxu1 %v15905_v7  ;;  %v13187_v1 = vld [vmem:[#allocation2 + $0x2c4] ss:$80 sps:$4 sm:$0xff]  }
 0x502   : > { %10861 = vmatprep.subr.bf16.mxu1 %v13166_v40  ;;  %10819 = vmatpush1.bf16.msra.mxu0 %v13161_v36 }
 0x503   : > { %10820 = vmatprep.subr.bf16.mxu0 %v13169_v24  ;;  %v13188_v24 = vld [vmem:[#allocation2 + $0x2c8] ss:$80 sps:$4 sm:$0xff]  }
 0x505   : > { %10862 = vmatpush1.bf16.msra.mxu1 %v13164_v19  ;;  %v13185_v19 = vld [vmem:[#allocation2 + $0x2c0] ss:$80 sps:$4 sm:$0xff]  }
 0x506   : > { %10863 = vmatprep.subr.bf16.mxu1 %v13172_v46  ;;  %10821 = vmatpush1.bf16.msra.mxu0 %v13167_v12  ;;  %v13193_v46 = vld [vmem:[#allocation2 + $0x224] ss:$80 sps:$4 sm:$0xff]   ;;  %v13196_v12 = vld [vmem:[#allocation2 + $0x22c] ss:$80 sps:$4 sm:$0xff]  }
 0x507   : > { %10822 = vmatprep.subr.bf16.mxu0 %v13175_v31 }
 0x509   : > { %10864 = vmatpush1.bf16.msra.mxu1 %v13170_v58  ;;  %v16105_v40 = vpop.f32.mrf.mxu0 }
 0x50a   : > { %10865 = vmatprep.subr.bf16.mxu1 %v13178_v2  ;;  %10823 = vmatpush1.bf16.msra.mxu0 %v13173_v32  ;;  %v13191_v2 = vld [vmem:[#allocation2 + $0x220] ss:$80 sps:$4 sm:$0xff]   ;;  %v12134_v32 = vcombine.high %v15905_v7, %v15905_v7 }
 0x50b   : > { %10824 = vmatprep.subr.bf16.mxu0 %v13181_v25  ;;  %v16113_v58 = vpop.f32.mrf.mxu0  ;;  %v13199_v25 = vld [vmem:[#allocation2 + $0x184] ss:$80 sps:$4 sm:$0xff]  }
 0x50c   : > { %v16107_v36 = vpop.f32.mrf.mxu1 }
 0x50d   : > { %10866 = vmatpush1.bf16.msra.mxu1 %v13176_v50  ;;  %v13194_v50 = vld [vmem:[#allocation2 + $0x228] ss:$80 sps:$4 sm:$0xff]  }
 0x50e   : > { %10867 = vmatprep.subr.bf16.mxu1 %v13184_v63  ;;  %10825 = vmatpush1.bf16.msra.mxu0 %v13179_v61  ;;  %v16115_v31 = vpop.f32.mrf.mxu1  ;;  %v16121_v63 = vpop.f32.mrf.mxu0  ;;  %v12133_v61 = vcombine.low %v15905_v7, %v15905_v7 }
 0x50f   : > { %10902 = vmatprep.subr.bf16.mxu0 %v13187_v1  ;;  %v13197_v1 = vld [vmem:[#allocation2 + $0x180] ss:$80 sps:$4 sm:$0xff]  }
 0x511   : > { %10868 = vmatpush1.bf16.msra.mxu1 %v13182_v52  ;;  %12171 = vmatmul.mubr.msk.bf16.vlgmr.msra.gmra.mxu0 %vm16753_vm3, %v16049_v21  ;;  %v16125_v52 = vpop.f32.mrf.mxu1 }
 0x512   : > { %10945 = vmatprep.subr.bf16.mxu1 %v13190_v42  ;;  %10903 = vmatpush1.bf16.msra.mxu0 %v13185_v19  ;;  %v13202_v42 = vld [vmem:[#allocation2 + $0xe4] ss:$80 sps:$4 sm:$0xff]   ;;  %v13205_v19 = vld [vmem:[#allocation2 + $0xec] ss:$80 sps:$4 sm:$0xff]  }
 0x513   : > { %10904 = vmatprep.subr.bf16.mxu0 %v13193_v46  ;;  %10928 = vmatprep.mubr.bf16.mxu0 %v15905_v7  ;;  %v16129_v46 = vpop.f32.mrf.mxu1 }
 0x514   : > { %12172 = vmatmul.mubr.msk.bf16.vlgmr.msra.gmra.mxu1 %vm16733_vm1, %v16049_v21 }
 0x515   : > { %10946 = vmatpush1.bf16.msra.mxu1 %v13188_v24  ;;  %10971 = vmatprep.mubr.bf16.mxu1 %v15905_v7  ;;  %v16127_v24 = vpop.f32.mrf.mxu0 }
 0x516   : > { %10947 = vmatprep.subr.bf16.mxu1 %v13196_v12  ;;  %10905 = vmatpush1.bf16.msra.mxu0 %v13191_v2  ;;  %v13200_v12 = vld [vmem:[#allocation2 + $0xe0] ss:$80 sps:$4 sm:$0xff]   ;;  %v13203_v2 = vld [vmem:[#allocation2 + $0xe8] ss:$80 sps:$4 sm:$0xff]  }
 0x517   : > { %10906 = vmatprep.subr.bf16.mxu0 %v13199_v25  ;;  %v13208_v25 = vld [vmem:[#allocation2 + $0x44] ss:$80 sps:$4 sm:$0xff]  }
 0x519   : > { %10948 = vmatpush1.bf16.msra.mxu1 %v13194_v50 }
 0x51a   : > { %10949 = vmatprep.subr.bf16.mxu1 %v12134_v32  ;;  %10907 = vmatpush1.bf16.msra.mxu0 %v13197_v1  ;;  %v13211_v32 = vld [vmem:[#allocation2 + $0x4c] ss:$80 sps:$4 sm:$0xff]  }
 0x51b   : > { %10908 = vmatprep.subr.bf16.mxu0 %v13202_v42 }
 0x51d   : > { %10950 = vmatpush1.bf16.msra.mxu1 %v12133_v61  ;;  %v9024_v50 = vpop.f32.mrf.mxu0 }
 0x51e   : > { %10951 = vmatprep.subr.bf16.mxu1 %v13205_v19  ;;  %v16132_v7 = vadd.f32 %v9024_v50, %v15994_v26  ;;  %10909 = vmatpush1.bf16.msra.mxu0 %v13200_v12  ;;  %v13206_v19 = vld [vmem:[#allocation2 + $0x40] ss:$80 sps:$4 sm:$0xff]   ;;  %v13209_v26 = vld [vmem:[#allocation2 + $0x48] ss:$80 sps:$4 sm:$0xff]  }
 0x51f   : > { %v9026_v45 = vpop.f32.mrf.mxu0  ;;  %10910 = vmatprep.subr.bf16.mxu0 %v13208_v25 }
 0x520   : > { %v9067_v28 = vpop.f32.mrf.mxu1  ;;  %v16138_v61 = vadd.f32 %v9026_v45, %v16002_v11 }
 0x521   : > { %v16135_v1 = vadd.f32 %v9067_v28, %v15998_v55  ;;  %10952 = vmatpush1.bf16.msra.mxu1 %v13203_v2  ;;  %v9028_v50 = vpop.f32.mrf.mxu0 }
 0x522   : > { %v9069_v42 = vpop.f32.mrf.mxu1  ;;  %10953 = vmatprep.subr.bf16.mxu1 %v13211_v32  ;;  %v16144_v12 = vadd.f32 %v9028_v50, %v16010_v43  ;;  %10911 = vmatpush1.bf16.msra.mxu0 %v13206_v19 }
 0x523   : > { %v16141_v8 = vadd.f32 %v9069_v42, %v16006_v57  ;;  %v9030_v55 = vpop.f32.mrf.mxu0 }
 0x524   : > { %v9071_v47 = vpop.f32.mrf.mxu1  ;;  %v16150_v45 = vadd.f32 %v9030_v55, %v16016_v15 }
 0x525   : > { %v16147_v28 = vadd.f32 %v9071_v47, %v16014_v0  ;;  %10954 = vmatpush1.bf16.msra.mxu1 %v13209_v26  ;;  %12173 = vmatmul.mubr.msk.bf16.vlgmr.msra.gmra.mxu0 %vm16755_vm4, %v16049_v21  ;;  %vm16774_vm4 = vcmp.lt.s32.totalorder %v14627_v16, 16 }
 0x526   : > { %v9073_v11 = vpop.f32.mrf.mxu1 }
 0x527   : > { %v16153_v2 = vadd.f32 %v9073_v11, %v16018_v6 }
 0x528   : > { %12174 = vmatmul.mubr.msk.bf16.vlgmr.msra.gmra.mxu1 %vm16756_vm15, %v16049_v21 }
 0x529   : > { %16754 = vst [vmem:[#allocation13_spill] sm:$0xff] %v16153_v2 }
 0x531   : > { %v9110_v57 = vpop.f32.mrf.mxu0 }
 0x532   : > { %v16160_v43 = vadd.f32 %v9110_v57, %v16032_v3 }
 0x533   : > { %v9112_v15 = vpop.f32.mrf.mxu0 }
 0x534   : > { %16757 = vst [vmem:[#allocation27_spill] sm:$0xff] %v16160_v43  ;;  %v9153_v47 = vpop.f32.mrf.mxu1  ;;  %v16166_v25 = vadd.f32 %v9112_v15, %v16040_v13 }
 0x535   : > { %v16163_v0 = vadd.f32 %v9153_v47, %v16036_v27  ;;  %v9114_v42 = vpop.f32.mrf.mxu0 }
 0x536   : > { %16759 = vst [vmem:[#allocation20_spill] sm:$0xff] %v16166_v25  ;;  %v9155_v6 = vpop.f32.mrf.mxu1  ;;  %v16172_v19 = vadd.f32 %v9114_v42, %v16053_v18 }
 0x537   : > { %16758 = vst [vmem:[#allocation19_spill] sm:$0xff] %v16163_v0  ;;  %v16169_v32 = vadd.f32 %v9155_v6, %v16044_v56  ;;  %v9116_v26 = vpop.f32.mrf.mxu0 }
 0x538   : > { %16761 = vst [vmem:[#allocation28_spill] sm:$0xff] %v16172_v19  ;;  %v9157_v21 = vpop.f32.mrf.mxu1  ;;  %v16178_v27 = vadd.f32 %v9116_v26, %v16059_v10 }
 0x539   : > { %16760 = vst [vmem:[#allocation14_spill] sm:$0xff] %v16169_v32  ;;  %v16175_v3 = vadd.f32 %v9157_v21, %v16057_v60 }
 0x53a   : > { %16763 = vst [vmem:[#allocation29_spill] sm:$0xff] %v16178_v27  ;;  %v9159_v50 = vpop.f32.mrf.mxu1 }
 0x53b   : > { %16762 = vst [vmem:[#allocation15_spill] sm:$0xff] %v16175_v3  ;;  %v16181_v13 = vadd.f32 %v9159_v50, %v16061_v41 }
 0x53d   : > { %16764 = vst [vmem:[#allocation16_spill] sm:$0xff] %v16181_v13 }
 0x545   : > { %v9196_v55 = vpop.f32.mrf.mxu0 }
 0x546   : > { %v9260_v56 = vadd.f32 %v9196_v55, %v16075_v48 }
 0x547   : > { %v9198_v18 = vpop.f32.mrf.mxu0 }
 0x548   : > { %v9239_v11 = vpop.f32.mrf.mxu1  ;;  %v9261_v47 = vadd.f32 %v9198_v18, %v16083_v17 }
 0x549   : > { %v9262_v57 = vadd.f32 %v9239_v11, %v16079_v62  ;;  %v9200_v6 = vpop.f32.mrf.mxu0 }
 0x54a   : > { %v9241_v15 = vpop.f32.mrf.mxu1  ;;  %v9276_v10 = vadd.f32 %v9200_v6, %v16089_v5 }
 0x54b   : > { %v9263_v60 = vadd.f32 %v9241_v15, %v16087_v23  ;;  %v9202_v41 = vpop.f32.mrf.mxu0 }
 0x54c   : > { %v9243_v42 = vpop.f32.mrf.mxu1  ;;  %v9277_v26 = vadd.f32 %v9202_v41, %v16094_v4 }
 0x54d   : > { %v9278_v21 = vadd.f32 %v9243_v42, %v16091_v14 }
 0x54e   : > { %v9245_v50 = vpop.f32.mrf.mxu1 }
 0x54f   : > { %v9279_v48 = vadd.f32 %v9245_v50, %v16097_v59 }
 0x559   : > { %v9805_v55 = vpop.f32.mrf.mxu0 }
 0x55b   : > { %v9807_v11 = vpop.f32.mrf.mxu0 }
 0x55c   : > { %v9848_v62 = vpop.f32.mrf.mxu1 }
 0x55d   : > { %v9809_v17 = vpop.f32.mrf.mxu0 }
 0x55e   : > { %v9850_v38 = vpop.f32.mrf.mxu1 }
 0x55f   : > { %v9811_v13 = vpop.f32.mrf.mxu0 }
 0x560   : > { %v9852_v18 = vpop.f32.mrf.mxu1 }
 0x562   : > { %v9854_v23 = vpop.f32.mrf.mxu1 }
 0x56d   : > { %v16191_v15 = vpop.f32.mrf.mxu0 }
 0x56f   : > { %v16195_v6 = vpop.f32.mrf.mxu0 }
 0x570   : > { %v16193_v5 = vpop.f32.mrf.mxu1  ;;  %v10120_v9 = vadd.f32 %v16195_v6, %v16138_v61  ;;  %v16776_v6 = vld [vmem:[#allocation13_spill] sm:$0xff] }
 0x571   : > { %v16199_v4 = vpop.f32.mrf.mxu0 }
 0x572   : > { %v16197_v14 = vpop.f32.mrf.mxu1  ;;  %v10135_v35 = vadd.f32 %v16199_v4, %v16144_v12 }
 0x573   : > { %v16203_v59 = vpop.f32.mrf.mxu0  ;;  %v10122_v33 = vadd.f32 %v16197_v14, %v16141_v8 }
 0x574   : > { %v16201_v42 = vpop.f32.mrf.mxu1 }
 0x576   : > { %v16205_v41 = vpop.f32.mrf.mxu1 }
 0x577   : > { %16765 = vst [vmem:[#allocation30_spill] sm:$0xff] %v16205_v41 }
 0x581   : > { %v16207_v50 = vpop.f32.mrf.mxu0 }
 0x582   : > { %16766 = vst [vmem:[#allocation17_spill] sm:$0xff] %v16207_v50 }
 0x583   : > { %v16211_v3 = vpop.f32.mrf.mxu0 }
 0x584   : > { %v16209_v27 = vpop.f32.mrf.mxu1  ;;  %16768 = vst [vmem:[#allocation32_spill] sm:$0xff] %v16211_v3 }
 0x585   : > { %16767 = vst [vmem:[#allocation31_spill] sm:$0xff] %v16209_v27  ;;  %v16215_v32 = vpop.f32.mrf.mxu0 }
 0x586   : > { %v16213_v19 = vpop.f32.mrf.mxu1  ;;  %16770 = vst [vmem:[#allocation6_spill] sm:$0xff] %v16215_v32 }
 0x587   : > { %16769 = vst [vmem:[#allocation33_spill] sm:$0xff] %v16213_v19  ;;  %v16219_v0 = vpop.f32.mrf.mxu0 }
 0x588   : > { %v16217_v25 = vpop.f32.mrf.mxu1  ;;  %16772 = vst [vmem:[#allocation10_spill] sm:$0xff] %v16219_v0 }
 0x589   : > { %16771 = vst [vmem:[#allocation7_spill] sm:$0xff] %v16217_v25 }
 0x58a   : > { %v16221_v43 = vpop.f32.mrf.mxu1 }
 0x58b   : > { %16773 = vst [vmem:[#allocation11_spill] sm:$0xff] %v16221_v43 }
 0x595   : > { %v10063_v54 = vpop.f32.mrf.mxu0 }
 0x596   : > { %v16223_v34 = vadd.f32 %v10063_v54, %v9260_v56 }
 0x597   : > { %v10065_v50 = vpop.f32.mrf.mxu0 }
 0x598   : > { %v10106_v51 = vpop.f32.mrf.mxu1  ;;  %v16227_v27 = vadd.f32 %v10065_v50, %v9261_v47  ;;  %v9266_v47 = vadd.f32 %v16125_v52, %v15976_v22 }
 0x599   : > { %v16225_v20 = vadd.f32 %v10106_v51, %v9262_v57  ;;  %v10067_v19 = vpop.f32.mrf.mxu0  ;;  %v9248_v51 = vadd.f32 %v16105_v40, %v15956_v37  ;;  %v9265_v37 = vadd.f32 %v16127_v24, %v15978_v29 }
 0x59a   : > { %v10108_v3 = vpop.f32.mrf.mxu1  ;;  %v16231_v32 = vadd.f32 %v10067_v19, %v9276_v10  ;;  %v9249_v19 = vadd.f32 %v16113_v58, %v15964_v44  ;;  %v16256_v58 = vpop.permute.xlu0 %11054 }
 0x59b   : > { %v16229_v41 = vadd.f32 %v10108_v3, %v9263_v60  ;;  %v10069_v0 = vpop.f32.mrf.mxu0  ;;  %v9250_v3 = vadd.f32 %v16107_v36, %v15960_v30  ;;  %v10115_v57 = vadd.f32 %v9805_v55, %v9248_v51  ;;  %v9267_v30 = vadd.f32 %v16129_v46, %v15980_v39 }
 0x59c   : > { %v10110_v25 = vpop.f32.mrf.mxu1  ;;  %v16235_v43 = vadd.f32 %v10069_v0, %v9277_v26  ;;  %v9264_v0 = vadd.f32 %v16121_v63, %v15972_v49  ;;  %v10116_v40 = vadd.f32 %v9807_v11, %v9249_v19  ;;  %v10133_v49 = vadd.f32 %v9852_v18, %v9266_v47 }
 0x59d   : > { %v16233_v2 = vadd.f32 %v10110_v25, %v9278_v21  ;;  %v9251_v25 = vadd.f32 %v16115_v31, %v15968_v53  ;;  %v10117_v60 = vadd.f32 %v9848_v62, %v9250_v3  ;;  %v10132_v22 = vadd.f32 %v9811_v13, %v9265_v37 }
 0x59e   : > { %v10112_v54 = vpop.f32.mrf.mxu1  ;;  %v10131_v31 = vadd.f32 %v9809_v17, %v9264_v0  ;;  %v10134_v24 = vadd.f32 %v9854_v23, %v9267_v30 }
 0x59f   : > { %v16237_v56 = vadd.f32 %v10112_v54, %v9279_v48  ;;  %v10118_v53 = vadd.f32 %v9850_v38, %v9251_v25 }
 0x5a9   : > { %v10672_v10 = vpop.f32.mrf.mxu0 }
 0x5aa   : > { %v10982_v44 = vadd.f32 %v10672_v10, %v10115_v57 }
 0x5ab   : > { %v10674_v21 = vpop.f32.mrf.mxu0 }
 0x5ac   : > { %v10715_v36 = vpop.f32.mrf.mxu1  ;;  %vm11014_vm2 = vcmp.ge.f32.partialorder %v10982_v44, 0.0  ;;  %v11057_v52 = vmul.f32 %v16256_v58, %v10982_v44  ;;  %v10983_v26 = vadd.f32 %v10674_v21, %v10116_v40  ;;  %v10119_v21 = vadd.f32 %v16191_v15, %v16132_v7 }
 0x5ad   : > { %v10984_v63 = vadd.f32 %v10715_v36, %v10117_v60  ;;  %v10676_v46 = vpop.f32.mrf.mxu0 }
 0x5ae   : > { %v10717_v29 = vpop.f32.mrf.mxu1  ;;  %v11089_v48 = vsel %vm11014_vm2, %v10982_v44, %v11057_v52  ;;  %vm11015_vm1 = vcmp.ge.f32.partialorder %v10983_v26, 0.0  ;;  %v11058_v13 = vmul.f32 %v16256_v58, %v10983_v26  ;;  %v10998_v55 = vadd.f32 %v10676_v46, %v10131_v31 }
 0x5af   : > { %vm11016_vm3 = vcmp.ge.f32.partialorder %v10984_v63, 0.0  ;;  %v11059_v38 = vmul.f32 %v16256_v58, %v10984_v63  ;;  %v10985_v39 = vadd.f32 %v10717_v29, %v10118_v53  ;;  %v11121_v11 = vsel %vm16774_vm4, %v11089_v48, 0.0  ;;  %v10678_v23 = vpop.f32.mrf.mxu0 }
 0x5b0   : > { %v10719_v62 = vpop.f32.mrf.mxu1  ;;  %11153 = vst [vmem:[%s16262_s16] sm:$0xff] %v11121_v11  ;;  %v11090_v54 = vsel %vm11015_vm1, %v10983_v26, %v11058_v13  ;;  %vm11030_vm2 = vcmp.ge.f32.partialorder %v10998_v55, 0.0  ;;  %v11073_v51 = vmul.f32 %v16256_v58, %v10998_v55  ;;  %v10999_v0 = vadd.f32 %v10678_v23, %v10132_v22 }
 0x5b1   : > { %v11091_v17 = vsel %vm11016_vm3, %v10984_v63, %v11059_v38  ;;  %vm11017_vm15 = vcmp.ge.f32.partialorder %v10985_v39, 0.0  ;;  %v11060_v18 = vmul.f32 %v16256_v58, %v10985_v39  ;;  %v11122_v19 = vsel %vm14669_vm10, %v11090_v54, 0.0  ;;  %vm16775_vm3 = vmmov %vm16774_vm4 }
 0x5b2   : > { %v11123_v50 = vsel %vm14659_vm7, %v11091_v17, 0.0  ;;  %v10721_v3 = vpop.f32.mrf.mxu1  ;;  %v11000_v25 = vadd.f32 %v10719_v62, %v10133_v49  ;;  %11154 = vst [vmem:[%s16262_s16 + $0x8] sm:$0xff] %v11122_v19  ;;  %v11105_v60 = vsel %vm11030_vm2, %v10998_v55, %v11073_v51  ;;  %vm11031_vm4 = vcmp.ge.f32.partialorder %v10999_v0, 0.0 }
 0x5b3   : > { %11155 = vst [vmem:[%s16262_s16 + $0x10] sm:$0xff] %v11123_v50  ;;  %v11092_v57 = vsel %vm11017_vm15, %v10985_v39, %v11060_v18  ;;  %v11001_v10 = vadd.f32 %v10721_v3, %v10134_v24  ;;  %v11137_v37 = vsel %vm16775_vm3, %v11105_v60, 0.0  ;;  %v11074_v40 = vmul.f32 %v16256_v58, %v10999_v0  ;;  %v16777_v39 = vld [vmem:[#allocation30_spill] sm:$0xff] }
 0x5b4   : > { %v11124_v47 = vsel %vm14673_vm11, %v11092_v57, 0.0  ;;  %vm11032_vm1 = vcmp.ge.f32.partialorder %v11000_v25, 0.0  ;;  %v11075_v30 = vmul.f32 %v16256_v58, %v11000_v25  ;;  %11169 = vst [vmem:[%s16262_s16 + $0x80] sm:$0xff] %v11137_v37  ;;  %v10121_v22 = vadd.f32 %v16193_v5, %v16135_v1 }
 0x5b5   : > { %11156 = vst [vmem:[%s16262_s16 + $0x18] sm:$0xff] %v11124_v47  ;;  %vm11033_vm15 = vcmp.ge.f32.partialorder %v11001_v10, 0.0  ;;  %v11076_v44 = vmul.f32 %v16256_v58, %v11001_v10  ;;  %v11106_v31 = vsel %vm11031_vm4, %v10999_v0, %v11074_v40  ;;  %v10137_v24 = vadd.f32 %v16201_v42, %v16147_v28 }
 0x5b6   : > { %v11107_v36 = vsel %vm11032_vm1, %v11000_v25, %v11075_v30  ;;  %v11138_v16 = vsel %vm14669_vm10, %v11106_v31, 0.0  ;;  %v10136_v1 = vadd.f32 %v16203_v59, %v16150_v45  ;;  %v10138_v8 = vadd.f32 %v16777_v39, %v16776_v6  ;;  %v16791_v6 = vld [vmem:[#allocation6_spill] sm:$0xff] }
 0x5b7   : > { %v11139_v53 = vsel %vm14659_vm7, %v11107_v36, 0.0  ;;  %v11108_v49 = vsel %vm11033_vm15, %v11001_v10, %v11076_v44  ;;  %11170 = vst [vmem:[%s16262_s16 + $0x88] sm:$0xff] %v11138_v16 }
 0x5b8   : > { %11171 = vst [vmem:[%s16262_s16 + $0x90] sm:$0xff] %v11139_v53  ;;  %v11140_v63 = vsel %vm14673_vm11, %v11108_v49, 0.0 }
 0x5b9   : > { %11172 = vst [vmem:[%s16262_s16 + $0x98] sm:$0xff] %v11140_v63  ;;  %v16782_v63 = vld [vmem:[#allocation27_spill] sm:$0xff] }
 0x5bd   : > { %v10758_v52 = vpop.f32.mrf.mxu0 }
 0x5be   : > { %v10986_v26 = vadd.f32 %v10758_v52, %v10119_v21  ;;  %v16783_v21 = vld [vmem:[#allocation17_spill] sm:$0xff]  ;;  %v16784_v52 = vld [vmem:[#allocation19_spill] sm:$0xff] }
 0x5bf   : > { %v10760_v7 = vpop.f32.mrf.mxu0 }
 0x5c0   : > { %v10801_v29 = vpop.f32.mrf.mxu1  ;;  %vm11018_vm7 = vcmp.ge.f32.partialorder %v10986_v26, 0.0  ;;  %v11061_v15 = vmul.f32 %v16256_v58, %v10986_v26  ;;  %v10987_v61 = vadd.f32 %v10760_v7, %v10120_v9  ;;  %v16785_v9 = vld [vmem:[#allocation31_spill] sm:$0xff] }
 0x5c1   : > { %v10988_v38 = vadd.f32 %v10801_v29, %v10121_v22  ;;  %v10762_v4 = vpop.f32.mrf.mxu0  ;;  %v10123_v22 = vadd.f32 %v16783_v21, %v16782_v63 }
 0x5c2   : > { %v10803_v5 = vpop.f32.mrf.mxu1  ;;  %v11093_v28 = vsel %vm11018_vm7, %v10986_v26, %v11061_v15  ;;  %vm11019_vm11 = vcmp.ge.f32.partialorder %v10987_v61, 0.0  ;;  %v11062_v42 = vmul.f32 %v16256_v58, %v10987_v61  ;;  %v11002_v45 = vadd.f32 %v10762_v4, %v10135_v35  ;;  %v16787_v35 = vld [vmem:[#allocation32_spill] sm:$0xff]  ;;  %v16789_v15 = vld [vmem:[#allocation33_spill] sm:$0xff] }
 0x5c3   : > { %vm11020_vm10 = vcmp.ge.f32.partialorder %v10988_v38, 0.0  ;;  %v11063_v12 = vmul.f32 %v16256_v58, %v10988_v38  ;;  %v10989_v14 = vadd.f32 %v10803_v5, %v10122_v33  ;;  %v11125_v48 = vsel %vm14730_vm12, %v11093_v28, 0.0  ;;  %v10764_v62 = vpop.f32.mrf.mxu0  ;;  %v16786_v33 = vld [vmem:[#allocation20_spill] sm:$0xff] }
 0x5c4   : > { %v10805_v59 = vpop.f32.mrf.mxu1  ;;  %11157 = vst [vmem:[%s16262_s16 + $0x20] sm:$0xff] %v11125_v48  ;;  %v11094_v18 = vsel %vm11019_vm11, %v10987_v61, %v11062_v42  ;;  %vm11034_vm3 = vcmp.ge.f32.partialorder %v11002_v45, 0.0  ;;  %v11077_v23 = vmul.f32 %v16256_v58, %v11002_v45  ;;  %v11003_v57 = vadd.f32 %v10764_v62, %v10136_v1  ;;  %v16788_v1 = vld [vmem:[#allocation14_spill] sm:$0xff]  ;;  %v16790_v5 = vld [vmem:[#allocation28_spill] sm:$0xff]  ;;  %v16794_v42 = vld [vmem:[#allocation29_spill] sm:$0xff] }
 0x5c5   : > { %v11095_v13 = vsel %vm11020_vm10, %v10988_v38, %v11063_v12  ;;  %vm11021_vm2 = vcmp.ge.f32.partialorder %v10989_v14, 0.0  ;;  %v11064_v55 = vmul.f32 %v16256_v58, %v10989_v14  ;;  %v11126_v51 = vsel %vm14749_vm8, %v11094_v18, 0.0  ;;  %v16793_v12 = vld [vmem:[#allocation7_spill] sm:$0xff] }
 0x5c6   : > { %v11127_v17 = vsel %vm14734_vm13, %v11095_v13, 0.0  ;;  %v10807_v50 = vpop.f32.mrf.mxu1  ;;  %v11004_v19 = vadd.f32 %v10805_v59, %v10137_v24  ;;  %11158 = vst [vmem:[%s16262_s16 + $0x28] sm:$0xff] %v11126_v51  ;;  %v11109_v47 = vsel %vm11034_vm3, %v11002_v45, %v11077_v23  ;;  %vm11035_vm4 = vcmp.ge.f32.partialorder %v11003_v57, 0.0  ;;  %v16795_v45 = vld [vmem:[#allocation10_spill] sm:$0xff]  ;;  %v16797_v62 = vld [vmem:[#allocation11_spill] sm:$0xff] }
 0x5c7   : > { %11159 = vst [vmem:[%s16262_s16 + $0x30] sm:$0xff] %v11127_v17  ;;  %v11096_v3 = vsel %vm11021_vm2, %v10989_v14, %v11064_v55  ;;  %v11005_v60 = vadd.f32 %v10807_v50, %v10138_v8  ;;  %v11141_v10 = vsel %vm14730_vm12, %v11109_v47, 0.0  ;;  %v11078_v30 = vmul.f32 %v16256_v58, %v11003_v57  ;;  %v16792_v8 = vld [vmem:[#allocation15_spill] sm:$0xff]  ;;  %v16796_v55 = vld [vmem:[#allocation16_spill] sm:$0xff] }
 0x5c8   : > { %v11128_v0 = vsel %vm14753_vm9, %v11096_v3, 0.0  ;;  %vm11036_vm1 = vcmp.ge.f32.partialorder %v11004_v19, 0.0  ;;  %v11079_v37 = vmul.f32 %v16256_v58, %v11004_v19  ;;  %11173 = vst [vmem:[%s16262_s16 + $0xa0] sm:$0xff] %v11141_v10  ;;  %v10125_v26 = vadd.f32 %v16785_v9, %v16784_v52 }
 0x5c9   : > { %11160 = vst [vmem:[%s16262_s16 + $0x38] sm:$0xff] %v11128_v0  ;;  %vm11037_vm15 = vcmp.ge.f32.partialorder %v11005_v60, 0.0  ;;  %v11080_v40 = vmul.f32 %v16256_v58, %v11005_v60  ;;  %v11110_v53 = vsel %vm11035_vm4, %v11003_v57, %v11078_v30  ;;  %v10124_v24 = vadd.f32 %v16787_v35, %v16786_v33 }
 0x5ca   : > { %v11111_v44 = vsel %vm11036_vm1, %v11004_v19, %v11079_v37  ;;  %v11142_v49 = vsel %vm14749_vm8, %v11110_v53, 0.0  ;;  %v10126_v61 = vadd.f32 %v16789_v15, %v16788_v1  ;;  %v10139_v39 = vadd.f32 %v16791_v6, %v16790_v5 }
 0x5cb   : > { %v11143_v36 = vsel %vm14734_vm13, %v11111_v44, 0.0  ;;  %v11112_v31 = vsel %vm11037_vm15, %v11005_v60, %v11080_v40  ;;  %11174 = vst [vmem:[%s16262_s16 + $0xa8] sm:$0xff] %v11142_v49  ;;  %v10141_v14 = vadd.f32 %v16793_v12, %v16792_v8  ;;  %v10140_v59 = vadd.f32 %v16795_v45, %v16794_v42  ;;  %v16799_v60 = vld [vmem:[#allocation25_spill] sm:$0xff]  ;;  %v16801_v44 = vld [vmem:[#allocation4_spill] sm:$0xff] }
 0x5cc   : > { %11175 = vst [vmem:[%s16262_s16 + $0xb0] sm:$0xff] %v11143_v36  ;;  %v11144_v16 = vsel %vm14753_vm9, %v11112_v31, 0.0  ;;  %v10142_v11 = vadd.f32 %v16797_v62, %v16796_v55  ;;  %vm16800_vm7 = vnez %v16799_v60  ;;  %vm16802_vm11 = vnez %v16801_v44 }
 0x5cd   : > { %11176 = vst [vmem:[%s16262_s16 + $0xb8] sm:$0xff] %v11144_v16  ;;  %v16803_v16 = vld [vmem:[#allocation5_spill] sm:$0xff] }
 0x5ce   : > { %vm16804_vm2 = vnez %v16803_v16 }
 0x5d1   : > { %v10844_v29 = vpop.f32.mrf.mxu0 }
 0x5d2   : > { %v10990_v38 = vadd.f32 %v10844_v29, %v10123_v22 }
 0x5d3   : > { %v10846_v28 = vpop.f32.mrf.mxu0 }
 0x5d4   : > { %v10887_v7 = vpop.f32.mrf.mxu1  ;;  %vm11022_vm12 = vcmp.ge.f32.partialorder %v10990_v38, 0.0  ;;  %v11065_v46 = vmul.f32 %v16256_v58, %v10990_v38  ;;  %v10991_v48 = vadd.f32 %v10846_v28, %v10124_v24 }
 0x5d5   : > { %v10992_v4 = vadd.f32 %v10887_v7, %v10125_v26  ;;  %v10848_v23 = vpop.f32.mrf.mxu0 }
 0x5d6   : > { %v10889_v13 = vpop.f32.mrf.mxu1  ;;  %v11097_v50 = vsel %vm11022_vm12, %v10990_v38, %v11065_v46  ;;  %vm11023_vm8 = vcmp.ge.f32.partialorder %v10991_v48, 0.0  ;;  %v11066_v54 = vmul.f32 %v16256_v58, %v10991_v48  ;;  %v11006_v51 = vadd.f32 %v10848_v23, %v10139_v39 }
 0x5d7   : > { %vm11024_vm13 = vcmp.ge.f32.partialorder %v10992_v4, 0.0  ;;  %v11067_v17 = vmul.f32 %v16256_v58, %v10992_v4  ;;  %v10993_v18 = vadd.f32 %v10889_v13, %v10126_v61  ;;  %v11129_v57 = vsel %vm14826_vm14, %v11097_v50, 0.0  ;;  %v10850_v47 = vpop.f32.mrf.mxu0 }
 0x5d8   : > { %v10891_v3 = vpop.f32.mrf.mxu1  ;;  %11161 = vst [vmem:[%s16262_s16 + $0x40] sm:$0xff] %v11129_v57  ;;  %v11098_v37 = vsel %vm11023_vm8, %v10991_v48, %v11066_v54  ;;  %vm11038_vm10 = vcmp.ge.f32.partialorder %v11006_v51, 0.0  ;;  %v11081_v30 = vmul.f32 %v16256_v58, %v11006_v51  ;;  %v11007_v49 = vadd.f32 %v10850_v47, %v10140_v59 }
 0x5d9   : > { %v11099_v25 = vsel %vm11024_vm13, %v10992_v4, %v11067_v17  ;;  %vm11025_vm9 = vcmp.ge.f32.partialorder %v10993_v18, 0.0  ;;  %v11068_v0 = vmul.f32 %v16256_v58, %v10993_v18  ;;  %v11130_v36 = vsel %vm16802_vm11, %v11098_v37, 0.0 }
 0x5da   : > { %v11131_v10 = vsel %vm16800_vm7, %v11099_v25, 0.0  ;;  %v10893_v40 = vpop.f32.mrf.mxu1  ;;  %v11008_v31 = vadd.f32 %v10891_v3, %v10141_v14  ;;  %11162 = vst [vmem:[%s16262_s16 + $0x48] sm:$0xff] %v11130_v36  ;;  %v11113_v21 = vsel %vm11038_vm10, %v11006_v51, %v11081_v30  ;;  %vm11039_vm1 = vcmp.ge.f32.partialorder %v11007_v49, 0.0  ;;  %v16808_v3 = vld [vmem:[#allocation26_spill] sm:$0xff] }
 0x5db   : > { %11163 = vst [vmem:[%s16262_s16 + $0x50] sm:$0xff] %v11131_v10  ;;  %v11100_v53 = vsel %vm11025_vm9, %v10993_v18, %v11068_v0  ;;  %v11009_v22 = vadd.f32 %v10893_v40, %v10142_v11  ;;  %v11145_v52 = vsel %vm14826_vm14, %v11113_v21, 0.0  ;;  %v11082_v26 = vmul.f32 %v16256_v58, %v11007_v49 }
 0x5dc   : > { %v11132_v63 = vsel %vm16804_vm2, %v11100_v53, 0.0  ;;  %vm11040_vm3 = vcmp.ge.f32.partialorder %v11008_v31, 0.0  ;;  %v11083_v9 = vmul.f32 %v16256_v58, %v11008_v31  ;;  %11177 = vst [vmem:[%s16262_s16 + $0xc0] sm:$0xff] %v11145_v52  ;;  %vm16809_vm9 = vnez %v16808_v3 }
 0x5dd   : > { %11164 = vst [vmem:[%s16262_s16 + $0x58] sm:$0xff] %v11132_v63  ;;  %vm11041_vm4 = vcmp.ge.f32.partialorder %v11009_v22, 0.0  ;;  %v11084_v29 = vmul.f32 %v16256_v58, %v11009_v22  ;;  %v11114_v24 = vsel %vm11039_vm1, %v11007_v49, %v11082_v26 }
 0x5de   : > { %v11115_v33 = vsel %vm11040_vm3, %v11008_v31, %v11083_v9  ;;  %v11146_v7 = vsel %vm16802_vm11, %v11114_v24, 0.0 }
 0x5df   : > { %v11147_v35 = vsel %vm16800_vm7, %v11115_v33, 0.0  ;;  %v11116_v38 = vsel %vm11041_vm4, %v11009_v22, %v11084_v29  ;;  %11178 = vst [vmem:[%s16262_s16 + $0xc8] sm:$0xff] %v11146_v7 }
 0x5e0   : > { %11179 = vst [vmem:[%s16262_s16 + $0xd0] sm:$0xff] %v11147_v35  ;;  %v11148_v1 = vsel %vm16804_vm2, %v11116_v38, 0.0 }
 0x5e1   : > { %11180 = vst [vmem:[%s16262_s16 + $0xd8] sm:$0xff] %v11148_v1 }
 0x5e5   : > { %v10930_v15 = vpop.f32.mrf.mxu0 }
 0x5e6   : > { %v10994_v61 = vadd.f32 %v10930_v15, %v16223_v34 }
 0x5e7   : > { %v10932_v39 = vpop.f32.mrf.mxu0 }
 0x5e8   : > { %v10973_v5 = vpop.f32.mrf.mxu1  ;;  %vm11026_vm14 = vcmp.ge.f32.partialorder %v10994_v61, 0.0  ;;  %v11069_v8 = vmul.f32 %v16256_v58, %v10994_v61  ;;  %v10995_v12 = vadd.f32 %v10932_v39, %v16227_v27 }
 0x5e9   : > { %v10996_v6 = vadd.f32 %v10973_v5, %v16225_v20  ;;  %v10934_v42 = vpop.f32.mrf.mxu0 }
 0x5ea   : > { %v10975_v14 = vpop.f32.mrf.mxu1  ;;  %v11101_v45 = vsel %vm11026_vm14, %v10994_v61, %v11069_v8  ;;  %vm11027_vm12 = vcmp.ge.f32.partialorder %v10995_v12, 0.0  ;;  %v11070_v34 = vmul.f32 %v16256_v58, %v10995_v12  ;;  %v11010_v20 = vadd.f32 %v10934_v42, %v16231_v32 }
 0x5eb   : > { %vm11028_vm15 = vcmp.ge.f32.partialorder %v10996_v6, 0.0  ;;  %v11071_v4 = vmul.f32 %v16256_v58, %v10996_v6  ;;  %v10997_v28 = vadd.f32 %v10975_v14, %v16229_v41  ;;  %v11133_v48 = vsel %vm14923_vm6, %v11101_v45, 0.0  ;;  %v10936_v55 = vpop.f32.mrf.mxu0 }
 0x5ec   : > { %v10977_v59 = vpop.f32.mrf.mxu1  ;;  %11165 = vst [vmem:[%s16262_s16 + $0x60] sm:$0xff] %v11133_v48  ;;  %v11102_v11 = vsel %vm11027_vm12, %v10995_v12, %v11070_v34  ;;  %vm11042_vm8 = vcmp.ge.f32.partialorder %v11010_v20, 0.0  ;;  %v11085_v17 = vmul.f32 %v16256_v58, %v11010_v20  ;;  %v11011_v51 = vadd.f32 %v10936_v55, %v16235_v43 }
 0x5ed   : > { %v11103_v27 = vsel %vm11028_vm15, %v10996_v6, %v11071_v4  ;;  %vm11029_vm13 = vcmp.ge.f32.partialorder %v10997_v28, 0.0  ;;  %v11072_v13 = vmul.f32 %v16256_v58, %v10997_v28  ;;  %v11134_v23 = vsel %vm14933_vm0, %v11102_v11, 0.0 }
 0x5ee   : > { %v11135_v62 = vsel %vm14927_vm5, %v11103_v27, 0.0  ;;  %v10979_v32 = vpop.f32.mrf.mxu1  ;;  %v11012_v54 = vadd.f32 %v10977_v59, %v16233_v2  ;;  %11166 = vst [vmem:[%s16262_s16 + $0x68] sm:$0xff] %v11134_v23  ;;  %v11117_v57 = vsel %vm11042_vm8, %v11010_v20, %v11085_v17  ;;  %vm11043_vm10 = vcmp.ge.f32.partialorder %v11011_v51, 0.0 }
 0x5ef   : > { %11167 = vst [vmem:[%s16262_s16 + $0x70] sm:$0xff] %v11135_v62  ;;  %v11104_v50 = vsel %vm11029_vm13, %v10997_v28, %v11072_v13  ;;  %v11013_v25 = vadd.f32 %v10979_v32, %v16237_v56  ;;  %v11149_v0 = vsel %vm14923_vm6, %v11117_v57, 0.0  ;;  %v11086_v2 = vmul.f32 %v16256_v58, %v11011_v51 }
 0x5f0   : > { %v11136_v19 = vsel %vm16809_vm9, %v11104_v50, 0.0  ;;  %vm11044_vm7 = vcmp.ge.f32.partialorder %v11012_v54, 0.0  ;;  %v11087_v47 = vmul.f32 %v16256_v58, %v11012_v54  ;;  %11181 = vst [vmem:[%s16262_s16 + $0xe0] sm:$0xff] %v11149_v0 }
 0x5f1   : > { %11168 = vst [vmem:[%s16262_s16 + $0x78] sm:$0xff] %v11136_v19  ;;  %vm11045_vm11 = vcmp.ge.f32.partialorder %v11013_v25, 0.0  ;;  %v11088_v43 = vmul.f32 %v16256_v58, %v11013_v25  ;;  %v11118_v10 = vsel %vm11043_vm10, %v11011_v51, %v11086_v2 }
 0x5f2   : > { %v11119_v60 = vsel %vm11044_vm7, %v11012_v54, %v11087_v47  ;;  %v11150_v30 = vsel %vm14933_vm0, %v11118_v10, 0.0 }
 0x5f3   : > { %v11151_v56 = vsel %vm14927_vm5, %v11119_v60, 0.0  ;;  %v11120_v37 = vsel %vm11045_vm11, %v11013_v25, %v11088_v43  ;;  %11182 = vst [vmem:[%s16262_s16 + $0xe8] sm:$0xff] %v11150_v30 }
 0x5f4   : > { %11183 = vst [vmem:[%s16262_s16 + $0xf0] sm:$0xff] %v11151_v56  ;;  %v11152_v40 = vsel %vm16809_vm9, %v11120_v37, 0.0 }
 0x5f5   : > { %11184 = vst [vmem:[%s16262_s16 + $0xf8] sm:$0xff] %v11152_v40 }
 0x5f6 PF: > { %s14_s15 = sadd.s32 1, %s13228_s15  }
 0x5f7   : > { %p11_p4 = scmp.ge.s32.totalorder %s14_s15, 4  }
 0x5f9   :  { %13 = sbr.rel (!%p11_p4) target bundleno = 1 (0x1), region = 77 }

</bundles_post_ra>
